<compile_context>
chip_gen: v6e
topology: v6e:2x2x1
jax: 0.10.0
libtpu: 0.0.40
codegen_flags: <defaults>
</compile_context>

<pallas_src>
import jax
import jax.numpy as jnp
from jax.experimental import pallas as pl
from jax.experimental.pallas import tpu as pltpu

EPS = 1e-5
NEG_SLOPE = 0.01  # nn.LeakyReLU() default


# ----------------------------- in-kernel helpers ----------------------------

def _bn_cols(t, g, b):
    # Training-mode BatchNorm: per-column stats over all rows, biased variance.
    mean = jnp.mean(t, axis=0, keepdims=True)
    var = jnp.mean(jnp.square(t - mean), axis=0, keepdims=True)
    return (t - mean) * jax.lax.rsqrt(var + EPS) * g + b


def _leaky(t):
    return jnp.where(t >= 0, t, NEG_SLOPE * t)


# ------------------------------ Pallas kernels ------------------------------

def _expand_kernel(x_ref, u_ref, w1_ref, b1_ref, g1_ref, be1_ref,
                   w2_ref, b2_ref, g2_ref, be2_ref, o_ref):
    # Linear(latent,128)+BN1d+LeakyReLU -> Linear(128,512)+BN1d+LeakyReLU, fused.
    h = x_ref[...] - u_ref[...]
    z1 = jnp.dot(h.astype(jnp.bfloat16), w1_ref[...],
                 preferred_element_type=jnp.float32) + b1_ref[...]
    a1 = _leaky(_bn_cols(z1, g1_ref[...], be1_ref[...]))
    z2 = jnp.dot(a1.astype(jnp.bfloat16), w2_ref[...],
                 preferred_element_type=jnp.float32) + b2_ref[...]
    o_ref[...] = _leaky(_bn_cols(z2, g2_ref[...], be2_ref[...]))


def _taps_gemm_kernel(a_ref, w_ref, o_ref):
    # deconv1: raw activation (B*H*W, Cin) @ Wall (Cin, k*k*Cout)
    o_ref[...] = jnp.dot(a_ref[...].astype(jnp.bfloat16), w_ref[...],
                         preferred_element_type=jnp.float32)


def _fused_conv_kernel(n_chunks, chunk):
    # prologue: previous-conv bias + BN2d + LeakyReLU on (B*OH*OW, C), then the
    # next layer's tap-GEMM, output stored in 128-lane-aligned column chunks.
    def kernel(s_ref, cb_ref, g_ref, be_ref, w_ref, o_ref):
        t = s_ref[...] + cb_ref[...]
        a = _leaky(_bn_cols(t, g_ref[...], be_ref[...])).astype(jnp.bfloat16)
        for c in range(n_chunks):
            sl = slice(c * chunk, (c + 1) * chunk)
            o_ref[:, sl] = jnp.dot(a, w_ref[:, sl],
                                   preferred_element_type=jnp.float32)
    return kernel


# ------------------------------- call wrappers ------------------------------

def _vmem_specs(n):
    return [pl.BlockSpec(memory_space=pltpu.MemorySpace.VMEM) for _ in range(n)]


def _expand(x, u, pp):
    B = x.shape[0]
    return pl.pallas_call(
        _expand_kernel,
        out_shape=jax.ShapeDtypeStruct((B, 512), jnp.float32),
        in_specs=_vmem_specs(10),
        out_specs=pl.BlockSpec(memory_space=pltpu.MemorySpace.VMEM),
    )(x, u, pp["w1"], pp["b1"], pp["g1"], pp["be1"],
      pp["w2p"], pp["b2p"], pp["g2p"], pp["be2p"])


def _deconv1_gemm(a, wall):
    M, N = a.shape[0], wall.shape[1]
    return pl.pallas_call(
        _taps_gemm_kernel,
        out_shape=jax.ShapeDtypeStruct((M, N), jnp.float32),
        in_specs=_vmem_specs(2),
        out_specs=pl.BlockSpec(memory_space=pltpu.MemorySpace.VMEM),
    )(a, wall)


def _fused_deconv_gemm(s2d, cb, g, be, wall, n_chunks, chunk):
    M, N = s2d.shape[0], wall.shape[1]
    return pl.pallas_call(
        _fused_conv_kernel(n_chunks, chunk),
        out_shape=jax.ShapeDtypeStruct((M, N), jnp.float32),
        in_specs=_vmem_specs(5),
        out_specs=pl.BlockSpec(memory_space=pltpu.MemorySpace.VMEM),
    )(s2d, cb, g, be, wall)


# ------------------------------ col2im (XLA glue) ----------------------------

def _col2im(y, B, H, W, k, s, cout):
    """Overlap-add of per-tap GEMM outputs of a ConvTranspose2d.

    y: (B*H*W, k*k*cout); column (kh*k+kw)*cout+co is the contribution of input
    pixel (ih, iw) to output pixel (ih*s+kh, iw*s+kw)."""
    OH = (H - 1) * s + k
    OW = (W - 1) * s + k
    y6 = y.reshape(B, H, W, k, k, cout)
    zero = jnp.zeros((), y6.dtype)
    out = jnp.zeros((B, OH, OW, cout), y6.dtype)
    # TODO(synk): this strided scatter-add (col2im) stays in XLA; an in-kernel
    # version would need strided VMEM stores / a phase-decomposed output layout.
    for kh in range(k):
        for kw in range(k):
            out = out + jax.lax.pad(
                y6[:, :, :, kh, kw, :], zero,
                ((0, 0, 0),
                 (kh, k - 1 - kh, s - 1),
                 (kw, k - 1 - kw, s - 1),
                 (0, 0, 0)))
    return out


# ------------------------------- full forward --------------------------------

def decoder_mnist_forward(x, u, pp):
    B = x.shape[0]

    h = _expand(x, u, pp)                                    # (B, 512), NHWC order
    a1 = h.reshape(B * 16, 32)                               # (B*4*4, 32)

    y1 = _deconv1_gemm(a1, pp["wall1"])                      # (B*16, 25*64)
    s1 = _col2im(y1, B, 4, 4, 5, 2, 64)                      # (B, 11, 11, 64)

    y2 = _fused_deconv_gemm(s1.reshape(B * 121, 64), pp["cb1"], pp["g3"],
                            pp["be3"], pp["wall2"], 25, 128)  # (B*121, 3200)
    s2 = _col2im(y2, B, 11, 11, 5, 2, 128)                   # (B, 25, 25, 128)

    y3 = _fused_deconv_gemm(s2.reshape(B * 625, 128), pp["cb2"], pp["g4"],
                            pp["be4"], pp["wall3"], 1, 16)    # (B*625, 16)
    s3 = _col2im(y3, B, 25, 25, 4, 1, 1)                     # (B, 28, 28, 1)

    out = jax.nn.sigmoid(s3 + pp["cb3"].reshape(1, 1, 1, 1))
    return jnp.transpose(out, (0, 3, 1, 2))                  # NCHW (B, 1, 28, 28)


# -------------------------------- parameters ---------------------------------

def init_params(key, latent_dim):
    keys = jax.random.split(key, 16)

    def rnd(k, shape, scale=0.05):
        return scale * jax.random.normal(k, shape, dtype=jnp.float32)

    p = {}
    p["w1"] = rnd(keys[0], (latent_dim, 128));  p["b1"] = rnd(keys[1], (128,))
    p["g1"] = 1.0 + rnd(keys[2], (128,));       p["be1"] = rnd(keys[3], (128,))
    p["w2"] = rnd(keys[4], (128, 512));         p["b2"] = rnd(keys[5], (512,))
    p["g2"] = 1.0 + rnd(keys[6], (512,));       p["be2"] = rnd(keys[7], (512,))
    p["cw1"] = rnd(keys[8], (32, 64, 5, 5));    p["cb1"] = rnd(keys[9], (64,))
    p["g3"] = jnp.ones((64,), jnp.float32);     p["be3"] = jnp.zeros((64,), jnp.float32)
    p["cw2"] = rnd(keys[10], (64, 128, 5, 5));  p["cb2"] = rnd(keys[11], (128,))
    p["g4"] = jnp.ones((128,), jnp.float32);    p["be4"] = jnp.zeros((128,), jnp.float32)
    p["cw3"] = rnd(keys[12], (128, 1, 4, 4));   p["cb3"] = rnd(keys[13], (1,))
    return p


def prepare_params(p):
    """One-time repack: bf16 GEMM weights, NHWC column permutation of the second
    Linear, ConvTranspose2d weights as (Cin, k*k*Cout) tap matrices."""
    f32, bf16 = jnp.float32, jnp.bfloat16
    # view(-1,32,4,4) (NCHW) -> NHWC flattening permutation of the 512 columns.
    perm = jnp.transpose(jnp.arange(512).reshape(32, 4, 4), (1, 2, 0)).reshape(-1)

    def wall(w):  # (Cin, Cout, k, k) -> (Cin, k*k*Cout), tap-major columns
        cin, cout, k, _ = w.shape
        return jnp.transpose(w, (0, 2, 3, 1)).reshape(cin, k * k * cout).astype(bf16)

    pp = {
        "w1": p["w1"].astype(bf16),
        "b1": p["b1"].reshape(1, -1).astype(f32),
        "g1": p["g1"].reshape(1, -1).astype(f32),
        "be1": p["be1"].reshape(1, -1).astype(f32),
        "w2p": p["w2"][:, perm].astype(bf16),
        "b2p": p["b2"][perm].reshape(1, -1).astype(f32),
        "g2p": p["g2"][perm].reshape(1, -1).astype(f32),
        "be2p": p["be2"][perm].reshape(1, -1).astype(f32),
        "wall1": wall(p["cw1"]), "cb1": p["cb1"].reshape(1, -1).astype(f32),
        "g3": p["g3"].reshape(1, -1), "be3": p["be3"].reshape(1, -1),
        "wall2": wall(p["cw2"]), "cb2": p["cb2"].reshape(1, -1).astype(f32),
        "g4": p["g4"].reshape(1, -1), "be4": p["be4"].reshape(1, -1),
        "wall3": wall(p["cw3"]), "cb3": p["cb3"].astype(f32),
    }
    return pp


if __name__ == "__main__":
    latent_dim = 32
    batch = 2
    key = jax.random.PRNGKey(0)
    kx, ku, kp = jax.random.split(key, 3)
    x = jax.random.normal(kx, (batch, latent_dim), dtype=jnp.float32)
    u = jax.random.normal(ku, (batch, latent_dim), dtype=jnp.float32)
    params = init_params(kp, latent_dim)
    pp = prepare_params(params)          # weight repack once, outside the jit path

    out = jax.jit(decoder_mnist_forward)(x, u, pp)
    out = jax.block_until_ready(out)

    assert out.shape == (batch, 1, 28, 28), out.shape
    assert out.dtype == jnp.float32
    assert bool(jnp.all(jnp.isfinite(out)))
    assert bool(jnp.all((out >= 0.0) & (out <= 1.0)))  # sigmoid range
    print("KERNEL_OK")
</pallas_src>

<mosaic_0001>
module attributes {stable_mosaic.version = 11 : i64} {
  func.func @_taps_gemm_kernel(%arg0: memref<32x32xf32, #tpu.memory_space<vmem>>, %arg1: memref<32x1600xbf16, #tpu.memory_space<vmem>>, %arg2: memref<32x1600xf32, #tpu.memory_space<vmem>>) attributes {dimension_semantics = [], scalar_prefetch = 0 : i64, scratch_operands = 0 : i64, tpu.core_type = #tpu.core_type<tc>} {
    %c0 = arith.constant 0 : index
    %c0_0 = arith.constant 0 : index
    %0 = vector.load %arg0[%c0, %c0_0] : memref<32x32xf32, #tpu.memory_space<vmem>>, vector<32x32xf32>
    %1 = arith.truncf %0 : vector<32x32xf32> to vector<32x32xbf16>
    %c0_1 = arith.constant 0 : index
    %c0_2 = arith.constant 0 : index
    %2 = vector.load %arg1[%c0_1, %c0_2] : memref<32x1600xbf16, #tpu.memory_space<vmem>>, vector<32x1600xbf16>
    %cst = arith.constant dense<0.000000e+00> : vector<32x1600xf32>
    %3 = tpu.matmul %1, %2, %cst {dimension_numbers = #tpu.dot_dimension_numbers<[1], [0], [0], [1], [0, 0, 1, 1], [], []>} : vector<32x32xbf16>, vector<32x1600xbf16>, vector<32x1600xf32> -> vector<32x1600xf32>
    %c0_3 = arith.constant 0 : index
    %c0_4 = arith.constant 0 : index
    %4 = vector.load %arg2[%c0_3, %c0_4] : memref<32x1600xf32, #tpu.memory_space<vmem>>, vector<32x1600xf32>
    tpu.vector_store %arg2[%c0_3, %c0_4], %3 {strides = array<i32>} : memref<32x1600xf32, #tpu.memory_space<vmem>>, vector<32x1600xf32>,
    return
  }
}

module attributes {stable_mosaic.version = 11 : i64} {
  func.func @_expand_kernel(%arg0: memref<2x32xf32, #tpu.memory_space<vmem>>, %arg1: memref<2x32xf32, #tpu.memory_space<vmem>>, %arg2: memref<32x128xbf16, #tpu.memory_space<vmem>>, %arg3: memref<1x128xf32, #tpu.memory_space<vmem>>, %arg4: memref<1x128xf32, #tpu.memory_space<vmem>>, %arg5: memref<1x128xf32, #tpu.memory_space<vmem>>, %arg6: memref<128x512xbf16, #tpu.memory_space<vmem>>, %arg7: memref<1x512xf32, #tpu.memory_space<vmem>>, %arg8: memref<1x512xf32, #tpu.memory_space<vmem>>, %arg9: memref<1x512xf32, #tpu.memory_space<vmem>>, %arg10: memref<2x512xf32, #tpu.memory_space<vmem>>) attributes {dimension_semantics = [], scalar_prefetch = 0 : i64, scratch_operands = 0 : i64, tpu.core_type = #tpu.core_type<tc>} {
    %c0 = arith.constant 0 : index
    %c0_0 = arith.constant 0 : index
    %0 = vector.load %arg0[%c0, %c0_0] : memref<2x32xf32, #tpu.memory_space<vmem>>, vector<2x32xf32>
    %c0_1 = arith.constant 0 : index
    %c0_2 = arith.constant 0 : index
    %1 = vector.load %arg1[%c0_1, %c0_2] : memref<2x32xf32, #tpu.memory_space<vmem>>, vector<2x32xf32>
    %2 = arith.subf %0, %1 : vector<2x32xf32>
    %3 = arith.truncf %2 : vector<2x32xf32> to vector<2x32xbf16>
    %c0_3 = arith.constant 0 : index
    %c0_4 = arith.constant 0 : index
    %4 = vector.load %arg2[%c0_3, %c0_4] : memref<32x128xbf16, #tpu.memory_space<vmem>>, vector<32x128xbf16>
    %cst = arith.constant dense<0.000000e+00> : vector<2x128xf32>
    %5 = tpu.matmul %3, %4, %cst {dimension_numbers = #tpu.dot_dimension_numbers<[1], [0], [0], [1], [0, 0, 1, 1], [], []>} : vector<2x32xbf16>, vector<32x128xbf16>, vector<2x128xf32> -> vector<2x128xf32>
    %c0_5 = arith.constant 0 : index
    %c0_6 = arith.constant 0 : index
    %6 = vector.load %arg3[%c0_5, %c0_6] : memref<1x128xf32, #tpu.memory_space<vmem>>, vector<1x128xf32>
    %7 = vector.broadcast %6 : vector<1x128xf32> to vector<2x128xf32>
    %8 = arith.addf %5, %7 : vector<2x128xf32>
    %c0_7 = arith.constant 0 : index
    %c0_8 = arith.constant 0 : index
    %9 = vector.load %arg4[%c0_7, %c0_8] : memref<1x128xf32, #tpu.memory_space<vmem>>, vector<1x128xf32>
    %c0_9 = arith.constant 0 : index
    %c0_10 = arith.constant 0 : index
    %10 = vector.load %arg5[%c0_9, %c0_10] : memref<1x128xf32, #tpu.memory_space<vmem>>, vector<1x128xf32>
    %cst_11 = arith.constant dense<0.000000e+00> : vector<128xf32>
    %11 = vector.multi_reduction <add>, %8, %cst_11 [0] : vector<2x128xf32> to vector<128xf32>
    %12 = vector.shape_cast %11 : vector<128xf32> to vector<1x128xf32>
    %cst_12 = arith.constant 2.000000e+00 : f32
    %13 = vector.broadcast %cst_12 : f32 to vector<1x128xf32>
    %14 = arith.divf %12, %13 : vector<1x128xf32>
    %15 = vector.broadcast %14 : vector<1x128xf32> to vector<2x128xf32>
    %16 = arith.subf %8, %15 : vector<2x128xf32>
    %17 = arith.mulf %16, %16 : vector<2x128xf32>
    %cst_13 = arith.constant dense<0.000000e+00> : vector<128xf32>
    %18 = vector.multi_reduction <add>, %17, %cst_13 [0] : vector<2x128xf32> to vector<128xf32>
    %19 = vector.shape_cast %18 : vector<128xf32> to vector<1x128xf32>
    %cst_14 = arith.constant 2.000000e+00 : f32
    %20 = vector.broadcast %cst_14 : f32 to vector<1x128xf32>
    %21 = arith.divf %19, %20 : vector<1x128xf32>
    %22 = vector.broadcast %14 : vector<1x128xf32> to vector<2x128xf32>
    %23 = arith.subf %8, %22 : vector<2x128xf32>
    %cst_15 = arith.constant 9.99999974E-6 : f32
    %24 = vector.broadcast %cst_15 : f32 to vector<1x128xf32>
    %25 = arith.addf %21, %24 : vector<1x128xf32>
    %26 = math.rsqrt %25 : vector<1x128xf32>
    %27 = vector.broadcast %26 : vector<1x128xf32> to vector<2x128xf32>
    %28 = arith.mulf %23, %27 : vector<2x128xf32>
    %29 = vector.broadcast %9 : vector<1x128xf32> to vector<2x128xf32>
    %30 = arith.mulf %28, %29 : vector<2x128xf32>
    %31 = vector.broadcast %10 : vector<1x128xf32> to vector<2x128xf32>
    %32 = arith.addf %30, %31 : vector<2x128xf32>
    %cst_16 = arith.constant 0.000000e+00 : f32
    %33 = vector.broadcast %cst_16 : f32 to vector<2x128xf32>
    %34 = arith.cmpf oge, %32, %33 : vector<2x128xf32>
    %cst_17 = arith.constant 0.00999999977 : f32
    %35 = vector.broadcast %cst_17 : f32 to vector<2x128xf32>
    %36 = arith.mulf %35, %32 : vector<2x128xf32>
    %37 = arith.select %34, %32, %36 : vector<2x128xi1>, vector<2x128xf32>
    %38 = arith.truncf %37 : vector<2x128xf32> to vector<2x128xbf16>
    %c0_18 = arith.constant 0 : index
    %c0_19 = arith.constant 0 : index
    %39 = vector.load %arg6[%c0_18, %c0_19] : memref<128x512xbf16, #tpu.memory_space<vmem>>, vector<128x512xbf16>
    %cst_20 = arith.constant dense<0.000000e+00> : vector<2x512xf32>
    %40 = tpu.matmul %38, %39, %cst_20 {dimension_numbers = #tpu.dot_dimension_numbers<[1], [0], [0], [1], [0, 0, 1, 1], [], []>} : vector<2x128xbf16>, vector<128x512xbf16>, vector<2x512xf32> -> vector<2x512xf32>
    %c0_21 = arith.constant 0 : index
    %c0_22 = arith.constant 0 : index
    %41 = vector.load %arg7[%c0_21, %c0_22] : memref<1x512xf32, #tpu.memory_space<vmem>>, vector<1x512xf32>
    %42 = vector.broadcast %41 : vector<1x512xf32> to vector<2x512xf32>
    %43 = arith.addf %40, %42 : vector<2x512xf32>
    %c0_23 = arith.constant 0 : index
    %c0_24 = arith.constant 0 : index
    %44 = vector.load %arg8[%c0_23, %c0_24] : memref<1x512xf32, #tpu.memory_space<vmem>>, vector<1x512xf32>
    %c0_25 = arith.constant 0 : index
    %c0_26 = arith.constant 0 : index
    %45 = vector.load %arg9[%c0_25, %c0_26] : memref<1x512xf32, #tpu.memory_space<vmem>>, vector<1x512xf32>
    %cst_27 = arith.constant dense<0.000000e+00> : vector<512xf32>
    %46 = vector.multi_reduction <add>, %43, %cst_27 [0] : vector<2x512xf32> to vector<512xf32>
    %47 = vector.shape_cast %46 : vector<512xf32> to vector<1x512xf32>
    %cst_28 = arith.constant 2.000000e+00 : f32
    %48 = vector.broadcast %cst_28 : f32 to vector<1x512xf32>
    %49 = arith.divf %47, %48 : vector<1x512xf32>
    %50 = vector.broadcast %49 : vector<1x512xf32> to vector<2x512xf32>
    %51 = arith.subf %43, %50 : vector<2x512xf32>
    %52 = arith.mulf %51, %51 : vector<2x512xf32>
    %cst_29 = arith.constant dense<0.000000e+00> : vector<512xf32>
    %53 = vector.multi_reduction <add>, %52, %cst_29 [0] : vector<2x512xf32> to vector<512xf32>
    %54 = vector.shape_cast %53 : vector<512xf32> to vector<1x512xf32>
    %cst_30 = arith.constant 2.000000e+00 : f32
    %55 = vector.broadcast %cst_30 : f32 to vector<1x512xf32>
    %56 = arith.divf %54, %55 : vector<1x512xf32>
    %57 = vector.broadcast %49 : vector<1x512xf32> to vector<2x512xf32>
    %58 = arith.subf %43, %57 : vector<2x512xf32>
    %cst_31 = arith.constant 9.99999974E-6 : f32
    %59 = vector.broadcast %cst_31 : f32 to vector<1x512xf32>
    %60 = arith.addf %56, %59 : vector<1x512xf32>
    %61 = math.rsqrt %60 : vector<1x512xf32>
    %62 = vector.broadcast %61 : vector<1x512xf32> to vector<2x512xf32>
    %63 = arith.mulf %58, %62 : vector<2x512xf32>
    %64 = vector.broadcast %44 : vector<1x512xf32> to vector<2x512xf32>
    %65 = arith.mulf %63, %64 : vector<2x512xf32>
    %66 = vector.broadcast %45 : vector<1x512xf32> to vector<2x512xf32>
    %67 = arith.addf %65, %66 : vector<2x512xf32>
    %cst_32 = arith.constant 0.000000e+00 : f32
    %68 = vector.broadcast %cst_32 : f32 to vector<2x512xf32>
    %69 = arith.cmpf oge, %67, %68 : vector<2x512xf32>
    %cst_33 = arith.constant 0.00999999977 : f32
    %70 = vector.broadcast %cst_33 : f32 to vector<2x512xf32>
    %71 = arith.mulf %70, %67 : vector<2x512xf32>
    %72 = arith.select %69, %67, %71 : vector<2x512xi1>, vector<2x512xf32>
    %c0_34 = arith.constant 0 : index
    %c0_35 = arith.constant 0 : index
    %73 = vector.load %arg10[%c0_34, %c0_35] : memref<2x512xf32, #tpu.memory_space<vmem>>, vector<2x512xf32>
    tpu.vector_store %arg10[%c0_34, %c0_35], %72 {strides = array<i32>} : memref<2x512xf32, #tpu.memory_space<vmem>>, vector<2x512xf32>,
    return
  }
}

module attributes {stable_mosaic.version = 11 : i64} {
  func.func @kernel(%arg0: memref<242x64xf32, #tpu.memory_space<vmem>>, %arg1: memref<1x64xf32, #tpu.memory_space<vmem>>, %arg2: memref<1x64xf32, #tpu.memory_space<vmem>>, %arg3: memref<1x64xf32, #tpu.memory_space<vmem>>, %arg4: memref<64x3200xbf16, #tpu.memory_space<vmem>>, %arg5: memref<242x3200xf32, #tpu.memory_space<vmem>>) attributes {dimension_semantics = [], scalar_prefetch = 0 : i64, scratch_operands = 0 : i64, tpu.core_type = #tpu.core_type<tc>} {
    %c0 = arith.constant 0 : index
    %c0_0 = arith.constant 0 : index
    %0 = vector.load %arg0[%c0, %c0_0] : memref<242x64xf32, #tpu.memory_space<vmem>>, vector<242x64xf32>
    %c0_1 = arith.constant 0 : index
    %c0_2 = arith.constant 0 : index
    %1 = vector.load %arg1[%c0_1, %c0_2] : memref<1x64xf32, #tpu.memory_space<vmem>>, vector<1x64xf32>
    %2 = vector.broadcast %1 : vector<1x64xf32> to vector<242x64xf32>
    %3 = arith.addf %0, %2 : vector<242x64xf32>
    %c0_3 = arith.constant 0 : index
    %c0_4 = arith.constant 0 : index
    %4 = vector.load %arg2[%c0_3, %c0_4] : memref<1x64xf32, #tpu.memory_space<vmem>>, vector<1x64xf32>
    %c0_5 = arith.constant 0 : index
    %c0_6 = arith.constant 0 : index
    %5 = vector.load %arg3[%c0_5, %c0_6] : memref<1x64xf32, #tpu.memory_space<vmem>>, vector<1x64xf32>
    %cst = arith.constant dense<0.000000e+00> : vector<64xf32>
    %6 = vector.multi_reduction <add>, %3, %cst [0] : vector<242x64xf32> to vector<64xf32>
    %7 = vector.shape_cast %6 : vector<64xf32> to vector<1x64xf32>
    %cst_7 = arith.constant 2.420000e+02 : f32
    %8 = vector.broadcast %cst_7 : f32 to vector<1x64xf32>
    %9 = arith.divf %7, %8 : vector<1x64xf32>
    %10 = vector.broadcast %9 : vector<1x64xf32> to vector<242x64xf32>
    %11 = arith.subf %3, %10 : vector<242x64xf32>
    %12 = arith.mulf %11, %11 : vector<242x64xf32>
    %cst_8 = arith.constant dense<0.000000e+00> : vector<64xf32>
    %13 = vector.multi_reduction <add>, %12, %cst_8 [0] : vector<242x64xf32> to vector<64xf32>
    %14 = vector.shape_cast %13 : vector<64xf32> to vector<1x64xf32>
    %cst_9 = arith.constant 2.420000e+02 : f32
    %15 = vector.broadcast %cst_9 : f32 to vector<1x64xf32>
    %16 = arith.divf %14, %15 : vector<1x64xf32>
    %17 = vector.broadcast %9 : vector<1x64xf32> to vector<242x64xf32>
    %18 = arith.subf %3, %17 : vector<242x64xf32>
    %cst_10 = arith.constant 9.99999974E-6 : f32
    %19 = vector.broadcast %cst_10 : f32 to vector<1x64xf32>
    %20 = arith.addf %16, %19 : vector<1x64xf32>
    %21 = math.rsqrt %20 : vector<1x64xf32>
    %22 = vector.broadcast %21 : vector<1x64xf32> to vector<242x64xf32>
    %23 = arith.mulf %18, %22 : vector<242x64xf32>
    %24 = vector.broadcast %4 : vector<1x64xf32> to vector<242x64xf32>
    %25 = arith.mulf %23, %24 : vector<242x64xf32>
    %26 = vector.broadcast %5 : vector<1x64xf32> to vector<242x64xf32>
    %27 = arith.addf %25, %26 : vector<242x64xf32>
    %cst_11 = arith.constant 0.000000e+00 : f32
    %28 = vector.broadcast %cst_11 : f32 to vector<242x64xf32>
    %29 = arith.cmpf oge, %27, %28 : vector<242x64xf32>
    %cst_12 = arith.constant 0.00999999977 : f32
    %30 = vector.broadcast %cst_12 : f32 to vector<242x64xf32>
    %31 = arith.mulf %30, %27 : vector<242x64xf32>
    %32 = arith.select %29, %27, %31 : vector<242x64xi1>, vector<242x64xf32>
    %33 = arith.truncf %32 : vector<242x64xf32> to vector<242x64xbf16>
    %c0_13 = arith.constant 0 : index
    %c0_14 = arith.constant 0 : index
    %34 = vector.load %arg4[%c0_13, %c0_14] : memref<64x3200xbf16, #tpu.memory_space<vmem>>, vector<64x128xbf16>
    %cst_15 = arith.constant dense<0.000000e+00> : vector<242x128xf32>
    %35 = tpu.matmul %33, %34, %cst_15 {dimension_numbers = #tpu.dot_dimension_numbers<[1], [0], [0], [1], [0, 0, 1, 1], [], []>} : vector<242x64xbf16>, vector<64x128xbf16>, vector<242x128xf32> -> vector<242x128xf32>
    %c0_16 = arith.constant 0 : index
    %c0_17 = arith.constant 0 : index
    %36 = vector.load %arg5[%c0_16, %c0_17] : memref<242x3200xf32, #tpu.memory_space<vmem>>, vector<242x128xf32>
    tpu.vector_store %arg5[%c0_16, %c0_17], %35 {strides = array<i32>} : memref<242x3200xf32, #tpu.memory_space<vmem>>, vector<242x128xf32>,
    %c0_18 = arith.constant 0 : index
    %c128 = arith.constant 128 : index
    %37 = vector.load %arg4[%c0_18, %c128] : memref<64x3200xbf16, #tpu.memory_space<vmem>>, vector<64x128xbf16>
    %cst_19 = arith.constant dense<0.000000e+00> : vector<242x128xf32>
    %38 = tpu.matmul %33, %37, %cst_19 {dimension_numbers = #tpu.dot_dimension_numbers<[1], [0], [0], [1], [0, 0, 1, 1], [], []>} : vector<242x64xbf16>, vector<64x128xbf16>, vector<242x128xf32> -> vector<242x128xf32>
    %c0_20 = arith.constant 0 : index
    %c128_21 = arith.constant 128 : index
    %39 = vector.load %arg5[%c0_20, %c128_21] : memref<242x3200xf32, #tpu.memory_space<vmem>>, vector<242x128xf32>
    tpu.vector_store %arg5[%c0_20, %c128_21], %38 {strides = array<i32>} : memref<242x3200xf32, #tpu.memory_space<vmem>>, vector<242x128xf32>,
    %c0_22 = arith.constant 0 : index
    %c256 = arith.constant 256 : index
    %40 = vector.load %arg4[%c0_22, %c256] : memref<64x3200xbf16, #tpu.memory_space<vmem>>, vector<64x128xbf16>
    %cst_23 = arith.constant dense<0.000000e+00> : vector<242x128xf32>
    %41 = tpu.matmul %33, %40, %cst_23 {dimension_numbers = #tpu.dot_dimension_numbers<[1], [0], [0], [1], [0, 0, 1, 1], [], []>} : vector<242x64xbf16>, vector<64x128xbf16>, vector<242x128xf32> -> vector<242x128xf32>
    %c0_24 = arith.constant 0 : index
    %c256_25 = arith.constant 256 : index
    %42 = vector.load %arg5[%c0_24, %c256_25] : memref<242x3200xf32, #tpu.memory_space<vmem>>, vector<242x128xf32>
    tpu.vector_store %arg5[%c0_24, %c256_25], %41 {strides = array<i32>} : memref<242x3200xf32, #tpu.memory_space<vmem>>, vector<242x128xf32>,
    %c0_26 = arith.constant 0 : index
    %c384 = arith.constant 384 : index
    %43 = vector.load %arg4[%c0_26, %c384] : memref<64x3200xbf16, #tpu.memory_space<vmem>>, vector<64x128xbf16>
    %cst_27 = arith.constant dense<0.000000e+00> : vector<242x128xf32>
    %44 = tpu.matmul %33, %43, %cst_27 {dimension_numbers = #tpu.dot_dimension_numbers<[1], [0], [0], [1], [0, 0, 1, 1], [], []>} : vector<242x64xbf16>, vector<64x128xbf16>, vector<242x128xf32> -> vector<242x128xf32>
    %c0_28 = arith.constant 0 : index
    %c384_29 = arith.constant 384 : index
    %45 = vector.load %arg5[%c0_28, %c384_29] : memref<242x3200xf32, #tpu.memory_space<vmem>>, vector<242x128xf32>
    tpu.vector_store %arg5[%c0_28, %c384_29], %44 {strides = array<i32>} : memref<242x3200xf32, #tpu.memory_space<vmem>>, vector<242x128xf32>,
    %c0_30 = arith.constant 0 : index
    %c512 = arith.constant 512 : index
    %46 = vector.load %arg4[%c0_30, %c512] : memref<64x3200xbf16, #tpu.memory_space<vmem>>, vector<64x128xbf16>
    %cst_31 = arith.constant dense<0.000000e+00> : vector<242x128xf32>
    %47 = tpu.matmul %33, %46, %cst_31 {dimension_numbers = #tpu.dot_dimension_numbers<[1], [0], [0], [1], [0, 0, 1, 1], [], []>} : vector<242x64xbf16>, vector<64x128xbf16>, vector<242x128xf32> -> vector<242x128xf32>
    %c0_32 = arith.constant 0 : index
    %c512_33 = arith.constant 512 : index
    %48 = vector.load %arg5[%c0_32, %c512_33] : memref<242x3200xf32, #tpu.memory_space<vmem>>, vector<242x128xf32>
    tpu.vector_store %arg5[%c0_32, %c512_33], %47 {strides = array<i32>} : memref<242x3200xf32, #tpu.memory_space<vmem>>, vector<242x128xf32>,
    %c0_34 = arith.constant 0 : index
    %c640 = arith.constant 640 : index
    %49 = vector.load %arg4[%c0_34, %c640] : memref<64x3200xbf16, #tpu.memory_space<vmem>>, vector<64x128xbf16>
    %cst_35 = arith.constant dense<0.000000e+00> : vector<242x128xf32>
    %50 = tpu.matmul %33, %49, %cst_35 {dimension_numbers = #tpu.dot_dimension_numbers<[1], [0], [0], [1], [0, 0, 1, 1], [], []>} : vector<242x64xbf16>, vector<64x128xbf16>, vector<242x128xf32> -> vector<242x128xf32>
    %c0_36 = arith.constant 0 : index
    %c640_37 = arith.constant 640 : index
    %51 = vector.load %arg5[%c0_36, %c640_37] : memref<242x3200xf32, #tpu.memory_space<vmem>>, vector<242x128xf32>
    tpu.vector_store %arg5[%c0_36, %c640_37], %50 {strides = array<i32>} : memref<242x3200xf32, #tpu.memory_space<vmem>>, vector<242x128xf32>,
    %c0_38 = arith.constant 0 : index
    %c768 = arith.constant 768 : index
    %52 = vector.load %arg4[%c0_38, %c768] : memref<64x3200xbf16, #tpu.memory_space<vmem>>, vector<64x128xbf16>
    %cst_39 = arith.constant dense<0.000000e+00> : vector<242x128xf32>
    %53 = tpu.matmul %33, %52, %cst_39 {dimension_numbers = #tpu.dot_dimension_numbers<[1], [0], [0], [1], [0, 0, 1, 1], [], []>} : vector<242x64xbf16>, vector<64x128xbf16>, vector<242x128xf32> -> vector<242x128xf32>
    %c0_40 = arith.constant 0 : index
    %c768_41 = arith.constant 768 : index
    %54 = vector.load %arg5[%c0_40, %c768_41] : memref<242x3200xf32, #tpu.memory_space<vmem>>, vector<242x128xf32>
    tpu.vector_store %arg5[%c0_40, %c768_41], %53 {strides = array<i32>} : memref<242x3200xf32, #tpu.memory_space<vmem>>, vector<242x128xf32>,
    %c0_42 = arith.constant 0 : index
    %c896 = arith.constant 896 : index
    %55 = vector.load %arg4[%c0_42, %c896] : memref<64x3200xbf16, #tpu.memory_space<vmem>>, vector<64x128xbf16>
    %cst_43 = arith.constant dense<0.000000e+00> : vector<242x128xf32>
    %56 = tpu.matmul %33, %55, %cst_43 {dimension_numbers = #tpu.dot_dimension_numbers<[1], [0], [0], [1], [0, 0, 1, 1], [], []>} : vector<242x64xbf16>, vector<64x128xbf16>, vector<242x128xf32> -> vector<242x128xf32>
    %c0_44 = arith.constant 0 : index
    %c896_45 = arith.constant 896 : index
    %57 = vector.load %arg5[%c0_44, %c896_45] : memref<242x3200xf32, #tpu.memory_space<vmem>>, vector<242x128xf32>
    tpu.vector_store %arg5[%c0_44, %c896_45], %56 {strides = array<i32>} : memref<242x3200xf32, #tpu.memory_space<vmem>>, vector<242x128xf32>,
    %c0_46 = arith.constant 0 : index
    %c1024 = arith.constant 1024 : index
    %58 = vector.load %arg4[%c0_46, %c1024] : memref<64x3200xbf16, #tpu.memory_space<vmem>>, vector<64x128xbf16>
    %cst_47 = arith.constant dense<0.000000e+00> : vector<242x128xf32>
    %59 = tpu.matmul %33, %58, %cst_47 {dimension_numbers = #tpu.dot_dimension_numbers<[1], [0], [0], [1], [0, 0, 1, 1], [], []>} : vector<242x64xbf16>, vector<64x128xbf16>, vector<242x128xf32> -> vector<242x128xf32>
    %c0_48 = arith.constant 0 : index
    %c1024_49 = arith.constant 1024 : index
    %60 = vector.load %arg5[%c0_48, %c1024_49] : memref<242x3200xf32, #tpu.memory_space<vmem>>, vector<242x128xf32>
    tpu.vector_store %arg5[%c0_48, %c1024_49], %59 {strides = array<i32>} : memref<242x3200xf32, #tpu.memory_space<vmem>>, vector<242x128xf32>,
    %c0_50 = arith.constant 0 : index
    %c1152 = arith.constant 1152 : index
    %61 = vector.load %arg4[%c0_50, %c1152] : memref<64x3200xbf16, #tpu.memory_space<vmem>>, vector<64x128xbf16>
    %cst_51 = arith.constant dense<0.000000e+00> : vector<242x128xf32>
    %62 = tpu.matmul %33, %61, %cst_51 {dimension_numbers = #tpu.dot_dimension_numbers<[1], [0], [0], [1], [0, 0, 1, 1], [], []>} : vector<242x64xbf16>, vector<64x128xbf16>, vector<242x128xf32> -> vector<242x128xf32>
    %c0_52 = arith.constant 0 : index
    %c1152_53 = arith.constant 1152 : index
    %63 = vector.load %arg5[%c0_52, %c1152_53] : memref<242x3200xf32, #tpu.memory_space<vmem>>, vector<242x128xf32>
    tpu.vector_store %arg5[%c0_52, %c1152_53], %62 {strides = array<i32>} : memref<242x3200xf32, #tpu.memory_space<vmem>>, vector<242x128xf32>,
    %c0_54 = arith.constant 0 : index
    %c1280 = arith.constant 1280 : index
    %64 = vector.load %arg4[%c0_54, %c1280] : memref<64x3200xbf16, #tpu.memory_space<vmem>>, vector<64x128xbf16>
    %cst_55 = arith.constant dense<0.000000e+00> : vector<242x128xf32>
    %65 = tpu.matmul %33, %64, %cst_55 {dimension_numbers = #tpu.dot_dimension_numbers<[1], [0], [0], [1], [0, 0, 1, 1], [], []>} : vector<242x64xbf16>, vector<64x128xbf16>, vector<242x128xf32> -> vector<242x128xf32>
    %c0_56 = arith.constant 0 : index
    %c1280_57 = arith.constant 1280 : index
    %66 = vector.load %arg5[%c0_56, %c1280_57] : memref<242x3200xf32, #tpu.memory_space<vmem>>, vector<242x128xf32>
    tpu.vector_store %arg5[%c0_56, %c1280_57], %65 {strides = array<i32>} : memref<242x3200xf32, #tpu.memory_space<vmem>>, vector<242x128xf32>,
    %c0_58 = arith.constant 0 : index
    %c1408 = arith.constant 1408 : index
    %67 = vector.load %arg4[%c0_58, %c1408] : memref<64x3200xbf16, #tpu.memory_space<vmem>>, vector<64x128xbf16>
    %cst_59 = arith.constant dense<0.000000e+00> : vector<242x128xf32>
    %68 = tpu.matmul %33, %67, %cst_59 {dimension_numbers = #tpu.dot_dimension_numbers<[1], [0], [0], [1], [0, 0, 1, 1], [], []>} : vector<242x64xbf16>, vector<64x128xbf16>, vector<242x128xf32> -> vector<242x128xf32>
    %c0_60 = arith.constant 0 : index
    %c1408_61 = arith.constant 1408 : index
    %69 = vector.load %arg5[%c0_60, %c1408_61] : memref<242x3200xf32, #tpu.memory_space<vmem>>, vector<242x128xf32>
    tpu.vector_store %arg5[%c0_60, %c1408_61], %68 {strides = array<i32>} : memref<242x3200xf32, #tpu.memory_space<vmem>>, vector<242x128xf32>,
    %c0_62 = arith.constant 0 : index
    %c1536 = arith.constant 1536 : index
    %70 = vector.load %arg4[%c0_62, %c1536] : memref<64x3200xbf16, #tpu.memory_space<vmem>>, vector<64x128xbf16>
    %cst_63 = arith.constant dense<0.000000e+00> : vector<242x128xf32>
    %71 = tpu.matmul %33, %70, %cst_63 {dimension_numbers = #tpu.dot_dimension_numbers<[1], [0], [0], [1], [0, 0, 1, 1], [], []>} : vector<242x64xbf16>, vector<64x128xbf16>, vector<242x128xf32> -> vector<242x128xf32>
    %c0_64 = arith.constant 0 : index
    %c1536_65 = arith.constant 1536 : index
    %72 = vector.load %arg5[%c0_64, %c1536_65] : memref<242x3200xf32, #tpu.memory_space<vmem>>, vector<242x128xf32>
    tpu.vector_store %arg5[%c0_64, %c1536_65], %71 {strides = array<i32>} : memref<242x3200xf32, #tpu.memory_space<vmem>>, vector<242x128xf32>,
    %c0_66 = arith.constant 0 : index
    %c1664 = arith.constant 1664 : index
    %73 = vector.load %arg4[%c0_66, %c1664] : memref<64x3200xbf16, #tpu.memory_space<vmem>>, vector<64x128xbf16>
    %cst_67 = arith.constant dense<0.000000e+00> : vector<242x128xf32>
    %74 = tpu.matmul %33, %73, %cst_67 {dimension_numbers = #tpu.dot_dimension_numbers<[1], [0], [0], [1], [0, 0, 1, 1], [], []>} : vector<242x64xbf16>, vector<64x128xbf16>, vector<242x128xf32> -> vector<242x128xf32>
    %c0_68 = arith.constant 0 : index
    %c1664_69 = arith.constant 1664 : index
    %75 = vector.load %arg5[%c0_68, %c1664_69] : memref<242x3200xf32, #tpu.memory_space<vmem>>, vector<242x128xf32>
    tpu.vector_store %arg5[%c0_68, %c1664_69], %74 {strides = array<i32>} : memref<242x3200xf32, #tpu.memory_space<vmem>>, vector<242x128xf32>,
    %c0_70 = arith.constant 0 : index
    %c1792 = arith.constant 1792 : index
    %76 = vector.load %arg4[%c0_70, %c1792] : memref<64x3200xbf16, #tpu.memory_space<vmem>>, vector<64x128xbf16>
    %cst_71 = arith.constant dense<0.000000e+00> : vector<242x128xf32>
    %77 = tpu.matmul %33, %76, %cst_71 {dimension_numbers = #tpu.dot_dimension_numbers<[1], [0], [0], [1], [0, 0, 1, 1], [], []>} : vector<242x64xbf16>, vector<64x128xbf16>, vector<242x128xf32> -> vector<242x128xf32>
    %c0_72 = arith.constant 0 : index
    %c1792_73 = arith.constant 1792 : index
    %78 = vector.load %arg5[%c0_72, %c1792_73] : memref<242x3200xf32, #tpu.memory_space<vmem>>, vector<242x128xf32>
    tpu.vector_store %arg5[%c0_72, %c1792_73], %77 {strides = array<i32>} : memref<242x3200xf32, #tpu.memory_space<vmem>>, vector<242x128xf32>,
    %c0_74 = arith.constant 0 : index
    %c1920 = arith.constant 1920 : index
    %79 = vector.load %arg4[%c0_74, %c1920] : memref<64x3200xbf16, #tpu.memory_space<vmem>>, vector<64x128xbf16>
    %cst_75 = arith.constant dense<0.000000e+00> : vector<242x128xf32>
    %80 = tpu.matmul %33, %79, %cst_75 {dimension_numbers = #tpu.dot_dimension_numbers<[1], [0], [0], [1], [0, 0, 1, 1], [], []>} : vector<242x64xbf16>, vector<64x128xbf16>, vector<242x128xf32> -> vector<242x128xf32>
    %c0_76 = arith.constant 0 : index
    %c1920_77 = arith.constant 1920 : index
    %81 = vector.load %arg5[%c0_76, %c1920_77] : memref<242x3200xf32, #tpu.memory_space<vmem>>, vector<242x128xf32>
    tpu.vector_store %arg5[%c0_76, %c1920_77], %80 {strides = array<i32>} : memref<242x3200xf32, #tpu.memory_space<vmem>>, vector<242x128xf32>,
    %c0_78 = arith.constant 0 : index
    %c2048 = arith.constant 2048 : index
    %82 = vector.load %arg4[%c0_78, %c2048] : memref<64x3200xbf16, #tpu.memory_space<vmem>>, vector<64x128xbf16>
    %cst_79 = arith.constant dense<0.000000e+00> : vector<242x128xf32>
    %83 = tpu.matmul %33, %82, %cst_79 {dimension_numbers = #tpu.dot_dimension_numbers<[1], [0], [0], [1], [0, 0, 1, 1], [], []>} : vector<242x64xbf16>, vector<64x128xbf16>, vector<242x128xf32> -> vector<242x128xf32>
    %c0_80 = arith.constant 0 : index
    %c2048_81 = arith.constant 2048 : index
    %84 = vector.load %arg5[%c0_80, %c2048_81] : memref<242x3200xf32, #tpu.memory_space<vmem>>, vector<242x128xf32>
    tpu.vector_store %arg5[%c0_80, %c2048_81], %83 {strides = array<i32>} : memref<242x3200xf32, #tpu.memory_space<vmem>>, vector<242x128xf32>,
    %c0_82 = arith.constant 0 : index
    %c2176 = arith.constant 2176 : index
    %85 = vector.load %arg4[%c0_82, %c2176] : memref<64x3200xbf16, #tpu.memory_space<vmem>>, vector<64x128xbf16>
    %cst_83 = arith.constant dense<0.000000e+00> : vector<242x128xf32>
    %86 = tpu.matmul %33, %85, %cst_83 {dimension_numbers = #tpu.dot_dimension_numbers<[1], [0], [0], [1], [0, 0, 1, 1], [], []>} : vector<242x64xbf16>, vector<64x128xbf16>, vector<242x128xf32> -> vector<242x128xf32>
    %c0_84 = arith.constant 0 : index
    %c2176_85 = arith.constant 2176 : index
    %87 = vector.load %arg5[%c0_84, %c2176_85] : memref<242x3200xf32, #tpu.memory_space<vmem>>, vector<242x128xf32>
    tpu.vector_store %arg5[%c0_84, %c2176_85], %86 {strides = array<i32>} : memref<242x3200xf32, #tpu.memory_space<vmem>>, vector<242x128xf32>,
    %c0_86 = arith.constant 0 : index
    %c2304 = arith.constant 2304 : index
    %88 = vector.load %arg4[%c0_86, %c2304] : memref<64x3200xbf16, #tpu.memory_space<vmem>>, vector<64x128xbf16>
    %cst_87 = arith.constant dense<0.000000e+00> : vector<242x128xf32>
    %89 = tpu.matmul %33, %88, %cst_87 {dimension_numbers = #tpu.dot_dimension_numbers<[1], [0], [0], [1], [0, 0, 1, 1], [], []>} : vector<242x64xbf16>, vector<64x128xbf16>, vector<242x128xf32> -> vector<242x128xf32>
    %c0_88 = arith.constant 0 : index
    %c2304_89 = arith.constant 2304 : index
    %90 = vector.load %arg5[%c0_88, %c2304_89] : memref<242x3200xf32, #tpu.memory_space<vmem>>, vector<242x128xf32>
    tpu.vector_store %arg5[%c0_88, %c2304_89], %89 {strides = array<i32>} : memref<242x3200xf32, #tpu.memory_space<vmem>>, vector<242x128xf32>,
    %c0_90 = arith.constant 0 : index
    %c2432 = arith.constant 2432 : index
    %91 = vector.load %arg4[%c0_90, %c2432] : memref<64x3200xbf16, #tpu.memory_space<vmem>>, vector<64x128xbf16>
    %cst_91 = arith.constant dense<0.000000e+00> : vector<242x128xf32>
    %92 = tpu.matmul %33, %91, %cst_91 {dimension_numbers = #tpu.dot_dimension_numbers<[1], [0], [0], [1], [0, 0, 1, 1], [], []>} : vector<242x64xbf16>, vector<64x128xbf16>, vector<242x128xf32> -> vector<242x128xf32>
    %c0_92 = arith.constant 0 : index
    %c2432_93 = arith.constant 2432 : index
    %93 = vector.load %arg5[%c0_92, %c2432_93] : memref<242x3200xf32, #tpu.memory_space<vmem>>, vector<242x128xf32>
    tpu.vector_store %arg5[%c0_92, %c2432_93], %92 {strides = array<i32>} : memref<242x3200xf32, #tpu.memory_space<vmem>>, vector<242x128xf32>,
    %c0_94 = arith.constant 0 : index
    %c2560 = arith.constant 2560 : index
    %94 = vector.load %arg4[%c0_94, %c2560] : memref<64x3200xbf16, #tpu.memory_space<vmem>>, vector<64x128xbf16>
    %cst_95 = arith.constant dense<0.000000e+00> : vector<242x128xf32>
    %95 = tpu.matmul %33, %94, %cst_95 {dimension_numbers = #tpu.dot_dimension_numbers<[1], [0], [0], [1], [0, 0, 1, 1], [], []>} : vector<242x64xbf16>, vector<64x128xbf16>, vector<242x128xf32> -> vector<242x128xf32>
    %c0_96 = arith.constant 0 : index
    %c2560_97 = arith.constant 2560 : index
    %96 = vector.load %arg5[%c0_96, %c2560_97] : memref<242x3200xf32, #tpu.memory_space<vmem>>, vector<242x128xf32>
    tpu.vector_store %arg5[%c0_96, %c2560_97], %95 {strides = array<i32>} : memref<242x3200xf32, #tpu.memory_space<vmem>>, vector<242x128xf32>,
    %c0_98 = arith.constant 0 : index
    %c2688 = arith.constant 2688 : index
    %97 = vector.load %arg4[%c0_98, %c2688] : memref<64x3200xbf16, #tpu.memory_space<vmem>>, vector<64x128xbf16>
    %cst_99 = arith.constant dense<0.000000e+00> : vector<242x128xf32>
    %98 = tpu.matmul %33, %97, %cst_99 {dimension_numbers = #tpu.dot_dimension_numbers<[1], [0], [0], [1], [0, 0, 1, 1], [], []>} : vector<242x64xbf16>, vector<64x128xbf16>, vector<242x128xf32> -> vector<242x128xf32>
    %c0_100 = arith.constant 0 : index
    %c2688_101 = arith.constant 2688 : index
    %99 = vector.load %arg5[%c0_100, %c2688_101] : memref<242x3200xf32, #tpu.memory_space<vmem>>, vector<242x128xf32>
    tpu.vector_store %arg5[%c0_100, %c2688_101], %98 {strides = array<i32>} : memref<242x3200xf32, #tpu.memory_space<vmem>>, vector<242x128xf32>,
    %c0_102 = arith.constant 0 : index
    %c2816 = arith.constant 2816 : index
    %100 = vector.load %arg4[%c0_102, %c2816] : memref<64x3200xbf16, #tpu.memory_space<vmem>>, vector<64x128xbf16>
    %cst_103 = arith.constant dense<0.000000e+00> : vector<242x128xf32>
    %101 = tpu.matmul %33, %100, %cst_103 {dimension_numbers = #tpu.dot_dimension_numbers<[1], [0], [0], [1], [0, 0, 1, 1], [], []>} : vector<242x64xbf16>, vector<64x128xbf16>, vector<242x128xf32> -> vector<242x128xf32>
    %c0_104 = arith.constant 0 : index
    %c2816_105 = arith.constant 2816 : index
    %102 = vector.load %arg5[%c0_104, %c2816_105] : memref<242x3200xf32, #tpu.memory_space<vmem>>, vector<242x128xf32>
    tpu.vector_store %arg5[%c0_104, %c2816_105], %101 {strides = array<i32>} : memref<242x3200xf32, #tpu.memory_space<vmem>>, vector<242x128xf32>,
    %c0_106 = arith.constant 0 : index
    %c2944 = arith.constant 2944 : index
    %103 = vector.load %arg4[%c0_106, %c2944] : memref<64x3200xbf16, #tpu.memory_space<vmem>>, vector<64x128xbf16>
    %cst_107 = arith.constant dense<0.000000e+00> : vector<242x128xf32>
    %104 = tpu.matmul %33, %103, %cst_107 {dimension_numbers = #tpu.dot_dimension_numbers<[1], [0], [0], [1], [0, 0, 1, 1], [], []>} : vector<242x64xbf16>, vector<64x128xbf16>, vector<242x128xf32> -> vector<242x128xf32>
    %c0_108 = arith.constant 0 : index
    %c2944_109 = arith.constant 2944 : index
    %105 = vector.load %arg5[%c0_108, %c2944_109] : memref<242x3200xf32, #tpu.memory_space<vmem>>, vector<242x128xf32>
    tpu.vector_store %arg5[%c0_108, %c2944_109], %104 {strides = array<i32>} : memref<242x3200xf32, #tpu.memory_space<vmem>>, vector<242x128xf32>,
    %c0_110 = arith.constant 0 : index
    %c3072 = arith.constant 3072 : index
    %106 = vector.load %arg4[%c0_110, %c3072] : memref<64x3200xbf16, #tpu.memory_space<vmem>>, vector<64x128xbf16>
    %cst_111 = arith.constant dense<0.000000e+00> : vector<242x128xf32>
    %107 = tpu.matmul %33, %106, %cst_111 {dimension_numbers = #tpu.dot_dimension_numbers<[1], [0], [0], [1], [0, 0, 1, 1], [], []>} : vector<242x64xbf16>, vector<64x128xbf16>, vector<242x128xf32> -> vector<242x128xf32>
    %c0_112 = arith.constant 0 : index
    %c3072_113 = arith.constant 3072 : index
    %108 = vector.load %arg5[%c0_112, %c3072_113] : memref<242x3200xf32, #tpu.memory_space<vmem>>, vector<242x128xf32>
    tpu.vector_store %arg5[%c0_112, %c3072_113], %107 {strides = array<i32>} : memref<242x3200xf32, #tpu.memory_space<vmem>>, vector<242x128xf32>,
    return
  }
}

module attributes {stable_mosaic.version = 11 : i64} {
  func.func @kernel(%arg0: memref<1250x128xf32, #tpu.memory_space<vmem>>, %arg1: memref<1x128xf32, #tpu.memory_space<vmem>>, %arg2: memref<1x128xf32, #tpu.memory_space<vmem>>, %arg3: memref<1x128xf32, #tpu.memory_space<vmem>>, %arg4: memref<128x16xbf16, #tpu.memory_space<vmem>>, %arg5: memref<1250x16xf32, #tpu.memory_space<vmem>>) attributes {dimension_semantics = [], scalar_prefetch = 0 : i64, scratch_operands = 0 : i64, tpu.core_type = #tpu.core_type<tc>} {
    %c0 = arith.constant 0 : index
    %c0_0 = arith.constant 0 : index
    %0 = vector.load %arg0[%c0, %c0_0] : memref<1250x128xf32, #tpu.memory_space<vmem>>, vector<1250x128xf32>
    %c0_1 = arith.constant 0 : index
    %c0_2 = arith.constant 0 : index
    %1 = vector.load %arg1[%c0_1, %c0_2] : memref<1x128xf32, #tpu.memory_space<vmem>>, vector<1x128xf32>
    %2 = vector.broadcast %1 : vector<1x128xf32> to vector<1250x128xf32>
    %3 = arith.addf %0, %2 : vector<1250x128xf32>
    %c0_3 = arith.constant 0 : index
    %c0_4 = arith.constant 0 : index
    %4 = vector.load %arg2[%c0_3, %c0_4] : memref<1x128xf32, #tpu.memory_space<vmem>>, vector<1x128xf32>
    %c0_5 = arith.constant 0 : index
    %c0_6 = arith.constant 0 : index
    %5 = vector.load %arg3[%c0_5, %c0_6] : memref<1x128xf32, #tpu.memory_space<vmem>>, vector<1x128xf32>
    %cst = arith.constant dense<0.000000e+00> : vector<128xf32>
    %6 = vector.multi_reduction <add>, %3, %cst [0] : vector<1250x128xf32> to vector<128xf32>
    %7 = vector.shape_cast %6 : vector<128xf32> to vector<1x128xf32>
    %cst_7 = arith.constant 1.250000e+03 : f32
    %8 = vector.broadcast %cst_7 : f32 to vector<1x128xf32>
    %9 = arith.divf %7, %8 : vector<1x128xf32>
    %10 = vector.broadcast %9 : vector<1x128xf32> to vector<1250x128xf32>
    %11 = arith.subf %3, %10 : vector<1250x128xf32>
    %12 = arith.mulf %11, %11 : vector<1250x128xf32>
    %cst_8 = arith.constant dense<0.000000e+00> : vector<128xf32>
    %13 = vector.multi_reduction <add>, %12, %cst_8 [0] : vector<1250x128xf32> to vector<128xf32>
    %14 = vector.shape_cast %13 : vector<128xf32> to vector<1x128xf32>
    %cst_9 = arith.constant 1.250000e+03 : f32
    %15 = vector.broadcast %cst_9 : f32 to vector<1x128xf32>
    %16 = arith.divf %14, %15 : vector<1x128xf32>
    %17 = vector.broadcast %9 : vector<1x128xf32> to vector<1250x128xf32>
    %18 = arith.subf %3, %17 : vector<1250x128xf32>
    %cst_10 = arith.constant 9.99999974E-6 : f32
    %19 = vector.broadcast %cst_10 : f32 to vector<1x128xf32>
    %20 = arith.addf %16, %19 : vector<1x128xf32>
    %21 = math.rsqrt %20 : vector<1x128xf32>
    %22 = vector.broadcast %21 : vector<1x128xf32> to vector<1250x128xf32>
    %23 = arith.mulf %18, %22 : vector<1250x128xf32>
    %24 = vector.broadcast %4 : vector<1x128xf32> to vector<1250x128xf32>
    %25 = arith.mulf %23, %24 : vector<1250x128xf32>
    %26 = vector.broadcast %5 : vector<1x128xf32> to vector<1250x128xf32>
    %27 = arith.addf %25, %26 : vector<1250x128xf32>
    %cst_11 = arith.constant 0.000000e+00 : f32
    %28 = vector.broadcast %cst_11 : f32 to vector<1250x128xf32>
    %29 = arith.cmpf oge, %27, %28 : vector<1250x128xf32>
    %cst_12 = arith.constant 0.00999999977 : f32
    %30 = vector.broadcast %cst_12 : f32 to vector<1250x128xf32>
    %31 = arith.mulf %30, %27 : vector<1250x128xf32>
    %32 = arith.select %29, %27, %31 : vector<1250x128xi1>, vector<1250x128xf32>
    %33 = arith.truncf %32 : vector<1250x128xf32> to vector<1250x128xbf16>
    %c0_13 = arith.constant 0 : index
    %c0_14 = arith.constant 0 : index
    %34 = vector.load %arg4[%c0_13, %c0_14] : memref<128x16xbf16, #tpu.memory_space<vmem>>, vector<128x16xbf16>
    %cst_15 = arith.constant dense<0.000000e+00> : vector<1250x16xf32>
    %35 = tpu.matmul %33, %34, %cst_15 {dimension_numbers = #tpu.dot_dimension_numbers<[1], [0], [0], [1], [0, 0, 1, 1], [], []>} : vector<1250x128xbf16>, vector<128x16xbf16>, vector<1250x16xf32> -> vector<1250x16xf32>
    %c0_16 = arith.constant 0 : index
    %c0_17 = arith.constant 0 : index
    %36 = vector.load %arg5[%c0_16, %c0_17] : memref<1250x16xf32, #tpu.memory_space<vmem>>, vector<1250x16xf32>
    tpu.vector_store %arg5[%c0_16, %c0_17], %35 {strides = array<i32>} : memref<1250x16xf32, #tpu.memory_space<vmem>>, vector<1250x16xf32>,
    return
  }
}

</mosaic_0001>

<bundles_post_ra>
// kernel: decoder_mnist_forward.4
= control target key start
LH: loop header
LB: loop body
LE: loop exit
PB: predicated region body
PF: predicated region fallthrough
CT: control target
= control target key end

     0   :  { %15 = vsyncpa [#allocation3], 0  ;;  %s1234_s0 = inlined_call_operand.hbm [shape: f32[2,32], index: 0, kind: input, shape index: {}]   ;;  %s1235_s1 = inlined_call_operand.hbm [shape: f32[2,32], index: 1, kind: input, shape index: {}]   ;;  %s1236_s2 = inlined_call_operand.hbm [shape: bf16[32,128], index: 2, kind: input, shape index: {}]   ;;  %s1237_s3 = inlined_call_operand.hbm [shape: f32[1,128], index: 3, kind: input, shape index: {}]   ;;  %s1238_s4 = inlined_call_operand.hbm [shape: f32[1,128], index: 4, kind: input, shape index: {}]   ;;  %s1239_s5 = inlined_call_operand.hbm [shape: f32[1,128], index: 5, kind: input, shape index: {}]   ;;  %s1240_s6 = inlined_call_operand.hbm [shape: bf16[128,512], index: 6, kind: input, shape index: {}]   ;;  %s1241_s7 = inlined_call_operand.hbm [shape: f32[1,512], index: 7, kind: input, shape index: {}]   ;;  %s1242_s8 = inlined_call_operand.hbm [shape: f32[1,512], index: 8, kind: input, shape index: {}]   ;;  %s1243_s9 = inlined_call_operand.hbm [shape: f32[1,512], index: 9, kind: input, shape index: {}]   ;;  %s1244_s10 = inlined_call_operand.vmem [shape: f32[2,512], index: 10, kind: output, shape index: {}]  }
   0x1   :  { %16 = vsyncpa [#allocation5], 0 }
   0x2   :  { %17 = vsyncpa [#allocation8], 0 }
   0x3   :  { %18 = vsyncpa [#allocation11], 0 }
   0x4   :  { %19 = vsyncpa [#allocation14], 0 }
   0x5   :  { %20 = vsyncpa [#allocation17], 0  ;;  %s1086_s13 = smov [#allocation4]   ;;  %s1087_s15 = smov [#allocation7]  }
   0x6   :  { %s37_s14 = sshll.u32 %s1086_s13, 4  ;;  %s59_s16 = sshll.u32 %s1087_s15, 4  ;;  %s38_s14 = int_to_ptr.vmem [resolvable:$true] %s37_s14  ;;  %s60_s16 = int_to_ptr.vmem [resolvable:$true] %s59_s16 }
   0x7   :  { %s882_s17 = scalar_lea.vmem %s38_s14, 32  ;;  %p887_p1 = scmp.lt.s32.totalorder %s38_s14, %s38_s14 }
   0x8   :  { %p883_p0 = scmp.ne.s32.totalorder %s38_s14, %s882_s17  ;;  %p888_p2 = scmp.lt.s32.totalorder %s882_s17, %s882_s17 }
   0xa   :  { %p889_p3 = por %p888_p2, %p887_p1 }
   0xc   :  { %p890_p4 = pnand %p889_p3, %p883_p0 }
   0xe   :  { %893 = shalt.err (!%p890_p4)
}
   0xf   :  { %40 = dma.hbm_to_vmem [thread:$0]  %s1235_s1, 32, %s38_s14, [#allocation5]  }
  0x10   :  { %s902_s20 = scalar_lea.vmem %s60_s16, 16  ;;  %s906_s21 = scalar_lea.vmem %s60_s16, 32 }
  0x11   :  { %p903_p5 = scmp.ne.s32.totalorder %s60_s16, %s902_s20  ;;  %p907_p6 = scmp.lt.s32.totalorder %s60_s16, %s60_s16 }
  0x12   :  { %p908_p7 = scmp.lt.s32.totalorder %s906_s21, %s902_s20 }
  0x14   :  { %p909_p8 = por %p908_p7, %p907_p6 }
  0x16   :  { %p910_p9 = pnand %p909_p8, %p903_p5 }
  0x18   :  { %913 = shalt.err (!%p910_p9)
}
  0x19   :  { %62 = dma.hbm_to_vmem [thread:$0]  %s1237_s3, 16, %s60_s16, [#allocation8]  }
  0x1a   :  { %s1088_s24 = smov [#allocation10]   ;;  %s1089_s26 = smov [#allocation13]  }
  0x1b   :  { %s79_s25 = sshll.u32 %s1088_s24, 4  ;;  %s101_s27 = sshll.u32 %s1089_s26, 4  ;;  %s80_s25 = int_to_ptr.vmem [resolvable:$true] %s79_s25  ;;  %s102_s27 = int_to_ptr.vmem [resolvable:$true] %s101_s27 }
  0x1c   :  { %s922_s28 = scalar_lea.vmem %s80_s25, 16  ;;  %s926_s1 = scalar_lea.vmem %s80_s25, 32 }
  0x1d   :  { %p923_p10 = scmp.ne.s32.totalorder %s80_s25, %s922_s28  ;;  %p927_p11 = scmp.lt.s32.totalorder %s80_s25, %s80_s25 }
  0x1e   :  { %p928_p12 = scmp.lt.s32.totalorder %s926_s1, %s922_s28 }
  0x20   :  { %p929_p13 = por %p928_p12, %p927_p11 }
  0x22   :  { %p930_p0 = pnand %p929_p13, %p923_p10 }
  0x24   :  { %933 = shalt.err (!%p930_p0)
}
  0x25   :  { %82 = dma.hbm_to_vmem [thread:$0]  %s1239_s5, 16, %s80_s25, [#allocation11]  }
  0x26   :  { %s942_s11 = scalar_lea.vmem %s102_s27, 64  ;;  %p947_p2 = scmp.lt.s32.totalorder %s102_s27, %s102_s27 }
  0x27   :  { %p943_p1 = scmp.ne.s32.totalorder %s102_s27, %s942_s11  ;;  %p948_p3 = scmp.lt.s32.totalorder %s942_s11, %s942_s11 }
  0x29   :  { %p949_p4 = por %p948_p3, %p947_p2 }
  0x2b   :  { %p950_p5 = pnand %p949_p4, %p943_p1 }
  0x2d   :  { %953 = shalt.err (!%p950_p5)
}
  0x2e   :  { %104 = dma.hbm_to_vmem [thread:$0]  %s1241_s7, 64, %s102_s27, [#allocation14]  }
  0x2f   :  { %s1090_s13 = smov [#allocation2]   ;;  %s1091_s15 = smov [#allocation6]  }
  0x30   :  { %s27_s14 = sshll.u32 %s1090_s13, 4  ;;  %s46_s16 = sshll.u32 %s1091_s15, 4  ;;  %s28_s14 = int_to_ptr.vmem [resolvable:$true] %s27_s14  ;;  %s47_s16 = int_to_ptr.vmem [resolvable:$true] %s46_s16 }
  0x31   :  { %s962_s17 = scalar_lea.vmem %s28_s14, 32  ;;  %p967_p7 = scmp.lt.s32.totalorder %s28_s14, %s28_s14 }
  0x32   :  { %p963_p6 = scmp.ne.s32.totalorder %s28_s14, %s962_s17  ;;  %p968_p8 = scmp.lt.s32.totalorder %s962_s17, %s962_s17 }
  0x34   :  { %p969_p9 = por %p968_p8, %p967_p7 }
  0x36   :  { %p970_p10 = pnand %p969_p9, %p963_p6 }
  0x38   :  { %973 = shalt.err (!%p970_p10)
}
  0x39   :  { %30 = dma.hbm_to_vmem [thread:$0]  %s1234_s0, 32, %s28_s14, [#allocation3]  }
  0x3a   :  { %s982_s19 = scalar_lea.vmem %s47_s16, 256  ;;  %p987_p12 = scmp.lt.s32.totalorder %s47_s16, %s47_s16 }
  0x3b   :  { %p983_p11 = scmp.ne.s32.totalorder %s47_s16, %s982_s19  ;;  %p988_p13 = scmp.lt.s32.totalorder %s982_s19, %s982_s19 }
  0x3d   :  { %p989_p0 = por %p988_p13, %p987_p12 }
  0x3f   :  { %p990_p1 = pnand %p989_p0, %p983_p11 }
  0x41   :  { %993 = shalt.err (!%p990_p1)
}
  0x42   :  { %s1092_s7 = smov 64   ;;  %s1093_s20 = smov 4  }
  0x43   :  { %52 = dma.hbm_to_vmem [thread:$0]  %s1236_s2, 256, %s47_s16, [#allocation5], %s1092_s7, %s1092_s7, %s1093_s20  }
  0x44   :  { %s1094_s23 = smov [#allocation9]   ;;  %s1095_s25 = smov [#allocation12]  }
  0x45   :  { %s69_s24 = sshll.u32 %s1094_s23, 4  ;;  %s88_s26 = sshll.u32 %s1095_s25, 4  ;;  %s70_s24 = int_to_ptr.vmem [resolvable:$true] %s69_s24  ;;  %s89_s26 = int_to_ptr.vmem [resolvable:$true] %s88_s26 }
  0x46   :  { %s1002_s0 = scalar_lea.vmem %s70_s24, 16  ;;  %s1006_s27 = scalar_lea.vmem %s70_s24, 32 }
  0x47   :  { %p1003_p2 = scmp.ne.s32.totalorder %s70_s24, %s1002_s0  ;;  %p1007_p3 = scmp.lt.s32.totalorder %s70_s24, %s70_s24 }
  0x48   :  { %p1008_p4 = scmp.lt.s32.totalorder %s1006_s27, %s1002_s0 }
  0x4a   :  { %p1009_p5 = por %p1008_p4, %p1007_p3 }
  0x4c   :  { %p1010_p6 = pnand %p1009_p5, %p1003_p2 }
  0x4e   :  { %1013 = shalt.err (!%p1010_p6)
}
  0x4f   :  { %72 = dma.hbm_to_vmem [thread:$0]  %s1238_s4, 16, %s70_s24, [#allocation8]  }
  0x50   :  { %s1022_s29 = scalar_lea.vmem %s89_s26, 4096  ;;  %p1027_p8 = scmp.lt.s32.totalorder %s89_s26, %s89_s26 }
  0x51   :  { %p1023_p7 = scmp.ne.s32.totalorder %s89_s26, %s1022_s29  ;;  %p1028_p9 = scmp.lt.s32.totalorder %s1022_s29, %s1022_s29 }
  0x53   :  { %p1029_p10 = por %p1028_p9, %p1027_p8 }
  0x55   :  { %p1030_p11 = pnand %p1029_p10, %p1023_p7 }
  0x57   :  { %1033 = shalt.err (!%p1030_p11)
}
  0x58   :  { %s1096_s2 = smov 256   ;;  %s1097_s30 = smov 16  }
  0x59   :  { %94 = dma.hbm_to_vmem [thread:$0]  %s1240_s6, 4096, %s89_s26, [#allocation11], %s1096_s2, %s1096_s2, %s1097_s30  }
  0x5a   :  { %s1098_s12 = smov [#allocation15]   ;;  %s1099_s14 = smov [#allocation16]  }
  0x5b   :  { %s111_s13 = sshll.u32 %s1098_s12, 4  ;;  %s121_s15 = sshll.u32 %s1099_s14, 4  ;;  %s112_s13 = int_to_ptr.vmem [resolvable:$true] %s111_s13  ;;  %s122_s15 = int_to_ptr.vmem [resolvable:$true] %s121_s15 }
  0x5c   :  { %s1042_s4 = scalar_lea.vmem %s112_s13, 64  ;;  %p1047_p13 = scmp.lt.s32.totalorder %s112_s13, %s112_s13 }
  0x5d   :  { %p1043_p12 = scmp.ne.s32.totalorder %s112_s13, %s1042_s4  ;;  %p1048_p0 = scmp.lt.s32.totalorder %s1042_s4, %s1042_s4 }
  0x5f   :  { %p1049_p1 = por %p1048_p0, %p1047_p13 }
  0x61   :  { %p1050_p2 = pnand %p1049_p1, %p1043_p12 }
  0x63   :  { %1053 = shalt.err (!%p1050_p2)
}
  0x64   :  { %114 = dma.hbm_to_vmem [thread:$0]  %s1242_s8, 64, %s112_s13, [#allocation14]  }
  0x65   :  { %s1062_s5 = scalar_lea.vmem %s122_s15, 64  ;;  %p1067_p4 = scmp.lt.s32.totalorder %s122_s15, %s122_s15 }
  0x66   :  { %p1063_p3 = scmp.ne.s32.totalorder %s122_s15, %s1062_s5  ;;  %p1068_p5 = scmp.lt.s32.totalorder %s1062_s5, %s1062_s5 }
  0x68   :  { %p1069_p6 = por %p1068_p5, %p1067_p4 }
  0x6a   :  { %p1070_p7 = pnand %p1069_p6, %p1063_p3 }
  0x6c   :  { %1073 = shalt.err (!%p1070_p7)
}
  0x6d   :  { %124 = dma.hbm_to_vmem [thread:$0]  %s1243_s9, 64, %s122_s15, [#allocation17]  }
  0x6e   :  { %1074 = dma.done.wait [#allocation3], 32  }
  0x6f   :  { %1075 = vsyncadd [#allocation3], 4294967264 }
  0x70   :  { %1076 = dma.done.wait [#allocation5], 288  }
  0x71   :  { %1077 = vsyncadd [#allocation5], 4294967008 }
  0x72   :  { %1078 = dma.done.wait [#allocation8], 32  }
  0x73   :  { %1079 = vsyncadd [#allocation8], 4294967264 }
  0x74   :  { %1080 = dma.done.wait [#allocation11], 4112  }
  0x75   :  { %1081 = vsyncadd [#allocation11], 4294963184 }
  0x76   :  { %1082 = dma.done.wait [#allocation14], 128  }
  0x77   :  { %1083 = vsyncadd [#allocation14], 4294967168 }
  0x78   :  { %1084 = dma.done.wait [#allocation17], 64  }
  0x79   :  { %1085 = vsyncadd [#allocation17], 4294967232  ;;  %v1100_v0 = vmov 0.0   ;;  %vm1101_vm0 = vmmov 0   ;;  %v814_v1 = vld [vmem:[#allocation6 + $0x8] sm:$0xff]   ;;  %v815_v2 = vld [vmem:[#allocation6] sm:$0xff]  }
  0x7a   :  { %788 = vmatprep.subr.bf16.mxu0 %v1100_v0  ;;  %792 = vmatprep.mubr.msk.bf16.mxu0 %vm1101_vm0, %v1100_v0  ;;  %v156_v3 = vld [vmem:[#allocation2] sm:$0x3]  ;;  %v157_v4 = vld [vmem:[#allocation4] sm:$0x3]  ;;  %vm183_vm1 = vcmask 261120   ;;  %v1102_v39 = vmov 0  }
  0x7b   :  { %789 = vmatpush3.bf16.msra.mxu0 %v814_v1  ;;  %v158_v5 = vsub.f32 %v156_v3, %v157_v4  ;;  %v816_v7 = vld [vmem:[#allocation12 + $0xe4] ss:$16 sps:$4 sm:$0xff]   ;;  %v820_v8 = vld [vmem:[#allocation12 + $0xec] ss:$16 sps:$4 sm:$0xff]   ;;  %v818_v9 = vld [vmem:[#allocation12 + $0xe8] ss:$16 sps:$4 sm:$0xff]   ;;  %516 = vmatprep.mubr.bf16.mxu1 %v1102_v39 }
  0x7c   :  { %790 = vmatprep.subr.bf16.mxu0 %v1100_v0  ;;  %v821_v10 = vld [vmem:[#allocation12 + $0xe0] ss:$16 sps:$4 sm:$0xff]   ;;  %484 = vmatprep.subr.bf16.mxu1 %v816_v7  ;;  %v822_v11 = vld [vmem:[#allocation12 + $0xc4] ss:$16 sps:$4 sm:$0xff]   ;;  %v826_v12 = vld [vmem:[#allocation12 + $0xcc] ss:$16 sps:$4 sm:$0xff]  }
  0x7d   :  { %v159_v6 = vpack.c.bf16 %v158_v5, %v158_v5  ;;  %485 = vmatpush1.bf16.msra.mxu1 %v821_v10  ;;  %v824_v13 = vld [vmem:[#allocation12 + $0xc8] ss:$16 sps:$4 sm:$0xff]   ;;  %v827_v14 = vld [vmem:[#allocation12 + $0xc0] ss:$16 sps:$4 sm:$0xff]   ;;  %v828_v15 = vld [vmem:[#allocation12 + $0xa4] ss:$16 sps:$4 sm:$0xff]   ;;  %v304_v10 = vlaneseq }
  0x7e   :  { %486 = vmatprep.subr.bf16.mxu1 %v822_v11  ;;  %v832_v16 = vld [vmem:[#allocation12 + $0xac] ss:$16 sps:$4 sm:$0xff]   ;;  %v830_v17 = vld [vmem:[#allocation12 + $0xa8] ss:$16 sps:$4 sm:$0xff]   ;;  %v833_v18 = vld [vmem:[#allocation12 + $0xa0] ss:$16 sps:$4 sm:$0xff]  }
  0x7f   :  { %791 = vmatpush3.bf16.msra.mxu0 %v815_v2  ;;  %v834_v19 = vld [vmem:[#allocation12 + $0x84] ss:$16 sps:$4 sm:$0xff]   ;;  %v838_v20 = vld [vmem:[#allocation12 + $0x8c] ss:$16 sps:$4 sm:$0xff]   ;;  %v836_v21 = vld [vmem:[#allocation12 + $0x88] ss:$16 sps:$4 sm:$0xff]  }
  0x80   :  { %525 = vmatprep.subr.bf16.mxu0 %v820_v8  ;;  %v839_v22 = vld [vmem:[#allocation12 + $0x80] ss:$16 sps:$4 sm:$0xff]   ;;  %v840_v23 = vld [vmem:[#allocation12 + $0x64] ss:$16 sps:$4 sm:$0xff]   ;;  %v844_v24 = vld [vmem:[#allocation12 + $0x6c] ss:$16 sps:$4 sm:$0xff]  }
  0x81   :  { %487 = vmatpush1.bf16.msra.mxu1 %v827_v14  ;;  %v842_v25 = vld [vmem:[#allocation12 + $0x68] ss:$16 sps:$4 sm:$0xff]   ;;  %v845_v26 = vld [vmem:[#allocation12 + $0x60] ss:$16 sps:$4 sm:$0xff]   ;;  %v846_v27 = vld [vmem:[#allocation12 + $0x44] ss:$16 sps:$4 sm:$0xff]  }
  0x82   :  { %793 = vmatmul.mubr.msk.bf16.vlgmr.msra.gmra.mxu0 %vm183_vm1, %v159_v6  ;;  %488 = vmatprep.subr.bf16.mxu1 %v828_v15  ;;  %v850_v28 = vld [vmem:[#allocation12 + $0x4c] ss:$16 sps:$4 sm:$0xff]   ;;  %v848_v29 = vld [vmem:[#allocation12 + $0x48] ss:$16 sps:$4 sm:$0xff]   ;;  %v851_v30 = vld [vmem:[#allocation12 + $0x40] ss:$16 sps:$4 sm:$0xff]  }
  0x83   :  { %526 = vmatpush1.bf16.msra.mxu0 %v818_v9  ;;  %v852_v31 = vld [vmem:[#allocation12 + $0x24] ss:$16 sps:$4 sm:$0xff]   ;;  %v856_v32 = vld [vmem:[#allocation12 + $0x2c] ss:$16 sps:$4 sm:$0xff]   ;;  %v854_v33 = vld [vmem:[#allocation12 + $0x28] ss:$16 sps:$4 sm:$0xff]   ;;  %557 = vmatprep.mubr.bf16.mxu0 %v1102_v39 }
  0x84   :  { %527 = vmatprep.subr.bf16.mxu0 %v826_v12  ;;  %v857_v34 = vld [vmem:[#allocation12 + $0x20] ss:$16 sps:$4 sm:$0xff]   ;;  %v858_v35 = vld [vmem:[#allocation12 + $0x4] ss:$16 sps:$4 sm:$0xff]   ;;  %v860_v36 = vld [vmem:[#allocation12 + $0x8] ss:$16 sps:$4 sm:$0xff]  }
  0x85   :  { %489 = vmatpush1.bf16.msra.mxu1 %v833_v18  ;;  %v862_v37 = vld [vmem:[#allocation12 + $0xc] ss:$16 sps:$4 sm:$0xff]   ;;  %v863_v38 = vld [vmem:[#allocation12] ss:$16 sps:$4 sm:$0xff]   ;;  %v747_v40 = vld [vmem:[#allocation7] ss:$0 sm:$0xff] }
  0x86   :  { %490 = vmatprep.subr.bf16.mxu1 %v834_v19  ;;  %vm229_vm2 = vcmask 1041408   ;;  %v751_v2 = vld [vmem:[#allocation9] ss:$0 sm:$0xff]  ;;  %v752_v4 = vld [vmem:[#allocation10] ss:$0 sm:$0xff]  ;;  %v1191_v11 = vshrl.u32 %v304_v10, 7 }
  0x87   :  { %528 = vmatpush1.bf16.msra.mxu0 %v824_v13  ;;  %v302_v14 = vld [vmem:[#allocation13] sm:$0xf] }
  0x88   :  { %529 = vmatprep.subr.bf16.mxu0 %v832_v16  ;;  %v1194_v12 = vsub.s32 0, %v1191_v11  ;;  %v1197_v13 = vsub.s32 2, %v1191_v11  ;;  %v1200_v15 = vsub.s32 1, %v1191_v11  ;;  %v1203_v16 = vsub.s32 3, %v1191_v11 }
  0x89   :  { %491 = vmatpush1.bf16.msra.mxu1 %v839_v22 }
  0x8a   :  { %492 = vmatprep.subr.bf16.mxu1 %v840_v23  ;;  %v315_v18 = vrot.slane %v302_v14, %v1197_v13  ;;  %v311_v19 = vrot.slane %v302_v14, %v1200_v15 }
  0x8b   :  { %530 = vmatpush1.bf16.msra.mxu0 %v830_v17  ;;  %v307_v17 = vrot.slane %v302_v14, %v1194_v12 }
  0x8c   :  { %531 = vmatprep.subr.bf16.mxu0 %v838_v20  ;;  %v319_v20 = vrot.slane %v302_v14, %v1203_v16 }
  0x8d   :  { %493 = vmatpush1.bf16.msra.mxu1 %v845_v26 }
  0x8e   :  { %494 = vmatprep.subr.bf16.mxu1 %v846_v27 }
  0x8f   :  { %532 = vmatpush1.bf16.msra.mxu0 %v836_v21 }
  0x90   :  { %533 = vmatprep.subr.bf16.mxu0 %v844_v24 }
  0x91   :  { %495 = vmatpush1.bf16.msra.mxu1 %v851_v30 }
  0x92   :  { %496 = vmatprep.subr.bf16.mxu1 %v852_v31 }
  0x93   :  { %534 = vmatpush1.bf16.msra.mxu0 %v842_v25 }
  0x94   :  { %535 = vmatprep.subr.bf16.mxu0 %v850_v28 }
  0x95   :  { %497 = vmatpush1.bf16.msra.mxu1 %v857_v34 }
  0x96   :  { %498 = vmatprep.subr.bf16.mxu1 %v858_v35 }
  0x97   :  { %536 = vmatpush1.bf16.msra.mxu0 %v848_v29 }
  0x98   :  { %537 = vmatprep.subr.bf16.mxu0 %v856_v32 }
  0x99   :  { %499 = vmatpush1.bf16.msra.mxu1 %v863_v38 }
  0x9b   :  { %538 = vmatpush1.bf16.msra.mxu0 %v854_v33 }
  0x9c   :  { %539 = vmatprep.subr.bf16.mxu0 %v862_v37 }
  0x9f   :  { %540 = vmatpush1.bf16.msra.mxu0 %v860_v36 }
 0x142   :  { %v221_v41 = vpop.f32.mrf.mxu0 }
 0x143   :  { %v222_v42 = vadd.f32 %v747_v40, %v221_v41 }
 0x144   :  { %v794_v43 = vpop.f32.mrf.mxu0 }
 0x145   :  { %v230_v44 = vsel %vm229_vm2, %v222_v42, 0.0 }
 0x146   :  { %v231_v45 = vrot.slane %v230_v44, 4  ;;  %v224_v46 = vpop.f32.mrf.mxu0 }
 0x148   :  { %v232_v47 = vadd.f32 %v231_v45, %v230_v44  ;;  %v795_v48 = vpop.f32.mrf.mxu0 }
 0x14a   :  { %v233_v49 = vrot.slane %v232_v47, 2 }
 0x14c   :  { %v234_v50 = vadd.f32 %v233_v49, %v232_v47 }
 0x14e   :  { %v235_v51 = vrot.slane %v234_v50, 1 }
 0x150   :  { %v236_v52 = vadd.f32 %v235_v51, %v234_v50 }
 0x152   :  { %v238_v53 = vmul.f32 0.5, %v236_v52 }
 0x154   :  { %v239_v54 = vsub.f32 %v222_v42, %v238_v53 }
 0x156   :  { %v240_v55 = vmul.f32 %v239_v54, %v239_v54 }
 0x158   :  { %v241_v56 = vsel %vm229_vm2, %v240_v55, 0.0 }
 0x159   :  { %v242_v57 = vrot.slane %v241_v56, 4 }
 0x15b   :  { %v243_v58 = vadd.f32 %v242_v57, %v241_v56 }
 0x15d   :  { %v244_v59 = vrot.slane %v243_v58, 2 }
 0x15f   :  { %v245_v60 = vadd.f32 %v244_v59, %v243_v58 }
 0x161   :  { %v246_v61 = vrot.slane %v245_v60, 1 }
 0x163   :  { %v247_v62 = vadd.f32 %v246_v61, %v245_v60 }
 0x165   :  { %v248_v63 = vmul.f32 0.5, %v247_v62 }
 0x167   :  { %v249_v0 = vadd.f32 1e-05, %v248_v63 }
 0x169   :  { %864 = vrsqrt.f32 %v249_v0 }
 0x176   :  { %v865_v1 = vpop.eup %864 }
 0x177   :  { %v251_v3 = vmul.f32 %v865_v1, %v239_v54 }
 0x179   :  { %v258_v5 = vmul.f32 %v751_v2, %v251_v3 }
 0x17b   :  { %v265_v6 = vadd.f32 %v752_v4, %v258_v5 }
 0x17d   :  { %vm266_vm3 = vcmp.ge.f32.partialorder %v265_v6, 0.0  ;;  %v267_v7 = vmul.f32 0.01, %v265_v6 }
 0x17f   :  { %v268_v8 = vsel %vm266_vm3, %v265_v6, %v267_v7 }
 0x180   :  { %v269_v9 = vpack.c.bf16 %v268_v8, %v268_v8 }
 0x182   :  { %517 = vmatmul.mubr.bf16.vlgmr.msra.gmra.mxu1 %v269_v9  ;;  %558 = vmatmul.mubr.bf16.vlgmr.msra.gmra.mxu0 %v269_v9 }
 0x242   :  { %v518_v21 = vpop.f32.mrf.mxu1  ;;  %v559_v22 = vpop.f32.mrf.mxu0 }
 0x243   :  { %v519_v23 = vadd.f32 %v518_v21, %v307_v17  ;;  %v560_v24 = vadd.f32 %v559_v22, %v315_v18 }
 0x244   :  { %v520_v25 = vpop.f32.mrf.mxu1  ;;  %v561_v26 = vpop.f32.mrf.mxu0 }
 0x245   :  { %v568_v27 = vsel %vm229_vm2, %v519_v23, 0.0  ;;  %v582_v28 = vsel %vm229_vm2, %v560_v24, 0.0  ;;  %v521_v29 = vadd.f32 %v520_v25, %v311_v19  ;;  %v562_v30 = vadd.f32 %v561_v26, %v319_v20 }
 0x246   :  { %v569_v31 = vrot.slane %v568_v27, 4  ;;  %v583_v32 = vrot.slane %v582_v28, 4  ;;  %v522_v33 = vpop.f32.mrf.mxu1  ;;  %v563_v34 = vpop.f32.mrf.mxu0 }
 0x247   :  { %v575_v35 = vsel %vm229_vm2, %v521_v29, 0.0  ;;  %v589_v36 = vsel %vm229_vm2, %v562_v30, 0.0 }
 0x248   :  { %v570_v37 = vadd.f32 %v569_v31, %v568_v27  ;;  %v584_v38 = vadd.f32 %v583_v32, %v582_v28  ;;  %v576_v39 = vrot.slane %v575_v35, 4  ;;  %v590_v40 = vrot.slane %v589_v36, 4  ;;  %v523_v41 = vpop.f32.mrf.mxu1  ;;  %v564_v42 = vpop.f32.mrf.mxu0 }
 0x24a   :  { %v571_v43 = vrot.slane %v570_v37, 2  ;;  %v585_v44 = vrot.slane %v584_v38, 2  ;;  %v577_v45 = vadd.f32 %v576_v39, %v575_v35  ;;  %v591_v46 = vadd.f32 %v590_v40, %v589_v36 }
 0x24c   :  { %v572_v47 = vadd.f32 %v571_v43, %v570_v37  ;;  %v586_v48 = vadd.f32 %v585_v44, %v584_v38  ;;  %v578_v49 = vrot.slane %v577_v45, 2  ;;  %v592_v50 = vrot.slane %v591_v46, 2 }
 0x24e   :  { %v573_v51 = vrot.slane %v572_v47, 1  ;;  %v587_v52 = vrot.slane %v586_v48, 1  ;;  %v579_v53 = vadd.f32 %v578_v49, %v577_v45  ;;  %v593_v54 = vadd.f32 %v592_v50, %v591_v46  ;;  %v566_v50 = vld [vmem:[#allocation15] sm:$0xf] }
 0x250   :  { %v574_v55 = vadd.f32 %v573_v51, %v572_v47  ;;  %v588_v56 = vadd.f32 %v587_v52, %v586_v48  ;;  %v580_v57 = vrot.slane %v579_v53, 1  ;;  %v594_v58 = vrot.slane %v593_v54, 1  ;;  %v567_v51 = vld [vmem:[#allocation16] sm:$0xf] }
 0x251   :  { %v656_v52 = vrot.slane %v566_v50, %v1194_v12 }
 0x252   :  { %v596_v59 = vmul.f32 0.5, %v574_v55  ;;  %v598_v60 = vmul.f32 0.5, %v588_v56  ;;  %v581_v61 = vadd.f32 %v580_v57, %v579_v53  ;;  %v595_v62 = vadd.f32 %v594_v58, %v593_v54 }
 0x253   :  { %v664_v54 = vrot.slane %v566_v50, %v1197_v13  ;;  %v681_v57 = vrot.slane %v567_v51, %v1194_v12  ;;  %v660_v58 = vrot.slane %v566_v50, %v1200_v15  ;;  %v693_v12 = vrot.slane %v567_v51, %v1203_v16 }
 0x254   :  { %v600_v63 = vsub.f32 %v519_v23, %v596_v59  ;;  %v602_v0 = vsub.f32 %v560_v24, %v598_v60  ;;  %v597_v1 = vmul.f32 0.5, %v581_v61  ;;  %v599_v2 = vmul.f32 0.5, %v595_v62 }
 0x255   :  { %v689_v61 = vrot.slane %v567_v51, %v1197_v13  ;;  %v1103_v62 = vmov 1983009808  }
 0x256   :  { %v604_v3 = vmul.f32 %v600_v63, %v600_v63  ;;  %v606_v4 = vmul.f32 %v602_v0, %v602_v0  ;;  %v601_v5 = vsub.f32 %v521_v29, %v597_v1  ;;  %v1213_v6 = vsub.f32 %v562_v30, %v599_v2 }
 0x257   :  { %v721_v1 = vunpack.c.l.s4 %v1103_v62  ;;  %v668_v2 = vrot.slane %v566_v50, %v1203_v16 }
 0x258   :  { %v608_v7 = vsel %vm229_vm2, %v604_v3, 0.0  ;;  %v622_v8 = vsel %vm229_vm2, %v606_v4, 0.0  ;;  %v605_v9 = vmul.f32 %v601_v5, %v601_v5  ;;  %v607_v10 = vmul.f32 %v1213_v6, %v1213_v6 }
 0x259   :  { %v609_v14 = vrot.slane %v608_v7, 4  ;;  %v623_v17 = vrot.slane %v622_v8, 4 }
 0x25a   :  { %v615_v18 = vsel %vm229_vm2, %v605_v9, 0.0  ;;  %v629_v19 = vsel %vm229_vm2, %v607_v10, 0.0 }
 0x25b   :  { %v610_v20 = vadd.f32 %v609_v14, %v608_v7  ;;  %v624_v21 = vadd.f32 %v623_v17, %v622_v8  ;;  %v616_v22 = vrot.slane %v615_v18, 4  ;;  %v630_v23 = vrot.slane %v629_v19, 4 }
 0x25c   :  { %v685_v8 = vrot.slane %v567_v51, %v1200_v15 }
 0x25d   :  { %v611_v24 = vrot.slane %v610_v20, 2  ;;  %v625_v25 = vrot.slane %v624_v21, 2  ;;  %v617_v26 = vadd.f32 %v616_v22, %v615_v18  ;;  %v631_v27 = vadd.f32 %v630_v23, %v629_v19 }
 0x25f   :  { %v612_v28 = vadd.f32 %v611_v24, %v610_v20  ;;  %v626_v29 = vadd.f32 %v625_v25, %v624_v21  ;;  %v618_v30 = vrot.slane %v617_v26, 2  ;;  %v632_v31 = vrot.slane %v631_v27, 2 }
 0x261   :  { %v613_v32 = vrot.slane %v612_v28, 1  ;;  %v627_v33 = vrot.slane %v626_v29, 1  ;;  %v619_v34 = vadd.f32 %v618_v30, %v617_v26  ;;  %v633_v35 = vadd.f32 %v632_v31, %v631_v27 }
 0x263   :  { %v614_v36 = vadd.f32 %v613_v32, %v612_v28  ;;  %v628_v37 = vadd.f32 %v627_v33, %v626_v29  ;;  %v620_v38 = vrot.slane %v619_v34, 1  ;;  %v634_v39 = vrot.slane %v633_v35, 1 }
 0x265   :  { %v636_v40 = vmul.f32 0.5, %v614_v36  ;;  %v638_v41 = vmul.f32 0.5, %v628_v37  ;;  %v621_v42 = vadd.f32 %v620_v38, %v619_v34  ;;  %v635_v43 = vadd.f32 %v634_v39, %v633_v35 }
 0x267   :  { %v640_v44 = vadd.f32 1e-05, %v636_v40  ;;  %v642_v45 = vadd.f32 1e-05, %v638_v41  ;;  %v637_v46 = vmul.f32 0.5, %v621_v42  ;;  %v639_v47 = vmul.f32 0.5, %v635_v43 }
 0x269   :  { %866 = vrsqrt.f32 %v640_v44  ;;  %v641_v48 = vadd.f32 1e-05, %v637_v46  ;;  %v643_v49 = vadd.f32 1e-05, %v639_v47 }
 0x26a   :  { %868 = vrsqrt.f32 %v642_v45 }
 0x26b   :  { %870 = vrsqrt.f32 %v641_v48 }
 0x26c   :  { %872 = vrsqrt.f32 %v643_v49 }
 0x276   :  { %v867_v53 = vpop.eup %866 }
 0x277   :  { %v869_v55 = vpop.eup %868  ;;  %v648_v56 = vmul.f32 %v867_v53, %v600_v63 }
 0x278   :  { %v871_v59 = vpop.eup %870  ;;  %v650_v60 = vmul.f32 %v869_v55, %v602_v0  ;;  %v722_v0 = vunpack.c.0.s8 %v721_v1 }
 0x279   :  { %v873_v3 = vpop.eup %872  ;;  %v673_v4 = vmul.f32 %v656_v52, %v648_v56  ;;  %v649_v7 = vmul.f32 %v871_v59, %v601_v5 }
 0x27a   :  { %v675_v9 = vmul.f32 %v664_v54, %v650_v60  ;;  %v651_v63 = vmul.f32 %v873_v3, %v1213_v6  ;;  %v725_v15 = vsub.s32 %v722_v0, %v1191_v11 }
 0x27b   :  { %v698_v10 = vadd.f32 %v681_v57, %v673_v4  ;;  %v674_v14 = vmul.f32 %v660_v58, %v649_v7 }
 0x27c   :  { %v700_v17 = vadd.f32 %v689_v61, %v675_v9  ;;  %v676_v18 = vmul.f32 %v668_v2, %v651_v63 }
 0x27d   :  { %v706_v13 = vmul.f32 0.01, %v698_v10  ;;  %v699_v19 = vadd.f32 %v685_v8, %v674_v14  ;;  %vm702_vm4 = vcmp.ge.f32.partialorder %v698_v10, 0.0 }
 0x27e   :  { %v708_v20 = vmul.f32 0.01, %v700_v17  ;;  %v701_v21 = vadd.f32 %v693_v12, %v676_v18  ;;  %vm704_vm5 = vcmp.ge.f32.partialorder %v700_v17, 0.0 }
 0x27f   :  { %vm703_vm6 = vcmp.ge.f32.partialorder %v699_v19, 0.0  ;;  %v707_v5 = vmul.f32 0.01, %v699_v19  ;;  %v710_v6 = vsel %vm702_vm4, %v698_v10, %v706_v13 }
 0x280   :  { %vm705_vm7 = vcmp.ge.f32.partialorder %v701_v21, 0.0  ;;  %v709_v22 = vmul.f32 0.01, %v701_v21  ;;  %v712_v16 = vsel %vm704_vm5, %v700_v17, %v708_v20 }
 0x281   :  { %v711_v23 = vsel %vm703_vm6, %v699_v19, %v707_v5 }
 0x282   :  { %v718_v24 = vcombine.low %v710_v6, %v711_v23  ;;  %v713_v25 = vsel %vm705_vm7, %v701_v21, %v709_v22 }
 0x283   :  { %v719_v26 = vcombine.low %v712_v16, %v713_v25 }
 0x284   :  { %v726_v27 = vrot.slane %v718_v24, %v725_v15 }
 0x285   :  { %v733_v28 = vrot.slane %v719_v26, %v725_v15 }
 0x287   :  { %v734_v29 = vcombine.low %v726_v27, %v733_v28 }
 0x289   :  { %736 = vst [vmem:[%s1244_s10] sm:$0xff] %v734_v29 }
 0x28a   :  { %741 = vsyncpa [#allocation3], 1 }
 0x28b   :  { %742 = vsyncpa [#allocation5], 1 }
 0x28c   :  { %743 = vsyncpa [#allocation8], 1 }
 0x28d   :  { %744 = vsyncpa [#allocation11], 1 }
 0x28e   :  { %745 = vsyncpa [#allocation14], 1 }
 0x28f   :  { %746 = vsyncpa [#allocation17], 1 }

// kernel: decoder_mnist_forward.5
= control target key start
LH: loop header
LB: loop body
LE: loop exit
PB: predicated region body
PF: predicated region fallthrough
CT: control target
= control target key end

     0   :  { %7 = vsyncpa [#allocation3], 0  ;;  %s740_s9 = smov [#allocation2]   ;;  %s965_s0 = inlined_call_operand.vmem [shape: f32[32,32], index: 0, kind: input, shape index: {}]   ;;  %s966_s1 = inlined_call_operand.hbm [shape: bf16[32,1600], index: 1, kind: input, shape index: {}]   ;;  %s967_s2 = inlined_call_operand.vmem [shape: f32[32,1600], index: 2, kind: output, shape index: {}]  }
   0x1   :  { %s15_s10 = sshll.u32 %s740_s9, 4  ;;  %s16_s10 = int_to_ptr.vmem [resolvable:$true] %s15_s10 }
   0x2   :  { %s726_s11 = scalar_lea.vmem %s16_s10, 3328  ;;  %p731_p1 = scmp.lt.s32.totalorder %s16_s10, %s16_s10 }
   0x3   :  { %p727_p0 = scmp.ne.s32.totalorder %s16_s10, %s726_s11  ;;  %p732_p2 = scmp.lt.s32.totalorder %s726_s11, %s726_s11 }
   0x5   :  { %p733_p3 = por %p732_p2, %p731_p1 }
   0x7   :  { %p734_p4 = pnand %p733_p3, %p727_p0 }
   0x9   :  { %737 = shalt.err (!%p734_p4)
}
   0xa   :  { %s741_s12 = smov 832   ;;  %s742_s13 = smov 52  }
   0xb   :  { %21 = dma.hbm_to_vmem [thread:$0]  %s966_s1, 3328, %s16_s10, [#allocation3], %s741_s12, %s741_s12, %s742_s13  }
   0xc   :  { %738 = dma.done.wait [#allocation3], 3328  }
   0xd   :  { %739 = vsyncadd [#allocation3], 4294963968  ;;  %v743_v0 = vmov 0   ;;  %v680_v1 = vld [vmem:[#allocation2 + $0x6c] ss:$52 sps:$4 sm:$0xff]   ;;  %vm192_vm0 = vcmask 261120  }
   0xe   :  { %231 = vmatprep.mubr.bf16.mxu0 %v743_v0  ;;  %284 = vmatprep.mubr.bf16.mxu1 %v743_v0  ;;  %v682_v2 = vld [vmem:[#allocation2 + $0x68] ss:$52 sps:$4 sm:$0xff]   ;;  %v685_v4 = vld [vmem:[#allocation2 + $0x4] ss:$52 sps:$4 sm:$0xff]   ;;  %v688_v6 = vld [vmem:[#allocation2] ss:$52 sps:$4 sm:$0xff]  }
   0xf   :  { %211 = vmatprep.subr.bf16.mxu0 %v680_v1  ;;  %v683_v3 = vld [vmem:[#allocation2 + $0x74] ss:$52 sps:$4 sm:$0xff]   ;;  %v687_v5 = vld [vmem:[#allocation2 + $0x70] ss:$52 sps:$4 sm:$0xff]   ;;  %v689_v7 = vld [vmem:[#allocation2 + $0xc] ss:$52 sps:$4 sm:$0xff]  }
  0x10   :  { %212 = vmatpush1.bf16.msra.mxu0 %v682_v2  ;;  %264 = vmatprep.subr.bf16.mxu1 %v683_v3  ;;  %v26_v8 = vld [vmem:[%s965_s0] sm:$0xff]  ;;  %v27_v9 = vld [vmem:[%s965_s0 + $0x8] sm:$0xff]  ;;  %v694_v13 = vld [vmem:[#allocation2 + $0x7c] ss:$52 sps:$4 sm:$0xff]   ;;  %vm578_vm1 = vcmask 523264  }
  0x11   :  { %213 = vmatprep.subr.bf16.mxu0 %v685_v4  ;;  %265 = vmatpush1.bf16.msra.mxu1 %v687_v5  ;;  %v691_v10 = vld [vmem:[#allocation2 + $0x8] ss:$52 sps:$4 sm:$0xff]   ;;  %v770_v11 = vpack.c.bf16 %v27_v9, %v26_v8  ;;  %v692_v12 = vld [vmem:[#allocation2 + $0x78] ss:$52 sps:$4 sm:$0xff]   ;;  %v28_v14 = vld [vmem:[%s965_s0 + $0x10] sm:$0xff] }
  0x12   :  { %266 = vmatprep.subr.bf16.mxu1 %v689_v7  ;;  %v29_v15 = vld [vmem:[%s965_s0 + $0x18] sm:$0xff]  ;;  %v697_v16 = vld [vmem:[#allocation2 + $0x14] ss:$52 sps:$4 sm:$0xff]   ;;  %v695_v19 = vld [vmem:[#allocation2 + $0x10] ss:$52 sps:$4 sm:$0xff]  }
  0x13   :  { %v698_v17 = vld [vmem:[#allocation2 + $0x80] ss:$52 sps:$4 sm:$0xff]   ;;  %v700_v18 = vld [vmem:[#allocation2 + $0x84] ss:$52 sps:$4 sm:$0xff]   ;;  %v703_v20 = vld [vmem:[#allocation2 + $0x1c] ss:$52 sps:$4 sm:$0xff]   ;;  %v31_v22 = vpack.c.bf16 %v29_v15, %v28_v14 }
  0x14   :  { %214 = vmatpush1.bf16.msra.mxu0 %v688_v6  ;;  %v706_v21 = vld [vmem:[#allocation2 + $0x8c] ss:$52 sps:$4 sm:$0xff]   ;;  %v712_v24 = vld [vmem:[#allocation2 + $0x94] ss:$52 sps:$4 sm:$0xff]   ;;  %v709_v26 = vld [vmem:[#allocation2 + $0x24] ss:$52 sps:$4 sm:$0xff]  }
  0x15   :  { %267 = vmatpush1.bf16.msra.mxu1 %v691_v10  ;;  %317 = vmatprep.subr.bf16.mxu0 %v694_v13  ;;  %v701_v23 = vld [vmem:[#allocation2 + $0x18] ss:$52 sps:$4 sm:$0xff]   ;;  %v704_v25 = vld [vmem:[#allocation2 + $0x88] ss:$52 sps:$4 sm:$0xff]   ;;  %v710_v27 = vld [vmem:[#allocation2 + $0x90] ss:$52 sps:$4 sm:$0xff]  }
  0x16   :  { %370 = vmatprep.subr.bf16.mxu1 %v700_v18  ;;  %v715_v28 = vld [vmem:[#allocation2 + $0x2c] ss:$52 sps:$4 sm:$0xff]   ;;  %v713_v31 = vld [vmem:[#allocation2 + $0x28] ss:$52 sps:$4 sm:$0xff]   ;;  %v717_v32 = vld [vmem:[#allocation2 + $0x30] ss:$52 sps:$4 sm:$0xff]  }
  0x17   :  { %650 = vmatmul.mubr.msk.bf16.vlgmr.msra.gmra.mxu0 %vm192_vm0, %v770_v11  ;;  %v707_v29 = vld [vmem:[#allocation2 + $0x20] ss:$52 sps:$4 sm:$0xff]   ;;  %v716_v30 = vld [vmem:[#allocation2 + $0x98] ss:$52 sps:$4 sm:$0xff]  }
  0x18   :  { %318 = vmatpush1.bf16.msra.mxu0 %v692_v12  ;;  %241 = vmatprep.mubr.bf16.mxu0 %v743_v0 }
  0x19   :  { %652 = vmatmul.mubr.msk.bf16.vlgmr.msra.gmra.mxu1 %vm192_vm0, %v770_v11  ;;  %319 = vmatprep.subr.bf16.mxu0 %v697_v16 }
  0x1a   :  { %294 = vmatprep.mubr.bf16.mxu1 %v743_v0  ;;  %371 = vmatpush1.bf16.msra.mxu1 %v698_v17 }
  0x1b   :  { %372 = vmatprep.subr.bf16.mxu1 %v703_v20 }
  0x1c   :  { %320 = vmatpush1.bf16.msra.mxu0 %v695_v19 }
  0x1d   :  { %423 = vmatprep.subr.bf16.mxu0 %v706_v21 }
  0x1e   :  { %373 = vmatpush1.bf16.msra.mxu1 %v701_v23 }
  0x1f   :  { %651 = vmatmul.mubr.msk.bf16.gmra.mxu0 %vm192_vm0, %v31_v22  ;;  %476 = vmatprep.subr.bf16.mxu1 %v712_v24 }
  0x20   :  { %337 = vmatprep.mubr.bf16.mxu0 %v743_v0 }
  0x21   :  { %653 = vmatmul.mubr.msk.bf16.gmra.mxu1 %vm192_vm0, %v31_v22 }
  0x22   :  { %390 = vmatprep.mubr.bf16.mxu1 %v743_v0 }
  0x27   :  { %654 = vmatmul.mubr.msk.bf16.vlgmr.msra.gmra.mxu0 %vm192_vm0, %v770_v11 }
  0x28   :  { %424 = vmatpush1.bf16.msra.mxu0 %v704_v25  ;;  %347 = vmatprep.mubr.bf16.mxu0 %v743_v0 }
  0x29   :  { %656 = vmatmul.mubr.msk.bf16.vlgmr.msra.gmra.mxu1 %vm192_vm0, %v770_v11  ;;  %425 = vmatprep.subr.bf16.mxu0 %v709_v26 }
  0x2a   :  { %477 = vmatpush1.bf16.msra.mxu1 %v710_v27  ;;  %400 = vmatprep.mubr.bf16.mxu1 %v743_v0 }
  0x2b   :  { %478 = vmatprep.subr.bf16.mxu1 %v715_v28 }
  0x2c   :  { %426 = vmatpush1.bf16.msra.mxu0 %v707_v29 }
  0x2d   :  { %668 = vmatprep.subr.bf16.mxu0 %v716_v30 }
  0x2e   :  { %479 = vmatpush1.bf16.msra.mxu1 %v713_v31 }
  0x2f   :  { %655 = vmatmul.mubr.msk.bf16.gmra.mxu0 %vm192_vm0, %v31_v22 }
  0x30   :  { %443 = vmatprep.mubr.bf16.mxu0 %v743_v0 }
  0x31   :  { %657 = vmatmul.mubr.msk.bf16.gmra.mxu1 %vm192_vm0, %v31_v22 }
  0x32   :  { %496 = vmatprep.mubr.bf16.mxu1 %v743_v0 }
  0x37   :  { %658 = vmatmul.mubr.msk.bf16.vlgmr.msra.gmra.mxu0 %vm192_vm0, %v770_v11 }
  0x38   :  { %669 = vmatpush3.bf16.msra.mxu0 %v716_v30  ;;  %453 = vmatprep.mubr.bf16.mxu0 %v743_v0 }
  0x39   :  { %660 = vmatmul.mubr.msk.bf16.vlgmr.msra.gmra.mxu1 %vm192_vm0, %v770_v11  ;;  %670 = vmatprep.subr.bf16.mxu0 %v717_v32 }
  0x3a   :  { %506 = vmatprep.mubr.bf16.mxu1 %v743_v0 }
  0x3c   :  { %671 = vmatpush3.bf16.msra.mxu0 %v717_v32 }
  0x3f   :  { %659 = vmatmul.mubr.msk.bf16.gmra.mxu0 %vm192_vm0, %v31_v22 }
  0x40   :  { %672 = vmatprep.mubr.msk.bf16.mxu0 %vm192_vm0, %v770_v11 }
  0x41   :  { %661 = vmatmul.mubr.msk.bf16.gmra.mxu1 %vm192_vm0, %v31_v22 }
  0x47   :  { %673 = vmatmul.mubr.msk.bf16.vlgmr.msra.gmra.mxu0 %vm192_vm0, %v31_v22 }
  0xd7   :  { %v233_v33 = vpop.f32.mrf.mxu0 }
  0xd8   :  { %566 = vst [vmem:[%s967_s2] sm:$0xff] %v233_v33 }
  0xd9   :  { %v235_v34 = vpop.f32.mrf.mxu0  ;;  %v286_v35 = vpop.f32.mrf.mxu1 }
  0xda   :  { %567 = vst [vmem:[%s967_s2 + $0x8] sm:$0xff] %v235_v34  ;;  %568 = vst [vmem:[%s967_s2 + $0x10] sm:$0xff] %v286_v35 }
  0xdb   :  { %v237_v36 = vpop.f32.mrf.mxu0  ;;  %v288_v37 = vpop.f32.mrf.mxu1 }
  0xdc   :  { %580 = vst [vmem:[%s967_s2 + $0x68] sm:$0xff] %v237_v36  ;;  %569 = vst [vmem:[%s967_s2 + $0x18] sm:$0xff] %v288_v37 }
  0xdd   :  { %v239_v38 = vpop.f32.mrf.mxu0  ;;  %v290_v39 = vpop.f32.mrf.mxu1 }
  0xde   :  { %581 = vst [vmem:[%s967_s2 + $0x70] sm:$0xff] %v239_v38  ;;  %582 = vst [vmem:[%s967_s2 + $0x78] sm:$0xff] %v290_v39 }
  0xdf   :  { %v243_v40 = vpop.f32.mrf.mxu0  ;;  %v292_v41 = vpop.f32.mrf.mxu1 }
  0xe0   :  { %593 = vst [vmem:[%s967_s2 + $0xd0] sm:$0xff] %v243_v40  ;;  %583 = vst [vmem:[%s967_s2 + $0x80] sm:$0xff] %v292_v41 }
  0xe1   :  { %v245_v42 = vpop.f32.mrf.mxu0  ;;  %v296_v43 = vpop.f32.mrf.mxu1 }
  0xe2   :  { %594 = vst [vmem:[%s967_s2 + $0xd8] sm:$0xff] %v245_v42  ;;  %595 = vst [vmem:[%s967_s2 + $0xe0] sm:$0xff] %v296_v43 }
  0xe3   :  { %v247_v44 = vpop.f32.mrf.mxu0  ;;  %v298_v45 = vpop.f32.mrf.mxu1 }
  0xe4   :  { %606 = vst [vmem:[%s967_s2 + $0x138] sm:$0xff] %v247_v44  ;;  %596 = vst [vmem:[%s967_s2 + $0xe8] sm:$0xff] %v298_v45 }
  0xe5   :  { %v249_v46 = vpop.f32.mrf.mxu0  ;;  %v300_v47 = vpop.f32.mrf.mxu1 }
  0xe6   :  { %607 = vst [vmem:[%s967_s2 + $0x140] sm:$0xff] %v249_v46  ;;  %608 = vst [vmem:[%s967_s2 + $0x148] sm:$0xff] %v300_v47 }
  0xe7   :  { %v339_v48 = vpop.f32.mrf.mxu0  ;;  %v302_v49 = vpop.f32.mrf.mxu1 }
  0xe8   :  { %570 = vst [vmem:[%s967_s2 + $0x20] sm:$0xff] %v339_v48  ;;  %609 = vst [vmem:[%s967_s2 + $0x150] sm:$0xff] %v302_v49 }
  0xe9   :  { %v341_v50 = vpop.f32.mrf.mxu0  ;;  %v392_v51 = vpop.f32.mrf.mxu1 }
  0xea   :  { %571 = vst [vmem:[%s967_s2 + $0x28] sm:$0xff] %v341_v50  ;;  %572 = vst [vmem:[%s967_s2 + $0x30] sm:$0xff] %v392_v51 }
  0xeb   :  { %v343_v52 = vpop.f32.mrf.mxu0  ;;  %v394_v53 = vpop.f32.mrf.mxu1 }
  0xec   :  { %584 = vst [vmem:[%s967_s2 + $0x88] sm:$0xff] %v343_v52  ;;  %573 = vst [vmem:[%s967_s2 + $0x38] sm:$0xff] %v394_v53 }
  0xed   :  { %v345_v54 = vpop.f32.mrf.mxu0  ;;  %v396_v55 = vpop.f32.mrf.mxu1 }
  0xee   :  { %585 = vst [vmem:[%s967_s2 + $0x90] sm:$0xff] %v345_v54  ;;  %586 = vst [vmem:[%s967_s2 + $0x98] sm:$0xff] %v396_v55 }
  0xef   :  { %v349_v56 = vpop.f32.mrf.mxu0  ;;  %v398_v57 = vpop.f32.mrf.mxu1 }
  0xf0   :  { %597 = vst [vmem:[%s967_s2 + $0xf0] sm:$0xff] %v349_v56  ;;  %587 = vst [vmem:[%s967_s2 + $0xa0] sm:$0xff] %v398_v57 }
  0xf1   :  { %v351_v58 = vpop.f32.mrf.mxu0  ;;  %v402_v59 = vpop.f32.mrf.mxu1 }
  0xf2   :  { %598 = vst [vmem:[%s967_s2 + $0xf8] sm:$0xff] %v351_v58  ;;  %599 = vst [vmem:[%s967_s2 + $0x100] sm:$0xff] %v402_v59 }
  0xf3   :  { %v353_v60 = vpop.f32.mrf.mxu0  ;;  %v404_v61 = vpop.f32.mrf.mxu1 }
  0xf4   :  { %610 = vst [vmem:[%s967_s2 + $0x158] sm:$0xff] %v353_v60  ;;  %600 = vst [vmem:[%s967_s2 + $0x108] sm:$0xff] %v404_v61 }
  0xf5   :  { %v355_v62 = vpop.f32.mrf.mxu0  ;;  %v406_v63 = vpop.f32.mrf.mxu1 }
  0xf6   :  { %611 = vst [vmem:[%s967_s2 + $0x160] sm:$0xff] %v355_v62  ;;  %612 = vst [vmem:[%s967_s2 + $0x168] sm:$0xff] %v406_v63 }
  0xf7   :  { %v445_v0 = vpop.f32.mrf.mxu0  ;;  %v408_v1 = vpop.f32.mrf.mxu1 }
  0xf8   :  { %574 = vst [vmem:[%s967_s2 + $0x40] sm:$0xff] %v445_v0  ;;  %613 = vst [vmem:[%s967_s2 + $0x170] sm:$0xff] %v408_v1 }
  0xf9   :  { %v447_v2 = vpop.f32.mrf.mxu0  ;;  %v498_v3 = vpop.f32.mrf.mxu1 }
  0xfa   :  { %575 = vst [vmem:[%s967_s2 + $0x48] sm:$0xff] %v447_v2  ;;  %576 = vst [vmem:[%s967_s2 + $0x50] sm:$0xff] %v498_v3 }
  0xfb   :  { %v449_v4 = vpop.f32.mrf.mxu0  ;;  %v500_v5 = vpop.f32.mrf.mxu1 }
  0xfc   :  { %588 = vst [vmem:[%s967_s2 + $0xa8] sm:$0xff] %v449_v4  ;;  %577 = vst [vmem:[%s967_s2 + $0x58] sm:$0xff] %v500_v5 }
  0xfd   :  { %v451_v6 = vpop.f32.mrf.mxu0  ;;  %v502_v7 = vpop.f32.mrf.mxu1 }
  0xfe   :  { %589 = vst [vmem:[%s967_s2 + $0xb0] sm:$0xff] %v451_v6  ;;  %590 = vst [vmem:[%s967_s2 + $0xb8] sm:$0xff] %v502_v7 }
  0xff   :  { %v455_v8 = vpop.f32.mrf.mxu0  ;;  %v504_v9 = vpop.f32.mrf.mxu1 }
 0x100   :  { %601 = vst [vmem:[%s967_s2 + $0x110] sm:$0xff] %v455_v8  ;;  %591 = vst [vmem:[%s967_s2 + $0xc0] sm:$0xff] %v504_v9 }
 0x101   :  { %v457_v10 = vpop.f32.mrf.mxu0  ;;  %v508_v11 = vpop.f32.mrf.mxu1 }
 0x102   :  { %602 = vst [vmem:[%s967_s2 + $0x118] sm:$0xff] %v457_v10  ;;  %603 = vst [vmem:[%s967_s2 + $0x120] sm:$0xff] %v508_v11 }
 0x103   :  { %v459_v12 = vpop.f32.mrf.mxu0  ;;  %v510_v13 = vpop.f32.mrf.mxu1 }
 0x104   :  { %614 = vst [vmem:[%s967_s2 + $0x178] sm:$0xff] %v459_v12  ;;  %604 = vst [vmem:[%s967_s2 + $0x128] sm:$0xff] %v510_v13 }
 0x105   :  { %v461_v14 = vpop.f32.mrf.mxu0  ;;  %v512_v15 = vpop.f32.mrf.mxu1 }
 0x106   :  { %615 = vst [vmem:[%s967_s2 + $0x180] sm:$0xff] %v461_v14  ;;  %616 = vst [vmem:[%s967_s2 + $0x188] sm:$0xff] %v512_v15 }
 0x107   :  { %v674_v16 = vpop.f32.mrf.mxu0  ;;  %v514_v17 = vpop.f32.mrf.mxu1 }
 0x108   :  { %605 = vst.msk [vmem:[%s967_s2 + $0x130] sm:$0xff] %vm578_vm1, %v674_v16  ;;  %617 = vst [vmem:[%s967_s2 + $0x190] sm:$0xff] %v514_v17 }
 0x109   :  { %v551_v18 = vpop.f32.mrf.mxu0 }
 0x10a   :  { %579 = vst.msk [vmem:[%s967_s2 + $0x60] sm:$0xff] %vm578_vm1, %v551_v18 }
 0x10b   :  { %v675_v19 = vpop.f32.mrf.mxu0 }
 0x10c   :  { %618 = vst.msk [vmem:[%s967_s2 + $0x198] sm:$0xff] %vm578_vm1, %v675_v19 }
 0x10d   :  { %v554_v20 = vpop.f32.mrf.mxu0 }
 0x10e   :  { %592 = vst.msk [vmem:[%s967_s2 + $0xc8] sm:$0xff] %vm578_vm1, %v554_v20 }
 0x10f   :  { %623 = vsyncpa [#allocation3], 1 }

// kernel: decoder_mnist_forward.6
= control target key start
LH: loop header
LB: loop body
LE: loop exit
PB: predicated region body
PF: predicated region fallthrough
CT: control target
= control target key end

     0   :  { %vm92_vm0 = vcmask 523264   ;;  %vm152_vm1 = vcmask 517120   ;;  %s12392_s4 = inlined_call_operand.vmem [shape: bf16[64,3200], index: 4, kind: input, shape index: {}]   ;;  %s12393_s0 = inlined_call_operand.vmem [shape: f32[242,64], index: 0, kind: input, shape index: {}]   ;;  %s12394_s1 = inlined_call_operand.vmem [shape: f32[1,64], index: 1, kind: input, shape index: {}]   ;;  %s12395_s2 = inlined_call_operand.vmem [shape: f32[1,64], index: 2, kind: input, shape index: {}]   ;;  %s12396_s3 = inlined_call_operand.vmem [shape: f32[1,64], index: 3, kind: input, shape index: {}]   ;;  %s12397_s5 = inlined_call_operand.vmem [shape: f32[242,3200], index: 5, kind: output, shape index: {}]  }
   0x1   :  { %v8147_v0 = vld [vmem:[%s12392_s4 + $0x258] ss:$100 sps:$4 sm:$0xff]   ;;  %v8148_v1 = vld [vmem:[%s12392_s4 + $0x190] ss:$100 sps:$4 sm:$0xff]   ;;  %v8149_v2 = vld [vmem:[%s12392_s4 + $0xc8] ss:$100 sps:$4 sm:$0xff]  }
   0x2   :  { %7139 = vmatprep.subr.bf16.mxu0 %v8147_v0  ;;  %8139 = vmatprep.subr.bf16.mxu1 %v8147_v0  ;;  %v8150_v3 = vld [vmem:[%s12392_s4] ss:$100 sps:$4 sm:$0xff]   ;;  %v22_v5 = vld [vmem:[%s12393_s0 + $0x8] sm:$0xff]  ;;  %v23_v6 = vld [vmem:[%s12393_s0 + $0x10] sm:$0xff] }
   0x3   :  { %7140 = vmatpush3.bf16.msra.mxu0 %v8147_v0  ;;  %8143 = vmatpush3.bf16.msra.mxu1 %v8147_v0  ;;  %v21_v4 = vld [vmem:[%s12393_s0] sm:$0xff]  ;;  %v24_v7 = vld [vmem:[%s12393_s0 + $0x18] sm:$0xff]  ;;  %v26_v9 = vld [vmem:[%s12393_s0 + $0x28] sm:$0xff] }
   0x4   :  { %7141 = vmatprep.subr.bf16.mxu0 %v8148_v1  ;;  %8140 = vmatprep.subr.bf16.mxu1 %v8148_v1  ;;  %v25_v8 = vld [vmem:[%s12393_s0 + $0x20] sm:$0xff]  ;;  %v27_v10 = vld [vmem:[%s12393_s0 + $0x30] sm:$0xff]  ;;  %v28_v11 = vld [vmem:[%s12393_s0 + $0x38] sm:$0xff] }
   0x5   :  { %v29_v12 = vld [vmem:[%s12393_s0 + $0x40] sm:$0xff]  ;;  %v30_v13 = vld [vmem:[%s12393_s0 + $0x48] sm:$0xff]  ;;  %v31_v14 = vld [vmem:[%s12393_s0 + $0x50] sm:$0xff] }
   0x6   :  { %v32_v15 = vld [vmem:[%s12393_s0 + $0x58] sm:$0xff]  ;;  %v33_v16 = vld [vmem:[%s12393_s0 + $0x60] sm:$0xff]  ;;  %v34_v17 = vld [vmem:[%s12393_s0 + $0x68] sm:$0xff] }
   0x7   :  { %7142 = vmatpush3.bf16.msra.mxu0 %v8148_v1  ;;  %8144 = vmatpush3.bf16.msra.mxu1 %v8148_v1  ;;  %v35_v18 = vld [vmem:[%s12393_s0 + $0x70] sm:$0xff]  ;;  %v36_v19 = vld [vmem:[%s12393_s0 + $0x78] sm:$0xff]  ;;  %v37_v20 = vld [vmem:[%s12393_s0 + $0x80] sm:$0xff] }
   0x8   :  { %7143 = vmatprep.subr.bf16.mxu0 %v8149_v2  ;;  %8141 = vmatprep.subr.bf16.mxu1 %v8149_v2  ;;  %v38_v21 = vld [vmem:[%s12393_s0 + $0x88] sm:$0xff]  ;;  %v6136_v22 = vld [vmem:[%s12394_s1] ss:$0 sm:$0xff]  ;;  %v39_v23 = vld [vmem:[%s12393_s0 + $0x90] sm:$0xff] }
   0x9   :  { %v40_v24 = vld [vmem:[%s12393_s0 + $0x98] sm:$0xff]  ;;  %v41_v25 = vld [vmem:[%s12393_s0 + $0xa0] sm:$0xff]  ;;  %v42_v26 = vld [vmem:[%s12393_s0 + $0xa8] sm:$0xff]  ;;  %v8360_v27 = vadd.f32 %v6136_v22, %v21_v4  ;;  %v8362_v28 = vadd.f32 %v6136_v22, %v22_v5  ;;  %v8376_v33 = vadd.f32 %v6136_v22, %v23_v6  ;;  %v8378_v34 = vadd.f32 %v6136_v22, %v24_v7 }
   0xa   :  { %v43_v29 = vld [vmem:[%s12393_s0 + $0xb0] sm:$0xff]  ;;  %v44_v30 = vld [vmem:[%s12393_s0 + $0xb8] sm:$0xff]  ;;  %v45_v31 = vld [vmem:[%s12393_s0 + $0xc0] sm:$0xff]  ;;  %v8380_v35 = vadd.f32 %v6136_v22, %v25_v8  ;;  %v8382_v36 = vadd.f32 %v6136_v22, %v26_v9  ;;  %v8396_v41 = vadd.f32 %v6136_v22, %v27_v10  ;;  %v8398_v42 = vadd.f32 %v6136_v22, %v28_v11 }
   0xb   :  { %7144 = vmatpush3.bf16.msra.mxu0 %v8149_v2  ;;  %8145 = vmatpush3.bf16.msra.mxu1 %v8149_v2  ;;  %v46_v32 = vld [vmem:[%s12393_s0 + $0xc8] sm:$0xff]  ;;  %v47_v37 = vld [vmem:[%s12393_s0 + $0xd0] sm:$0xff]  ;;  %v48_v38 = vld [vmem:[%s12393_s0 + $0xd8] sm:$0xff]  ;;  %v8400_v43 = vadd.f32 %v6136_v22, %v29_v12  ;;  %v8402_v44 = vadd.f32 %v6136_v22, %v30_v13  ;;  %v8407_v46 = vadd.f32 %v6136_v22, %v31_v14  ;;  %v94_v4 = vsel %vm92_vm0, %v8362_v28, 0.0 }
   0xc   :  { %7145 = vmatprep.subr.bf16.mxu0 %v8150_v3  ;;  %8142 = vmatprep.subr.bf16.mxu1 %v8150_v3  ;;  %v49_v39 = vld [vmem:[%s12393_s0 + $0xe0] sm:$0xff]  ;;  %v50_v40 = vld [vmem:[%s12393_s0 + $0xe8] sm:$0xff]  ;;  %v51_v45 = vld [vmem:[%s12393_s0 + $0xf0] sm:$0x3]  ;;  %v8409_v47 = vadd.f32 %v6136_v22, %v32_v15  ;;  %v8411_v48 = vadd.f32 %v6136_v22, %v33_v16  ;;  %v8413_v49 = vadd.f32 %v6136_v22, %v34_v17  ;;  %v96_v5 = vsel %vm92_vm0, %v8376_v33, 0.0 }
   0xd   :  { %v8415_v50 = vadd.f32 %v6136_v22, %v35_v18  ;;  %v8417_v51 = vadd.f32 %v6136_v22, %v36_v19  ;;  %v8419_v52 = vadd.f32 %v6136_v22, %v37_v20  ;;  %v8421_v53 = vadd.f32 %v6136_v22, %v38_v21 }
   0xe   :  { %v8423_v54 = vadd.f32 %v6136_v22, %v39_v23  ;;  %v8425_v55 = vadd.f32 %v6136_v22, %v40_v24  ;;  %v8427_v56 = vadd.f32 %v6136_v22, %v41_v25  ;;  %v8429_v57 = vadd.f32 %v6136_v22, %v42_v26 }
   0xf   :  { %7146 = vmatpush3.bf16.msra.mxu0 %v8150_v3  ;;  %8146 = vmatpush3.bf16.msra.mxu1 %v8150_v3  ;;  %12412 = vst [vmem:[#allocation2_spill] sm:$0xff] %v8421_v53  ;;  %v8431_v58 = vadd.f32 %v6136_v22, %v43_v29  ;;  %v8433_v59 = vadd.f32 %v6136_v22, %v44_v30  ;;  %v93_v3 = vsel %vm92_vm0, %v8360_v27, 0.0  ;;  %v98_v7 = vsel %vm92_vm0, %v8378_v34, 0.0 }
  0x10   :  { %12413 = vst [vmem:[#allocation3_spill] sm:$0xff] %v8423_v54  ;;  %12414 = vst [vmem:[#allocation4_spill] sm:$0xff] %v8425_v55  ;;  %v8435_v60 = vadd.f32 %v6136_v22, %v45_v31  ;;  %v8437_v61 = vadd.f32 %v6136_v22, %v46_v32  ;;  %v8439_v62 = vadd.f32 %v6136_v22, %v47_v37  ;;  %v100_v8 = vsel %vm92_vm0, %v8380_v35, 0.0 }
  0x11   :  { %12415 = vst [vmem:[#allocation5_spill] sm:$0xff] %v8427_v56  ;;  %12416 = vst [vmem:[#allocation6_spill] sm:$0xff] %v8429_v57  ;;  %v8441_v63 = vadd.f32 %v6136_v22, %v48_v38  ;;  %v8443_v0 = vadd.f32 %v6136_v22, %v49_v39  ;;  %v8445_v1 = vadd.f32 %v6136_v22, %v50_v40  ;;  %v102_v9 = vsel %vm92_vm0, %v8382_v36, 0.0 }
  0x12   :  { %12417 = vst [vmem:[#allocation7_spill] sm:$0xff] %v8431_v58  ;;  %12418 = vst [vmem:[#allocation8_spill] sm:$0xff] %v8433_v59  ;;  %v8447_v2 = vadd.f32 %v6136_v22, %v51_v45  ;;  %v95_v6 = vadd.f32 %v94_v4, %v93_v3  ;;  %v104_v10 = vsel %vm92_vm0, %v8396_v41, 0.0  ;;  %v106_v11 = vsel %vm92_vm0, %v8398_v42, 0.0 }
  0x13   :  { %12419 = vst [vmem:[#allocation9_spill] sm:$0xff] %v8435_v60  ;;  %12420 = vst [vmem:[#allocation10_spill] sm:$0xff] %v8437_v61  ;;  %v108_v12 = vsel %vm92_vm0, %v8400_v43, 0.0  ;;  %v110_v13 = vsel %vm92_vm0, %v8402_v44, 0.0  ;;  %v112_v15 = vsel %vm92_vm0, %v8407_v46, 0.0  ;;  %v114_v16 = vsel %vm92_vm0, %v8409_v47, 0.0 }
  0x14   :  { %12421 = vst [vmem:[#allocation11_spill] sm:$0xff] %v8439_v62  ;;  %12422 = vst [vmem:[#allocation12_spill] sm:$0xff] %v8441_v63  ;;  %v97_v14 = vadd.f32 %v96_v5, %v95_v6  ;;  %v116_v17 = vsel %vm92_vm0, %v8411_v48, 0.0  ;;  %v118_v18 = vsel %vm92_vm0, %v8413_v49, 0.0  ;;  %v120_v19 = vsel %vm92_vm0, %v8415_v50, 0.0 }
  0x15   :  { %12423 = vst [vmem:[#allocation13_spill] sm:$0xff] %v8443_v0  ;;  %12424 = vst [vmem:[#allocation14_spill] sm:$0xff] %v8445_v1  ;;  %v122_v20 = vsel %vm92_vm0, %v8417_v51, 0.0  ;;  %v124_v21 = vsel %vm92_vm0, %v8419_v52, 0.0  ;;  %v126_v23 = vsel %vm92_vm0, %v8421_v53, 0.0  ;;  %v128_v24 = vsel %vm92_vm0, %v8423_v54, 0.0 }
  0x16   :  { %12425 = vst [vmem:[#allocation15_spill] sm:$0xff] %v8447_v2  ;;  %v99_v22 = vadd.f32 %v98_v7, %v97_v14  ;;  %v130_v25 = vsel %vm92_vm0, %v8425_v55, 0.0  ;;  %v132_v26 = vsel %vm92_vm0, %v8427_v56, 0.0  ;;  %v134_v29 = vsel %vm92_vm0, %v8429_v57, 0.0 }
  0x17   :  { %v136_v30 = vsel %vm92_vm0, %v8431_v58, 0.0  ;;  %v138_v31 = vsel %vm92_vm0, %v8433_v59, 0.0  ;;  %v140_v37 = vsel %vm92_vm0, %v8435_v60, 0.0  ;;  %v142_v38 = vsel %vm92_vm0, %v8437_v61, 0.0 }
  0x18   :  { %v101_v32 = vadd.f32 %v100_v8, %v99_v22  ;;  %v144_v39 = vsel %vm92_vm0, %v8439_v62, 0.0  ;;  %v146_v40 = vsel %vm92_vm0, %v8441_v63, 0.0  ;;  %v148_v45 = vsel %vm92_vm0, %v8443_v0, 0.0 }
  0x19   :  { %v150_v3 = vsel %vm92_vm0, %v8445_v1, 0.0  ;;  %v153_v4 = vsel %vm152_vm1, %v8447_v2, 0.0 }
  0x1a   :  { %v103_v5 = vadd.f32 %v102_v9, %v101_v32 }
  0x1c   :  { %v105_v6 = vadd.f32 %v104_v10, %v103_v5 }
  0x1e   :  { %v107_v7 = vadd.f32 %v106_v11, %v105_v6 }
  0x20   :  { %v109_v8 = vadd.f32 %v108_v12, %v107_v7 }
  0x22   :  { %v111_v14 = vadd.f32 %v110_v13, %v109_v8 }
  0x24   :  { %v113_v22 = vadd.f32 %v112_v15, %v111_v14 }
  0x26   :  { %v115_v61 = vadd.f32 %v114_v16, %v113_v22 }
  0x28   :  { %v117_v62 = vadd.f32 %v116_v17, %v115_v61 }
  0x2a   :  { %v119_v60 = vadd.f32 %v118_v18, %v117_v62 }
  0x2c   :  { %v121_v59 = vadd.f32 %v120_v19, %v119_v60 }
  0x2e   :  { %v123_v63 = vadd.f32 %v122_v20, %v121_v59 }
  0x30   :  { %v125_v58 = vadd.f32 %v124_v21, %v123_v63 }
  0x32   :  { %v127_v57 = vadd.f32 %v126_v23, %v125_v58  ;;  %v8514_v58 = vld [vmem:[%s12392_s4 + $0x25c] ss:$100 sps:$4 sm:$0xff]  }
  0x33   :  { %7179 = vmatprep.subr.bf16.mxu1 %v8514_v58 }
  0x34   :  { %v129_v0 = vadd.f32 %v128_v24, %v127_v57 }
  0x36   :  { %v131_v56 = vadd.f32 %v130_v25, %v129_v0 }
  0x38   :  { %v133_v55 = vadd.f32 %v132_v26, %v131_v56 }
  0x3a   :  { %v135_v1 = vadd.f32 %v134_v29, %v133_v55  ;;  %v8519_v55 = vld [vmem:[%s12392_s4 + $0x260] ss:$100 sps:$4 sm:$0xff]  }
  0x3b   :  { %7219 = vmatprep.subr.bf16.mxu0 %v8519_v55 }
  0x3c   :  { %v137_v54 = vadd.f32 %v136_v30, %v135_v1 }
  0x3e   :  { %v139_v53 = vadd.f32 %v138_v31, %v137_v54 }
  0x40   :  { %v141_v2 = vadd.f32 %v140_v37, %v139_v53 }
  0x42   :  { %v143_v9 = vadd.f32 %v142_v38, %v141_v2 }
  0x44   :  { %v145_v10 = vadd.f32 %v144_v39, %v143_v9 }
  0x46   :  { %v147_v11 = vadd.f32 %v146_v40, %v145_v10 }
  0x48   :  { %v149_v12 = vadd.f32 %v148_v45, %v147_v11 }
  0x4a   :  { %v151_v13 = vadd.f32 %v150_v3, %v149_v12 }
  0x4c   :  { %v154_v15 = vadd.f32 %v153_v4, %v151_v13 }
  0x4e   :  { %v155_v16 = vrot.slane %v154_v15, 4 }
  0x50   :  { %v156_v61 = vadd.f32 %v155_v16, %v154_v15 }
  0x52   :  { %v157_v62 = vrot.slane %v156_v61, 2 }
  0x54   :  { %v158_v53 = vadd.f32 %v157_v62, %v156_v61 }
  0x56   :  { %v159_v54 = vrot.slane %v158_v53, 1 }
  0x58   :  { %v160_v56 = vadd.f32 %v159_v54, %v158_v53  ;;  %v12426_v53 = vld [vmem:[#allocation2_spill] sm:$0xff] }
  0x5a   :  { %v8523_v57 = vmul.f32 0.004132231, %v160_v56 }
  0x5c   :  { %v8527_v59 = vsub.f32 %v8360_v27, %v8523_v57  ;;  %v8531_v60 = vsub.f32 %v8362_v28, %v8523_v57  ;;  %v8535_v63 = vsub.f32 %v8376_v33, %v8523_v57  ;;  %v8539_v0 = vsub.f32 %v8378_v34, %v8523_v57 }
  0x5d   :  { %v8543_v1 = vsub.f32 %v8380_v35, %v8523_v57  ;;  %v8553_v33 = vsub.f32 %v8382_v36, %v8523_v57  ;;  %v8559_v35 = vsub.f32 %v8396_v41, %v8523_v57  ;;  %v8568_v36 = vsub.f32 %v8398_v42, %v8523_v57 }
  0x5e   :  { %v194_v27 = vmul.f32 %v8527_v59, %v8527_v59  ;;  %v195_v2 = vmul.f32 %v8531_v60, %v8531_v60  ;;  %v196_v28 = vmul.f32 %v8535_v63, %v8535_v63  ;;  %v197_v34 = vmul.f32 %v8539_v0, %v8539_v0 }
  0x5f   :  { %v198_v17 = vmul.f32 %v8543_v1, %v8543_v1  ;;  %v199_v23 = vmul.f32 %v8553_v33, %v8553_v33  ;;  %v8575_v25 = vsub.f32 %v8400_v43, %v8523_v57  ;;  %v200_v26 = vmul.f32 %v8559_v35, %v8559_v35 }
  0x60   :  { %v225_v18 = vsel %vm92_vm0, %v194_v27, 0.0  ;;  %v226_v19 = vsel %vm92_vm0, %v195_v2, 0.0  ;;  %v228_v21 = vsel %vm92_vm0, %v196_v28, 0.0  ;;  %v230_v41 = vsel %vm92_vm0, %v197_v34, 0.0  ;;  %v12427_v2 = vld [vmem:[#allocation3_spill] sm:$0xff] }
  0x61   :  { %v227_v20 = vadd.f32 %v226_v19, %v225_v18  ;;  %v232_v29 = vsel %vm92_vm0, %v198_v17, 0.0  ;;  %v8582_v42 = vsub.f32 %v8402_v44, %v8523_v57  ;;  %v201_v31 = vmul.f32 %v8568_v36, %v8568_v36  ;;  %v12428_v18 = vld [vmem:[#allocation4_spill] sm:$0xff] }
  0x62   :  { %v234_v32 = vsel %vm92_vm0, %v199_v23, 0.0  ;;  %v8589_v43 = vsub.f32 %v8407_v46, %v8523_v57  ;;  %v202_v38 = vmul.f32 %v8575_v25, %v8575_v25  ;;  %v236_v39 = vsel %vm92_vm0, %v200_v26, 0.0 }
  0x63   :  { %v229_v24 = vadd.f32 %v228_v21, %v227_v20  ;;  %v8596_v44 = vsub.f32 %v8409_v47, %v8523_v57  ;;  %v203_v45 = vmul.f32 %v8582_v42, %v8582_v42  ;;  %v238_v3 = vsel %vm92_vm0, %v201_v31, 0.0  ;;  %v12430_v31 = vld [vmem:[#allocation6_spill] sm:$0xff] }
  0x64   :  { %v8603_v46 = vsub.f32 %v8411_v48, %v8523_v57  ;;  %v204_v5 = vmul.f32 %v8589_v43, %v8589_v43  ;;  %v240_v6 = vsel %vm92_vm0, %v202_v38, 0.0  ;;  %v8610_v47 = vsub.f32 %v8413_v49, %v8523_v57 }
  0x65   :  { %v231_v30 = vadd.f32 %v230_v41, %v229_v24  ;;  %v205_v8 = vmul.f32 %v8596_v44, %v8596_v44  ;;  %v242_v14 = vsel %vm92_vm0, %v203_v45, 0.0  ;;  %v8617_v48 = vsub.f32 %v8415_v50, %v8523_v57  ;;  %v12429_v41 = vld [vmem:[#allocation5_spill] sm:$0xff] }
  0x66   :  { %v206_v9 = vmul.f32 %v8603_v46, %v8603_v46  ;;  %v244_v10 = vsel %vm92_vm0, %v204_v5, 0.0  ;;  %v8624_v49 = vsub.f32 %v8417_v51, %v8523_v57  ;;  %v207_v12 = vmul.f32 %v8610_v47, %v8610_v47 }
  0x67   :  { %v233_v37 = vadd.f32 %v232_v29, %v231_v30  ;;  %v246_v13 = vsel %vm92_vm0, %v205_v8, 0.0  ;;  %v8631_v50 = vsub.f32 %v8419_v52, %v8523_v57  ;;  %v208_v16 = vmul.f32 %v8617_v48, %v8617_v48 }
  0x68   :  { %v248_v61 = vsel %vm92_vm0, %v206_v9, 0.0  ;;  %v8638_v51 = vsub.f32 %v12426_v53, %v8523_v57  ;;  %v209_v54 = vmul.f32 %v8624_v49, %v8624_v49  ;;  %v250_v56 = vsel %vm92_vm0, %v207_v12, 0.0  ;;  %v12433_v9 = vld [vmem:[#allocation9_spill] sm:$0xff] }
  0x69   :  { %v235_v40 = vadd.f32 %v234_v32, %v233_v37  ;;  %v8645_v52 = vsub.f32 %v12427_v2, %v8523_v57  ;;  %v210_v28 = vmul.f32 %v8631_v50, %v8631_v50  ;;  %v252_v34 = vsel %vm92_vm0, %v208_v16, 0.0 }
  0x6a   :  { %v8652_v19 = vsub.f32 %v12428_v18, %v8523_v57  ;;  %v211_v20 = vmul.f32 %v8638_v51, %v8638_v51  ;;  %v254_v21 = vsel %vm92_vm0, %v209_v54, 0.0  ;;  %v8659_v24 = vsub.f32 %v12429_v41, %v8523_v57  ;;  %v12435_v54 = vld [vmem:[#allocation11_spill] sm:$0xff] }
  0x6b   :  { %v237_v4 = vadd.f32 %v236_v39, %v235_v40  ;;  %v212_v26 = vmul.f32 %v8645_v52, %v8645_v52  ;;  %v256_v29 = vsel %vm92_vm0, %v210_v28, 0.0  ;;  %v8666_v32 = vsub.f32 %v12430_v31, %v8523_v57  ;;  %v12431_v40 = vld [vmem:[#allocation7_spill] sm:$0xff]  ;;  %v12438_v31 = vld [vmem:[#allocation14_spill] sm:$0xff] }
  0x6c   :  { %v213_v37 = vmul.f32 %v8652_v19, %v8652_v19  ;;  %v258_v38 = vsel %vm92_vm0, %v211_v20, 0.0  ;;  %v8673_v45 = vsub.f32 %v12431_v40, %v8523_v57 }
  0x6d   :  { %v239_v7 = vadd.f32 %v238_v3, %v237_v4  ;;  %v214_v3 = vmul.f32 %v8659_v24, %v8659_v24  ;;  %v260_v4 = vsel %vm92_vm0, %v212_v26, 0.0  ;;  %v215_v8 = vmul.f32 %v8666_v32, %v8666_v32 }
  0x6f   :  { %v241_v22 = vadd.f32 %v240_v6, %v239_v7  ;;  %v12432_v6 = vld [vmem:[#allocation8_spill] sm:$0xff]  ;;  %v264_v12 = vsel %vm92_vm0, %v214_v3, 0.0  ;;  %v12439_v3 = vld [vmem:[#allocation15_spill] sm:$0xff] }
  0x70   :  { %v8680_v7 = vsub.f32 %v12432_v6, %v8523_v57 }
  0x71   :  { %v243_v11 = vadd.f32 %v242_v14, %v241_v22  ;;  %v262_v14 = vsel %vm92_vm0, %v213_v37, 0.0  ;;  %v8722_v37 = vsub.f32 %v12438_v31, %v8523_v57 }
  0x73   :  { %v245_v15 = vadd.f32 %v244_v10, %v243_v11  ;;  %v8687_v10 = vsub.f32 %v12433_v9, %v8523_v57  ;;  %v216_v11 = vmul.f32 %v8673_v45, %v8673_v45 }
  0x75   :  { %v247_v62 = vadd.f32 %v246_v13, %v245_v15  ;;  %v12434_v15 = vld [vmem:[#allocation10_spill] sm:$0xff]  ;;  %v268_v2 = vsel %vm92_vm0, %v216_v11, 0.0 }
  0x76   :  { %v8694_v16 = vsub.f32 %v12434_v15, %v8523_v57 }
  0x77   :  { %v249_v27 = vadd.f32 %v248_v61, %v247_v62  ;;  %v217_v61 = vmul.f32 %v8680_v7, %v8680_v7  ;;  %v266_v62 = vsel %vm92_vm0, %v215_v8, 0.0 }
  0x78   :  { %v219_v18 = vmul.f32 %v8694_v16, %v8694_v16 }
  0x79   :  { %v251_v17 = vadd.f32 %v250_v56, %v249_v27  ;;  %v8701_v56 = vsub.f32 %v12435_v54, %v8523_v57  ;;  %v218_v27 = vmul.f32 %v8687_v10, %v8687_v10  ;;  %v270_v20 = vsel %vm92_vm0, %v217_v61, 0.0 }
  0x7b   :  { %v253_v23 = vadd.f32 %v252_v34, %v251_v17  ;;  %v12436_v34 = vld [vmem:[#allocation12_spill] sm:$0xff]  ;;  %v220_v26 = vmul.f32 %v8701_v56, %v8701_v56 }
  0x7c   :  { %v8708_v17 = vsub.f32 %v12436_v34, %v8523_v57 }
  0x7d   :  { %v255_v30 = vadd.f32 %v254_v21, %v253_v23  ;;  %v12437_v23 = vld [vmem:[#allocation13_spill] sm:$0xff]  ;;  %v276_v6 = vsel %vm92_vm0, %v220_v26, 0.0  ;;  %v8747_v26 = vld [vmem:[%s12395_s2] ss:$0 sm:$0xff] }
  0x7e   :  { %v8715_v41 = vsub.f32 %v12437_v23, %v8523_v57 }
  0x7f   :  { %v257_v39 = vadd.f32 %v256_v29, %v255_v30  ;;  %v272_v29 = vsel %vm92_vm0, %v218_v27, 0.0 }
  0x81   :  { %v259_v5 = vadd.f32 %v258_v38, %v257_v39  ;;  %v221_v38 = vmul.f32 %v8708_v17, %v8708_v17  ;;  %v274_v39 = vsel %vm92_vm0, %v219_v18, 0.0 }
  0x83   :  { %v261_v22 = vadd.f32 %v260_v4, %v259_v5  ;;  %v8729_v4 = vsub.f32 %v12439_v3, %v8523_v57  ;;  %v222_v5 = vmul.f32 %v8715_v41, %v8715_v41 }
  0x85   :  { %v263_v13 = vadd.f32 %v262_v14, %v261_v22  ;;  %v223_v14 = vmul.f32 %v8722_v37, %v8722_v37  ;;  %v278_v22 = vsel %vm92_vm0, %v221_v38, 0.0  ;;  %v224_v11 = vmul.f32 %v8729_v4, %v8729_v4 }
  0x87   :  { %v265_v53 = vadd.f32 %v264_v12, %v263_v13  ;;  %v280_v12 = vsel %vm92_vm0, %v222_v5, 0.0  ;;  %v282_v57 = vsel %vm92_vm0, %v223_v14, 0.0  ;;  %v284_v61 = vsel %vm152_vm1, %v224_v11, 0.0 }
  0x89   :  { %v267_v28 = vadd.f32 %v266_v62, %v265_v53 }
  0x8b   :  { %v269_v21 = vadd.f32 %v268_v2, %v267_v28 }
  0x8d   :  { %v271_v30 = vadd.f32 %v270_v20, %v269_v21 }
  0x8f   :  { %v273_v40 = vadd.f32 %v272_v29, %v271_v30 }
  0x91   :  { %v275_v8 = vadd.f32 %v274_v39, %v273_v40  ;;  %v8760_v39 = vld [vmem:[%s12396_s3] ss:$0 sm:$0xff] }
  0x93   :  { %v277_v9 = vadd.f32 %v276_v6, %v275_v8 }
  0x95   :  { %v279_v13 = vadd.f32 %v278_v22, %v277_v9 }
  0x97   :  { %v281_v15 = vadd.f32 %v280_v12, %v279_v13 }
  0x99   :  { %v283_v62 = vadd.f32 %v282_v57, %v281_v15 }
  0x9b   :  { %v285_v53 = vadd.f32 %v284_v61, %v283_v62 }
  0x9d   :  { %v286_v54 = vrot.slane %v285_v53, 4 }
  0x9f   :  { %v287_v27 = vadd.f32 %v286_v54, %v285_v53 }
  0xa1   :  { %v288_v2 = vrot.slane %v287_v27, 2 }
  0xa3   :  { %v289_v28 = vadd.f32 %v288_v2, %v287_v27 }
  0xa5   :  { %v290_v34 = vrot.slane %v289_v28, 1 }
  0xa7   :  { %v291_v18 = vadd.f32 %v290_v34, %v289_v28 }
  0xa9   :  { %v292_v20 = vmul.f32 0.004132231, %v291_v18 }
  0xab   :  { %v293_v21 = vadd.f32 1e-05, %v292_v20 }
  0xad   :  { %8247 = vrsqrt.f32 %v293_v21 }
  0xba   :  { %v8742_v23 = vpop.eup %8247 }
  0xbb   :  { %v295_v29 = vmul.f32 %v8742_v23, %v8527_v59  ;;  %v296_v30 = vmul.f32 %v8742_v23, %v8531_v60  ;;  %v311_v31 = vmul.f32 %v8742_v23, %v8631_v50  ;;  %v312_v38 = vmul.f32 %v8742_v23, %v8638_v51 }
  0xbc   :  { %v297_v40 = vmul.f32 %v8742_v23, %v8535_v63  ;;  %v298_v59 = vmul.f32 %v8742_v23, %v8539_v0  ;;  %v313_v60 = vmul.f32 %v8742_v23, %v8645_v52  ;;  %v314_v50 = vmul.f32 %v8742_v23, %v8652_v19 }
  0xbd   :  { %v332_v3 = vmul.f32 %v8747_v26, %v295_v29  ;;  %v333_v51 = vmul.f32 %v8747_v26, %v296_v30  ;;  %v348_v5 = vmul.f32 %v8747_v26, %v311_v31  ;;  %v349_v6 = vmul.f32 %v8747_v26, %v312_v38 }
  0xbe   :  { %v334_v8 = vmul.f32 %v8747_v26, %v297_v40  ;;  %v335_v63 = vmul.f32 %v8747_v26, %v298_v59  ;;  %v350_v0 = vmul.f32 %v8747_v26, %v313_v60  ;;  %v351_v14 = vmul.f32 %v8747_v26, %v314_v50 }
  0xbf   :  { %v369_v52 = vadd.f32 %v8760_v39, %v332_v3  ;;  %v370_v19 = vadd.f32 %v8760_v39, %v333_v51  ;;  %v385_v22 = vadd.f32 %v8760_v39, %v348_v5  ;;  %v386_v9 = vadd.f32 %v8760_v39, %v349_v6 }
  0xc0   :  { %v371_v11 = vadd.f32 %v8760_v39, %v334_v8  ;;  %v372_v12 = vadd.f32 %v8760_v39, %v335_v63  ;;  %v387_v13 = vadd.f32 %v8760_v39, %v350_v0  ;;  %v388_v57 = vadd.f32 %v8760_v39, %v351_v14 }
  0xc1   :  { %vm400_vm2 = vcmp.ge.f32.partialorder %v369_v52, 0.0  ;;  %vm401_vm3 = vcmp.ge.f32.partialorder %v370_v19, 0.0  ;;  %v431_v15 = vmul.f32 0.01, %v369_v52  ;;  %v432_v61 = vmul.f32 0.01, %v370_v19 }
  0xc2   :  { %vm416_vm4 = vcmp.ge.f32.partialorder %v385_v22, 0.0  ;;  %vm417_vm5 = vcmp.ge.f32.partialorder %v386_v9, 0.0  ;;  %v447_v62 = vmul.f32 0.01, %v385_v22  ;;  %v448_v53 = vmul.f32 0.01, %v386_v9 }
  0xc3   :  { %v462_v54 = vsel %vm400_vm2, %v369_v52, %v431_v15  ;;  %v463_v27 = vsel %vm401_vm3, %v370_v19, %v432_v61  ;;  %vm402_vm6 = vcmp.ge.f32.partialorder %v371_v11, 0.0  ;;  %vm403_vm7 = vcmp.ge.f32.partialorder %v372_v12, 0.0 }
  0xc4   :  { %v8786_v2 = vpack.c.bf16 %v463_v27, %v462_v54  ;;  %v478_v28 = vsel %vm416_vm4, %v385_v22, %v447_v62  ;;  %v479_v34 = vsel %vm417_vm5, %v386_v9, %v448_v53  ;;  %v433_v18 = vmul.f32 0.01, %v371_v11 }
  0xc5   :  { %v8788_v20 = vpack.c.bf16 %v479_v34, %v478_v28  ;;  %v434_v21 = vmul.f32 0.01, %v372_v12  ;;  %vm418_vm8 = vcmp.ge.f32.partialorder %v387_v13, 0.0  ;;  %vm419_vm9 = vcmp.ge.f32.partialorder %v388_v57, 0.0 }
  0xc6   :  { %7147 = vmatprep.mubr.msk.bf16.mxu0 %vm92_vm0, %v8786_v2  ;;  %v464_v29 = vsel %vm402_vm6, %v371_v11, %v433_v18  ;;  %v449_v30 = vmul.f32 0.01, %v387_v13  ;;  %v450_v31 = vmul.f32 0.01, %v388_v57  ;;  %v299_v38 = vmul.f32 %v8742_v23, %v8543_v1  ;;  %v8154_v1 = vld [vmem:[%s12392_s4 + $0x198] ss:$100 sps:$4 sm:$0xff]  }
  0xc7   :  { %7163 = vmatprep.mubr.msk.bf16.mxu1 %vm92_vm0, %v8788_v20  ;;  %v465_v40 = vsel %vm403_vm7, %v372_v12, %v434_v21  ;;  %v300_v59 = vmul.f32 %v8742_v23, %v8553_v33  ;;  %v315_v60 = vmul.f32 %v8742_v23, %v8659_v24  ;;  %v316_v50 = vmul.f32 %v8742_v23, %v8666_v32  ;;  %v8153_v32 = vld [vmem:[%s12392_s4 + $0x194] ss:$100 sps:$4 sm:$0xff]   ;;  %v8157_v21 = vld [vmem:[%s12392_s4 + $0x4] ss:$100 sps:$4 sm:$0xff]  }
  0xc8   :  { %v8802_v3 = vpack.c.bf16 %v465_v40, %v464_v29  ;;  %v480_v51 = vsel %vm418_vm8, %v387_v13, %v449_v30  ;;  %v481_v5 = vsel %vm419_vm9, %v388_v57, %v450_v31  ;;  %v336_v6 = vmul.f32 %v8747_v26, %v299_v38 }
  0xc9   :  { %v8808_v8 = vpack.c.bf16 %v481_v5, %v480_v51  ;;  %v337_v33 = vmul.f32 %v8747_v26, %v300_v59  ;;  %v352_v63 = vmul.f32 %v8747_v26, %v315_v60  ;;  %v353_v24 = vmul.f32 %v8747_v26, %v316_v50  ;;  %v8158_v60 = vld [vmem:[%s12392_s4 + $0x8] ss:$100 sps:$4 sm:$0xff]  }
  0xca   :  { %7148 = vmatmul.mubr.msk.bf16.vlgmr.msra.gmra.mxu0 %vm92_vm0, %v8802_v3  ;;  %v373_v0 = vadd.f32 %v8760_v39, %v336_v6  ;;  %v301_v14 = vmul.f32 %v8742_v23, %v8559_v35  ;;  %v302_v52 = vmul.f32 %v8742_v23, %v8568_v36  ;;  %v317_v19 = vmul.f32 %v8742_v23, %v8673_v45  ;;  %v8155_v35 = vld [vmem:[%s12392_s4 + $0xcc] ss:$100 sps:$4 sm:$0xff]  }
  0xcb   :  { %7164 = vmatmul.mubr.msk.bf16.vlgmr.msra.gmra.mxu1 %vm92_vm0, %v8808_v8  ;;  %7220 = vmatpush3.bf16.msra.mxu0 %v8519_v55  ;;  %v374_v22 = vadd.f32 %v8760_v39, %v337_v33  ;;  %v389_v9 = vadd.f32 %v8760_v39, %v352_v63  ;;  %v390_v11 = vadd.f32 %v8760_v39, %v353_v24  ;;  %v8156_v55 = vld [vmem:[%s12392_s4 + $0xd0] ss:$100 sps:$4 sm:$0xff]  }
  0xcc   :  { %7180 = vmatpush3.bf16.msra.mxu1 %v8514_v58  ;;  %vm404_vm10 = vcmp.ge.f32.partialorder %v373_v0, 0.0  ;;  %v435_v36 = vmul.f32 0.01, %v373_v0  ;;  %7221 = vmatprep.subr.bf16.mxu0 %v8154_v1  ;;  %v338_v45 = vmul.f32 %v8747_v26, %v301_v14  ;;  %v339_v12 = vmul.f32 %v8747_v26, %v302_v52  ;;  %v8889_v52 = vld [vmem:[%s12392_s4 + $0x268] ss:$100 sps:$4 sm:$0xff]  }
  0xcd   :  { %vm405_vm11 = vcmp.ge.f32.partialorder %v374_v22, 0.0  ;;  %v436_v13 = vmul.f32 0.01, %v374_v22  ;;  %vm420_vm12 = vcmp.ge.f32.partialorder %v389_v9, 0.0  ;;  %vm421_vm13 = vcmp.ge.f32.partialorder %v390_v11, 0.0  ;;  %7181 = vmatprep.subr.bf16.mxu1 %v8153_v32 }
  0xce   :  { %v466_v57 = vsel %vm404_vm10, %v373_v0, %v435_v36  ;;  %v451_v15 = vmul.f32 0.01, %v389_v9  ;;  %v452_v61 = vmul.f32 0.01, %v390_v11  ;;  %v375_v58 = vadd.f32 %v8760_v39, %v338_v45 }
  0xcf   :  { %v467_v62 = vsel %vm405_vm11, %v374_v22, %v436_v13  ;;  %v376_v53 = vadd.f32 %v8760_v39, %v339_v12  ;;  %v318_v54 = vmul.f32 %v8742_v23, %v8680_v7  ;;  %v354_v27 = vmul.f32 %v8747_v26, %v317_v19  ;;  %7222 = vmatpush3.bf16.msra.mxu0 %v8154_v1 }
  0xd0   :  { %v8845_v28 = vpack.c.bf16 %v467_v62, %v466_v57  ;;  %v482_v34 = vsel %vm420_vm12, %v389_v9, %v451_v15  ;;  %v483_v18 = vsel %vm421_vm13, %v390_v11, %v452_v61  ;;  %vm406_vm14 = vcmp.ge.f32.partialorder %v375_v58, 0.0  ;;  %7182 = vmatpush3.bf16.msra.mxu1 %v8153_v32  ;;  %7223 = vmatprep.subr.bf16.mxu0 %v8156_v55 }
  0xd1   :  { %v8850_v29 = vpack.c.bf16 %v483_v18, %v482_v34  ;;  %vm407_vm15 = vcmp.ge.f32.partialorder %v376_v53, 0.0  ;;  %v437_v30 = vmul.f32 0.01, %v375_v58  ;;  %v438_v31 = vmul.f32 0.01, %v376_v53  ;;  %7183 = vmatprep.subr.bf16.mxu1 %v8155_v35 }
  0xd2   :  { %7151 = vmatprep.mubr.msk.bf16.mxu0 %vm92_vm0, %v8845_v28  ;;  %v355_v7 = vmul.f32 %v8747_v26, %v318_v54  ;;  %v391_v38 = vadd.f32 %v8760_v39, %v354_v27  ;;  %v303_v40 = vmul.f32 %v8742_v23, %v8575_v25  ;;  %v304_v59 = vmul.f32 %v8742_v23, %v8582_v42 }
  0xd3   :  { %7167 = vmatprep.mubr.msk.bf16.mxu1 %vm92_vm0, %v8850_v29  ;;  %v468_v50 = vsel %vm406_vm14, %v375_v58, %v437_v30  ;;  %v469_v51 = vsel %vm407_vm15, %v376_v53, %v438_v31  ;;  %v319_v5 = vmul.f32 %v8742_v23, %v8687_v10  ;;  %v320_v6 = vmul.f32 %v8742_v23, %v8694_v16  ;;  %v8880_v10 = vld [vmem:[%s12392_s4 + $0x264] ss:$100 sps:$4 sm:$0xff]  }
  0xd4   :  { %v8870_v25 = vpack.c.bf16 %v469_v51, %v468_v50  ;;  %v392_v42 = vadd.f32 %v8760_v39, %v355_v7  ;;  %vm422_vm1 = vcmp.ge.f32.partialorder %v391_v38, 0.0  ;;  %v453_v1 = vmul.f32 0.01, %v391_v38  ;;  %7184 = vmatpush3.bf16.msra.mxu1 %v8155_v35  ;;  %7224 = vmatpush3.bf16.msra.mxu0 %v8156_v55 }
  0xd5   :  { %v340_v33 = vmul.f32 %v8747_v26, %v303_v40  ;;  %v341_v63 = vmul.f32 %v8747_v26, %v304_v59  ;;  %v356_v24 = vmul.f32 %v8747_v26, %v319_v5  ;;  %v357_v32 = vmul.f32 %v8747_v26, %v320_v6  ;;  %7185 = vmatprep.subr.bf16.mxu1 %v8157_v21 }
  0xd6   :  { %7152 = vmatmul.mubr.msk.bf16.gmra.mxu0 %vm92_vm0, %v8870_v25  ;;  %vm423_vm2 = vcmp.ge.f32.partialorder %v392_v42, 0.0  ;;  %v454_v16 = vmul.f32 0.01, %v392_v42  ;;  %v484_v0 = vsel %vm422_vm1, %v391_v38, %v453_v1  ;;  %v305_v14 = vmul.f32 %v8742_v23, %v8589_v43  ;;  %7225 = vmatprep.subr.bf16.mxu0 %v8158_v60 }
  0xd7   :  { %v377_v19 = vadd.f32 %v8760_v39, %v340_v33  ;;  %v378_v22 = vadd.f32 %v8760_v39, %v341_v63  ;;  %v393_v9 = vadd.f32 %v8760_v39, %v356_v24  ;;  %v394_v11 = vadd.f32 %v8760_v39, %v357_v32 }
  0xd8   :  { %v485_v35 = vsel %vm423_vm2, %v392_v42, %v454_v16  ;;  %v306_v36 = vmul.f32 %v8742_v23, %v8596_v44  ;;  %v342_v43 = vmul.f32 %v8747_v26, %v305_v14  ;;  %v321_v45 = vmul.f32 %v8742_v23, %v8701_v56  ;;  %7186 = vmatpush3.bf16.msra.mxu1 %v8157_v21 }
  0xd9   :  { %v8900_v12 = vpack.c.bf16 %v485_v35, %v484_v0  ;;  %vm408_vm3 = vcmp.ge.f32.partialorder %v377_v19, 0.0  ;;  %vm409_vm4 = vcmp.ge.f32.partialorder %v378_v22, 0.0  ;;  %v439_v55 = vmul.f32 0.01, %v377_v19  ;;  %7226 = vmatpush3.bf16.msra.mxu0 %v8158_v60  ;;  %7259 = vmatprep.subr.bf16.mxu1 %v8880_v10 }
  0xda   :  { %v440_v13 = vmul.f32 0.01, %v378_v22  ;;  %vm424_vm5 = vcmp.ge.f32.partialorder %v393_v9, 0.0  ;;  %vm425_vm6 = vcmp.ge.f32.partialorder %v394_v11, 0.0  ;;  %v455_v57 = vmul.f32 0.01, %v393_v9  ;;  %7299 = vmatprep.subr.bf16.mxu0 %v8889_v52 }
  0xdb   :  { %7168 = vmatmul.mubr.msk.bf16.gmra.mxu1 %vm92_vm0, %v8900_v12  ;;  %v470_v44 = vsel %vm408_vm3, %v377_v19, %v439_v55  ;;  %v456_v56 = vmul.f32 0.01, %v394_v11  ;;  %v343_v15 = vmul.f32 %v8747_v26, %v306_v36  ;;  %v379_v61 = vadd.f32 %v8760_v39, %v342_v43 }
  0xdc   :  { %v471_v58 = vsel %vm409_vm4, %v378_v22, %v440_v13  ;;  %v486_v62 = vsel %vm424_vm5, %v393_v9, %v455_v57  ;;  %v322_v53 = vmul.f32 %v8742_v23, %v8708_v17  ;;  %v358_v54 = vmul.f32 %v8747_v26, %v321_v45 }
  0xdd   :  { %v8911_v27 = vpack.c.bf16 %v471_v58, %v470_v44  ;;  %v487_v34 = vsel %vm425_vm6, %v394_v11, %v456_v56  ;;  %v380_v18 = vadd.f32 %v8760_v39, %v343_v15  ;;  %vm410_vm7 = vcmp.ge.f32.partialorder %v379_v61, 0.0 }
  0xde   :  { %v8914_v21 = vpack.c.bf16 %v487_v34, %v486_v62  ;;  %v441_v30 = vmul.f32 0.01, %v379_v61  ;;  %v359_v31 = vmul.f32 %v8747_v26, %v322_v53  ;;  %v395_v7 = vadd.f32 %v8760_v39, %v358_v54 }
  0xdf   :  { %7155 = vmatprep.mubr.msk.bf16.mxu0 %vm92_vm0, %v8911_v27  ;;  %vm411_vm8 = vcmp.ge.f32.partialorder %v380_v18, 0.0  ;;  %v442_v17 = vmul.f32 0.01, %v380_v18  ;;  %v307_v38 = vmul.f32 %v8742_v23, %v8603_v46  ;;  %v308_v40 = vmul.f32 %v8742_v23, %v8610_v47 }
  0xe0   :  { %7171 = vmatprep.mubr.msk.bf16.mxu1 %vm92_vm0, %v8914_v21  ;;  %v472_v59 = vsel %vm410_vm7, %v379_v61, %v441_v30  ;;  %v396_v60 = vadd.f32 %v8760_v39, %v359_v31  ;;  %vm426_vm9 = vcmp.ge.f32.partialorder %v395_v7, 0.0  ;;  %v457_v50 = vmul.f32 0.01, %v395_v7  ;;  %v8161_v30 = vld [vmem:[%s12392_s4 + $0x19c] ss:$100 sps:$4 sm:$0xff]  }
  0xe1   :  { %v473_v51 = vsel %vm411_vm8, %v380_v18, %v442_v17  ;;  %v344_v5 = vmul.f32 %v8747_v26, %v307_v38  ;;  %v345_v6 = vmul.f32 %v8747_v26, %v308_v40  ;;  %v323_v42 = vmul.f32 %v8742_v23, %v8715_v41  ;;  %v8162_v31 = vld [vmem:[%s12392_s4 + $0x1a0] ss:$100 sps:$4 sm:$0xff]   ;;  %v8163_v17 = vld [vmem:[%s12392_s4 + $0xd4] ss:$100 sps:$4 sm:$0xff]   ;;  %v8167_v38 = vld [vmem:[%s12392_s4 + $0x26c] ss:$100 sps:$4 sm:$0xff]  }
  0xe2   :  { %v8931_v46 = vpack.c.bf16 %v473_v51, %v472_v59  ;;  %vm427_vm10 = vcmp.ge.f32.partialorder %v396_v60, 0.0  ;;  %v458_v47 = vmul.f32 0.01, %v396_v60  ;;  %v488_v1 = vsel %vm426_vm9, %v395_v7, %v457_v50  ;;  %v8164_v7 = vld [vmem:[%s12392_s4 + $0xd8] ss:$100 sps:$4 sm:$0xff]  }
  0xe3   :  { %v381_v33 = vadd.f32 %v8760_v39, %v344_v5  ;;  %v382_v63 = vadd.f32 %v8760_v39, %v345_v6  ;;  %v324_v24 = vmul.f32 %v8742_v23, %v8722_v37  ;;  %v360_v32 = vmul.f32 %v8747_v26, %v323_v42  ;;  %v8168_v40 = vld [vmem:[%s12392_s4 + $0x270] ss:$100 sps:$4 sm:$0xff]   ;;  %v8169_v59 = vld [vmem:[%s12392_s4 + $0x1a4] ss:$100 sps:$4 sm:$0xff]   ;;  %v8171_v51 = vld [vmem:[%s12392_s4 + $0xdc] ss:$100 sps:$4 sm:$0xff]  }
  0xe4   :  { %7156 = vmatmul.mubr.msk.bf16.gmra.mxu0 %vm92_vm0, %v8931_v46  ;;  %v489_v16 = vsel %vm427_vm10, %v396_v60, %v458_v47  ;;  %v309_v41 = vmul.f32 %v8742_v23, %v8617_v48  ;;  %v310_v0 = vmul.f32 %v8742_v23, %v8624_v49  ;;  %v325_v14 = vmul.f32 %v8742_v23, %v8729_v4  ;;  %v8170_v60 = vld [vmem:[%s12392_s4 + $0x1a8] ss:$100 sps:$4 sm:$0xff]   ;;  %v8172_v50 = vld [vmem:[%s12392_s4 + $0xe0] ss:$100 sps:$4 sm:$0xff]   ;;  %v8173_v5 = vld [vmem:[%s12392_s4 + $0x14] ss:$100 sps:$4 sm:$0xff]  }
  0xe5   :  { %v8946_v19 = vpack.c.bf16 %v489_v16, %v488_v1  ;;  %vm412_vm11 = vcmp.ge.f32.partialorder %v381_v33, 0.0  ;;  %vm413_vm12 = vcmp.ge.f32.partialorder %v382_v63, 0.0  ;;  %v443_v37 = vmul.f32 0.01, %v381_v33  ;;  %v8174_v6 = vld [vmem:[%s12392_s4 + $0x18] ss:$100 sps:$4 sm:$0xff]  }
  0xe6   :  { %v444_v22 = vmul.f32 0.01, %v382_v63  ;;  %v361_v9 = vmul.f32 %v8747_v26, %v324_v24  ;;  %v397_v11 = vadd.f32 %v8760_v39, %v360_v32  ;;  %v346_v35 = vmul.f32 %v8747_v26, %v309_v41  ;;  %v8175_v42 = vld [vmem:[%s12392_s4 + $0x274] ss:$100 sps:$4 sm:$0xff]   ;;  %v8177_v1 = vld [vmem:[%s12392_s4 + $0x1ac] ss:$100 sps:$4 sm:$0xff]  }
  0xe7   :  { %7172 = vmatmul.mubr.msk.bf16.gmra.mxu1 %vm92_vm0, %v8946_v19  ;;  %v474_v48 = vsel %vm412_vm11, %v381_v33, %v443_v37  ;;  %v347_v49 = vmul.f32 %v8747_v26, %v310_v0  ;;  %v362_v4 = vmul.f32 %v8747_v26, %v325_v14  ;;  %v8176_v47 = vld [vmem:[%s12392_s4 + $0x278] ss:$100 sps:$4 sm:$0xff]   ;;  %v8178_v33 = vld [vmem:[%s12392_s4 + $0x1b0] ss:$100 sps:$4 sm:$0xff]   ;;  %v8179_v24 = vld [vmem:[%s12392_s4 + $0xe4] ss:$100 sps:$4 sm:$0xff]  }
  0xe8   :  { %v475_v23 = vsel %vm413_vm12, %v382_v63, %v444_v22  ;;  %v398_v36 = vadd.f32 %v8760_v39, %v361_v9  ;;  %vm428_vm13 = vcmp.ge.f32.partialorder %v397_v11, 0.0  ;;  %v459_v43 = vmul.f32 0.01, %v397_v11  ;;  %v8180_v63 = vld [vmem:[%s12392_s4 + $0xe8] ss:$100 sps:$4 sm:$0xff]  }
  0xe9   :  { %v8956_v45 = vpack.c.bf16 %v475_v23, %v474_v48  ;;  %v383_v55 = vadd.f32 %v8760_v39, %v346_v35  ;;  %v384_v13 = vadd.f32 %v8760_v39, %v347_v49  ;;  %v399_v57 = vadd.f32 %v8760_v39, %v362_v4  ;;  %v8181_v32 = vld [vmem:[%s12392_s4 + $0x1c] ss:$100 sps:$4 sm:$0xff]  }
  0xea   :  { %vm429_vm14 = vcmp.ge.f32.partialorder %v398_v36, 0.0  ;;  %v460_v44 = vmul.f32 0.01, %v398_v36  ;;  %v490_v56 = vsel %vm428_vm13, %v397_v11, %v459_v43  ;;  %v8182_v16 = vld [vmem:[%s12392_s4 + $0x20] ss:$100 sps:$4 sm:$0xff]  }
  0xeb   :  { %7159 = vmatprep.mubr.msk.bf16.mxu0 %vm92_vm0, %v8956_v45  ;;  %vm414_vm15 = vcmp.ge.f32.partialorder %v383_v55, 0.0  ;;  %vm415_vm1 = vcmp.ge.f32.partialorder %v384_v13, 0.0  ;;  %v445_v26 = vmul.f32 0.01, %v383_v55  ;;  %v446_v15 = vmul.f32 0.01, %v384_v13 }
  0xec   :  { %v491_v61 = vsel %vm429_vm14, %v398_v36, %v460_v44  ;;  %vm430_vm2 = vcmp.ge.f32.partialorder %v399_v57, 0.0  ;;  %v461_v58 = vmul.f32 0.01, %v399_v57  ;;  %v9194_v41 = vld [vmem:[%s12392_s4 + $0x27c] ss:$100 sps:$4 sm:$0xff]  }
  0xed   :  { %v8963_v62 = vpack.c.bf16 %v491_v61, %v490_v56  ;;  %v476_v53 = vsel %vm414_vm15, %v383_v55, %v445_v26  ;;  %v477_v54 = vsel %vm415_vm1, %v384_v13, %v446_v15  ;;  %v9199_v0 = vld [vmem:[%s12392_s4 + $0x280] ss:$100 sps:$4 sm:$0xff]  }
  0xee   :  { %v8965_v34 = vpack.c.bf16 %v477_v54, %v476_v53  ;;  %v492_v39 = vsel %vm430_vm2, %v399_v57, %v461_v58 }
  0xef   :  { %7175 = vmatprep.mubr.msk.bf16.mxu1 %vm92_vm0, %v8963_v62  ;;  %v8969_v18 = vpack.c.bf16 %v492_v39, %v492_v39 }
  0xf0   :  { %7160 = vmatmul.mubr.msk.bf16.gmra.mxu0 %vm92_vm0, %v8965_v34 }
  0xf1   :  { %7176 = vmatmul.mubr.msk.bf16.gmra.mxu1 %vm92_vm0, %v8969_v18  ;;  %7227 = vmatprep.mubr.msk.bf16.mxu0 %vm92_vm0, %v8786_v2 }
  0xf2   :  { %7187 = vmatprep.mubr.msk.bf16.mxu1 %vm92_vm0, %v8786_v2 }
  0xf8   :  { %7228 = vmatmul.mubr.msk.bf16.vlgmr.msra.gmra.mxu0 %vm92_vm0, %v8802_v3 }
  0xf9   :  { %7188 = vmatmul.mubr.msk.bf16.vlgmr.msra.gmra.mxu1 %vm92_vm0, %v8802_v3  ;;  %7300 = vmatpush3.bf16.msra.mxu0 %v8889_v52  ;;  %v8166_v52 = vld [vmem:[%s12392_s4 + $0x10] ss:$100 sps:$4 sm:$0xff]  }
  0xfa   :  { %7260 = vmatpush3.bf16.msra.mxu1 %v8880_v10  ;;  %7191 = vmatprep.mubr.msk.bf16.mxu1 %vm92_vm0, %v8845_v28  ;;  %v8165_v10 = vld [vmem:[%s12392_s4 + $0xc] ss:$100 sps:$4 sm:$0xff]  }
  0xfb   :  { %7231 = vmatprep.mubr.msk.bf16.mxu0 %vm92_vm0, %v8845_v28  ;;  %7261 = vmatprep.subr.bf16.mxu1 %v8161_v30 }
  0xfc   :  { %7301 = vmatprep.subr.bf16.mxu0 %v8162_v31 }
  0xfd   :  { %7302 = vmatpush3.bf16.msra.mxu0 %v8162_v31 }
  0xfe   :  { %7262 = vmatpush3.bf16.msra.mxu1 %v8161_v30  ;;  %7303 = vmatprep.subr.bf16.mxu0 %v8164_v7 }
  0xff   :  { %7263 = vmatprep.subr.bf16.mxu1 %v8163_v17 }
 0x100   :  { %7232 = vmatmul.mubr.msk.bf16.gmra.mxu0 %vm92_vm0, %v8870_v25 }
 0x101   :  { %7192 = vmatmul.mubr.msk.bf16.gmra.mxu1 %vm92_vm0, %v8870_v25  ;;  %7235 = vmatprep.mubr.msk.bf16.mxu0 %vm92_vm0, %v8911_v27 }
 0x102   :  { %7195 = vmatprep.mubr.msk.bf16.mxu1 %vm92_vm0, %v8911_v27  ;;  %7264 = vmatpush3.bf16.msra.mxu1 %v8163_v17 }
 0x103   :  { %7304 = vmatpush3.bf16.msra.mxu0 %v8164_v7  ;;  %7265 = vmatprep.subr.bf16.mxu1 %v8165_v10 }
 0x104   :  { %7305 = vmatprep.subr.bf16.mxu0 %v8166_v52 }
 0x106   :  { %7266 = vmatpush3.bf16.msra.mxu1 %v8165_v10 }
 0x107   :  { %7306 = vmatpush3.bf16.msra.mxu0 %v8166_v52  ;;  %7339 = vmatprep.subr.bf16.mxu1 %v8167_v38 }
 0x108   :  { %7236 = vmatmul.mubr.msk.bf16.gmra.mxu0 %vm92_vm0, %v8931_v46  ;;  %7379 = vmatprep.subr.bf16.mxu0 %v8168_v40 }
 0x109   :  { %7196 = vmatmul.mubr.msk.bf16.gmra.mxu1 %vm92_vm0, %v8931_v46  ;;  %7239 = vmatprep.mubr.msk.bf16.mxu0 %vm92_vm0, %v8956_v45 }
 0x10a   :  { %7199 = vmatprep.mubr.msk.bf16.mxu1 %vm92_vm0, %v8956_v45 }
 0x110   :  { %7240 = vmatmul.mubr.msk.bf16.gmra.mxu0 %vm92_vm0, %v8965_v34 }
 0x111   :  { %7200 = vmatmul.mubr.msk.bf16.gmra.mxu1 %vm92_vm0, %v8965_v34  ;;  %7243 = vmatprep.mubr.msk.bf16.mxu0 %vm92_vm0, %v8788_v20 }
 0x112   :  { %7203 = vmatprep.mubr.msk.bf16.mxu1 %vm92_vm0, %v8788_v20 }
 0x118   :  { %7244 = vmatmul.mubr.msk.bf16.gmra.mxu0 %vm92_vm0, %v8808_v8 }
 0x119   :  { %7204 = vmatmul.mubr.msk.bf16.gmra.mxu1 %vm92_vm0, %v8808_v8  ;;  %7247 = vmatprep.mubr.msk.bf16.mxu0 %vm92_vm0, %v8850_v29 }
 0x11a   :  { %7207 = vmatprep.mubr.msk.bf16.mxu1 %vm92_vm0, %v8850_v29 }
 0x120   :  { %7248 = vmatmul.mubr.msk.bf16.gmra.mxu0 %vm92_vm0, %v8900_v12 }
 0x121   :  { %7208 = vmatmul.mubr.msk.bf16.gmra.mxu1 %vm92_vm0, %v8900_v12  ;;  %7251 = vmatprep.mubr.msk.bf16.mxu0 %vm92_vm0, %v8914_v21 }
 0x122   :  { %7211 = vmatprep.mubr.msk.bf16.mxu1 %vm92_vm0, %v8914_v21 }
 0x128   :  { %7252 = vmatmul.mubr.msk.bf16.gmra.mxu0 %vm92_vm0, %v8946_v19 }
 0x129   :  { %7212 = vmatmul.mubr.msk.bf16.gmra.mxu1 %vm92_vm0, %v8946_v19  ;;  %7255 = vmatprep.mubr.msk.bf16.mxu0 %vm92_vm0, %v8963_v62 }
 0x12a   :  { %7215 = vmatprep.mubr.msk.bf16.mxu1 %vm92_vm0, %v8963_v62 }
 0x130   :  { %7256 = vmatmul.mubr.msk.bf16.gmra.mxu0 %vm92_vm0, %v8969_v18 }
 0x131   :  { %7216 = vmatmul.mubr.msk.bf16.gmra.mxu1 %vm92_vm0, %v8969_v18  ;;  %7307 = vmatprep.mubr.msk.bf16.mxu0 %vm92_vm0, %v8786_v2 }
 0x132   :  { %7267 = vmatprep.mubr.msk.bf16.mxu1 %vm92_vm0, %v8786_v2 }
 0x138   :  { %7308 = vmatmul.mubr.msk.bf16.vlgmr.msra.gmra.mxu0 %vm92_vm0, %v8802_v3 }
 0x139   :  { %7268 = vmatmul.mubr.msk.bf16.vlgmr.msra.gmra.mxu1 %vm92_vm0, %v8802_v3  ;;  %7380 = vmatpush3.bf16.msra.mxu0 %v8168_v40 }
 0x13a   :  { %7340 = vmatpush3.bf16.msra.mxu1 %v8167_v38  ;;  %7271 = vmatprep.mubr.msk.bf16.mxu1 %vm92_vm0, %v8845_v28 }
 0x13b   :  { %7311 = vmatprep.mubr.msk.bf16.mxu0 %vm92_vm0, %v8845_v28  ;;  %7341 = vmatprep.subr.bf16.mxu1 %v8169_v59 }
 0x13c   :  { %7381 = vmatprep.subr.bf16.mxu0 %v8170_v60 }
 0x13d   :  { %7382 = vmatpush3.bf16.msra.mxu0 %v8170_v60 }
 0x13e   :  { %7342 = vmatpush3.bf16.msra.mxu1 %v8169_v59  ;;  %7383 = vmatprep.subr.bf16.mxu0 %v8172_v50  ;;  %v8185_v59 = vld [vmem:[%s12392_s4 + $0x1b4] ss:$100 sps:$4 sm:$0xff]  }
 0x13f   :  { %7343 = vmatprep.subr.bf16.mxu1 %v8171_v51 }
 0x140   :  { %7312 = vmatmul.mubr.msk.bf16.gmra.mxu0 %vm92_vm0, %v8870_v25 }
 0x141   :  { %7272 = vmatmul.mubr.msk.bf16.gmra.mxu1 %vm92_vm0, %v8870_v25  ;;  %7315 = vmatprep.mubr.msk.bf16.mxu0 %vm92_vm0, %v8911_v27 }
 0x142   :  { %7275 = vmatprep.mubr.msk.bf16.mxu1 %vm92_vm0, %v8911_v27  ;;  %7344 = vmatpush3.bf16.msra.mxu1 %v8171_v51 }
 0x143   :  { %7384 = vmatpush3.bf16.msra.mxu0 %v8172_v50  ;;  %7345 = vmatprep.subr.bf16.mxu1 %v8173_v5  ;;  %v8186_v50 = vld [vmem:[%s12392_s4 + $0x1b8] ss:$100 sps:$4 sm:$0xff]  }
 0x144   :  { %7385 = vmatprep.subr.bf16.mxu0 %v8174_v6 }
 0x146   :  { %7346 = vmatpush3.bf16.msra.mxu1 %v8173_v5 }
 0x147   :  { %7386 = vmatpush3.bf16.msra.mxu0 %v8174_v6  ;;  %7419 = vmatprep.subr.bf16.mxu1 %v8175_v42  ;;  %v8188_v6 = vld [vmem:[%s12392_s4 + $0xf0] ss:$100 sps:$4 sm:$0xff]  }
 0x148   :  { %7316 = vmatmul.mubr.msk.bf16.gmra.mxu0 %vm92_vm0, %v8931_v46  ;;  %7459 = vmatprep.subr.bf16.mxu0 %v8176_v47 }
 0x149   :  { %7276 = vmatmul.mubr.msk.bf16.gmra.mxu1 %vm92_vm0, %v8931_v46  ;;  %7319 = vmatprep.mubr.msk.bf16.mxu0 %vm92_vm0, %v8956_v45 }
 0x14a   :  { %7279 = vmatprep.mubr.msk.bf16.mxu1 %vm92_vm0, %v8956_v45 }
 0x150   :  { %7320 = vmatmul.mubr.msk.bf16.gmra.mxu0 %vm92_vm0, %v8965_v34 }
 0x151   :  { %7280 = vmatmul.mubr.msk.bf16.gmra.mxu1 %vm92_vm0, %v8965_v34  ;;  %7323 = vmatprep.mubr.msk.bf16.mxu0 %vm92_vm0, %v8788_v20 }
 0x152   :  { %7283 = vmatprep.mubr.msk.bf16.mxu1 %vm92_vm0, %v8788_v20 }
 0x158   :  { %7324 = vmatmul.mubr.msk.bf16.gmra.mxu0 %vm92_vm0, %v8808_v8 }
 0x159   :  { %7284 = vmatmul.mubr.msk.bf16.gmra.mxu1 %vm92_vm0, %v8808_v8  ;;  %7327 = vmatprep.mubr.msk.bf16.mxu0 %vm92_vm0, %v8850_v29 }
 0x15a   :  { %7287 = vmatprep.mubr.msk.bf16.mxu1 %vm92_vm0, %v8850_v29 }
 0x160   :  { %7328 = vmatmul.mubr.msk.bf16.gmra.mxu0 %vm92_vm0, %v8900_v12 }
 0x161   :  { %7288 = vmatmul.mubr.msk.bf16.gmra.mxu1 %vm92_vm0, %v8900_v12  ;;  %7331 = vmatprep.mubr.msk.bf16.mxu0 %vm92_vm0, %v8914_v21 }
 0x162   :  { %7291 = vmatprep.mubr.msk.bf16.mxu1 %vm92_vm0, %v8914_v21 }
 0x168   :  { %7332 = vmatmul.mubr.msk.bf16.gmra.mxu0 %vm92_vm0, %v8946_v19 }
 0x169   :  { %7292 = vmatmul.mubr.msk.bf16.gmra.mxu1 %vm92_vm0, %v8946_v19  ;;  %7335 = vmatprep.mubr.msk.bf16.mxu0 %vm92_vm0, %v8963_v62 }
 0x16a   :  { %7295 = vmatprep.mubr.msk.bf16.mxu1 %vm92_vm0, %v8963_v62 }
 0x170   :  { %7336 = vmatmul.mubr.msk.bf16.gmra.mxu0 %vm92_vm0, %v8969_v18 }
 0x171   :  { %7296 = vmatmul.mubr.msk.bf16.gmra.mxu1 %vm92_vm0, %v8969_v18  ;;  %7387 = vmatprep.mubr.msk.bf16.mxu0 %vm92_vm0, %v8786_v2 }
 0x172   :  { %7347 = vmatprep.mubr.msk.bf16.mxu1 %vm92_vm0, %v8786_v2 }
 0x178   :  { %7388 = vmatmul.mubr.msk.bf16.vlgmr.msra.gmra.mxu0 %vm92_vm0, %v8802_v3 }
 0x179   :  { %7348 = vmatmul.mubr.msk.bf16.vlgmr.msra.gmra.mxu1 %vm92_vm0, %v8802_v3  ;;  %7460 = vmatpush3.bf16.msra.mxu0 %v8176_v47  ;;  %v8187_v47 = vld [vmem:[%s12392_s4 + $0xec] ss:$100 sps:$4 sm:$0xff]  }
 0x17a   :  { %7420 = vmatpush3.bf16.msra.mxu1 %v8175_v42  ;;  %7351 = vmatprep.mubr.msk.bf16.mxu1 %vm92_vm0, %v8845_v28 }
 0x17b   :  { %7391 = vmatprep.mubr.msk.bf16.mxu0 %vm92_vm0, %v8845_v28  ;;  %7421 = vmatprep.subr.bf16.mxu1 %v8177_v1 }
 0x17c   :  { %7461 = vmatprep.subr.bf16.mxu0 %v8178_v33 }
 0x17d   :  { %7462 = vmatpush3.bf16.msra.mxu0 %v8178_v33 }
 0x17e   :  { %7422 = vmatpush3.bf16.msra.mxu1 %v8177_v1  ;;  %7463 = vmatprep.subr.bf16.mxu0 %v8180_v63 }
 0x17f   :  { %7423 = vmatprep.subr.bf16.mxu1 %v8179_v24 }
 0x180   :  { %7392 = vmatmul.mubr.msk.bf16.gmra.mxu0 %vm92_vm0, %v8870_v25 }
 0x181   :  { %7352 = vmatmul.mubr.msk.bf16.gmra.mxu1 %vm92_vm0, %v8870_v25  ;;  %7395 = vmatprep.mubr.msk.bf16.mxu0 %vm92_vm0, %v8911_v27 }
 0x182   :  { %7355 = vmatprep.mubr.msk.bf16.mxu1 %vm92_vm0, %v8911_v27  ;;  %7424 = vmatpush3.bf16.msra.mxu1 %v8179_v24 }
 0x183   :  { %7464 = vmatpush3.bf16.msra.mxu0 %v8180_v63  ;;  %7425 = vmatprep.subr.bf16.mxu1 %v8181_v32 }
 0x184   :  { %7465 = vmatprep.subr.bf16.mxu0 %v8182_v16 }
 0x186   :  { %7426 = vmatpush3.bf16.msra.mxu1 %v8181_v32  ;;  %v8189_v32 = vld [vmem:[%s12392_s4 + $0x24] ss:$100 sps:$4 sm:$0xff]  }
 0x187   :  { %7466 = vmatpush3.bf16.msra.mxu0 %v8182_v16  ;;  %7499 = vmatprep.subr.bf16.mxu1 %v9194_v41 }
 0x188   :  { %7396 = vmatmul.mubr.msk.bf16.gmra.mxu0 %vm92_vm0, %v8931_v46  ;;  %7539 = vmatprep.subr.bf16.mxu0 %v9199_v0 }
 0x189   :  { %7356 = vmatmul.mubr.msk.bf16.gmra.mxu1 %vm92_vm0, %v8931_v46  ;;  %7399 = vmatprep.mubr.msk.bf16.mxu0 %vm92_vm0, %v8956_v45 }
 0x18a   :  { %7359 = vmatprep.mubr.msk.bf16.mxu1 %vm92_vm0, %v8956_v45  ;;  %v7149_v14 = vpop.f32.mrf.mxu0 }
 0x18b   :  { %751 = vst [vmem:[%s12397_s5 + $0x190] sm:$0xff] %v7149_v14  ;;  %v7165_v37 = vpop.f32.mrf.mxu1 }
 0x18c   :  { %767 = vst [vmem:[%s12397_s5 + $0xe10] sm:$0xff] %v7165_v37  ;;  %v623_v22 = vpop.f32.mrf.mxu0 }
 0x18d   :  { %749 = vst [vmem:[%s12397_s5] sm:$0xff] %v623_v22  ;;  %v687_v9 = vpop.f32.mrf.mxu1  ;;  %v9416_v22 = vld [vmem:[%s12392_s4 + $0x284] ss:$100 sps:$4 sm:$0xff]  }
 0x18e   :  { %765 = vst [vmem:[%s12397_s5 + $0xc80] sm:$0xff] %v687_v9  ;;  %v7150_v11 = vpop.f32.mrf.mxu0 }
 0x18f   :  { %752 = vst [vmem:[%s12397_s5 + $0x258] sm:$0xff] %v7150_v11  ;;  %v7166_v35 = vpop.f32.mrf.mxu1  ;;  %v9424_v11 = vld [vmem:[%s12392_s4 + $0x288] ss:$100 sps:$4 sm:$0xff]  }
 0x190   :  { %7400 = vmatmul.mubr.msk.bf16.gmra.mxu0 %vm92_vm0, %v8965_v34  ;;  %768 = vst [vmem:[%s12397_s5 + $0xed8] sm:$0xff] %v7166_v35  ;;  %v626_v48 = vpop.f32.mrf.mxu0 }
 0x191   :  { %7360 = vmatmul.mubr.msk.bf16.gmra.mxu1 %vm92_vm0, %v8965_v34  ;;  %7403 = vmatprep.mubr.msk.bf16.mxu0 %vm92_vm0, %v8788_v20  ;;  %750 = vst [vmem:[%s12397_s5 + $0xc8] sm:$0xff] %v626_v48  ;;  %v690_v49 = vpop.f32.mrf.mxu1 }
 0x192   :  { %7363 = vmatprep.mubr.msk.bf16.mxu1 %vm92_vm0, %v8788_v20  ;;  %766 = vst [vmem:[%s12397_s5 + $0xd48] sm:$0xff] %v690_v49 }
 0x196   :  { %v7153_v4 = vpop.f32.mrf.mxu0 }
 0x197   :  { %755 = vst [vmem:[%s12397_s5 + $0x4b0] sm:$0xff] %v7153_v4 }
 0x198   :  { %7404 = vmatmul.mubr.msk.bf16.gmra.mxu0 %vm92_vm0, %v8808_v8  ;;  %v639_v23 = vpop.f32.mrf.mxu0 }
 0x199   :  { %7364 = vmatmul.mubr.msk.bf16.gmra.mxu1 %vm92_vm0, %v8808_v8  ;;  %7407 = vmatprep.mubr.msk.bf16.mxu0 %vm92_vm0, %v8850_v29  ;;  %753 = vst [vmem:[%s12397_s5 + $0x320] sm:$0xff] %v639_v23 }
 0x19a   :  { %7367 = vmatprep.mubr.msk.bf16.mxu1 %vm92_vm0, %v8850_v29  ;;  %v7154_v36 = vpop.f32.mrf.mxu0 }
 0x19b   :  { %v7169_v43 = vpop.f32.mrf.mxu1  ;;  %756 = vst [vmem:[%s12397_s5 + $0x578] sm:$0xff] %v7154_v36 }
 0x19c   :  { %771 = vst [vmem:[%s12397_s5 + $0x1130] sm:$0xff] %v7169_v43  ;;  %v642_v55 = vpop.f32.mrf.mxu0 }
 0x19d   :  { %v703_v13 = vpop.f32.mrf.mxu1  ;;  %754 = vst [vmem:[%s12397_s5 + $0x3e8] sm:$0xff] %v642_v55 }
 0x19e   :  { %769 = vst [vmem:[%s12397_s5 + $0xfa0] sm:$0xff] %v703_v13 }
 0x19f   :  { %v7170_v57 = vpop.f32.mrf.mxu1 }
 0x1a0   :  { %7408 = vmatmul.mubr.msk.bf16.gmra.mxu0 %vm92_vm0, %v8900_v12  ;;  %772 = vst [vmem:[%s12397_s5 + $0x11f8] sm:$0xff] %v7170_v57 }
 0x1a1   :  { %7368 = vmatmul.mubr.msk.bf16.gmra.mxu1 %vm92_vm0, %v8900_v12  ;;  %v706_v44 = vpop.f32.mrf.mxu1  ;;  %7411 = vmatprep.mubr.msk.bf16.mxu0 %vm92_vm0, %v8914_v21 }
 0x1a2   :  { %770 = vst [vmem:[%s12397_s5 + $0x1068] sm:$0xff] %v706_v44  ;;  %7371 = vmatprep.mubr.msk.bf16.mxu1 %vm92_vm0, %v8914_v21 }
 0x1a4   :  { %v7157_v56 = vpop.f32.mrf.mxu0 }
 0x1a5   :  { %759 = vst [vmem:[%s12397_s5 + $0x7d0] sm:$0xff] %v7157_v56 }
 0x1a6   :  { %v655_v26 = vpop.f32.mrf.mxu0 }
 0x1a7   :  { %v7173_v15 = vpop.f32.mrf.mxu1  ;;  %757 = vst [vmem:[%s12397_s5 + $0x640] sm:$0xff] %v655_v26 }
 0x1a8   :  { %775 = vst [vmem:[%s12397_s5 + $0x1450] sm:$0xff] %v7173_v15  ;;  %7412 = vmatmul.mubr.msk.bf16.gmra.mxu0 %vm92_vm0, %v8946_v19  ;;  %v7158_v61 = vpop.f32.mrf.mxu0 }
 0x1a9   :  { %7372 = vmatmul.mubr.msk.bf16.gmra.mxu1 %vm92_vm0, %v8946_v19  ;;  %v719_v58 = vpop.f32.mrf.mxu1  ;;  %760 = vst [vmem:[%s12397_s5 + $0x898] sm:$0xff] %v7158_v61  ;;  %7415 = vmatprep.mubr.msk.bf16.mxu0 %vm92_vm0, %v8963_v62 }
 0x1aa   :  { %773 = vst [vmem:[%s12397_s5 + $0x12c0] sm:$0xff] %v719_v58  ;;  %v658_v53 = vpop.f32.mrf.mxu0  ;;  %7375 = vmatprep.mubr.msk.bf16.mxu1 %vm92_vm0, %v8963_v62 }
 0x1ab   :  { %v7174_v54 = vpop.f32.mrf.mxu1  ;;  %758 = vst [vmem:[%s12397_s5 + $0x708] sm:$0xff] %v658_v53 }
 0x1ac   :  { %776 = vst [vmem:[%s12397_s5 + $0x1518] sm:$0xff] %v7174_v54 }
 0x1ad   :  { %v722_v39 = vpop.f32.mrf.mxu1 }
 0x1ae   :  { %774 = vst [vmem:[%s12397_s5 + $0x1388] sm:$0xff] %v722_v39 }
 0x1b0   :  { %v7161_v30 = vpop.f32.mrf.mxu0  ;;  %7416 = vmatmul.mubr.msk.bf16.gmra.mxu0 %vm92_vm0, %v8969_v18 }
 0x1b1   :  { %763 = vst [vmem:[%s12397_s5 + $0xaf0] sm:$0xff] %v7161_v30  ;;  %v7177_v31 = vpop.f32.mrf.mxu1  ;;  %7376 = vmatmul.mubr.msk.bf16.gmra.mxu1 %vm92_vm0, %v8969_v18  ;;  %7467 = vmatprep.mubr.msk.bf16.mxu0 %vm92_vm0, %v8786_v2 }
 0x1b2   :  { %779 = vst [vmem:[%s12397_s5 + $0x1770] sm:$0x3] %v7177_v31  ;;  %v671_v7 = vpop.f32.mrf.mxu0  ;;  %7427 = vmatprep.mubr.msk.bf16.mxu1 %vm92_vm0, %v8786_v2 }
 0x1b3   :  { %761 = vst [vmem:[%s12397_s5 + $0x960] sm:$0xff] %v671_v7  ;;  %v735_v17 = vpop.f32.mrf.mxu1 }
 0x1b4   :  { %777 = vst [vmem:[%s12397_s5 + $0x15e0] sm:$0xff] %v735_v17  ;;  %v7162_v10 = vpop.f32.mrf.mxu0 }
 0x1b5   :  { %764 = vst [vmem:[%s12397_s5 + $0xbb8] sm:$0xff] %v7162_v10  ;;  %v7178_v52 = vpop.f32.mrf.mxu1 }
 0x1b6   :  { %v674_v38 = vpop.f32.mrf.mxu0 }
 0x1b7   :  { %762 = vst [vmem:[%s12397_s5 + $0xa28] sm:$0xff] %v674_v38  ;;  %v738_v40 = vpop.f32.mrf.mxu1 }
 0x1b8   :  { %778 = vst [vmem:[%s12397_s5 + $0x16a8] sm:$0xff] %v738_v40  ;;  %v7229_v60 = vpop.f32.mrf.mxu0  ;;  %7468 = vmatmul.mubr.msk.bf16.vlgmr.msra.gmra.mxu0 %vm92_vm0, %v8802_v3 }
 0x1b9   :  { %v7189_v51 = vpop.f32.mrf.mxu1  ;;  %1197 = vst [vmem:[%s12397_s5 + $0x1a0] sm:$0xff] %v7229_v60  ;;  %7428 = vmatmul.mubr.msk.bf16.vlgmr.msra.gmra.mxu1 %vm92_vm0, %v8802_v3  ;;  %7540 = vmatpush3.bf16.msra.mxu0 %v9199_v0 }
 0x1ba   :  { %974 = vst [vmem:[%s12397_s5 + $0x198] sm:$0xff] %v7189_v51  ;;  %7500 = vmatpush3.bf16.msra.mxu1 %v9194_v41  ;;  %v1069_v5 = vpop.f32.mrf.mxu0  ;;  %7431 = vmatprep.mubr.msk.bf16.mxu1 %vm92_vm0, %v8845_v28  ;;  %v8190_v41 = vld [vmem:[%s12392_s4 + $0x28] ss:$100 sps:$4 sm:$0xff]  }
 0x1bb   :  { %v846_v42 = vpop.f32.mrf.mxu1  ;;  %1195 = vst [vmem:[%s12397_s5 + $0x10] sm:$0xff] %v1069_v5  ;;  %7471 = vmatprep.mubr.msk.bf16.mxu0 %vm92_vm0, %v8845_v28  ;;  %7501 = vmatprep.subr.bf16.mxu1 %v8185_v59 }
 0x1bc   :  { %972 = vst [vmem:[%s12397_s5 + $0x8] sm:$0xff] %v846_v42  ;;  %v7230_v1 = vpop.f32.mrf.mxu0  ;;  %7541 = vmatprep.subr.bf16.mxu0 %v8186_v50 }
 0x1bd   :  { %v7190_v33 = vpop.f32.mrf.mxu1  ;;  %1198 = vst [vmem:[%s12397_s5 + $0x268] sm:$0xff] %v7230_v1  ;;  %7542 = vmatpush3.bf16.msra.mxu0 %v8186_v50 }
 0x1be   :  { %975 = vst [vmem:[%s12397_s5 + $0x260] sm:$0xff] %v7190_v33  ;;  %v1072_v63 = vpop.f32.mrf.mxu0  ;;  %7502 = vmatpush3.bf16.msra.mxu1 %v8185_v59  ;;  %7543 = vmatprep.subr.bf16.mxu0 %v8188_v6 }
 0x1bf   :  { %v849_v24 = vpop.f32.mrf.mxu1  ;;  %1196 = vst [vmem:[%s12397_s5 + $0xd8] sm:$0xff] %v1072_v63  ;;  %7503 = vmatprep.subr.bf16.mxu1 %v8187_v47 }
 0x1c0   :  { %973 = vst [vmem:[%s12397_s5 + $0xd0] sm:$0xff] %v849_v24  ;;  %v7233_v16 = vpop.f32.mrf.mxu0  ;;  %7472 = vmatmul.mubr.msk.bf16.gmra.mxu0 %vm92_vm0, %v8870_v25 }
 0x1c1   :  { %v7193_v0 = vpop.f32.mrf.mxu1  ;;  %1201 = vst [vmem:[%s12397_s5 + $0x4c0] sm:$0xff] %v7233_v16  ;;  %7432 = vmatmul.mubr.msk.bf16.gmra.mxu1 %vm92_vm0, %v8870_v25  ;;  %7475 = vmatprep.mubr.msk.bf16.mxu0 %vm92_vm0, %v8911_v27 }
 0x1c2   :  { %978 = vst [vmem:[%s12397_s5 + $0x4b8] sm:$0xff] %v7193_v0  ;;  %v1085_v14 = vpop.f32.mrf.mxu0  ;;  %7435 = vmatprep.mubr.msk.bf16.mxu1 %vm92_vm0, %v8911_v27  ;;  %7504 = vmatpush3.bf16.msra.mxu1 %v8187_v47 }
 0x1c3   :  { %v862_v37 = vpop.f32.mrf.mxu1  ;;  %1199 = vst [vmem:[%s12397_s5 + $0x330] sm:$0xff] %v1085_v14  ;;  %7544 = vmatpush3.bf16.msra.mxu0 %v8188_v6  ;;  %7505 = vmatprep.subr.bf16.mxu1 %v8189_v32 }
 0x1c4   :  { %976 = vst [vmem:[%s12397_s5 + $0x328] sm:$0xff] %v862_v37  ;;  %v7234_v9 = vpop.f32.mrf.mxu0  ;;  %7545 = vmatprep.subr.bf16.mxu0 %v8190_v41 }
 0x1c5   :  { %v7194_v35 = vpop.f32.mrf.mxu1  ;;  %1202 = vst [vmem:[%s12397_s5 + $0x588] sm:$0xff] %v7234_v9 }
 0x1c6   :  { %979 = vst [vmem:[%s12397_s5 + $0x580] sm:$0xff] %v7194_v35  ;;  %v1088_v48 = vpop.f32.mrf.mxu0  ;;  %7506 = vmatpush3.bf16.msra.mxu1 %v8189_v32 }
 0x1c7   :  { %v865_v49 = vpop.f32.mrf.mxu1  ;;  %1200 = vst [vmem:[%s12397_s5 + $0x3f8] sm:$0xff] %v1088_v48  ;;  %7546 = vmatpush3.bf16.msra.mxu0 %v8190_v41  ;;  %7579 = vmatprep.subr.bf16.mxu1 %v9416_v22 }
 0x1c8   :  { %977 = vst [vmem:[%s12397_s5 + $0x3f0] sm:$0xff] %v865_v49  ;;  %v7237_v4 = vpop.f32.mrf.mxu0  ;;  %7476 = vmatmul.mubr.msk.bf16.gmra.mxu0 %vm92_vm0, %v8931_v46  ;;  %7619 = vmatprep.subr.bf16.mxu0 %v9424_v11 }
 0x1c9   :  { %v7197_v23 = vpop.f32.mrf.mxu1  ;;  %1205 = vst [vmem:[%s12397_s5 + $0x7e0] sm:$0xff] %v7237_v4  ;;  %7436 = vmatmul.mubr.msk.bf16.gmra.mxu1 %vm92_vm0, %v8931_v46  ;;  %7479 = vmatprep.mubr.msk.bf16.mxu0 %vm92_vm0, %v8956_v45 }
 0x1ca   :  { %982 = vst [vmem:[%s12397_s5 + $0x7d8] sm:$0xff] %v7197_v23  ;;  %v1101_v36 = vpop.f32.mrf.mxu0  ;;  %7439 = vmatprep.mubr.msk.bf16.mxu1 %vm92_vm0, %v8956_v45 }
 0x1cb   :  { %v878_v43 = vpop.f32.mrf.mxu1  ;;  %1203 = vst [vmem:[%s12397_s5 + $0x650] sm:$0xff] %v1101_v36  ;;  %v8193_v36 = vld [vmem:[%s12392_s4 + $0x1bc] ss:$100 sps:$4 sm:$0xff]  }
 0x1cc   :  { %980 = vst [vmem:[%s12397_s5 + $0x648] sm:$0xff] %v878_v43  ;;  %v7238_v55 = vpop.f32.mrf.mxu0 }
 0x1cd   :  { %v7198_v13 = vpop.f32.mrf.mxu1  ;;  %1206 = vst [vmem:[%s12397_s5 + $0x8a8] sm:$0xff] %v7238_v55  ;;  %v8194_v55 = vld [vmem:[%s12392_s4 + $0x1c0] ss:$100 sps:$4 sm:$0xff]  }
 0x1ce   :  { %983 = vst [vmem:[%s12397_s5 + $0x8a0] sm:$0xff] %v7198_v13  ;;  %v1104_v57 = vpop.f32.mrf.mxu0 }
 0x1cf   :  { %v881_v44 = vpop.f32.mrf.mxu1  ;;  %1204 = vst [vmem:[%s12397_s5 + $0x718] sm:$0xff] %v1104_v57 }
 0x1d0   :  { %981 = vst [vmem:[%s12397_s5 + $0x710] sm:$0xff] %v881_v44  ;;  %v7241_v56 = vpop.f32.mrf.mxu0  ;;  %7480 = vmatmul.mubr.msk.bf16.gmra.mxu0 %vm92_vm0, %v8965_v34  ;;  %v8196_v44 = vld [vmem:[%s12392_s4 + $0xf8] ss:$100 sps:$4 sm:$0xff]  }
 0x1d1   :  { %v7201_v26 = vpop.f32.mrf.mxu1  ;;  %1209 = vst [vmem:[%s12397_s5 + $0xb00] sm:$0xff] %v7241_v56  ;;  %7440 = vmatmul.mubr.msk.bf16.gmra.mxu1 %vm92_vm0, %v8965_v34  ;;  %7483 = vmatprep.mubr.msk.bf16.mxu0 %vm92_vm0, %v8788_v20 }
 0x1d2   :  { %986 = vst [vmem:[%s12397_s5 + $0xaf8] sm:$0xff] %v7201_v26  ;;  %v1117_v15 = vpop.f32.mrf.mxu0  ;;  %7443 = vmatprep.mubr.msk.bf16.mxu1 %vm92_vm0, %v8788_v20 }
 0x1d3   :  { %v894_v61 = vpop.f32.mrf.mxu1  ;;  %1207 = vst [vmem:[%s12397_s5 + $0x970] sm:$0xff] %v1117_v15 }
 0x1d4   :  { %984 = vst [vmem:[%s12397_s5 + $0x968] sm:$0xff] %v894_v61  ;;  %v7242_v58 = vpop.f32.mrf.mxu0 }
 0x1d5   :  { %v7202_v53 = vpop.f32.mrf.mxu1  ;;  %1210 = vst [vmem:[%s12397_s5 + $0xbc8] sm:$0xff] %v7242_v58  ;;  %v8197_v58 = vld [vmem:[%s12392_s4 + $0x2c] ss:$100 sps:$4 sm:$0xff]  }
 0x1d6   :  { %987 = vst [vmem:[%s12397_s5 + $0xbc0] sm:$0xff] %v7202_v53  ;;  %v1120_v54 = vpop.f32.mrf.mxu0 }
 0x1d7   :  { %v897_v39 = vpop.f32.mrf.mxu1  ;;  %1208 = vst [vmem:[%s12397_s5 + $0xa38] sm:$0xff] %v1120_v54  ;;  %v8198_v54 = vld [vmem:[%s12392_s4 + $0x30] ss:$100 sps:$4 sm:$0xff]  }
 0x1d8   :  { %985 = vst [vmem:[%s12397_s5 + $0xa30] sm:$0xff] %v897_v39  ;;  %v7245_v30 = vpop.f32.mrf.mxu0  ;;  %7484 = vmatmul.mubr.msk.bf16.gmra.mxu0 %vm92_vm0, %v8808_v8 }
 0x1d9   :  { %v7205_v31 = vpop.f32.mrf.mxu1  ;;  %1213 = vst [vmem:[%s12397_s5 + $0xe20] sm:$0xff] %v7245_v30  ;;  %7444 = vmatmul.mubr.msk.bf16.gmra.mxu1 %vm92_vm0, %v8808_v8  ;;  %7487 = vmatprep.mubr.msk.bf16.mxu0 %vm92_vm0, %v8850_v29 }
 0x1da   :  { %990 = vst [vmem:[%s12397_s5 + $0xe18] sm:$0xff] %v7205_v31  ;;  %v1133_v7 = vpop.f32.mrf.mxu0  ;;  %7447 = vmatprep.mubr.msk.bf16.mxu1 %vm92_vm0, %v8850_v29 }
 0x1db   :  { %v910_v17 = vpop.f32.mrf.mxu1  ;;  %1211 = vst [vmem:[%s12397_s5 + $0xc90] sm:$0xff] %v1133_v7  ;;  %v9698_v7 = vld [vmem:[%s12392_s4 + $0x28c] ss:$100 sps:$4 sm:$0xff]  }
 0x1dc   :  { %988 = vst [vmem:[%s12397_s5 + $0xc88] sm:$0xff] %v910_v17  ;;  %v7246_v10 = vpop.f32.mrf.mxu0 }
 0x1dd   :  { %v7206_v52 = vpop.f32.mrf.mxu1  ;;  %1214 = vst [vmem:[%s12397_s5 + $0xee8] sm:$0xff] %v7246_v10  ;;  %v9706_v10 = vld [vmem:[%s12392_s4 + $0x290] ss:$100 sps:$4 sm:$0xff]  }
 0x1de   :  { %991 = vst [vmem:[%s12397_s5 + $0xee0] sm:$0xff] %v7206_v52  ;;  %v1136_v38 = vpop.f32.mrf.mxu0 }
 0x1df   :  { %v913_v40 = vpop.f32.mrf.mxu1  ;;  %1212 = vst [vmem:[%s12397_s5 + $0xd58] sm:$0xff] %v1136_v38 }
 0x1e0   :  { %989 = vst [vmem:[%s12397_s5 + $0xd50] sm:$0xff] %v913_v40  ;;  %v7249_v59 = vpop.f32.mrf.mxu0  ;;  %7488 = vmatmul.mubr.msk.bf16.gmra.mxu0 %vm92_vm0, %v8900_v12 }
 0x1e1   :  { %v7209_v60 = vpop.f32.mrf.mxu1  ;;  %1217 = vst [vmem:[%s12397_s5 + $0x1140] sm:$0xff] %v7249_v59  ;;  %7448 = vmatmul.mubr.msk.bf16.gmra.mxu1 %vm92_vm0, %v8900_v12  ;;  %7491 = vmatprep.mubr.msk.bf16.mxu0 %vm92_vm0, %v8914_v21 }
 0x1e2   :  { %994 = vst [vmem:[%s12397_s5 + $0x1138] sm:$0xff] %v7209_v60  ;;  %v1149_v50 = vpop.f32.mrf.mxu0  ;;  %7451 = vmatprep.mubr.msk.bf16.mxu1 %vm92_vm0, %v8914_v21 }
 0x1e3   :  { %v926_v51 = vpop.f32.mrf.mxu1  ;;  %1215 = vst [vmem:[%s12397_s5 + $0xfb0] sm:$0xff] %v1149_v50 }
 0x1e4   :  { %992 = vst [vmem:[%s12397_s5 + $0xfa8] sm:$0xff] %v926_v51  ;;  %v7250_v5 = vpop.f32.mrf.mxu0 }
 0x1e5   :  { %v7210_v6 = vpop.f32.mrf.mxu1  ;;  %1218 = vst [vmem:[%s12397_s5 + $0x1208] sm:$0xff] %v7250_v5 }
 0x1e6   :  { %995 = vst [vmem:[%s12397_s5 + $0x1200] sm:$0xff] %v7210_v6  ;;  %v1152_v42 = vpop.f32.mrf.mxu0 }
 0x1e7   :  { %v929_v47 = vpop.f32.mrf.mxu1  ;;  %1216 = vst [vmem:[%s12397_s5 + $0x1078] sm:$0xff] %v1152_v42 }
 0x1e8   :  { %993 = vst [vmem:[%s12397_s5 + $0x1070] sm:$0xff] %v929_v47  ;;  %v7253_v1 = vpop.f32.mrf.mxu0  ;;  %7492 = vmatmul.mubr.msk.bf16.gmra.mxu0 %vm92_vm0, %v8946_v19 }
 0x1e9   :  { %v7213_v33 = vpop.f32.mrf.mxu1  ;;  %1221 = vst [vmem:[%s12397_s5 + $0x1460] sm:$0xff] %v7253_v1  ;;  %7452 = vmatmul.mubr.msk.bf16.gmra.mxu1 %vm92_vm0, %v8946_v19  ;;  %7495 = vmatprep.mubr.msk.bf16.mxu0 %vm92_vm0, %v8963_v62 }
 0x1ea   :  { %998 = vst [vmem:[%s12397_s5 + $0x1458] sm:$0xff] %v7213_v33  ;;  %v1165_v63 = vpop.f32.mrf.mxu0  ;;  %7455 = vmatprep.mubr.msk.bf16.mxu1 %vm92_vm0, %v8963_v62 }
 0x1eb   :  { %v942_v24 = vpop.f32.mrf.mxu1  ;;  %1219 = vst [vmem:[%s12397_s5 + $0x12d0] sm:$0xff] %v1165_v63 }
 0x1ec   :  { %996 = vst [vmem:[%s12397_s5 + $0x12c8] sm:$0xff] %v942_v24  ;;  %v7254_v32 = vpop.f32.mrf.mxu0 }
 0x1ed   :  { %v7214_v16 = vpop.f32.mrf.mxu1  ;;  %1222 = vst [vmem:[%s12397_s5 + $0x1528] sm:$0xff] %v7254_v32 }
 0x1ee   :  { %999 = vst [vmem:[%s12397_s5 + $0x1520] sm:$0xff] %v7214_v16  ;;  %v1168_v41 = vpop.f32.mrf.mxu0 }
 0x1ef   :  { %v945_v0 = vpop.f32.mrf.mxu1  ;;  %1220 = vst [vmem:[%s12397_s5 + $0x1398] sm:$0xff] %v1168_v41 }
 0x1f0   :  { %997 = vst [vmem:[%s12397_s5 + $0x1390] sm:$0xff] %v945_v0  ;;  %v7257_v14 = vpop.f32.mrf.mxu0  ;;  %7496 = vmatmul.mubr.msk.bf16.gmra.mxu0 %vm92_vm0, %v8969_v18 }
 0x1f1   :  { %v7217_v37 = vpop.f32.mrf.mxu1  ;;  %1225 = vst [vmem:[%s12397_s5 + $0x1780] sm:$0x3] %v7257_v14  ;;  %7456 = vmatmul.mubr.msk.bf16.gmra.mxu1 %vm92_vm0, %v8969_v18  ;;  %7547 = vmatprep.mubr.msk.bf16.mxu0 %vm92_vm0, %v8786_v2 }
 0x1f2   :  { %1002 = vst [vmem:[%s12397_s5 + $0x1778] sm:$0x3] %v7217_v37  ;;  %v1181_v9 = vpop.f32.mrf.mxu0  ;;  %7507 = vmatprep.mubr.msk.bf16.mxu1 %vm92_vm0, %v8786_v2 }
 0x1f3   :  { %v958_v35 = vpop.f32.mrf.mxu1  ;;  %1223 = vst [vmem:[%s12397_s5 + $0x15f0] sm:$0xff] %v1181_v9 }
 0x1f4   :  { %1000 = vst [vmem:[%s12397_s5 + $0x15e8] sm:$0xff] %v958_v35  ;;  %v7258_v48 = vpop.f32.mrf.mxu0 }
 0x1f5   :  { %v7218_v49 = vpop.f32.mrf.mxu1 }
 0x1f6   :  { %v1184_v4 = vpop.f32.mrf.mxu0 }
 0x1f7   :  { %v961_v23 = vpop.f32.mrf.mxu1  ;;  %1224 = vst [vmem:[%s12397_s5 + $0x16b8] sm:$0xff] %v1184_v4 }
 0x1f8   :  { %1001 = vst [vmem:[%s12397_s5 + $0x16b0] sm:$0xff] %v961_v23  ;;  %v7309_v43 = vpop.f32.mrf.mxu0  ;;  %7548 = vmatmul.mubr.msk.bf16.vlgmr.msra.gmra.mxu0 %vm92_vm0, %v8802_v3 }
 0x1f9   :  { %v7269_v13 = vpop.f32.mrf.mxu1  ;;  %1643 = vst [vmem:[%s12397_s5 + $0x1b0] sm:$0xff] %v7309_v43  ;;  %7508 = vmatmul.mubr.msk.bf16.vlgmr.msra.gmra.mxu1 %vm92_vm0, %v8802_v3  ;;  %7620 = vmatpush3.bf16.msra.mxu0 %v9424_v11 }
 0x1fa   :  { %1420 = vst [vmem:[%s12397_s5 + $0x1a8] sm:$0xff] %v7269_v13  ;;  %7580 = vmatpush3.bf16.msra.mxu1 %v9416_v22  ;;  %v1515_v57 = vpop.f32.mrf.mxu0  ;;  %7511 = vmatprep.mubr.msk.bf16.mxu1 %vm92_vm0, %v8845_v28  ;;  %v8195_v22 = vld [vmem:[%s12392_s4 + $0xf4] ss:$100 sps:$4 sm:$0xff]  }
 0x1fb   :  { %v1292_v56 = vpop.f32.mrf.mxu1  ;;  %1641 = vst [vmem:[%s12397_s5 + $0x20] sm:$0xff] %v1515_v57  ;;  %7551 = vmatprep.mubr.msk.bf16.mxu0 %vm92_vm0, %v8845_v28  ;;  %7581 = vmatprep.subr.bf16.mxu1 %v8193_v36 }
 0x1fc   :  { %1418 = vst [vmem:[%s12397_s5 + $0x18] sm:$0xff] %v1292_v56  ;;  %v7310_v11 = vpop.f32.mrf.mxu0  ;;  %7621 = vmatprep.subr.bf16.mxu0 %v8194_v55 }
 0x1fd   :  { %v7270_v26 = vpop.f32.mrf.mxu1  ;;  %1644 = vst [vmem:[%s12397_s5 + $0x278] sm:$0xff] %v7310_v11  ;;  %7622 = vmatpush3.bf16.msra.mxu0 %v8194_v55 }
 0x1fe   :  { %1421 = vst [vmem:[%s12397_s5 + $0x270] sm:$0xff] %v7270_v26  ;;  %v1518_v15 = vpop.f32.mrf.mxu0  ;;  %7582 = vmatpush3.bf16.msra.mxu1 %v8193_v36  ;;  %7623 = vmatprep.subr.bf16.mxu0 %v8196_v44 }
 0x1ff   :  { %v1295_v61 = vpop.f32.mrf.mxu1  ;;  %1642 = vst [vmem:[%s12397_s5 + $0xe8] sm:$0xff] %v1518_v15  ;;  %7583 = vmatprep.subr.bf16.mxu1 %v8195_v22 }
 0x200   :  { %1419 = vst [vmem:[%s12397_s5 + $0xe0] sm:$0xff] %v1295_v61  ;;  %v7313_v53 = vpop.f32.mrf.mxu0  ;;  %7552 = vmatmul.mubr.msk.bf16.gmra.mxu0 %vm92_vm0, %v8870_v25 }
 0x201   :  { %v7273_v39 = vpop.f32.mrf.mxu1  ;;  %1647 = vst [vmem:[%s12397_s5 + $0x4d0] sm:$0xff] %v7313_v53  ;;  %7512 = vmatmul.mubr.msk.bf16.gmra.mxu1 %vm92_vm0, %v8870_v25  ;;  %7555 = vmatprep.mubr.msk.bf16.mxu0 %vm92_vm0, %v8911_v27 }
 0x202   :  { %1424 = vst [vmem:[%s12397_s5 + $0x4c8] sm:$0xff] %v7273_v39  ;;  %v1531_v30 = vpop.f32.mrf.mxu0  ;;  %7515 = vmatprep.mubr.msk.bf16.mxu1 %vm92_vm0, %v8911_v27  ;;  %7584 = vmatpush3.bf16.msra.mxu1 %v8195_v22 }
 0x203   :  { %v1308_v31 = vpop.f32.mrf.mxu1  ;;  %1645 = vst [vmem:[%s12397_s5 + $0x340] sm:$0xff] %v1531_v30  ;;  %7624 = vmatpush3.bf16.msra.mxu0 %v8196_v44  ;;  %7585 = vmatprep.subr.bf16.mxu1 %v8197_v58 }
 0x204   :  { %1422 = vst [vmem:[%s12397_s5 + $0x338] sm:$0xff] %v1308_v31  ;;  %v7314_v17 = vpop.f32.mrf.mxu0  ;;  %7625 = vmatprep.subr.bf16.mxu0 %v8198_v54 }
 0x205   :  { %v7274_v52 = vpop.f32.mrf.mxu1  ;;  %1648 = vst [vmem:[%s12397_s5 + $0x598] sm:$0xff] %v7314_v17 }
 0x206   :  { %1425 = vst [vmem:[%s12397_s5 + $0x590] sm:$0xff] %v7274_v52  ;;  %v1534_v38 = vpop.f32.mrf.mxu0  ;;  %7586 = vmatpush3.bf16.msra.mxu1 %v8197_v58 }
 0x207   :  { %v1311_v40 = vpop.f32.mrf.mxu1  ;;  %1646 = vst [vmem:[%s12397_s5 + $0x408] sm:$0xff] %v1534_v38  ;;  %7626 = vmatpush3.bf16.msra.mxu0 %v8198_v54  ;;  %7659 = vmatprep.subr.bf16.mxu1 %v9698_v7 }
 0x208   :  { %1423 = vst [vmem:[%s12397_s5 + $0x400] sm:$0xff] %v1311_v40  ;;  %v7317_v59 = vpop.f32.mrf.mxu0  ;;  %7556 = vmatmul.mubr.msk.bf16.gmra.mxu0 %vm92_vm0, %v8931_v46  ;;  %7699 = vmatprep.subr.bf16.mxu0 %v9706_v10 }
 0x209   :  { %v7277_v60 = vpop.f32.mrf.mxu1  ;;  %1651 = vst [vmem:[%s12397_s5 + $0x7f0] sm:$0xff] %v7317_v59  ;;  %7516 = vmatmul.mubr.msk.bf16.gmra.mxu1 %vm92_vm0, %v8931_v46  ;;  %7559 = vmatprep.mubr.msk.bf16.mxu0 %vm92_vm0, %v8956_v45 }
 0x20a   :  { %1428 = vst [vmem:[%s12397_s5 + $0x7e8] sm:$0xff] %v7277_v60  ;;  %v1547_v50 = vpop.f32.mrf.mxu0  ;;  %7519 = vmatprep.mubr.msk.bf16.mxu1 %vm92_vm0, %v8956_v45 }
 0x20b   :  { %v1324_v51 = vpop.f32.mrf.mxu1  ;;  %1649 = vst [vmem:[%s12397_s5 + $0x660] sm:$0xff] %v1547_v50  ;;  %v8201_v50 = vld [vmem:[%s12392_s4 + $0x1c4] ss:$100 sps:$4 sm:$0xff]  }
 0x20c   :  { %1426 = vst [vmem:[%s12397_s5 + $0x658] sm:$0xff] %v1324_v51  ;;  %v7318_v5 = vpop.f32.mrf.mxu0 }
 0x20d   :  { %v7278_v6 = vpop.f32.mrf.mxu1  ;;  %1652 = vst [vmem:[%s12397_s5 + $0x8b8] sm:$0xff] %v7318_v5  ;;  %v8202_v5 = vld [vmem:[%s12392_s4 + $0x1c8] ss:$100 sps:$4 sm:$0xff]  }
 0x20e   :  { %1429 = vst [vmem:[%s12397_s5 + $0x8b0] sm:$0xff] %v7278_v6  ;;  %v1550_v42 = vpop.f32.mrf.mxu0 }
 0x20f   :  { %v1327_v47 = vpop.f32.mrf.mxu1  ;;  %1650 = vst [vmem:[%s12397_s5 + $0x728] sm:$0xff] %v1550_v42 }
 0x210   :  { %1427 = vst [vmem:[%s12397_s5 + $0x720] sm:$0xff] %v1327_v47  ;;  %v7321_v1 = vpop.f32.mrf.mxu0  ;;  %7560 = vmatmul.mubr.msk.bf16.gmra.mxu0 %vm92_vm0, %v8965_v34  ;;  %v8204_v47 = vld [vmem:[%s12392_s4 + $0x100] ss:$100 sps:$4 sm:$0xff]  }
 0x211   :  { %v7281_v33 = vpop.f32.mrf.mxu1  ;;  %1655 = vst [vmem:[%s12397_s5 + $0xb10] sm:$0xff] %v7321_v1  ;;  %7520 = vmatmul.mubr.msk.bf16.gmra.mxu1 %vm92_vm0, %v8965_v34  ;;  %7563 = vmatprep.mubr.msk.bf16.mxu0 %vm92_vm0, %v8788_v20 }
 0x212   :  { %1432 = vst [vmem:[%s12397_s5 + $0xb08] sm:$0xff] %v7281_v33  ;;  %v1563_v63 = vpop.f32.mrf.mxu0  ;;  %7523 = vmatprep.mubr.msk.bf16.mxu1 %vm92_vm0, %v8788_v20 }
 0x213   :  { %v1340_v24 = vpop.f32.mrf.mxu1  ;;  %1653 = vst [vmem:[%s12397_s5 + $0x980] sm:$0xff] %v1563_v63 }
 0x214   :  { %1430 = vst [vmem:[%s12397_s5 + $0x978] sm:$0xff] %v1340_v24  ;;  %v7322_v32 = vpop.f32.mrf.mxu0 }
 0x215   :  { %v7282_v16 = vpop.f32.mrf.mxu1  ;;  %1656 = vst [vmem:[%s12397_s5 + $0xbd8] sm:$0xff] %v7322_v32  ;;  %v8205_v32 = vld [vmem:[%s12392_s4 + $0x34] ss:$100 sps:$4 sm:$0xff]  }
 0x216   :  { %1433 = vst [vmem:[%s12397_s5 + $0xbd0] sm:$0xff] %v7282_v16  ;;  %v1566_v41 = vpop.f32.mrf.mxu0 }
 0x217   :  { %v1343_v0 = vpop.f32.mrf.mxu1  ;;  %1654 = vst [vmem:[%s12397_s5 + $0xa48] sm:$0xff] %v1566_v41  ;;  %v8206_v41 = vld [vmem:[%s12392_s4 + $0x38] ss:$100 sps:$4 sm:$0xff]  }
 0x218   :  { %1431 = vst [vmem:[%s12397_s5 + $0xa40] sm:$0xff] %v1343_v0  ;;  %v7325_v14 = vpop.f32.mrf.mxu0  ;;  %7564 = vmatmul.mubr.msk.bf16.gmra.mxu0 %vm92_vm0, %v8808_v8 }
 0x219   :  { %v7285_v37 = vpop.f32.mrf.mxu1  ;;  %1659 = vst [vmem:[%s12397_s5 + $0xe30] sm:$0xff] %v7325_v14  ;;  %7524 = vmatmul.mubr.msk.bf16.gmra.mxu1 %vm92_vm0, %v8808_v8  ;;  %7567 = vmatprep.mubr.msk.bf16.mxu0 %vm92_vm0, %v8850_v29 }
 0x21a   :  { %1436 = vst [vmem:[%s12397_s5 + $0xe28] sm:$0xff] %v7285_v37  ;;  %v1579_v9 = vpop.f32.mrf.mxu0  ;;  %7527 = vmatprep.mubr.msk.bf16.mxu1 %vm92_vm0, %v8850_v29 }
 0x21b   :  { %v1356_v35 = vpop.f32.mrf.mxu1  ;;  %1657 = vst [vmem:[%s12397_s5 + $0xca0] sm:$0xff] %v1579_v9  ;;  %v9980_v9 = vld [vmem:[%s12392_s4 + $0x294] ss:$100 sps:$4 sm:$0xff]  }
 0x21c   :  { %1434 = vst [vmem:[%s12397_s5 + $0xc98] sm:$0xff] %v1356_v35  ;;  %v7326_v48 = vpop.f32.mrf.mxu0 }
 0x21d   :  { %v7286_v49 = vpop.f32.mrf.mxu1  ;;  %1660 = vst [vmem:[%s12397_s5 + $0xef8] sm:$0xff] %v7326_v48  ;;  %v9988_v48 = vld [vmem:[%s12392_s4 + $0x298] ss:$100 sps:$4 sm:$0xff]  }
 0x21e   :  { %1437 = vst [vmem:[%s12397_s5 + $0xef0] sm:$0xff] %v7286_v49  ;;  %v1582_v4 = vpop.f32.mrf.mxu0 }
 0x21f   :  { %v1359_v23 = vpop.f32.mrf.mxu1  ;;  %1658 = vst [vmem:[%s12397_s5 + $0xd68] sm:$0xff] %v1582_v4 }
 0x220   :  { %1435 = vst [vmem:[%s12397_s5 + $0xd60] sm:$0xff] %v1359_v23  ;;  %v7329_v36 = vpop.f32.mrf.mxu0  ;;  %7568 = vmatmul.mubr.msk.bf16.gmra.mxu0 %vm92_vm0, %v8900_v12 }
 0x221   :  { %v7289_v43 = vpop.f32.mrf.mxu1  ;;  %1663 = vst [vmem:[%s12397_s5 + $0x1150] sm:$0xff] %v7329_v36  ;;  %7528 = vmatmul.mubr.msk.bf16.gmra.mxu1 %vm92_vm0, %v8900_v12  ;;  %7571 = vmatprep.mubr.msk.bf16.mxu0 %vm92_vm0, %v8914_v21 }
 0x222   :  { %1440 = vst [vmem:[%s12397_s5 + $0x1148] sm:$0xff] %v7289_v43  ;;  %v1595_v55 = vpop.f32.mrf.mxu0  ;;  %7531 = vmatprep.mubr.msk.bf16.mxu1 %vm92_vm0, %v8914_v21 }
 0x223   :  { %v1372_v13 = vpop.f32.mrf.mxu1  ;;  %1661 = vst [vmem:[%s12397_s5 + $0xfc0] sm:$0xff] %v1595_v55 }
 0x224   :  { %1438 = vst [vmem:[%s12397_s5 + $0xfb8] sm:$0xff] %v1372_v13  ;;  %v7330_v57 = vpop.f32.mrf.mxu0 }
 0x225   :  { %v7290_v44 = vpop.f32.mrf.mxu1  ;;  %1664 = vst [vmem:[%s12397_s5 + $0x1218] sm:$0xff] %v7330_v57 }
 0x226   :  { %1441 = vst [vmem:[%s12397_s5 + $0x1210] sm:$0xff] %v7290_v44  ;;  %v1598_v56 = vpop.f32.mrf.mxu0 }
 0x227   :  { %v1375_v22 = vpop.f32.mrf.mxu1  ;;  %1662 = vst [vmem:[%s12397_s5 + $0x1088] sm:$0xff] %v1598_v56 }
 0x228   :  { %1439 = vst [vmem:[%s12397_s5 + $0x1080] sm:$0xff] %v1375_v22  ;;  %v7333_v11 = vpop.f32.mrf.mxu0  ;;  %7572 = vmatmul.mubr.msk.bf16.gmra.mxu0 %vm92_vm0, %v8946_v19 }
 0x229   :  { %v7293_v26 = vpop.f32.mrf.mxu1  ;;  %1667 = vst [vmem:[%s12397_s5 + $0x1470] sm:$0xff] %v7333_v11  ;;  %7532 = vmatmul.mubr.msk.bf16.gmra.mxu1 %vm92_vm0, %v8946_v19  ;;  %7575 = vmatprep.mubr.msk.bf16.mxu0 %vm92_vm0, %v8963_v62 }
 0x22a   :  { %1444 = vst [vmem:[%s12397_s5 + $0x1468] sm:$0xff] %v7293_v26  ;;  %v1611_v15 = vpop.f32.mrf.mxu0  ;;  %7535 = vmatprep.mubr.msk.bf16.mxu1 %vm92_vm0, %v8963_v62 }
 0x22b   :  { %v1388_v61 = vpop.f32.mrf.mxu1  ;;  %1665 = vst [vmem:[%s12397_s5 + $0x12e0] sm:$0xff] %v1611_v15 }
 0x22c   :  { %1442 = vst [vmem:[%s12397_s5 + $0x12d8] sm:$0xff] %v1388_v61  ;;  %v7334_v58 = vpop.f32.mrf.mxu0 }
 0x22d   :  { %v7294_v53 = vpop.f32.mrf.mxu1  ;;  %1668 = vst [vmem:[%s12397_s5 + $0x1538] sm:$0xff] %v7334_v58 }
 0x22e   :  { %1445 = vst [vmem:[%s12397_s5 + $0x1530] sm:$0xff] %v7294_v53  ;;  %v1614_v54 = vpop.f32.mrf.mxu0 }
 0x22f   :  { %v1391_v39 = vpop.f32.mrf.mxu1  ;;  %1666 = vst [vmem:[%s12397_s5 + $0x13a8] sm:$0xff] %v1614_v54 }
 0x230   :  { %1443 = vst [vmem:[%s12397_s5 + $0x13a0] sm:$0xff] %v1391_v39  ;;  %v7337_v30 = vpop.f32.mrf.mxu0  ;;  %7576 = vmatmul.mubr.msk.bf16.gmra.mxu0 %vm92_vm0, %v8969_v18 }
 0x231   :  { %v7297_v31 = vpop.f32.mrf.mxu1  ;;  %1671 = vst [vmem:[%s12397_s5 + $0x1790] sm:$0x3] %v7337_v30  ;;  %7536 = vmatmul.mubr.msk.bf16.gmra.mxu1 %vm92_vm0, %v8969_v18  ;;  %7627 = vmatprep.mubr.msk.bf16.mxu0 %vm92_vm0, %v8786_v2 }
 0x232   :  { %1448 = vst [vmem:[%s12397_s5 + $0x1788] sm:$0x3] %v7297_v31  ;;  %v1627_v17 = vpop.f32.mrf.mxu0  ;;  %7587 = vmatprep.mubr.msk.bf16.mxu1 %vm92_vm0, %v8786_v2 }
 0x233   :  { %v1404_v52 = vpop.f32.mrf.mxu1  ;;  %1669 = vst [vmem:[%s12397_s5 + $0x1600] sm:$0xff] %v1627_v17 }
 0x234   :  { %1446 = vst [vmem:[%s12397_s5 + $0x15f8] sm:$0xff] %v1404_v52  ;;  %v7338_v38 = vpop.f32.mrf.mxu0 }
 0x235   :  { %v7298_v40 = vpop.f32.mrf.mxu1 }
 0x236   :  { %v1630_v59 = vpop.f32.mrf.mxu0 }
 0x237   :  { %v1407_v60 = vpop.f32.mrf.mxu1  ;;  %1670 = vst [vmem:[%s12397_s5 + $0x16c8] sm:$0xff] %v1630_v59 }
 0x238   :  { %1447 = vst [vmem:[%s12397_s5 + $0x16c0] sm:$0xff] %v1407_v60  ;;  %v7389_v51 = vpop.f32.mrf.mxu0  ;;  %7628 = vmatmul.mubr.msk.bf16.vlgmr.msra.gmra.mxu0 %vm92_vm0, %v8802_v3 }
 0x239   :  { %v7349_v6 = vpop.f32.mrf.mxu1  ;;  %2089 = vst [vmem:[%s12397_s5 + $0x1c0] sm:$0xff] %v7389_v51  ;;  %7588 = vmatmul.mubr.msk.bf16.vlgmr.msra.gmra.mxu1 %vm92_vm0, %v8802_v3  ;;  %7700 = vmatpush3.bf16.msra.mxu0 %v9706_v10 }
 0x23a   :  { %1866 = vst [vmem:[%s12397_s5 + $0x1b8] sm:$0xff] %v7349_v6  ;;  %7660 = vmatpush3.bf16.msra.mxu1 %v9698_v7  ;;  %v1961_v42 = vpop.f32.mrf.mxu0  ;;  %7591 = vmatprep.mubr.msk.bf16.mxu1 %vm92_vm0, %v8845_v28  ;;  %v8203_v7 = vld [vmem:[%s12392_s4 + $0xfc] ss:$100 sps:$4 sm:$0xff]  }
 0x23b   :  { %v1738_v1 = vpop.f32.mrf.mxu1  ;;  %2087 = vst [vmem:[%s12397_s5 + $0x30] sm:$0xff] %v1961_v42  ;;  %7631 = vmatprep.mubr.msk.bf16.mxu0 %vm92_vm0, %v8845_v28  ;;  %7661 = vmatprep.subr.bf16.mxu1 %v8201_v50 }
 0x23c   :  { %1864 = vst [vmem:[%s12397_s5 + $0x28] sm:$0xff] %v1738_v1  ;;  %v7390_v10 = vpop.f32.mrf.mxu0  ;;  %7701 = vmatprep.subr.bf16.mxu0 %v8202_v5 }
 0x23d   :  { %v7350_v33 = vpop.f32.mrf.mxu1  ;;  %2090 = vst [vmem:[%s12397_s5 + $0x288] sm:$0xff] %v7390_v10  ;;  %7702 = vmatpush3.bf16.msra.mxu0 %v8202_v5 }
 0x23e   :  { %1867 = vst [vmem:[%s12397_s5 + $0x280] sm:$0xff] %v7350_v33  ;;  %v1964_v63 = vpop.f32.mrf.mxu0  ;;  %7662 = vmatpush3.bf16.msra.mxu1 %v8201_v50  ;;  %7703 = vmatprep.subr.bf16.mxu0 %v8204_v47 }
 0x23f   :  { %v1741_v24 = vpop.f32.mrf.mxu1  ;;  %2088 = vst [vmem:[%s12397_s5 + $0xf8] sm:$0xff] %v1964_v63  ;;  %7663 = vmatprep.subr.bf16.mxu1 %v8203_v7 }
 0x240   :  { %1865 = vst [vmem:[%s12397_s5 + $0xf0] sm:$0xff] %v1741_v24  ;;  %v7393_v16 = vpop.f32.mrf.mxu0  ;;  %7632 = vmatmul.mubr.msk.bf16.gmra.mxu0 %vm92_vm0, %v8870_v25 }
 0x241   :  { %v7353_v0 = vpop.f32.mrf.mxu1  ;;  %2093 = vst [vmem:[%s12397_s5 + $0x4e0] sm:$0xff] %v7393_v16  ;;  %7592 = vmatmul.mubr.msk.bf16.gmra.mxu1 %vm92_vm0, %v8870_v25  ;;  %7635 = vmatprep.mubr.msk.bf16.mxu0 %vm92_vm0, %v8911_v27 }
 0x242   :  { %1870 = vst [vmem:[%s12397_s5 + $0x4d8] sm:$0xff] %v7353_v0  ;;  %v1977_v14 = vpop.f32.mrf.mxu0  ;;  %7595 = vmatprep.mubr.msk.bf16.mxu1 %vm92_vm0, %v8911_v27  ;;  %7664 = vmatpush3.bf16.msra.mxu1 %v8203_v7 }
 0x243   :  { %v1754_v37 = vpop.f32.mrf.mxu1  ;;  %2091 = vst [vmem:[%s12397_s5 + $0x350] sm:$0xff] %v1977_v14  ;;  %7704 = vmatpush3.bf16.msra.mxu0 %v8204_v47  ;;  %7665 = vmatprep.subr.bf16.mxu1 %v8205_v32 }
 0x244   :  { %1868 = vst [vmem:[%s12397_s5 + $0x348] sm:$0xff] %v1754_v37  ;;  %v7394_v35 = vpop.f32.mrf.mxu0  ;;  %7705 = vmatprep.subr.bf16.mxu0 %v8206_v41 }
 0x245   :  { %v7354_v49 = vpop.f32.mrf.mxu1  ;;  %2094 = vst [vmem:[%s12397_s5 + $0x5a8] sm:$0xff] %v7394_v35 }
 0x246   :  { %1871 = vst [vmem:[%s12397_s5 + $0x5a0] sm:$0xff] %v7354_v49  ;;  %v1980_v4 = vpop.f32.mrf.mxu0  ;;  %7666 = vmatpush3.bf16.msra.mxu1 %v8205_v32 }
 0x247   :  { %v1757_v23 = vpop.f32.mrf.mxu1  ;;  %2092 = vst [vmem:[%s12397_s5 + $0x418] sm:$0xff] %v1980_v4  ;;  %7706 = vmatpush3.bf16.msra.mxu0 %v8206_v41  ;;  %7739 = vmatprep.subr.bf16.mxu1 %v9980_v9 }
 0x248   :  { %1869 = vst [vmem:[%s12397_s5 + $0x410] sm:$0xff] %v1757_v23  ;;  %v7397_v36 = vpop.f32.mrf.mxu0  ;;  %7636 = vmatmul.mubr.msk.bf16.gmra.mxu0 %vm92_vm0, %v8931_v46  ;;  %7779 = vmatprep.subr.bf16.mxu0 %v9988_v48 }
 0x249   :  { %v7357_v43 = vpop.f32.mrf.mxu1  ;;  %2097 = vst [vmem:[%s12397_s5 + $0x800] sm:$0xff] %v7397_v36  ;;  %7596 = vmatmul.mubr.msk.bf16.gmra.mxu1 %vm92_vm0, %v8931_v46  ;;  %7639 = vmatprep.mubr.msk.bf16.mxu0 %vm92_vm0, %v8956_v45 }
 0x24a   :  { %1874 = vst [vmem:[%s12397_s5 + $0x7f8] sm:$0xff] %v7357_v43  ;;  %v1993_v55 = vpop.f32.mrf.mxu0  ;;  %7599 = vmatprep.mubr.msk.bf16.mxu1 %vm92_vm0, %v8956_v45 }
 0x24b   :  { %v1770_v13 = vpop.f32.mrf.mxu1  ;;  %2095 = vst [vmem:[%s12397_s5 + $0x670] sm:$0xff] %v1993_v55  ;;  %v8209_v55 = vld [vmem:[%s12392_s4 + $0x1cc] ss:$100 sps:$4 sm:$0xff]  }
 0x24c   :  { %1872 = vst [vmem:[%s12397_s5 + $0x668] sm:$0xff] %v1770_v13  ;;  %v7398_v57 = vpop.f32.mrf.mxu0 }
 0x24d   :  { %v7358_v44 = vpop.f32.mrf.mxu1  ;;  %2098 = vst [vmem:[%s12397_s5 + $0x8c8] sm:$0xff] %v7398_v57  ;;  %v8210_v57 = vld [vmem:[%s12392_s4 + $0x1d0] ss:$100 sps:$4 sm:$0xff]  }
 0x24e   :  { %1875 = vst [vmem:[%s12397_s5 + $0x8c0] sm:$0xff] %v7358_v44  ;;  %v1996_v56 = vpop.f32.mrf.mxu0 }
 0x24f   :  { %v1773_v22 = vpop.f32.mrf.mxu1  ;;  %2096 = vst [vmem:[%s12397_s5 + $0x738] sm:$0xff] %v1996_v56 }
 0x250   :  { %1873 = vst [vmem:[%s12397_s5 + $0x730] sm:$0xff] %v1773_v22  ;;  %v7401_v11 = vpop.f32.mrf.mxu0  ;;  %7640 = vmatmul.mubr.msk.bf16.gmra.mxu0 %vm92_vm0, %v8965_v34  ;;  %v8212_v22 = vld [vmem:[%s12392_s4 + $0x108] ss:$100 sps:$4 sm:$0xff]  }
 0x251   :  { %v7361_v26 = vpop.f32.mrf.mxu1  ;;  %2101 = vst [vmem:[%s12397_s5 + $0xb20] sm:$0xff] %v7401_v11  ;;  %7600 = vmatmul.mubr.msk.bf16.gmra.mxu1 %vm92_vm0, %v8965_v34  ;;  %7643 = vmatprep.mubr.msk.bf16.mxu0 %vm92_vm0, %v8788_v20 }
 0x252   :  { %1878 = vst [vmem:[%s12397_s5 + $0xb18] sm:$0xff] %v7361_v26  ;;  %v2009_v15 = vpop.f32.mrf.mxu0  ;;  %7603 = vmatprep.mubr.msk.bf16.mxu1 %vm92_vm0, %v8788_v20 }
 0x253   :  { %v1786_v61 = vpop.f32.mrf.mxu1  ;;  %2099 = vst [vmem:[%s12397_s5 + $0x990] sm:$0xff] %v2009_v15 }
 0x254   :  { %1876 = vst [vmem:[%s12397_s5 + $0x988] sm:$0xff] %v1786_v61  ;;  %v7402_v58 = vpop.f32.mrf.mxu0 }
 0x255   :  { %v7362_v53 = vpop.f32.mrf.mxu1  ;;  %2102 = vst [vmem:[%s12397_s5 + $0xbe8] sm:$0xff] %v7402_v58  ;;  %v8213_v58 = vld [vmem:[%s12392_s4 + $0x3c] ss:$100 sps:$4 sm:$0xff]  }
 0x256   :  { %1879 = vst [vmem:[%s12397_s5 + $0xbe0] sm:$0xff] %v7362_v53  ;;  %v2012_v54 = vpop.f32.mrf.mxu0 }
 0x257   :  { %v1789_v39 = vpop.f32.mrf.mxu1  ;;  %2100 = vst [vmem:[%s12397_s5 + $0xa58] sm:$0xff] %v2012_v54  ;;  %v8214_v54 = vld [vmem:[%s12392_s4 + $0x40] ss:$100 sps:$4 sm:$0xff]  }
 0x258   :  { %1877 = vst [vmem:[%s12397_s5 + $0xa50] sm:$0xff] %v1789_v39  ;;  %v7405_v30 = vpop.f32.mrf.mxu0  ;;  %7644 = vmatmul.mubr.msk.bf16.gmra.mxu0 %vm92_vm0, %v8808_v8 }
 0x259   :  { %v7365_v31 = vpop.f32.mrf.mxu1  ;;  %2105 = vst [vmem:[%s12397_s5 + $0xe40] sm:$0xff] %v7405_v30  ;;  %7604 = vmatmul.mubr.msk.bf16.gmra.mxu1 %vm92_vm0, %v8808_v8  ;;  %7647 = vmatprep.mubr.msk.bf16.mxu0 %vm92_vm0, %v8850_v29 }
 0x25a   :  { %1882 = vst [vmem:[%s12397_s5 + $0xe38] sm:$0xff] %v7365_v31  ;;  %v2025_v17 = vpop.f32.mrf.mxu0  ;;  %7607 = vmatprep.mubr.msk.bf16.mxu1 %vm92_vm0, %v8850_v29 }
 0x25b   :  { %v1802_v52 = vpop.f32.mrf.mxu1  ;;  %2103 = vst [vmem:[%s12397_s5 + $0xcb0] sm:$0xff] %v2025_v17  ;;  %v10262_v17 = vld [vmem:[%s12392_s4 + $0x29c] ss:$100 sps:$4 sm:$0xff]  }
 0x25c   :  { %1880 = vst [vmem:[%s12397_s5 + $0xca8] sm:$0xff] %v1802_v52  ;;  %v7406_v38 = vpop.f32.mrf.mxu0 }
 0x25d   :  { %v7366_v40 = vpop.f32.mrf.mxu1  ;;  %2106 = vst [vmem:[%s12397_s5 + $0xf08] sm:$0xff] %v7406_v38  ;;  %v10270_v38 = vld [vmem:[%s12392_s4 + $0x2a0] ss:$100 sps:$4 sm:$0xff]  }
 0x25e   :  { %1883 = vst [vmem:[%s12397_s5 + $0xf00] sm:$0xff] %v7366_v40  ;;  %v2028_v59 = vpop.f32.mrf.mxu0 }
 0x25f   :  { %v1805_v60 = vpop.f32.mrf.mxu1  ;;  %2104 = vst [vmem:[%s12397_s5 + $0xd78] sm:$0xff] %v2028_v59 }
 0x260   :  { %1881 = vst [vmem:[%s12397_s5 + $0xd70] sm:$0xff] %v1805_v60  ;;  %v7409_v50 = vpop.f32.mrf.mxu0  ;;  %7648 = vmatmul.mubr.msk.bf16.gmra.mxu0 %vm92_vm0, %v8900_v12 }
 0x261   :  { %v7369_v51 = vpop.f32.mrf.mxu1  ;;  %2109 = vst [vmem:[%s12397_s5 + $0x1160] sm:$0xff] %v7409_v50  ;;  %7608 = vmatmul.mubr.msk.bf16.gmra.mxu1 %vm92_vm0, %v8900_v12  ;;  %7651 = vmatprep.mubr.msk.bf16.mxu0 %vm92_vm0, %v8914_v21 }
 0x262   :  { %1886 = vst [vmem:[%s12397_s5 + $0x1158] sm:$0xff] %v7369_v51  ;;  %v2041_v5 = vpop.f32.mrf.mxu0  ;;  %7611 = vmatprep.mubr.msk.bf16.mxu1 %vm92_vm0, %v8914_v21 }
 0x263   :  { %v1818_v6 = vpop.f32.mrf.mxu1  ;;  %2107 = vst [vmem:[%s12397_s5 + $0xfd0] sm:$0xff] %v2041_v5 }
 0x264   :  { %1884 = vst [vmem:[%s12397_s5 + $0xfc8] sm:$0xff] %v1818_v6  ;;  %v7410_v42 = vpop.f32.mrf.mxu0 }
 0x265   :  { %v7370_v47 = vpop.f32.mrf.mxu1  ;;  %2110 = vst [vmem:[%s12397_s5 + $0x1228] sm:$0xff] %v7410_v42 }
 0x266   :  { %1887 = vst [vmem:[%s12397_s5 + $0x1220] sm:$0xff] %v7370_v47  ;;  %v2044_v1 = vpop.f32.mrf.mxu0 }
 0x267   :  { %v1821_v7 = vpop.f32.mrf.mxu1  ;;  %2108 = vst [vmem:[%s12397_s5 + $0x1098] sm:$0xff] %v2044_v1 }
 0x268   :  { %1885 = vst [vmem:[%s12397_s5 + $0x1090] sm:$0xff] %v1821_v7  ;;  %v7413_v10 = vpop.f32.mrf.mxu0  ;;  %7652 = vmatmul.mubr.msk.bf16.gmra.mxu0 %vm92_vm0, %v8946_v19 }
 0x269   :  { %v7373_v33 = vpop.f32.mrf.mxu1  ;;  %2113 = vst [vmem:[%s12397_s5 + $0x1480] sm:$0xff] %v7413_v10  ;;  %7612 = vmatmul.mubr.msk.bf16.gmra.mxu1 %vm92_vm0, %v8946_v19  ;;  %7655 = vmatprep.mubr.msk.bf16.mxu0 %vm92_vm0, %v8963_v62 }
 0x26a   :  { %1890 = vst [vmem:[%s12397_s5 + $0x1478] sm:$0xff] %v7373_v33  ;;  %v2057_v63 = vpop.f32.mrf.mxu0  ;;  %7615 = vmatprep.mubr.msk.bf16.mxu1 %vm92_vm0, %v8963_v62 }
 0x26b   :  { %v1834_v24 = vpop.f32.mrf.mxu1  ;;  %2111 = vst [vmem:[%s12397_s5 + $0x12f0] sm:$0xff] %v2057_v63 }
 0x26c   :  { %1888 = vst [vmem:[%s12397_s5 + $0x12e8] sm:$0xff] %v1834_v24  ;;  %v7414_v32 = vpop.f32.mrf.mxu0 }
 0x26d   :  { %v7374_v16 = vpop.f32.mrf.mxu1  ;;  %2114 = vst [vmem:[%s12397_s5 + $0x1548] sm:$0xff] %v7414_v32 }
 0x26e   :  { %1891 = vst [vmem:[%s12397_s5 + $0x1540] sm:$0xff] %v7374_v16  ;;  %v2060_v41 = vpop.f32.mrf.mxu0 }
 0x26f   :  { %v1837_v0 = vpop.f32.mrf.mxu1  ;;  %2112 = vst [vmem:[%s12397_s5 + $0x13b8] sm:$0xff] %v2060_v41 }
 0x270   :  { %1889 = vst [vmem:[%s12397_s5 + $0x13b0] sm:$0xff] %v1837_v0  ;;  %v7417_v14 = vpop.f32.mrf.mxu0  ;;  %7656 = vmatmul.mubr.msk.bf16.gmra.mxu0 %vm92_vm0, %v8969_v18 }
 0x271   :  { %v7377_v37 = vpop.f32.mrf.mxu1  ;;  %2117 = vst [vmem:[%s12397_s5 + $0x17a0] sm:$0x3] %v7417_v14  ;;  %7616 = vmatmul.mubr.msk.bf16.gmra.mxu1 %vm92_vm0, %v8969_v18  ;;  %7707 = vmatprep.mubr.msk.bf16.mxu0 %vm92_vm0, %v8786_v2 }
 0x272   :  { %1894 = vst [vmem:[%s12397_s5 + $0x1798] sm:$0x3] %v7377_v37  ;;  %v2073_v35 = vpop.f32.mrf.mxu0  ;;  %7667 = vmatprep.mubr.msk.bf16.mxu1 %vm92_vm0, %v8786_v2 }
 0x273   :  { %v1850_v49 = vpop.f32.mrf.mxu1  ;;  %2115 = vst [vmem:[%s12397_s5 + $0x1610] sm:$0xff] %v2073_v35 }
 0x274   :  { %1892 = vst [vmem:[%s12397_s5 + $0x1608] sm:$0xff] %v1850_v49  ;;  %v7418_v4 = vpop.f32.mrf.mxu0 }
 0x275   :  { %v7378_v23 = vpop.f32.mrf.mxu1 }
 0x276   :  { %v2076_v36 = vpop.f32.mrf.mxu0 }
 0x277   :  { %v1853_v43 = vpop.f32.mrf.mxu1  ;;  %2116 = vst [vmem:[%s12397_s5 + $0x16d8] sm:$0xff] %v2076_v36 }
 0x278   :  { %1893 = vst [vmem:[%s12397_s5 + $0x16d0] sm:$0xff] %v1853_v43  ;;  %v7469_v13 = vpop.f32.mrf.mxu0  ;;  %7708 = vmatmul.mubr.msk.bf16.vlgmr.msra.gmra.mxu0 %vm92_vm0, %v8802_v3 }
 0x279   :  { %v7429_v44 = vpop.f32.mrf.mxu1  ;;  %2535 = vst [vmem:[%s12397_s5 + $0x1d0] sm:$0xff] %v7469_v13  ;;  %7668 = vmatmul.mubr.msk.bf16.vlgmr.msra.gmra.mxu1 %vm92_vm0, %v8802_v3  ;;  %7780 = vmatpush3.bf16.msra.mxu0 %v9988_v48 }
 0x27a   :  { %2312 = vst [vmem:[%s12397_s5 + $0x1c8] sm:$0xff] %v7429_v44  ;;  %7740 = vmatpush3.bf16.msra.mxu1 %v9980_v9  ;;  %v2407_v56 = vpop.f32.mrf.mxu0  ;;  %7671 = vmatprep.mubr.msk.bf16.mxu1 %vm92_vm0, %v8845_v28  ;;  %v8211_v9 = vld [vmem:[%s12392_s4 + $0x104] ss:$100 sps:$4 sm:$0xff]  }
 0x27b   :  { %v2184_v11 = vpop.f32.mrf.mxu1  ;;  %2533 = vst [vmem:[%s12397_s5 + $0x40] sm:$0xff] %v2407_v56  ;;  %7711 = vmatprep.mubr.msk.bf16.mxu0 %vm92_vm0, %v8845_v28  ;;  %7741 = vmatprep.subr.bf16.mxu1 %v8209_v55 }
 0x27c   :  { %2310 = vst [vmem:[%s12397_s5 + $0x38] sm:$0xff] %v2184_v11  ;;  %v7470_v48 = vpop.f32.mrf.mxu0  ;;  %7781 = vmatprep.subr.bf16.mxu0 %v8210_v57 }
 0x27d   :  { %v7430_v26 = vpop.f32.mrf.mxu1  ;;  %2536 = vst [vmem:[%s12397_s5 + $0x298] sm:$0xff] %v7470_v48  ;;  %7782 = vmatpush3.bf16.msra.mxu0 %v8210_v57 }
 0x27e   :  { %2313 = vst [vmem:[%s12397_s5 + $0x290] sm:$0xff] %v7430_v26  ;;  %v2410_v15 = vpop.f32.mrf.mxu0  ;;  %7742 = vmatpush3.bf16.msra.mxu1 %v8209_v55  ;;  %7783 = vmatprep.subr.bf16.mxu0 %v8212_v22 }
 0x27f   :  { %v2187_v61 = vpop.f32.mrf.mxu1  ;;  %2534 = vst [vmem:[%s12397_s5 + $0x108] sm:$0xff] %v2410_v15  ;;  %7743 = vmatprep.subr.bf16.mxu1 %v8211_v9 }
 0x280   :  { %2311 = vst [vmem:[%s12397_s5 + $0x100] sm:$0xff] %v2187_v61  ;;  %v7473_v53 = vpop.f32.mrf.mxu0  ;;  %7712 = vmatmul.mubr.msk.bf16.gmra.mxu0 %vm92_vm0, %v8870_v25 }
 0x281   :  { %v7433_v39 = vpop.f32.mrf.mxu1  ;;  %2539 = vst [vmem:[%s12397_s5 + $0x4f0] sm:$0xff] %v7473_v53  ;;  %7672 = vmatmul.mubr.msk.bf16.gmra.mxu1 %vm92_vm0, %v8870_v25  ;;  %7715 = vmatprep.mubr.msk.bf16.mxu0 %vm92_vm0, %v8911_v27 }
 0x282   :  { %2316 = vst [vmem:[%s12397_s5 + $0x4e8] sm:$0xff] %v7433_v39  ;;  %v2423_v30 = vpop.f32.mrf.mxu0  ;;  %7675 = vmatprep.mubr.msk.bf16.mxu1 %vm92_vm0, %v8911_v27  ;;  %7744 = vmatpush3.bf16.msra.mxu1 %v8211_v9 }
 0x283   :  { %v2200_v31 = vpop.f32.mrf.mxu1  ;;  %2537 = vst [vmem:[%s12397_s5 + $0x360] sm:$0xff] %v2423_v30  ;;  %7784 = vmatpush3.bf16.msra.mxu0 %v8212_v22  ;;  %7745 = vmatprep.subr.bf16.mxu1 %v8213_v58 }
 0x284   :  { %2314 = vst [vmem:[%s12397_s5 + $0x358] sm:$0xff] %v2200_v31  ;;  %v7474_v52 = vpop.f32.mrf.mxu0  ;;  %7785 = vmatprep.subr.bf16.mxu0 %v8214_v54 }
 0x285   :  { %v7434_v40 = vpop.f32.mrf.mxu1  ;;  %2540 = vst [vmem:[%s12397_s5 + $0x5b8] sm:$0xff] %v7474_v52 }
 0x286   :  { %2317 = vst [vmem:[%s12397_s5 + $0x5b0] sm:$0xff] %v7434_v40  ;;  %v2426_v59 = vpop.f32.mrf.mxu0  ;;  %7746 = vmatpush3.bf16.msra.mxu1 %v8213_v58 }
 0x287   :  { %v2203_v60 = vpop.f32.mrf.mxu1  ;;  %2538 = vst [vmem:[%s12397_s5 + $0x428] sm:$0xff] %v2426_v59  ;;  %7786 = vmatpush3.bf16.msra.mxu0 %v8214_v54  ;;  %7819 = vmatprep.subr.bf16.mxu1 %v10262_v17 }
 0x288   :  { %2315 = vst [vmem:[%s12397_s5 + $0x420] sm:$0xff] %v2203_v60  ;;  %v7477_v50 = vpop.f32.mrf.mxu0  ;;  %7716 = vmatmul.mubr.msk.bf16.gmra.mxu0 %vm92_vm0, %v8931_v46  ;;  %7859 = vmatprep.subr.bf16.mxu0 %v10270_v38 }
 0x289   :  { %v7437_v51 = vpop.f32.mrf.mxu1  ;;  %2543 = vst [vmem:[%s12397_s5 + $0x810] sm:$0xff] %v7477_v50  ;;  %7676 = vmatmul.mubr.msk.bf16.gmra.mxu1 %vm92_vm0, %v8931_v46  ;;  %7719 = vmatprep.mubr.msk.bf16.mxu0 %vm92_vm0, %v8956_v45 }
 0x28a   :  { %2320 = vst [vmem:[%s12397_s5 + $0x808] sm:$0xff] %v7437_v51  ;;  %v2439_v5 = vpop.f32.mrf.mxu0  ;;  %7679 = vmatprep.mubr.msk.bf16.mxu1 %vm92_vm0, %v8956_v45 }
 0x28b   :  { %v2216_v6 = vpop.f32.mrf.mxu1  ;;  %2541 = vst [vmem:[%s12397_s5 + $0x680] sm:$0xff] %v2439_v5  ;;  %v8217_v5 = vld [vmem:[%s12392_s4 + $0x1d4] ss:$100 sps:$4 sm:$0xff]  }
 0x28c   :  { %2318 = vst [vmem:[%s12397_s5 + $0x678] sm:$0xff] %v2216_v6  ;;  %v7478_v42 = vpop.f32.mrf.mxu0 }
 0x28d   :  { %v7438_v47 = vpop.f32.mrf.mxu1  ;;  %2544 = vst [vmem:[%s12397_s5 + $0x8d8] sm:$0xff] %v7478_v42  ;;  %v8218_v42 = vld [vmem:[%s12392_s4 + $0x1d8] ss:$100 sps:$4 sm:$0xff]  }
 0x28e   :  { %2321 = vst [vmem:[%s12397_s5 + $0x8d0] sm:$0xff] %v7438_v47  ;;  %v2442_v1 = vpop.f32.mrf.mxu0 }
 0x28f   :  { %v2219_v7 = vpop.f32.mrf.mxu1  ;;  %2542 = vst [vmem:[%s12397_s5 + $0x748] sm:$0xff] %v2442_v1 }
 0x290   :  { %2319 = vst [vmem:[%s12397_s5 + $0x740] sm:$0xff] %v2219_v7  ;;  %v7481_v10 = vpop.f32.mrf.mxu0  ;;  %7720 = vmatmul.mubr.msk.bf16.gmra.mxu0 %vm92_vm0, %v8965_v34  ;;  %v8220_v7 = vld [vmem:[%s12392_s4 + $0x110] ss:$100 sps:$4 sm:$0xff]  }
 0x291   :  { %v7441_v33 = vpop.f32.mrf.mxu1  ;;  %2547 = vst [vmem:[%s12397_s5 + $0xb30] sm:$0xff] %v7481_v10  ;;  %7680 = vmatmul.mubr.msk.bf16.gmra.mxu1 %vm92_vm0, %v8965_v34  ;;  %7723 = vmatprep.mubr.msk.bf16.mxu0 %vm92_vm0, %v8788_v20 }
 0x292   :  { %2324 = vst [vmem:[%s12397_s5 + $0xb28] sm:$0xff] %v7441_v33  ;;  %v2455_v63 = vpop.f32.mrf.mxu0  ;;  %7683 = vmatprep.mubr.msk.bf16.mxu1 %vm92_vm0, %v8788_v20 }
 0x293   :  { %v2232_v24 = vpop.f32.mrf.mxu1  ;;  %2545 = vst [vmem:[%s12397_s5 + $0x9a0] sm:$0xff] %v2455_v63 }
 0x294   :  { %2322 = vst [vmem:[%s12397_s5 + $0x998] sm:$0xff] %v2232_v24  ;;  %v7482_v32 = vpop.f32.mrf.mxu0 }
 0x295   :  { %v7442_v16 = vpop.f32.mrf.mxu1  ;;  %2548 = vst [vmem:[%s12397_s5 + $0xbf8] sm:$0xff] %v7482_v32  ;;  %v8221_v32 = vld [vmem:[%s12392_s4 + $0x44] ss:$100 sps:$4 sm:$0xff]  }
 0x296   :  { %2325 = vst [vmem:[%s12397_s5 + $0xbf0] sm:$0xff] %v7442_v16  ;;  %v2458_v41 = vpop.f32.mrf.mxu0 }
 0x297   :  { %v2235_v0 = vpop.f32.mrf.mxu1  ;;  %2546 = vst [vmem:[%s12397_s5 + $0xa68] sm:$0xff] %v2458_v41  ;;  %v8222_v41 = vld [vmem:[%s12392_s4 + $0x48] ss:$100 sps:$4 sm:$0xff]  }
 0x298   :  { %2323 = vst [vmem:[%s12397_s5 + $0xa60] sm:$0xff] %v2235_v0  ;;  %v7485_v14 = vpop.f32.mrf.mxu0  ;;  %7724 = vmatmul.mubr.msk.bf16.gmra.mxu0 %vm92_vm0, %v8808_v8 }
 0x299   :  { %v7445_v37 = vpop.f32.mrf.mxu1  ;;  %2551 = vst [vmem:[%s12397_s5 + $0xe50] sm:$0xff] %v7485_v14  ;;  %7684 = vmatmul.mubr.msk.bf16.gmra.mxu1 %vm92_vm0, %v8808_v8  ;;  %7727 = vmatprep.mubr.msk.bf16.mxu0 %vm92_vm0, %v8850_v29 }
 0x29a   :  { %2328 = vst [vmem:[%s12397_s5 + $0xe48] sm:$0xff] %v7445_v37  ;;  %v2471_v35 = vpop.f32.mrf.mxu0  ;;  %7687 = vmatprep.mubr.msk.bf16.mxu1 %vm92_vm0, %v8850_v29 }
 0x29b   :  { %v2248_v49 = vpop.f32.mrf.mxu1  ;;  %2549 = vst [vmem:[%s12397_s5 + $0xcc0] sm:$0xff] %v2471_v35  ;;  %v10544_v35 = vld [vmem:[%s12392_s4 + $0x2a4] ss:$100 sps:$4 sm:$0xff]  }
 0x29c   :  { %2326 = vst [vmem:[%s12397_s5 + $0xcb8] sm:$0xff] %v2248_v49  ;;  %v7486_v4 = vpop.f32.mrf.mxu0 }
 0x29d   :  { %v7446_v23 = vpop.f32.mrf.mxu1  ;;  %2552 = vst [vmem:[%s12397_s5 + $0xf18] sm:$0xff] %v7486_v4  ;;  %v10552_v4 = vld [vmem:[%s12392_s4 + $0x2a8] ss:$100 sps:$4 sm:$0xff]  }
 0x29e   :  { %2329 = vst [vmem:[%s12397_s5 + $0xf10] sm:$0xff] %v7446_v23  ;;  %v2474_v36 = vpop.f32.mrf.mxu0 }
 0x29f   :  { %v2251_v43 = vpop.f32.mrf.mxu1  ;;  %2550 = vst [vmem:[%s12397_s5 + $0xd88] sm:$0xff] %v2474_v36 }
 0x2a0   :  { %2327 = vst [vmem:[%s12397_s5 + $0xd80] sm:$0xff] %v2251_v43  ;;  %v7489_v55 = vpop.f32.mrf.mxu0  ;;  %7728 = vmatmul.mubr.msk.bf16.gmra.mxu0 %vm92_vm0, %v8900_v12 }
 0x2a1   :  { %v7449_v13 = vpop.f32.mrf.mxu1  ;;  %2555 = vst [vmem:[%s12397_s5 + $0x1170] sm:$0xff] %v7489_v55  ;;  %7688 = vmatmul.mubr.msk.bf16.gmra.mxu1 %vm92_vm0, %v8900_v12  ;;  %7731 = vmatprep.mubr.msk.bf16.mxu0 %vm92_vm0, %v8914_v21 }
 0x2a2   :  { %2332 = vst [vmem:[%s12397_s5 + $0x1168] sm:$0xff] %v7449_v13  ;;  %v2487_v57 = vpop.f32.mrf.mxu0  ;;  %7691 = vmatprep.mubr.msk.bf16.mxu1 %vm92_vm0, %v8914_v21 }
 0x2a3   :  { %v2264_v44 = vpop.f32.mrf.mxu1  ;;  %2553 = vst [vmem:[%s12397_s5 + $0xfe0] sm:$0xff] %v2487_v57 }
 0x2a4   :  { %2330 = vst [vmem:[%s12397_s5 + $0xfd8] sm:$0xff] %v2264_v44  ;;  %v7490_v56 = vpop.f32.mrf.mxu0 }
 0x2a5   :  { %v7450_v22 = vpop.f32.mrf.mxu1  ;;  %2556 = vst [vmem:[%s12397_s5 + $0x1238] sm:$0xff] %v7490_v56 }
 0x2a6   :  { %2333 = vst [vmem:[%s12397_s5 + $0x1230] sm:$0xff] %v7450_v22  ;;  %v2490_v11 = vpop.f32.mrf.mxu0 }
 0x2a7   :  { %v2267_v9 = vpop.f32.mrf.mxu1  ;;  %2554 = vst [vmem:[%s12397_s5 + $0x10a8] sm:$0xff] %v2490_v11 }
 0x2a8   :  { %2331 = vst [vmem:[%s12397_s5 + $0x10a0] sm:$0xff] %v2267_v9  ;;  %v7493_v48 = vpop.f32.mrf.mxu0  ;;  %7732 = vmatmul.mubr.msk.bf16.gmra.mxu0 %vm92_vm0, %v8946_v19 }
 0x2a9   :  { %v7453_v26 = vpop.f32.mrf.mxu1  ;;  %2559 = vst [vmem:[%s12397_s5 + $0x1490] sm:$0xff] %v7493_v48  ;;  %7692 = vmatmul.mubr.msk.bf16.gmra.mxu1 %vm92_vm0, %v8946_v19  ;;  %7735 = vmatprep.mubr.msk.bf16.mxu0 %vm92_vm0, %v8963_v62 }
 0x2aa   :  { %2336 = vst [vmem:[%s12397_s5 + $0x1488] sm:$0xff] %v7453_v26  ;;  %v2503_v15 = vpop.f32.mrf.mxu0  ;;  %7695 = vmatprep.mubr.msk.bf16.mxu1 %vm92_vm0, %v8963_v62 }
 0x2ab   :  { %v2280_v61 = vpop.f32.mrf.mxu1  ;;  %2557 = vst [vmem:[%s12397_s5 + $0x1300] sm:$0xff] %v2503_v15 }
 0x2ac   :  { %2334 = vst [vmem:[%s12397_s5 + $0x12f8] sm:$0xff] %v2280_v61  ;;  %v7494_v58 = vpop.f32.mrf.mxu0 }
 0x2ad   :  { %v7454_v53 = vpop.f32.mrf.mxu1  ;;  %2560 = vst [vmem:[%s12397_s5 + $0x1558] sm:$0xff] %v7494_v58 }
 0x2ae   :  { %2337 = vst [vmem:[%s12397_s5 + $0x1550] sm:$0xff] %v7454_v53  ;;  %v2506_v54 = vpop.f32.mrf.mxu0 }
 0x2af   :  { %v2283_v39 = vpop.f32.mrf.mxu1  ;;  %2558 = vst [vmem:[%s12397_s5 + $0x13c8] sm:$0xff] %v2506_v54 }
 0x2b0   :  { %2335 = vst [vmem:[%s12397_s5 + $0x13c0] sm:$0xff] %v2283_v39  ;;  %v7497_v30 = vpop.f32.mrf.mxu0  ;;  %7736 = vmatmul.mubr.msk.bf16.gmra.mxu0 %vm92_vm0, %v8969_v18 }
 0x2b1   :  { %v7457_v31 = vpop.f32.mrf.mxu1  ;;  %2563 = vst [vmem:[%s12397_s5 + $0x17b0] sm:$0x3] %v7497_v30  ;;  %7696 = vmatmul.mubr.msk.bf16.gmra.mxu1 %vm92_vm0, %v8969_v18  ;;  %7787 = vmatprep.mubr.msk.bf16.mxu0 %vm92_vm0, %v8786_v2 }
 0x2b2   :  { %2340 = vst [vmem:[%s12397_s5 + $0x17a8] sm:$0x3] %v7457_v31  ;;  %v2519_v52 = vpop.f32.mrf.mxu0  ;;  %7747 = vmatprep.mubr.msk.bf16.mxu1 %vm92_vm0, %v8786_v2 }
 0x2b3   :  { %v2296_v40 = vpop.f32.mrf.mxu1  ;;  %2561 = vst [vmem:[%s12397_s5 + $0x1620] sm:$0xff] %v2519_v52 }
 0x2b4   :  { %2338 = vst [vmem:[%s12397_s5 + $0x1618] sm:$0xff] %v2296_v40  ;;  %v7498_v59 = vpop.f32.mrf.mxu0 }
 0x2b5   :  { %v7458_v60 = vpop.f32.mrf.mxu1 }
 0x2b6   :  { %v2522_v50 = vpop.f32.mrf.mxu0 }
 0x2b7   :  { %v2299_v51 = vpop.f32.mrf.mxu1  ;;  %2562 = vst [vmem:[%s12397_s5 + $0x16e8] sm:$0xff] %v2522_v50 }
 0x2b8   :  { %2339 = vst [vmem:[%s12397_s5 + $0x16e0] sm:$0xff] %v2299_v51  ;;  %v7549_v6 = vpop.f32.mrf.mxu0  ;;  %7788 = vmatmul.mubr.msk.bf16.vlgmr.msra.gmra.mxu0 %vm92_vm0, %v8802_v3 }
 0x2b9   :  { %v7509_v47 = vpop.f32.mrf.mxu1  ;;  %2981 = vst [vmem:[%s12397_s5 + $0x1e0] sm:$0xff] %v7549_v6  ;;  %7748 = vmatmul.mubr.msk.bf16.vlgmr.msra.gmra.mxu1 %vm92_vm0, %v8802_v3  ;;  %7860 = vmatpush3.bf16.msra.mxu0 %v10270_v38 }
 0x2ba   :  { %2758 = vst [vmem:[%s12397_s5 + $0x1d8] sm:$0xff] %v7509_v47  ;;  %7820 = vmatpush3.bf16.msra.mxu1 %v10262_v17  ;;  %v2853_v1 = vpop.f32.mrf.mxu0  ;;  %7751 = vmatprep.mubr.msk.bf16.mxu1 %vm92_vm0, %v8845_v28  ;;  %v8219_v17 = vld [vmem:[%s12392_s4 + $0x10c] ss:$100 sps:$4 sm:$0xff]  }
 0x2bb   :  { %v2630_v10 = vpop.f32.mrf.mxu1  ;;  %2979 = vst [vmem:[%s12397_s5 + $0x50] sm:$0xff] %v2853_v1  ;;  %7791 = vmatprep.mubr.msk.bf16.mxu0 %vm92_vm0, %v8845_v28  ;;  %7821 = vmatprep.subr.bf16.mxu1 %v8217_v5 }
 0x2bc   :  { %2756 = vst [vmem:[%s12397_s5 + $0x48] sm:$0xff] %v2630_v10  ;;  %v7550_v38 = vpop.f32.mrf.mxu0  ;;  %7861 = vmatprep.subr.bf16.mxu0 %v8218_v42 }
 0x2bd   :  { %v7510_v33 = vpop.f32.mrf.mxu1  ;;  %2982 = vst [vmem:[%s12397_s5 + $0x2a8] sm:$0xff] %v7550_v38  ;;  %7862 = vmatpush3.bf16.msra.mxu0 %v8218_v42 }
 0x2be   :  { %2759 = vst [vmem:[%s12397_s5 + $0x2a0] sm:$0xff] %v7510_v33  ;;  %v2856_v63 = vpop.f32.mrf.mxu0  ;;  %7822 = vmatpush3.bf16.msra.mxu1 %v8217_v5  ;;  %7863 = vmatprep.subr.bf16.mxu0 %v8220_v7 }
 0x2bf   :  { %v2633_v24 = vpop.f32.mrf.mxu1  ;;  %2980 = vst [vmem:[%s12397_s5 + $0x118] sm:$0xff] %v2856_v63  ;;  %7823 = vmatprep.subr.bf16.mxu1 %v8219_v17 }
 0x2c0   :  { %2757 = vst [vmem:[%s12397_s5 + $0x110] sm:$0xff] %v2633_v24  ;;  %v7553_v16 = vpop.f32.mrf.mxu0  ;;  %7792 = vmatmul.mubr.msk.bf16.gmra.mxu0 %vm92_vm0, %v8870_v25 }
 0x2c1   :  { %v7513_v0 = vpop.f32.mrf.mxu1  ;;  %2985 = vst [vmem:[%s12397_s5 + $0x500] sm:$0xff] %v7553_v16  ;;  %7752 = vmatmul.mubr.msk.bf16.gmra.mxu1 %vm92_vm0, %v8870_v25  ;;  %7795 = vmatprep.mubr.msk.bf16.mxu0 %vm92_vm0, %v8911_v27 }
 0x2c2   :  { %2762 = vst [vmem:[%s12397_s5 + $0x4f8] sm:$0xff] %v7513_v0  ;;  %v2869_v14 = vpop.f32.mrf.mxu0  ;;  %7755 = vmatprep.mubr.msk.bf16.mxu1 %vm92_vm0, %v8911_v27  ;;  %7824 = vmatpush3.bf16.msra.mxu1 %v8219_v17 }
 0x2c3   :  { %v2646_v37 = vpop.f32.mrf.mxu1  ;;  %2983 = vst [vmem:[%s12397_s5 + $0x370] sm:$0xff] %v2869_v14  ;;  %7864 = vmatpush3.bf16.msra.mxu0 %v8220_v7  ;;  %7825 = vmatprep.subr.bf16.mxu1 %v8221_v32 }
 0x2c4   :  { %2760 = vst [vmem:[%s12397_s5 + $0x368] sm:$0xff] %v2646_v37  ;;  %v7554_v49 = vpop.f32.mrf.mxu0  ;;  %7865 = vmatprep.subr.bf16.mxu0 %v8222_v41 }
 0x2c5   :  { %v7514_v23 = vpop.f32.mrf.mxu1  ;;  %2986 = vst [vmem:[%s12397_s5 + $0x5c8] sm:$0xff] %v7554_v49 }
 0x2c6   :  { %2763 = vst [vmem:[%s12397_s5 + $0x5c0] sm:$0xff] %v7514_v23  ;;  %v2872_v36 = vpop.f32.mrf.mxu0  ;;  %7826 = vmatpush3.bf16.msra.mxu1 %v8221_v32 }
 0x2c7   :  { %v2649_v43 = vpop.f32.mrf.mxu1  ;;  %2984 = vst [vmem:[%s12397_s5 + $0x438] sm:$0xff] %v2872_v36  ;;  %7866 = vmatpush3.bf16.msra.mxu0 %v8222_v41  ;;  %7899 = vmatprep.subr.bf16.mxu1 %v10544_v35 }
 0x2c8   :  { %2761 = vst [vmem:[%s12397_s5 + $0x430] sm:$0xff] %v2649_v43  ;;  %v7557_v55 = vpop.f32.mrf.mxu0  ;;  %7796 = vmatmul.mubr.msk.bf16.gmra.mxu0 %vm92_vm0, %v8931_v46  ;;  %7939 = vmatprep.subr.bf16.mxu0 %v10552_v4 }
 0x2c9   :  { %v7517_v13 = vpop.f32.mrf.mxu1  ;;  %2989 = vst [vmem:[%s12397_s5 + $0x820] sm:$0xff] %v7557_v55  ;;  %7756 = vmatmul.mubr.msk.bf16.gmra.mxu1 %vm92_vm0, %v8931_v46  ;;  %7799 = vmatprep.mubr.msk.bf16.mxu0 %vm92_vm0, %v8956_v45 }
 0x2ca   :  { %2766 = vst [vmem:[%s12397_s5 + $0x818] sm:$0xff] %v7517_v13  ;;  %v2885_v57 = vpop.f32.mrf.mxu0  ;;  %7759 = vmatprep.mubr.msk.bf16.mxu1 %vm92_vm0, %v8956_v45 }
 0x2cb   :  { %v2662_v44 = vpop.f32.mrf.mxu1  ;;  %2987 = vst [vmem:[%s12397_s5 + $0x690] sm:$0xff] %v2885_v57  ;;  %v8225_v57 = vld [vmem:[%s12392_s4 + $0x1dc] ss:$100 sps:$4 sm:$0xff]  }
 0x2cc   :  { %2764 = vst [vmem:[%s12397_s5 + $0x688] sm:$0xff] %v2662_v44  ;;  %v7558_v56 = vpop.f32.mrf.mxu0 }
 0x2cd   :  { %v7518_v22 = vpop.f32.mrf.mxu1  ;;  %2990 = vst [vmem:[%s12397_s5 + $0x8e8] sm:$0xff] %v7558_v56  ;;  %v8226_v56 = vld [vmem:[%s12392_s4 + $0x1e0] ss:$100 sps:$4 sm:$0xff]  }
 0x2ce   :  { %2767 = vst [vmem:[%s12397_s5 + $0x8e0] sm:$0xff] %v7518_v22  ;;  %v2888_v11 = vpop.f32.mrf.mxu0 }
 0x2cf   :  { %v2665_v9 = vpop.f32.mrf.mxu1  ;;  %2988 = vst [vmem:[%s12397_s5 + $0x758] sm:$0xff] %v2888_v11 }
 0x2d0   :  { %2765 = vst [vmem:[%s12397_s5 + $0x750] sm:$0xff] %v2665_v9  ;;  %v7561_v48 = vpop.f32.mrf.mxu0  ;;  %7800 = vmatmul.mubr.msk.bf16.gmra.mxu0 %vm92_vm0, %v8965_v34  ;;  %v8228_v9 = vld [vmem:[%s12392_s4 + $0x118] ss:$100 sps:$4 sm:$0xff]  }
 0x2d1   :  { %v7521_v26 = vpop.f32.mrf.mxu1  ;;  %2993 = vst [vmem:[%s12397_s5 + $0xb40] sm:$0xff] %v7561_v48  ;;  %7760 = vmatmul.mubr.msk.bf16.gmra.mxu1 %vm92_vm0, %v8965_v34  ;;  %7803 = vmatprep.mubr.msk.bf16.mxu0 %vm92_vm0, %v8788_v20 }
 0x2d2   :  { %2770 = vst [vmem:[%s12397_s5 + $0xb38] sm:$0xff] %v7521_v26  ;;  %v2901_v15 = vpop.f32.mrf.mxu0  ;;  %7763 = vmatprep.mubr.msk.bf16.mxu1 %vm92_vm0, %v8788_v20 }
 0x2d3   :  { %v2678_v61 = vpop.f32.mrf.mxu1  ;;  %2991 = vst [vmem:[%s12397_s5 + $0x9b0] sm:$0xff] %v2901_v15 }
 0x2d4   :  { %2768 = vst [vmem:[%s12397_s5 + $0x9a8] sm:$0xff] %v2678_v61  ;;  %v7562_v58 = vpop.f32.mrf.mxu0 }
 0x2d5   :  { %v7522_v53 = vpop.f32.mrf.mxu1  ;;  %2994 = vst [vmem:[%s12397_s5 + $0xc08] sm:$0xff] %v7562_v58  ;;  %v8229_v58 = vld [vmem:[%s12392_s4 + $0x4c] ss:$100 sps:$4 sm:$0xff]  }
 0x2d6   :  { %2771 = vst [vmem:[%s12397_s5 + $0xc00] sm:$0xff] %v7522_v53  ;;  %v2904_v54 = vpop.f32.mrf.mxu0 }
 0x2d7   :  { %v2681_v39 = vpop.f32.mrf.mxu1  ;;  %2992 = vst [vmem:[%s12397_s5 + $0xa78] sm:$0xff] %v2904_v54  ;;  %v8230_v54 = vld [vmem:[%s12392_s4 + $0x50] ss:$100 sps:$4 sm:$0xff]  }
 0x2d8   :  { %2769 = vst [vmem:[%s12397_s5 + $0xa70] sm:$0xff] %v2681_v39  ;;  %v7565_v30 = vpop.f32.mrf.mxu0  ;;  %7804 = vmatmul.mubr.msk.bf16.gmra.mxu0 %vm92_vm0, %v8808_v8 }
 0x2d9   :  { %v7525_v31 = vpop.f32.mrf.mxu1  ;;  %2997 = vst [vmem:[%s12397_s5 + $0xe60] sm:$0xff] %v7565_v30  ;;  %7764 = vmatmul.mubr.msk.bf16.gmra.mxu1 %vm92_vm0, %v8808_v8  ;;  %7807 = vmatprep.mubr.msk.bf16.mxu0 %vm92_vm0, %v8850_v29 }
 0x2da   :  { %2774 = vst [vmem:[%s12397_s5 + $0xe58] sm:$0xff] %v7525_v31  ;;  %v2917_v52 = vpop.f32.mrf.mxu0  ;;  %7767 = vmatprep.mubr.msk.bf16.mxu1 %vm92_vm0, %v8850_v29 }
 0x2db   :  { %v2694_v40 = vpop.f32.mrf.mxu1  ;;  %2995 = vst [vmem:[%s12397_s5 + $0xcd0] sm:$0xff] %v2917_v52  ;;  %v10826_v52 = vld [vmem:[%s12392_s4 + $0x2ac] ss:$100 sps:$4 sm:$0xff]  }
 0x2dc   :  { %2772 = vst [vmem:[%s12397_s5 + $0xcc8] sm:$0xff] %v2694_v40  ;;  %v7566_v59 = vpop.f32.mrf.mxu0 }
 0x2dd   :  { %v7526_v60 = vpop.f32.mrf.mxu1  ;;  %2998 = vst [vmem:[%s12397_s5 + $0xf28] sm:$0xff] %v7566_v59  ;;  %v10834_v59 = vld [vmem:[%s12392_s4 + $0x2b0] ss:$100 sps:$4 sm:$0xff]  }
 0x2de   :  { %2775 = vst [vmem:[%s12397_s5 + $0xf20] sm:$0xff] %v7526_v60  ;;  %v2920_v50 = vpop.f32.mrf.mxu0 }
 0x2df   :  { %v2697_v51 = vpop.f32.mrf.mxu1  ;;  %2996 = vst [vmem:[%s12397_s5 + $0xd98] sm:$0xff] %v2920_v50 }
 0x2e0   :  { %2773 = vst [vmem:[%s12397_s5 + $0xd90] sm:$0xff] %v2697_v51  ;;  %v7569_v5 = vpop.f32.mrf.mxu0  ;;  %7808 = vmatmul.mubr.msk.bf16.gmra.mxu0 %vm92_vm0, %v8900_v12 }
 0x2e1   :  { %v7529_v6 = vpop.f32.mrf.mxu1  ;;  %3001 = vst [vmem:[%s12397_s5 + $0x1180] sm:$0xff] %v7569_v5  ;;  %7768 = vmatmul.mubr.msk.bf16.gmra.mxu1 %vm92_vm0, %v8900_v12  ;;  %7811 = vmatprep.mubr.msk.bf16.mxu0 %vm92_vm0, %v8914_v21 }
 0x2e2   :  { %2778 = vst [vmem:[%s12397_s5 + $0x1178] sm:$0xff] %v7529_v6  ;;  %v2933_v42 = vpop.f32.mrf.mxu0  ;;  %7771 = vmatprep.mubr.msk.bf16.mxu1 %vm92_vm0, %v8914_v21 }
 0x2e3   :  { %v2710_v47 = vpop.f32.mrf.mxu1  ;;  %2999 = vst [vmem:[%s12397_s5 + $0xff0] sm:$0xff] %v2933_v42 }
 0x2e4   :  { %2776 = vst [vmem:[%s12397_s5 + $0xfe8] sm:$0xff] %v2710_v47  ;;  %v7570_v1 = vpop.f32.mrf.mxu0 }
 0x2e5   :  { %v7530_v7 = vpop.f32.mrf.mxu1  ;;  %3002 = vst [vmem:[%s12397_s5 + $0x1248] sm:$0xff] %v7570_v1 }
 0x2e6   :  { %2779 = vst [vmem:[%s12397_s5 + $0x1240] sm:$0xff] %v7530_v7  ;;  %v2936_v10 = vpop.f32.mrf.mxu0 }
 0x2e7   :  { %v2713_v17 = vpop.f32.mrf.mxu1  ;;  %3000 = vst [vmem:[%s12397_s5 + $0x10b8] sm:$0xff] %v2936_v10 }
 0x2e8   :  { %2777 = vst [vmem:[%s12397_s5 + $0x10b0] sm:$0xff] %v2713_v17  ;;  %v7573_v38 = vpop.f32.mrf.mxu0  ;;  %7812 = vmatmul.mubr.msk.bf16.gmra.mxu0 %vm92_vm0, %v8946_v19 }
 0x2e9   :  { %v7533_v33 = vpop.f32.mrf.mxu1  ;;  %3005 = vst [vmem:[%s12397_s5 + $0x14a0] sm:$0xff] %v7573_v38  ;;  %7772 = vmatmul.mubr.msk.bf16.gmra.mxu1 %vm92_vm0, %v8946_v19  ;;  %7815 = vmatprep.mubr.msk.bf16.mxu0 %vm92_vm0, %v8963_v62 }
 0x2ea   :  { %2782 = vst [vmem:[%s12397_s5 + $0x1498] sm:$0xff] %v7533_v33  ;;  %v2949_v63 = vpop.f32.mrf.mxu0  ;;  %7775 = vmatprep.mubr.msk.bf16.mxu1 %vm92_vm0, %v8963_v62 }
 0x2eb   :  { %v2726_v24 = vpop.f32.mrf.mxu1  ;;  %3003 = vst [vmem:[%s12397_s5 + $0x1310] sm:$0xff] %v2949_v63 }
 0x2ec   :  { %2780 = vst [vmem:[%s12397_s5 + $0x1308] sm:$0xff] %v2726_v24  ;;  %v7574_v32 = vpop.f32.mrf.mxu0 }
 0x2ed   :  { %v7534_v16 = vpop.f32.mrf.mxu1  ;;  %3006 = vst [vmem:[%s12397_s5 + $0x1568] sm:$0xff] %v7574_v32 }
 0x2ee   :  { %2783 = vst [vmem:[%s12397_s5 + $0x1560] sm:$0xff] %v7534_v16  ;;  %v2952_v41 = vpop.f32.mrf.mxu0 }
 0x2ef   :  { %v2729_v0 = vpop.f32.mrf.mxu1  ;;  %3004 = vst [vmem:[%s12397_s5 + $0x13d8] sm:$0xff] %v2952_v41 }
 0x2f0   :  { %2781 = vst [vmem:[%s12397_s5 + $0x13d0] sm:$0xff] %v2729_v0  ;;  %v7577_v14 = vpop.f32.mrf.mxu0  ;;  %7816 = vmatmul.mubr.msk.bf16.gmra.mxu0 %vm92_vm0, %v8969_v18 }
 0x2f1   :  { %v7537_v37 = vpop.f32.mrf.mxu1  ;;  %3009 = vst [vmem:[%s12397_s5 + $0x17c0] sm:$0x3] %v7577_v14  ;;  %7776 = vmatmul.mubr.msk.bf16.gmra.mxu1 %vm92_vm0, %v8969_v18  ;;  %7867 = vmatprep.mubr.msk.bf16.mxu0 %vm92_vm0, %v8786_v2 }
 0x2f2   :  { %2786 = vst [vmem:[%s12397_s5 + $0x17b8] sm:$0x3] %v7537_v37  ;;  %v2965_v49 = vpop.f32.mrf.mxu0  ;;  %7827 = vmatprep.mubr.msk.bf16.mxu1 %vm92_vm0, %v8786_v2 }
 0x2f3   :  { %v2742_v23 = vpop.f32.mrf.mxu1  ;;  %3007 = vst [vmem:[%s12397_s5 + $0x1630] sm:$0xff] %v2965_v49 }
 0x2f4   :  { %2784 = vst [vmem:[%s12397_s5 + $0x1628] sm:$0xff] %v2742_v23  ;;  %v7578_v36 = vpop.f32.mrf.mxu0 }
 0x2f5   :  { %v7538_v43 = vpop.f32.mrf.mxu1 }
 0x2f6   :  { %v2968_v55 = vpop.f32.mrf.mxu0 }
 0x2f7   :  { %v2745_v13 = vpop.f32.mrf.mxu1  ;;  %3008 = vst [vmem:[%s12397_s5 + $0x16f8] sm:$0xff] %v2968_v55 }
 0x2f8   :  { %2785 = vst [vmem:[%s12397_s5 + $0x16f0] sm:$0xff] %v2745_v13  ;;  %v7629_v44 = vpop.f32.mrf.mxu0  ;;  %7868 = vmatmul.mubr.msk.bf16.vlgmr.msra.gmra.mxu0 %vm92_vm0, %v8802_v3 }
 0x2f9   :  { %v7589_v22 = vpop.f32.mrf.mxu1  ;;  %3427 = vst [vmem:[%s12397_s5 + $0x1f0] sm:$0xff] %v7629_v44  ;;  %7828 = vmatmul.mubr.msk.bf16.vlgmr.msra.gmra.mxu1 %vm92_vm0, %v8802_v3  ;;  %7940 = vmatpush3.bf16.msra.mxu0 %v10552_v4 }
 0x2fa   :  { %3204 = vst [vmem:[%s12397_s5 + $0x1e8] sm:$0xff] %v7589_v22  ;;  %7900 = vmatpush3.bf16.msra.mxu1 %v10544_v35  ;;  %v3299_v11 = vpop.f32.mrf.mxu0  ;;  %7831 = vmatprep.mubr.msk.bf16.mxu1 %vm92_vm0, %v8845_v28  ;;  %v8227_v35 = vld [vmem:[%s12392_s4 + $0x114] ss:$100 sps:$4 sm:$0xff]  }
 0x2fb   :  { %v3076_v48 = vpop.f32.mrf.mxu1  ;;  %3425 = vst [vmem:[%s12397_s5 + $0x60] sm:$0xff] %v3299_v11  ;;  %7871 = vmatprep.mubr.msk.bf16.mxu0 %vm92_vm0, %v8845_v28  ;;  %7901 = vmatprep.subr.bf16.mxu1 %v8225_v57 }
 0x2fc   :  { %3202 = vst [vmem:[%s12397_s5 + $0x58] sm:$0xff] %v3076_v48  ;;  %v7630_v4 = vpop.f32.mrf.mxu0  ;;  %7941 = vmatprep.subr.bf16.mxu0 %v8226_v56 }
 0x2fd   :  { %v7590_v26 = vpop.f32.mrf.mxu1  ;;  %3428 = vst [vmem:[%s12397_s5 + $0x2b8] sm:$0xff] %v7630_v4  ;;  %7942 = vmatpush3.bf16.msra.mxu0 %v8226_v56 }
 0x2fe   :  { %3205 = vst [vmem:[%s12397_s5 + $0x2b0] sm:$0xff] %v7590_v26  ;;  %v3302_v15 = vpop.f32.mrf.mxu0  ;;  %7902 = vmatpush3.bf16.msra.mxu1 %v8225_v57  ;;  %7943 = vmatprep.subr.bf16.mxu0 %v8228_v9 }
 0x2ff   :  { %v3079_v61 = vpop.f32.mrf.mxu1  ;;  %3426 = vst [vmem:[%s12397_s5 + $0x128] sm:$0xff] %v3302_v15  ;;  %7903 = vmatprep.subr.bf16.mxu1 %v8227_v35 }
 0x300   :  { %3203 = vst [vmem:[%s12397_s5 + $0x120] sm:$0xff] %v3079_v61  ;;  %v7633_v53 = vpop.f32.mrf.mxu0  ;;  %7872 = vmatmul.mubr.msk.bf16.gmra.mxu0 %vm92_vm0, %v8870_v25 }
 0x301   :  { %v7593_v39 = vpop.f32.mrf.mxu1  ;;  %3431 = vst [vmem:[%s12397_s5 + $0x510] sm:$0xff] %v7633_v53  ;;  %7832 = vmatmul.mubr.msk.bf16.gmra.mxu1 %vm92_vm0, %v8870_v25  ;;  %7875 = vmatprep.mubr.msk.bf16.mxu0 %vm92_vm0, %v8911_v27 }
 0x302   :  { %3208 = vst [vmem:[%s12397_s5 + $0x508] sm:$0xff] %v7593_v39  ;;  %v3315_v30 = vpop.f32.mrf.mxu0  ;;  %7835 = vmatprep.mubr.msk.bf16.mxu1 %vm92_vm0, %v8911_v27  ;;  %7904 = vmatpush3.bf16.msra.mxu1 %v8227_v35 }
 0x303   :  { %v3092_v31 = vpop.f32.mrf.mxu1  ;;  %3429 = vst [vmem:[%s12397_s5 + $0x380] sm:$0xff] %v3315_v30  ;;  %7944 = vmatpush3.bf16.msra.mxu0 %v8228_v9  ;;  %7905 = vmatprep.subr.bf16.mxu1 %v8229_v58 }
 0x304   :  { %3206 = vst [vmem:[%s12397_s5 + $0x378] sm:$0xff] %v3092_v31  ;;  %v7634_v40 = vpop.f32.mrf.mxu0  ;;  %7945 = vmatprep.subr.bf16.mxu0 %v8230_v54 }
 0x305   :  { %v7594_v60 = vpop.f32.mrf.mxu1  ;;  %3432 = vst [vmem:[%s12397_s5 + $0x5d8] sm:$0xff] %v7634_v40 }
 0x306   :  { %3209 = vst [vmem:[%s12397_s5 + $0x5d0] sm:$0xff] %v7594_v60  ;;  %v3318_v50 = vpop.f32.mrf.mxu0  ;;  %7906 = vmatpush3.bf16.msra.mxu1 %v8229_v58 }
 0x307   :  { %v3095_v51 = vpop.f32.mrf.mxu1  ;;  %3430 = vst [vmem:[%s12397_s5 + $0x448] sm:$0xff] %v3318_v50  ;;  %7946 = vmatpush3.bf16.msra.mxu0 %v8230_v54  ;;  %7979 = vmatprep.subr.bf16.mxu1 %v10826_v52 }
 0x308   :  { %3207 = vst [vmem:[%s12397_s5 + $0x440] sm:$0xff] %v3095_v51  ;;  %v7637_v5 = vpop.f32.mrf.mxu0  ;;  %7876 = vmatmul.mubr.msk.bf16.gmra.mxu0 %vm92_vm0, %v8931_v46  ;;  %8019 = vmatprep.subr.bf16.mxu0 %v10834_v59 }
 0x309   :  { %v7597_v6 = vpop.f32.mrf.mxu1  ;;  %3435 = vst [vmem:[%s12397_s5 + $0x830] sm:$0xff] %v7637_v5  ;;  %7836 = vmatmul.mubr.msk.bf16.gmra.mxu1 %vm92_vm0, %v8931_v46  ;;  %7879 = vmatprep.mubr.msk.bf16.mxu0 %vm92_vm0, %v8956_v45 }
 0x30a   :  { %3212 = vst [vmem:[%s12397_s5 + $0x828] sm:$0xff] %v7597_v6  ;;  %v3331_v42 = vpop.f32.mrf.mxu0  ;;  %7839 = vmatprep.mubr.msk.bf16.mxu1 %vm92_vm0, %v8956_v45 }
 0x30b   :  { %v3108_v47 = vpop.f32.mrf.mxu1  ;;  %3433 = vst [vmem:[%s12397_s5 + $0x6a0] sm:$0xff] %v3331_v42  ;;  %v8233_v42 = vld [vmem:[%s12392_s4 + $0x1e4] ss:$100 sps:$4 sm:$0xff]  }
 0x30c   :  { %3210 = vst [vmem:[%s12397_s5 + $0x698] sm:$0xff] %v3108_v47  ;;  %v7638_v1 = vpop.f32.mrf.mxu0 }
 0x30d   :  { %v7598_v7 = vpop.f32.mrf.mxu1  ;;  %3436 = vst [vmem:[%s12397_s5 + $0x8f8] sm:$0xff] %v7638_v1  ;;  %v8234_v1 = vld [vmem:[%s12392_s4 + $0x1e8] ss:$100 sps:$4 sm:$0xff]  }
 0x30e   :  { %3213 = vst [vmem:[%s12397_s5 + $0x8f0] sm:$0xff] %v7598_v7  ;;  %v3334_v10 = vpop.f32.mrf.mxu0 }
 0x30f   :  { %v3111_v17 = vpop.f32.mrf.mxu1  ;;  %3434 = vst [vmem:[%s12397_s5 + $0x768] sm:$0xff] %v3334_v10 }
 0x310   :  { %3211 = vst [vmem:[%s12397_s5 + $0x760] sm:$0xff] %v3111_v17  ;;  %v7641_v38 = vpop.f32.mrf.mxu0  ;;  %7880 = vmatmul.mubr.msk.bf16.gmra.mxu0 %vm92_vm0, %v8965_v34  ;;  %v8236_v17 = vld [vmem:[%s12392_s4 + $0x120] ss:$100 sps:$4 sm:$0xff]  }
 0x311   :  { %v7601_v33 = vpop.f32.mrf.mxu1  ;;  %3439 = vst [vmem:[%s12397_s5 + $0xb50] sm:$0xff] %v7641_v38  ;;  %7840 = vmatmul.mubr.msk.bf16.gmra.mxu1 %vm92_vm0, %v8965_v34  ;;  %7883 = vmatprep.mubr.msk.bf16.mxu0 %vm92_vm0, %v8788_v20 }
 0x312   :  { %3216 = vst [vmem:[%s12397_s5 + $0xb48] sm:$0xff] %v7601_v33  ;;  %v3347_v63 = vpop.f32.mrf.mxu0  ;;  %7843 = vmatprep.mubr.msk.bf16.mxu1 %vm92_vm0, %v8788_v20 }
 0x313   :  { %v3124_v24 = vpop.f32.mrf.mxu1  ;;  %3437 = vst [vmem:[%s12397_s5 + $0x9c0] sm:$0xff] %v3347_v63 }
 0x314   :  { %3214 = vst [vmem:[%s12397_s5 + $0x9b8] sm:$0xff] %v3124_v24  ;;  %v7642_v32 = vpop.f32.mrf.mxu0 }
 0x315   :  { %v7602_v16 = vpop.f32.mrf.mxu1  ;;  %3440 = vst [vmem:[%s12397_s5 + $0xc18] sm:$0xff] %v7642_v32  ;;  %v8237_v32 = vld [vmem:[%s12392_s4 + $0x54] ss:$100 sps:$4 sm:$0xff]  }
 0x316   :  { %3217 = vst [vmem:[%s12397_s5 + $0xc10] sm:$0xff] %v7602_v16  ;;  %v3350_v41 = vpop.f32.mrf.mxu0 }
 0x317   :  { %v3127_v0 = vpop.f32.mrf.mxu1  ;;  %3438 = vst [vmem:[%s12397_s5 + $0xa88] sm:$0xff] %v3350_v41  ;;  %v8238_v41 = vld [vmem:[%s12392_s4 + $0x58] ss:$100 sps:$4 sm:$0xff]  }
 0x318   :  { %3215 = vst [vmem:[%s12397_s5 + $0xa80] sm:$0xff] %v3127_v0  ;;  %v7645_v14 = vpop.f32.mrf.mxu0  ;;  %7884 = vmatmul.mubr.msk.bf16.gmra.mxu0 %vm92_vm0, %v8808_v8 }
 0x319   :  { %v7605_v37 = vpop.f32.mrf.mxu1  ;;  %3443 = vst [vmem:[%s12397_s5 + $0xe70] sm:$0xff] %v7645_v14  ;;  %7844 = vmatmul.mubr.msk.bf16.gmra.mxu1 %vm92_vm0, %v8808_v8  ;;  %7887 = vmatprep.mubr.msk.bf16.mxu0 %vm92_vm0, %v8850_v29 }
 0x31a   :  { %3220 = vst [vmem:[%s12397_s5 + $0xe68] sm:$0xff] %v7605_v37  ;;  %v3363_v49 = vpop.f32.mrf.mxu0  ;;  %7847 = vmatprep.mubr.msk.bf16.mxu1 %vm92_vm0, %v8850_v29 }
 0x31b   :  { %v3140_v23 = vpop.f32.mrf.mxu1  ;;  %3441 = vst [vmem:[%s12397_s5 + $0xce0] sm:$0xff] %v3363_v49  ;;  %v11108_v49 = vld [vmem:[%s12392_s4 + $0x2b4] ss:$100 sps:$4 sm:$0xff]  }
 0x31c   :  { %3218 = vst [vmem:[%s12397_s5 + $0xcd8] sm:$0xff] %v3140_v23  ;;  %v7646_v36 = vpop.f32.mrf.mxu0 }
 0x31d   :  { %v7606_v43 = vpop.f32.mrf.mxu1  ;;  %3444 = vst [vmem:[%s12397_s5 + $0xf38] sm:$0xff] %v7646_v36  ;;  %v11116_v36 = vld [vmem:[%s12392_s4 + $0x2b8] ss:$100 sps:$4 sm:$0xff]  }
 0x31e   :  { %3221 = vst [vmem:[%s12397_s5 + $0xf30] sm:$0xff] %v7606_v43  ;;  %v3366_v55 = vpop.f32.mrf.mxu0 }
 0x31f   :  { %v3143_v13 = vpop.f32.mrf.mxu1  ;;  %3442 = vst [vmem:[%s12397_s5 + $0xda8] sm:$0xff] %v3366_v55 }
 0x320   :  { %3219 = vst [vmem:[%s12397_s5 + $0xda0] sm:$0xff] %v3143_v13  ;;  %v7649_v57 = vpop.f32.mrf.mxu0  ;;  %7888 = vmatmul.mubr.msk.bf16.gmra.mxu0 %vm92_vm0, %v8900_v12 }
 0x321   :  { %v7609_v44 = vpop.f32.mrf.mxu1  ;;  %3447 = vst [vmem:[%s12397_s5 + $0x1190] sm:$0xff] %v7649_v57  ;;  %7848 = vmatmul.mubr.msk.bf16.gmra.mxu1 %vm92_vm0, %v8900_v12  ;;  %7891 = vmatprep.mubr.msk.bf16.mxu0 %vm92_vm0, %v8914_v21 }
 0x322   :  { %3224 = vst [vmem:[%s12397_s5 + $0x1188] sm:$0xff] %v7609_v44  ;;  %v3379_v56 = vpop.f32.mrf.mxu0  ;;  %7851 = vmatprep.mubr.msk.bf16.mxu1 %vm92_vm0, %v8914_v21 }
 0x323   :  { %v3156_v22 = vpop.f32.mrf.mxu1  ;;  %3445 = vst [vmem:[%s12397_s5 + $0x1000] sm:$0xff] %v3379_v56 }
 0x324   :  { %3222 = vst [vmem:[%s12397_s5 + $0xff8] sm:$0xff] %v3156_v22  ;;  %v7650_v11 = vpop.f32.mrf.mxu0 }
 0x325   :  { %v7610_v9 = vpop.f32.mrf.mxu1  ;;  %3448 = vst [vmem:[%s12397_s5 + $0x1258] sm:$0xff] %v7650_v11 }
 0x326   :  { %3225 = vst [vmem:[%s12397_s5 + $0x1250] sm:$0xff] %v7610_v9  ;;  %v3382_v48 = vpop.f32.mrf.mxu0 }
 0x327   :  { %v3159_v35 = vpop.f32.mrf.mxu1  ;;  %3446 = vst [vmem:[%s12397_s5 + $0x10c8] sm:$0xff] %v3382_v48 }
 0x328   :  { %3223 = vst [vmem:[%s12397_s5 + $0x10c0] sm:$0xff] %v3159_v35  ;;  %v7653_v4 = vpop.f32.mrf.mxu0  ;;  %7892 = vmatmul.mubr.msk.bf16.gmra.mxu0 %vm92_vm0, %v8946_v19 }
 0x329   :  { %v7613_v26 = vpop.f32.mrf.mxu1  ;;  %3451 = vst [vmem:[%s12397_s5 + $0x14b0] sm:$0xff] %v7653_v4  ;;  %7852 = vmatmul.mubr.msk.bf16.gmra.mxu1 %vm92_vm0, %v8946_v19  ;;  %7895 = vmatprep.mubr.msk.bf16.mxu0 %vm92_vm0, %v8963_v62 }
 0x32a   :  { %3228 = vst [vmem:[%s12397_s5 + $0x14a8] sm:$0xff] %v7613_v26  ;;  %v3395_v15 = vpop.f32.mrf.mxu0  ;;  %7855 = vmatprep.mubr.msk.bf16.mxu1 %vm92_vm0, %v8963_v62 }
 0x32b   :  { %v3172_v61 = vpop.f32.mrf.mxu1  ;;  %3449 = vst [vmem:[%s12397_s5 + $0x1320] sm:$0xff] %v3395_v15 }
 0x32c   :  { %3226 = vst [vmem:[%s12397_s5 + $0x1318] sm:$0xff] %v3172_v61  ;;  %v7654_v58 = vpop.f32.mrf.mxu0 }
 0x32d   :  { %v7614_v53 = vpop.f32.mrf.mxu1  ;;  %3452 = vst [vmem:[%s12397_s5 + $0x1578] sm:$0xff] %v7654_v58 }
 0x32e   :  { %3229 = vst [vmem:[%s12397_s5 + $0x1570] sm:$0xff] %v7614_v53  ;;  %v3398_v54 = vpop.f32.mrf.mxu0 }
 0x32f   :  { %v3175_v39 = vpop.f32.mrf.mxu1  ;;  %3450 = vst [vmem:[%s12397_s5 + $0x13e8] sm:$0xff] %v3398_v54 }
 0x330   :  { %3227 = vst [vmem:[%s12397_s5 + $0x13e0] sm:$0xff] %v3175_v39  ;;  %v7657_v30 = vpop.f32.mrf.mxu0  ;;  %7896 = vmatmul.mubr.msk.bf16.gmra.mxu0 %vm92_vm0, %v8969_v18 }
 0x331   :  { %v7617_v31 = vpop.f32.mrf.mxu1  ;;  %3455 = vst [vmem:[%s12397_s5 + $0x17d0] sm:$0x3] %v7657_v30  ;;  %7856 = vmatmul.mubr.msk.bf16.gmra.mxu1 %vm92_vm0, %v8969_v18  ;;  %7947 = vmatprep.mubr.msk.bf16.mxu0 %vm92_vm0, %v8786_v2 }
 0x332   :  { %3232 = vst [vmem:[%s12397_s5 + $0x17c8] sm:$0x3] %v7617_v31  ;;  %v3411_v40 = vpop.f32.mrf.mxu0  ;;  %7907 = vmatprep.mubr.msk.bf16.mxu1 %vm92_vm0, %v8786_v2 }
 0x333   :  { %v3188_v60 = vpop.f32.mrf.mxu1  ;;  %3453 = vst [vmem:[%s12397_s5 + $0x1640] sm:$0xff] %v3411_v40 }
 0x334   :  { %3230 = vst [vmem:[%s12397_s5 + $0x1638] sm:$0xff] %v3188_v60  ;;  %v7658_v50 = vpop.f32.mrf.mxu0 }
 0x335   :  { %v7618_v51 = vpop.f32.mrf.mxu1 }
 0x336   :  { %v3414_v5 = vpop.f32.mrf.mxu0 }
 0x337   :  { %v3191_v6 = vpop.f32.mrf.mxu1  ;;  %3454 = vst [vmem:[%s12397_s5 + $0x1708] sm:$0xff] %v3414_v5 }
 0x338   :  { %3231 = vst [vmem:[%s12397_s5 + $0x1700] sm:$0xff] %v3191_v6  ;;  %v7709_v47 = vpop.f32.mrf.mxu0  ;;  %7948 = vmatmul.mubr.msk.bf16.vlgmr.msra.gmra.mxu0 %vm92_vm0, %v8802_v3 }
 0x339   :  { %v7669_v7 = vpop.f32.mrf.mxu1  ;;  %3873 = vst [vmem:[%s12397_s5 + $0x200] sm:$0xff] %v7709_v47  ;;  %7908 = vmatmul.mubr.msk.bf16.vlgmr.msra.gmra.mxu1 %vm92_vm0, %v8802_v3  ;;  %8020 = vmatpush3.bf16.msra.mxu0 %v10834_v59 }
 0x33a   :  { %3650 = vst [vmem:[%s12397_s5 + $0x1f8] sm:$0xff] %v7669_v7  ;;  %7980 = vmatpush3.bf16.msra.mxu1 %v10826_v52  ;;  %v3745_v10 = vpop.f32.mrf.mxu0  ;;  %7911 = vmatprep.mubr.msk.bf16.mxu1 %vm92_vm0, %v8845_v28  ;;  %v8235_v52 = vld [vmem:[%s12392_s4 + $0x11c] ss:$100 sps:$4 sm:$0xff]  }
 0x33b   :  { %v3522_v38 = vpop.f32.mrf.mxu1  ;;  %3871 = vst [vmem:[%s12397_s5 + $0x70] sm:$0xff] %v3745_v10  ;;  %7951 = vmatprep.mubr.msk.bf16.mxu0 %vm92_vm0, %v8845_v28  ;;  %7981 = vmatprep.subr.bf16.mxu1 %v8233_v42 }
 0x33c   :  { %3648 = vst [vmem:[%s12397_s5 + $0x68] sm:$0xff] %v3522_v38  ;;  %v7710_v59 = vpop.f32.mrf.mxu0  ;;  %8021 = vmatprep.subr.bf16.mxu0 %v8234_v1 }
 0x33d   :  { %v7670_v33 = vpop.f32.mrf.mxu1  ;;  %3874 = vst [vmem:[%s12397_s5 + $0x2c8] sm:$0xff] %v7710_v59  ;;  %8022 = vmatpush3.bf16.msra.mxu0 %v8234_v1 }
 0x33e   :  { %3651 = vst [vmem:[%s12397_s5 + $0x2c0] sm:$0xff] %v7670_v33  ;;  %v3748_v63 = vpop.f32.mrf.mxu0  ;;  %7982 = vmatpush3.bf16.msra.mxu1 %v8233_v42  ;;  %8023 = vmatprep.subr.bf16.mxu0 %v8236_v17 }
 0x33f   :  { %v3525_v24 = vpop.f32.mrf.mxu1  ;;  %3872 = vst [vmem:[%s12397_s5 + $0x138] sm:$0xff] %v3748_v63  ;;  %7983 = vmatprep.subr.bf16.mxu1 %v8235_v52 }
 0x340   :  { %3649 = vst [vmem:[%s12397_s5 + $0x130] sm:$0xff] %v3525_v24  ;;  %v7713_v16 = vpop.f32.mrf.mxu0  ;;  %7952 = vmatmul.mubr.msk.bf16.gmra.mxu0 %vm92_vm0, %v8870_v25 }
 0x341   :  { %v7673_v0 = vpop.f32.mrf.mxu1  ;;  %3877 = vst [vmem:[%s12397_s5 + $0x520] sm:$0xff] %v7713_v16  ;;  %7912 = vmatmul.mubr.msk.bf16.gmra.mxu1 %vm92_vm0, %v8870_v25  ;;  %7955 = vmatprep.mubr.msk.bf16.mxu0 %vm92_vm0, %v8911_v27 }
 0x342   :  { %3654 = vst [vmem:[%s12397_s5 + $0x518] sm:$0xff] %v7673_v0  ;;  %v3761_v14 = vpop.f32.mrf.mxu0  ;;  %7915 = vmatprep.mubr.msk.bf16.mxu1 %vm92_vm0, %v8911_v27  ;;  %7984 = vmatpush3.bf16.msra.mxu1 %v8235_v52 }
 0x343   :  { %v3538_v37 = vpop.f32.mrf.mxu1  ;;  %3875 = vst [vmem:[%s12397_s5 + $0x390] sm:$0xff] %v3761_v14  ;;  %8024 = vmatpush3.bf16.msra.mxu0 %v8236_v17  ;;  %7985 = vmatprep.subr.bf16.mxu1 %v8237_v32 }
 0x344   :  { %3652 = vst [vmem:[%s12397_s5 + $0x388] sm:$0xff] %v3538_v37  ;;  %v7714_v23 = vpop.f32.mrf.mxu0  ;;  %8025 = vmatprep.subr.bf16.mxu0 %v8238_v41 }
 0x345   :  { %v7674_v43 = vpop.f32.mrf.mxu1  ;;  %3878 = vst [vmem:[%s12397_s5 + $0x5e8] sm:$0xff] %v7714_v23 }
 0x346   :  { %3655 = vst [vmem:[%s12397_s5 + $0x5e0] sm:$0xff] %v7674_v43  ;;  %v3764_v55 = vpop.f32.mrf.mxu0  ;;  %7986 = vmatpush3.bf16.msra.mxu1 %v8237_v32 }
 0x347   :  { %v3541_v13 = vpop.f32.mrf.mxu1  ;;  %3876 = vst [vmem:[%s12397_s5 + $0x458] sm:$0xff] %v3764_v55  ;;  %8026 = vmatpush3.bf16.msra.mxu0 %v8238_v41  ;;  %8059 = vmatprep.subr.bf16.mxu1 %v11108_v49 }
 0x348   :  { %3653 = vst [vmem:[%s12397_s5 + $0x450] sm:$0xff] %v3541_v13  ;;  %v7717_v57 = vpop.f32.mrf.mxu0  ;;  %7956 = vmatmul.mubr.msk.bf16.gmra.mxu0 %vm92_vm0, %v8931_v46  ;;  %8099 = vmatprep.subr.bf16.mxu0 %v11116_v36 }
 0x349   :  { %v7677_v44 = vpop.f32.mrf.mxu1  ;;  %3881 = vst [vmem:[%s12397_s5 + $0x840] sm:$0xff] %v7717_v57  ;;  %7916 = vmatmul.mubr.msk.bf16.gmra.mxu1 %vm92_vm0, %v8931_v46  ;;  %7959 = vmatprep.mubr.msk.bf16.mxu0 %vm92_vm0, %v8956_v45 }
 0x34a   :  { %3658 = vst [vmem:[%s12397_s5 + $0x838] sm:$0xff] %v7677_v44  ;;  %v3777_v56 = vpop.f32.mrf.mxu0  ;;  %7919 = vmatprep.mubr.msk.bf16.mxu1 %vm92_vm0, %v8956_v45 }
 0x34b   :  { %v3554_v22 = vpop.f32.mrf.mxu1  ;;  %3879 = vst [vmem:[%s12397_s5 + $0x6b0] sm:$0xff] %v3777_v56  ;;  %v8241_v56 = vld [vmem:[%s12392_s4 + $0x1ec] ss:$100 sps:$4 sm:$0xff]  }
 0x34c   :  { %3656 = vst [vmem:[%s12397_s5 + $0x6a8] sm:$0xff] %v3554_v22  ;;  %v7718_v11 = vpop.f32.mrf.mxu0 }
 0x34d   :  { %v7678_v9 = vpop.f32.mrf.mxu1  ;;  %3882 = vst [vmem:[%s12397_s5 + $0x908] sm:$0xff] %v7718_v11  ;;  %v8242_v11 = vld [vmem:[%s12392_s4 + $0x1f0] ss:$100 sps:$4 sm:$0xff]  }
 0x34e   :  { %3659 = vst [vmem:[%s12397_s5 + $0x900] sm:$0xff] %v7678_v9  ;;  %v3780_v48 = vpop.f32.mrf.mxu0 }
 0x34f   :  { %v3557_v35 = vpop.f32.mrf.mxu1  ;;  %3880 = vst [vmem:[%s12397_s5 + $0x778] sm:$0xff] %v3780_v48 }
 0x350   :  { %3657 = vst [vmem:[%s12397_s5 + $0x770] sm:$0xff] %v3557_v35  ;;  %v7721_v4 = vpop.f32.mrf.mxu0  ;;  %7960 = vmatmul.mubr.msk.bf16.gmra.mxu0 %vm92_vm0, %v8965_v34  ;;  %v8244_v35 = vld [vmem:[%s12392_s4 + $0x128] ss:$100 sps:$4 sm:$0xff]  }
 0x351   :  { %v7681_v26 = vpop.f32.mrf.mxu1  ;;  %3885 = vst [vmem:[%s12397_s5 + $0xb60] sm:$0xff] %v7721_v4  ;;  %7920 = vmatmul.mubr.msk.bf16.gmra.mxu1 %vm92_vm0, %v8965_v34  ;;  %7963 = vmatprep.mubr.msk.bf16.mxu0 %vm92_vm0, %v8788_v20 }
 0x352   :  { %3662 = vst [vmem:[%s12397_s5 + $0xb58] sm:$0xff] %v7681_v26  ;;  %v3793_v15 = vpop.f32.mrf.mxu0  ;;  %7923 = vmatprep.mubr.msk.bf16.mxu1 %vm92_vm0, %v8788_v20 }
 0x353   :  { %v3570_v61 = vpop.f32.mrf.mxu1  ;;  %3883 = vst [vmem:[%s12397_s5 + $0x9d0] sm:$0xff] %v3793_v15 }
 0x354   :  { %3660 = vst [vmem:[%s12397_s5 + $0x9c8] sm:$0xff] %v3570_v61  ;;  %v7722_v58 = vpop.f32.mrf.mxu0 }
 0x355   :  { %v7682_v53 = vpop.f32.mrf.mxu1  ;;  %3886 = vst [vmem:[%s12397_s5 + $0xc28] sm:$0xff] %v7722_v58  ;;  %v8245_v58 = vld [vmem:[%s12392_s4 + $0x5c] ss:$100 sps:$4 sm:$0xff]  }
 0x356   :  { %3663 = vst [vmem:[%s12397_s5 + $0xc20] sm:$0xff] %v7682_v53  ;;  %v3796_v54 = vpop.f32.mrf.mxu0 }
 0x357   :  { %v3573_v39 = vpop.f32.mrf.mxu1  ;;  %3884 = vst [vmem:[%s12397_s5 + $0xa98] sm:$0xff] %v3796_v54  ;;  %v8246_v54 = vld [vmem:[%s12392_s4 + $0x60] ss:$100 sps:$4 sm:$0xff]  }
 0x358   :  { %3661 = vst [vmem:[%s12397_s5 + $0xa90] sm:$0xff] %v3573_v39  ;;  %v7725_v30 = vpop.f32.mrf.mxu0  ;;  %7964 = vmatmul.mubr.msk.bf16.gmra.mxu0 %vm92_vm0, %v8808_v8 }
 0x359   :  { %v7685_v31 = vpop.f32.mrf.mxu1  ;;  %3889 = vst [vmem:[%s12397_s5 + $0xe80] sm:$0xff] %v7725_v30  ;;  %7924 = vmatmul.mubr.msk.bf16.gmra.mxu1 %vm92_vm0, %v8808_v8  ;;  %7967 = vmatprep.mubr.msk.bf16.mxu0 %vm92_vm0, %v8850_v29 }
 0x35a   :  { %3666 = vst [vmem:[%s12397_s5 + $0xe78] sm:$0xff] %v7685_v31  ;;  %v3809_v40 = vpop.f32.mrf.mxu0  ;;  %7927 = vmatprep.mubr.msk.bf16.mxu1 %vm92_vm0, %v8850_v29 }
 0x35b   :  { %v3586_v60 = vpop.f32.mrf.mxu1  ;;  %3887 = vst [vmem:[%s12397_s5 + $0xcf0] sm:$0xff] %v3809_v40 }
 0x35c   :  { %3664 = vst [vmem:[%s12397_s5 + $0xce8] sm:$0xff] %v3586_v60  ;;  %v7726_v50 = vpop.f32.mrf.mxu0 }
 0x35d   :  { %v7686_v51 = vpop.f32.mrf.mxu1  ;;  %3890 = vst [vmem:[%s12397_s5 + $0xf48] sm:$0xff] %v7726_v50 }
 0x35e   :  { %3667 = vst [vmem:[%s12397_s5 + $0xf40] sm:$0xff] %v7686_v51  ;;  %v3812_v5 = vpop.f32.mrf.mxu0 }
 0x35f   :  { %v3589_v6 = vpop.f32.mrf.mxu1  ;;  %3888 = vst [vmem:[%s12397_s5 + $0xdb8] sm:$0xff] %v3812_v5 }
 0x360   :  { %3665 = vst [vmem:[%s12397_s5 + $0xdb0] sm:$0xff] %v3589_v6  ;;  %v7729_v42 = vpop.f32.mrf.mxu0  ;;  %7968 = vmatmul.mubr.msk.bf16.gmra.mxu0 %vm92_vm0, %v8900_v12 }
 0x361   :  { %v7689_v47 = vpop.f32.mrf.mxu1  ;;  %3893 = vst [vmem:[%s12397_s5 + $0x11a0] sm:$0xff] %v7729_v42  ;;  %7928 = vmatmul.mubr.msk.bf16.gmra.mxu1 %vm92_vm0, %v8900_v12  ;;  %7971 = vmatprep.mubr.msk.bf16.mxu0 %vm92_vm0, %v8914_v21 }
 0x362   :  { %3670 = vst [vmem:[%s12397_s5 + $0x1198] sm:$0xff] %v7689_v47  ;;  %v3825_v1 = vpop.f32.mrf.mxu0  ;;  %7931 = vmatprep.mubr.msk.bf16.mxu1 %vm92_vm0, %v8914_v21 }
 0x363   :  { %v3602_v7 = vpop.f32.mrf.mxu1  ;;  %3891 = vst [vmem:[%s12397_s5 + $0x1010] sm:$0xff] %v3825_v1 }
 0x364   :  { %3668 = vst [vmem:[%s12397_s5 + $0x1008] sm:$0xff] %v3602_v7  ;;  %v7730_v10 = vpop.f32.mrf.mxu0 }
 0x365   :  { %v7690_v17 = vpop.f32.mrf.mxu1  ;;  %3894 = vst [vmem:[%s12397_s5 + $0x1268] sm:$0xff] %v7730_v10 }
 0x366   :  { %3671 = vst [vmem:[%s12397_s5 + $0x1260] sm:$0xff] %v7690_v17  ;;  %v3828_v38 = vpop.f32.mrf.mxu0 }
 0x367   :  { %v3605_v52 = vpop.f32.mrf.mxu1  ;;  %3892 = vst [vmem:[%s12397_s5 + $0x10d8] sm:$0xff] %v3828_v38 }
 0x368   :  { %3669 = vst [vmem:[%s12397_s5 + $0x10d0] sm:$0xff] %v3605_v52  ;;  %v7733_v59 = vpop.f32.mrf.mxu0  ;;  %7972 = vmatmul.mubr.msk.bf16.gmra.mxu0 %vm92_vm0, %v8946_v19 }
 0x369   :  { %v7693_v33 = vpop.f32.mrf.mxu1  ;;  %3897 = vst [vmem:[%s12397_s5 + $0x14c0] sm:$0xff] %v7733_v59  ;;  %7932 = vmatmul.mubr.msk.bf16.gmra.mxu1 %vm92_vm0, %v8946_v19  ;;  %7975 = vmatprep.mubr.msk.bf16.mxu0 %vm92_vm0, %v8963_v62 }
 0x36a   :  { %3674 = vst [vmem:[%s12397_s5 + $0x14b8] sm:$0xff] %v7693_v33  ;;  %v3841_v63 = vpop.f32.mrf.mxu0  ;;  %7935 = vmatprep.mubr.msk.bf16.mxu1 %vm92_vm0, %v8963_v62 }
 0x36b   :  { %v3618_v24 = vpop.f32.mrf.mxu1  ;;  %3895 = vst [vmem:[%s12397_s5 + $0x1330] sm:$0xff] %v3841_v63 }
 0x36c   :  { %3672 = vst [vmem:[%s12397_s5 + $0x1328] sm:$0xff] %v3618_v24  ;;  %v7734_v32 = vpop.f32.mrf.mxu0 }
 0x36d   :  { %v7694_v16 = vpop.f32.mrf.mxu1  ;;  %3898 = vst [vmem:[%s12397_s5 + $0x1588] sm:$0xff] %v7734_v32 }
 0x36e   :  { %3675 = vst [vmem:[%s12397_s5 + $0x1580] sm:$0xff] %v7694_v16  ;;  %v3844_v41 = vpop.f32.mrf.mxu0 }
 0x36f   :  { %v3621_v0 = vpop.f32.mrf.mxu1  ;;  %3896 = vst [vmem:[%s12397_s5 + $0x13f8] sm:$0xff] %v3844_v41 }
 0x370   :  { %3673 = vst [vmem:[%s12397_s5 + $0x13f0] sm:$0xff] %v3621_v0  ;;  %v7737_v14 = vpop.f32.mrf.mxu0  ;;  %7976 = vmatmul.mubr.msk.bf16.gmra.mxu0 %vm92_vm0, %v8969_v18 }
 0x371   :  { %v7697_v37 = vpop.f32.mrf.mxu1  ;;  %3901 = vst [vmem:[%s12397_s5 + $0x17e0] sm:$0x3] %v7737_v14  ;;  %7936 = vmatmul.mubr.msk.bf16.gmra.mxu1 %vm92_vm0, %v8969_v18  ;;  %8027 = vmatprep.mubr.msk.bf16.mxu0 %vm92_vm0, %v8786_v2 }
 0x372   :  { %3678 = vst [vmem:[%s12397_s5 + $0x17d8] sm:$0x3] %v7697_v37  ;;  %v3857_v23 = vpop.f32.mrf.mxu0  ;;  %7987 = vmatprep.mubr.msk.bf16.mxu1 %vm92_vm0, %v8786_v2 }
 0x373   :  { %v3634_v43 = vpop.f32.mrf.mxu1  ;;  %3899 = vst [vmem:[%s12397_s5 + $0x1650] sm:$0xff] %v3857_v23 }
 0x374   :  { %3676 = vst [vmem:[%s12397_s5 + $0x1648] sm:$0xff] %v3634_v43  ;;  %v7738_v55 = vpop.f32.mrf.mxu0 }
 0x375   :  { %v7698_v13 = vpop.f32.mrf.mxu1 }
 0x376   :  { %v3860_v57 = vpop.f32.mrf.mxu0 }
 0x377   :  { %v3637_v44 = vpop.f32.mrf.mxu1  ;;  %3900 = vst [vmem:[%s12397_s5 + $0x1718] sm:$0xff] %v3860_v57 }
 0x378   :  { %3677 = vst [vmem:[%s12397_s5 + $0x1710] sm:$0xff] %v3637_v44  ;;  %v7789_v22 = vpop.f32.mrf.mxu0  ;;  %8028 = vmatmul.mubr.msk.bf16.vlgmr.msra.gmra.mxu0 %vm92_vm0, %v8802_v3 }
 0x379   :  { %v7749_v9 = vpop.f32.mrf.mxu1  ;;  %4319 = vst [vmem:[%s12397_s5 + $0x210] sm:$0xff] %v7789_v22  ;;  %7988 = vmatmul.mubr.msk.bf16.vlgmr.msra.gmra.mxu1 %vm92_vm0, %v8802_v3  ;;  %8100 = vmatpush3.bf16.msra.mxu0 %v11116_v36 }
 0x37a   :  { %4096 = vst [vmem:[%s12397_s5 + $0x208] sm:$0xff] %v7749_v9  ;;  %8060 = vmatpush3.bf16.msra.mxu1 %v11108_v49  ;;  %v4191_v48 = vpop.f32.mrf.mxu0  ;;  %7991 = vmatprep.mubr.msk.bf16.mxu1 %vm92_vm0, %v8845_v28  ;;  %v8243_v49 = vld [vmem:[%s12392_s4 + $0x124] ss:$100 sps:$4 sm:$0xff]  }
 0x37b   :  { %v3968_v4 = vpop.f32.mrf.mxu1  ;;  %4317 = vst [vmem:[%s12397_s5 + $0x80] sm:$0xff] %v4191_v48  ;;  %8031 = vmatprep.mubr.msk.bf16.mxu0 %vm92_vm0, %v8845_v28  ;;  %8061 = vmatprep.subr.bf16.mxu1 %v8241_v56 }
 0x37c   :  { %4094 = vst [vmem:[%s12397_s5 + $0x78] sm:$0xff] %v3968_v4  ;;  %v7790_v36 = vpop.f32.mrf.mxu0  ;;  %8101 = vmatprep.subr.bf16.mxu0 %v8242_v11 }
 0x37d   :  { %v7750_v26 = vpop.f32.mrf.mxu1  ;;  %4320 = vst [vmem:[%s12397_s5 + $0x2d8] sm:$0xff] %v7790_v36  ;;  %8102 = vmatpush3.bf16.msra.mxu0 %v8242_v11 }
 0x37e   :  { %4097 = vst [vmem:[%s12397_s5 + $0x2d0] sm:$0xff] %v7750_v26  ;;  %v4194_v15 = vpop.f32.mrf.mxu0  ;;  %8062 = vmatpush3.bf16.msra.mxu1 %v8241_v56  ;;  %8103 = vmatprep.subr.bf16.mxu0 %v8244_v35 }
 0x37f   :  { %v3971_v61 = vpop.f32.mrf.mxu1  ;;  %4318 = vst [vmem:[%s12397_s5 + $0x148] sm:$0xff] %v4194_v15  ;;  %8063 = vmatprep.subr.bf16.mxu1 %v8243_v49 }
 0x380   :  { %4095 = vst [vmem:[%s12397_s5 + $0x140] sm:$0xff] %v3971_v61  ;;  %v7793_v53 = vpop.f32.mrf.mxu0  ;;  %8032 = vmatmul.mubr.msk.bf16.gmra.mxu0 %vm92_vm0, %v8870_v25 }
 0x381   :  { %v7753_v39 = vpop.f32.mrf.mxu1  ;;  %4323 = vst [vmem:[%s12397_s5 + $0x530] sm:$0xff] %v7793_v53  ;;  %7992 = vmatmul.mubr.msk.bf16.gmra.mxu1 %vm92_vm0, %v8870_v25  ;;  %8035 = vmatprep.mubr.msk.bf16.mxu0 %vm92_vm0, %v8911_v27 }
 0x382   :  { %4100 = vst [vmem:[%s12397_s5 + $0x528] sm:$0xff] %v7753_v39  ;;  %v4207_v30 = vpop.f32.mrf.mxu0  ;;  %7995 = vmatprep.mubr.msk.bf16.mxu1 %vm92_vm0, %v8911_v27  ;;  %8064 = vmatpush3.bf16.msra.mxu1 %v8243_v49 }
 0x383   :  { %v3984_v31 = vpop.f32.mrf.mxu1  ;;  %4321 = vst [vmem:[%s12397_s5 + $0x3a0] sm:$0xff] %v4207_v30  ;;  %8104 = vmatpush3.bf16.msra.mxu0 %v8244_v35  ;;  %8065 = vmatprep.subr.bf16.mxu1 %v8245_v58 }
 0x384   :  { %4098 = vst [vmem:[%s12397_s5 + $0x398] sm:$0xff] %v3984_v31  ;;  %v7794_v40 = vpop.f32.mrf.mxu0  ;;  %8105 = vmatprep.subr.bf16.mxu0 %v8246_v54 }
 0x385   :  { %v7754_v60 = vpop.f32.mrf.mxu1  ;;  %4324 = vst [vmem:[%s12397_s5 + $0x5f8] sm:$0xff] %v7794_v40 }
 0x386   :  { %4101 = vst [vmem:[%s12397_s5 + $0x5f0] sm:$0xff] %v7754_v60  ;;  %v4210_v50 = vpop.f32.mrf.mxu0  ;;  %8066 = vmatpush3.bf16.msra.mxu1 %v8245_v58 }
 0x387   :  { %v3987_v51 = vpop.f32.mrf.mxu1  ;;  %4322 = vst [vmem:[%s12397_s5 + $0x468] sm:$0xff] %v4210_v50  ;;  %8106 = vmatpush3.bf16.msra.mxu0 %v8246_v54 }
 0x388   :  { %4099 = vst [vmem:[%s12397_s5 + $0x460] sm:$0xff] %v3987_v51  ;;  %v7797_v5 = vpop.f32.mrf.mxu0  ;;  %8036 = vmatmul.mubr.msk.bf16.gmra.mxu0 %vm92_vm0, %v8931_v46 }
 0x389   :  { %v7757_v6 = vpop.f32.mrf.mxu1  ;;  %4327 = vst [vmem:[%s12397_s5 + $0x850] sm:$0xff] %v7797_v5  ;;  %7996 = vmatmul.mubr.msk.bf16.gmra.mxu1 %vm92_vm0, %v8931_v46  ;;  %8039 = vmatprep.mubr.msk.bf16.mxu0 %vm92_vm0, %v8956_v45 }
 0x38a   :  { %4104 = vst [vmem:[%s12397_s5 + $0x848] sm:$0xff] %v7757_v6  ;;  %v4223_v42 = vpop.f32.mrf.mxu0  ;;  %7999 = vmatprep.mubr.msk.bf16.mxu1 %vm92_vm0, %v8956_v45 }
 0x38b   :  { %v4000_v47 = vpop.f32.mrf.mxu1  ;;  %4325 = vst [vmem:[%s12397_s5 + $0x6c0] sm:$0xff] %v4223_v42 }
 0x38c   :  { %4102 = vst [vmem:[%s12397_s5 + $0x6b8] sm:$0xff] %v4000_v47  ;;  %v7798_v1 = vpop.f32.mrf.mxu0 }
 0x38d   :  { %v7758_v7 = vpop.f32.mrf.mxu1  ;;  %4328 = vst [vmem:[%s12397_s5 + $0x918] sm:$0xff] %v7798_v1 }
 0x38e   :  { %4105 = vst [vmem:[%s12397_s5 + $0x910] sm:$0xff] %v7758_v7  ;;  %v4226_v10 = vpop.f32.mrf.mxu0 }
 0x38f   :  { %v4003_v17 = vpop.f32.mrf.mxu1  ;;  %4326 = vst [vmem:[%s12397_s5 + $0x788] sm:$0xff] %v4226_v10 }
 0x390   :  { %4103 = vst [vmem:[%s12397_s5 + $0x780] sm:$0xff] %v4003_v17  ;;  %v7801_v38 = vpop.f32.mrf.mxu0  ;;  %8040 = vmatmul.mubr.msk.bf16.gmra.mxu0 %vm92_vm0, %v8965_v34 }
 0x391   :  { %v7761_v52 = vpop.f32.mrf.mxu1  ;;  %4331 = vst [vmem:[%s12397_s5 + $0xb70] sm:$0xff] %v7801_v38  ;;  %8000 = vmatmul.mubr.msk.bf16.gmra.mxu1 %vm92_vm0, %v8965_v34  ;;  %8043 = vmatprep.mubr.msk.bf16.mxu0 %vm92_vm0, %v8788_v20 }
 0x392   :  { %4108 = vst [vmem:[%s12397_s5 + $0xb68] sm:$0xff] %v7761_v52  ;;  %v4239_v59 = vpop.f32.mrf.mxu0  ;;  %8003 = vmatprep.mubr.msk.bf16.mxu1 %vm92_vm0, %v8788_v20 }
 0x393   :  { %v4016_v33 = vpop.f32.mrf.mxu1  ;;  %4329 = vst [vmem:[%s12397_s5 + $0x9e0] sm:$0xff] %v4239_v59 }
 0x394   :  { %4106 = vst [vmem:[%s12397_s5 + $0x9d8] sm:$0xff] %v4016_v33  ;;  %v7802_v63 = vpop.f32.mrf.mxu0 }
 0x395   :  { %v7762_v24 = vpop.f32.mrf.mxu1  ;;  %4332 = vst [vmem:[%s12397_s5 + $0xc38] sm:$0xff] %v7802_v63 }
 0x396   :  { %4109 = vst [vmem:[%s12397_s5 + $0xc30] sm:$0xff] %v7762_v24  ;;  %v4242_v32 = vpop.f32.mrf.mxu0 }
 0x397   :  { %v4019_v16 = vpop.f32.mrf.mxu1  ;;  %4330 = vst [vmem:[%s12397_s5 + $0xaa8] sm:$0xff] %v4242_v32 }
 0x398   :  { %4107 = vst [vmem:[%s12397_s5 + $0xaa0] sm:$0xff] %v4019_v16  ;;  %v7805_v41 = vpop.f32.mrf.mxu0  ;;  %8044 = vmatmul.mubr.msk.bf16.gmra.mxu0 %vm92_vm0, %v8808_v8 }
 0x399   :  { %v7765_v0 = vpop.f32.mrf.mxu1  ;;  %4335 = vst [vmem:[%s12397_s5 + $0xe90] sm:$0xff] %v7805_v41  ;;  %8004 = vmatmul.mubr.msk.bf16.gmra.mxu1 %vm92_vm0, %v8808_v8  ;;  %8047 = vmatprep.mubr.msk.bf16.mxu0 %vm92_vm0, %v8850_v29 }
 0x39a   :  { %4112 = vst [vmem:[%s12397_s5 + $0xe88] sm:$0xff] %v7765_v0  ;;  %v4255_v14 = vpop.f32.mrf.mxu0  ;;  %8007 = vmatprep.mubr.msk.bf16.mxu1 %vm92_vm0, %v8850_v29 }
 0x39b   :  { %v4032_v37 = vpop.f32.mrf.mxu1  ;;  %4333 = vst [vmem:[%s12397_s5 + $0xd00] sm:$0xff] %v4255_v14 }
 0x39c   :  { %4110 = vst [vmem:[%s12397_s5 + $0xcf8] sm:$0xff] %v4032_v37  ;;  %v7806_v23 = vpop.f32.mrf.mxu0 }
 0x39d   :  { %v7766_v43 = vpop.f32.mrf.mxu1  ;;  %4336 = vst [vmem:[%s12397_s5 + $0xf58] sm:$0xff] %v7806_v23 }
 0x39e   :  { %4113 = vst [vmem:[%s12397_s5 + $0xf50] sm:$0xff] %v7766_v43  ;;  %v4258_v55 = vpop.f32.mrf.mxu0 }
 0x39f   :  { %v4035_v13 = vpop.f32.mrf.mxu1  ;;  %4334 = vst [vmem:[%s12397_s5 + $0xdc8] sm:$0xff] %v4258_v55 }
 0x3a0   :  { %4111 = vst [vmem:[%s12397_s5 + $0xdc0] sm:$0xff] %v4035_v13  ;;  %v7809_v57 = vpop.f32.mrf.mxu0  ;;  %8048 = vmatmul.mubr.msk.bf16.gmra.mxu0 %vm92_vm0, %v8900_v12 }
 0x3a1   :  { %v7769_v44 = vpop.f32.mrf.mxu1  ;;  %4339 = vst [vmem:[%s12397_s5 + $0x11b0] sm:$0xff] %v7809_v57  ;;  %8008 = vmatmul.mubr.msk.bf16.gmra.mxu1 %vm92_vm0, %v8900_v12  ;;  %8051 = vmatprep.mubr.msk.bf16.mxu0 %vm92_vm0, %v8914_v21 }
 0x3a2   :  { %4116 = vst [vmem:[%s12397_s5 + $0x11a8] sm:$0xff] %v7769_v44  ;;  %v4271_v56 = vpop.f32.mrf.mxu0  ;;  %8011 = vmatprep.mubr.msk.bf16.mxu1 %vm92_vm0, %v8914_v21 }
 0x3a3   :  { %v4048_v22 = vpop.f32.mrf.mxu1  ;;  %4337 = vst [vmem:[%s12397_s5 + $0x1020] sm:$0xff] %v4271_v56 }
 0x3a4   :  { %4114 = vst [vmem:[%s12397_s5 + $0x1018] sm:$0xff] %v4048_v22  ;;  %v7810_v11 = vpop.f32.mrf.mxu0 }
 0x3a5   :  { %v7770_v9 = vpop.f32.mrf.mxu1  ;;  %4340 = vst [vmem:[%s12397_s5 + $0x1278] sm:$0xff] %v7810_v11 }
 0x3a6   :  { %4117 = vst [vmem:[%s12397_s5 + $0x1270] sm:$0xff] %v7770_v9  ;;  %v4274_v48 = vpop.f32.mrf.mxu0 }
 0x3a7   :  { %v4051_v35 = vpop.f32.mrf.mxu1  ;;  %4338 = vst [vmem:[%s12397_s5 + $0x10e8] sm:$0xff] %v4274_v48 }
 0x3a8   :  { %4115 = vst [vmem:[%s12397_s5 + $0x10e0] sm:$0xff] %v4051_v35  ;;  %v7813_v4 = vpop.f32.mrf.mxu0  ;;  %8052 = vmatmul.mubr.msk.bf16.gmra.mxu0 %vm92_vm0, %v8946_v19 }
 0x3a9   :  { %v7773_v49 = vpop.f32.mrf.mxu1  ;;  %4343 = vst [vmem:[%s12397_s5 + $0x14d0] sm:$0xff] %v7813_v4  ;;  %8012 = vmatmul.mubr.msk.bf16.gmra.mxu1 %vm92_vm0, %v8946_v19  ;;  %8055 = vmatprep.mubr.msk.bf16.mxu0 %vm92_vm0, %v8963_v62 }
 0x3aa   :  { %4120 = vst [vmem:[%s12397_s5 + $0x14c8] sm:$0xff] %v7773_v49  ;;  %v4287_v36 = vpop.f32.mrf.mxu0  ;;  %8015 = vmatprep.mubr.msk.bf16.mxu1 %vm92_vm0, %v8963_v62 }
 0x3ab   :  { %v4064_v26 = vpop.f32.mrf.mxu1  ;;  %4341 = vst [vmem:[%s12397_s5 + $0x1340] sm:$0xff] %v4287_v36 }
 0x3ac   :  { %4118 = vst [vmem:[%s12397_s5 + $0x1338] sm:$0xff] %v4064_v26  ;;  %v7814_v15 = vpop.f32.mrf.mxu0 }
 0x3ad   :  { %v7774_v61 = vpop.f32.mrf.mxu1  ;;  %4344 = vst [vmem:[%s12397_s5 + $0x1598] sm:$0xff] %v7814_v15 }
 0x3ae   :  { %4121 = vst [vmem:[%s12397_s5 + $0x1590] sm:$0xff] %v7774_v61  ;;  %v4290_v58 = vpop.f32.mrf.mxu0 }
 0x3af   :  { %v4067_v53 = vpop.f32.mrf.mxu1  ;;  %4342 = vst [vmem:[%s12397_s5 + $0x1408] sm:$0xff] %v4290_v58 }
 0x3b0   :  { %4119 = vst [vmem:[%s12397_s5 + $0x1400] sm:$0xff] %v4067_v53  ;;  %v7817_v54 = vpop.f32.mrf.mxu0  ;;  %8056 = vmatmul.mubr.msk.bf16.gmra.mxu0 %vm92_vm0, %v8969_v18 }
 0x3b1   :  { %v7777_v39 = vpop.f32.mrf.mxu1  ;;  %4347 = vst [vmem:[%s12397_s5 + $0x17f0] sm:$0x3] %v7817_v54  ;;  %8016 = vmatmul.mubr.msk.bf16.gmra.mxu1 %vm92_vm0, %v8969_v18  ;;  %8107 = vmatprep.mubr.msk.bf16.mxu0 %vm92_vm0, %v8786_v2 }
 0x3b2   :  { %4124 = vst [vmem:[%s12397_s5 + $0x17e8] sm:$0x3] %v7777_v39  ;;  %v4303_v30 = vpop.f32.mrf.mxu0  ;;  %8067 = vmatprep.mubr.msk.bf16.mxu1 %vm92_vm0, %v8786_v2 }
 0x3b3   :  { %v4080_v31 = vpop.f32.mrf.mxu1  ;;  %4345 = vst [vmem:[%s12397_s5 + $0x1660] sm:$0xff] %v4303_v30 }
 0x3b4   :  { %4122 = vst [vmem:[%s12397_s5 + $0x1658] sm:$0xff] %v4080_v31  ;;  %v7818_v40 = vpop.f32.mrf.mxu0 }
 0x3b5   :  { %v7778_v60 = vpop.f32.mrf.mxu1 }
 0x3b6   :  { %v4306_v50 = vpop.f32.mrf.mxu0 }
 0x3b7   :  { %v4083_v51 = vpop.f32.mrf.mxu1  ;;  %4346 = vst [vmem:[%s12397_s5 + $0x1728] sm:$0xff] %v4306_v50 }
 0x3b8   :  { %4123 = vst [vmem:[%s12397_s5 + $0x1720] sm:$0xff] %v4083_v51  ;;  %v7869_v2 = vpop.f32.mrf.mxu0  ;;  %8108 = vmatmul.mubr.msk.bf16.vlgmr.msra.gmra.mxu0 %vm92_vm0, %v8802_v3 }
 0x3b9   :  { %v7829_v5 = vpop.f32.mrf.mxu1  ;;  %4765 = vst [vmem:[%s12397_s5 + $0x220] sm:$0xff] %v7869_v2  ;;  %8068 = vmatmul.mubr.msk.bf16.vlgmr.msra.gmra.mxu1 %vm92_vm0, %v8802_v3  ;;  %8111 = vmatprep.mubr.msk.bf16.mxu0 %vm92_vm0, %v8845_v28 }
 0x3ba   :  { %4542 = vst [vmem:[%s12397_s5 + $0x218] sm:$0xff] %v7829_v5  ;;  %v4637_v6 = vpop.f32.mrf.mxu0  ;;  %8071 = vmatprep.mubr.msk.bf16.mxu1 %vm92_vm0, %v8845_v28 }
 0x3bb   :  { %v4414_v42 = vpop.f32.mrf.mxu1  ;;  %4763 = vst [vmem:[%s12397_s5 + $0x90] sm:$0xff] %v4637_v6 }
 0x3bc   :  { %4540 = vst [vmem:[%s12397_s5 + $0x88] sm:$0xff] %v4414_v42  ;;  %v7870_v3 = vpop.f32.mrf.mxu0 }
 0x3bd   :  { %v7830_v47 = vpop.f32.mrf.mxu1  ;;  %4766 = vst [vmem:[%s12397_s5 + $0x2e8] sm:$0xff] %v7870_v3 }
 0x3be   :  { %4543 = vst [vmem:[%s12397_s5 + $0x2e0] sm:$0xff] %v7830_v47  ;;  %v4640_v28 = vpop.f32.mrf.mxu0 }
 0x3bf   :  { %v4417_v1 = vpop.f32.mrf.mxu1  ;;  %4764 = vst [vmem:[%s12397_s5 + $0x158] sm:$0xff] %v4640_v28 }
 0x3c0   :  { %4541 = vst [vmem:[%s12397_s5 + $0x150] sm:$0xff] %v4417_v1  ;;  %v7873_v7 = vpop.f32.mrf.mxu0  ;;  %8112 = vmatmul.mubr.msk.bf16.gmra.mxu0 %vm92_vm0, %v8870_v25 }
 0x3c1   :  { %v7833_v10 = vpop.f32.mrf.mxu1  ;;  %4769 = vst [vmem:[%s12397_s5 + $0x540] sm:$0xff] %v7873_v7  ;;  %8072 = vmatmul.mubr.msk.bf16.gmra.mxu1 %vm92_vm0, %v8870_v25  ;;  %8115 = vmatprep.mubr.msk.bf16.mxu0 %vm92_vm0, %v8911_v27 }
 0x3c2   :  { %4546 = vst [vmem:[%s12397_s5 + $0x538] sm:$0xff] %v7833_v10  ;;  %v4653_v17 = vpop.f32.mrf.mxu0  ;;  %8075 = vmatprep.mubr.msk.bf16.mxu1 %vm92_vm0, %v8911_v27 }
 0x3c3   :  { %v4430_v38 = vpop.f32.mrf.mxu1  ;;  %4767 = vst [vmem:[%s12397_s5 + $0x3b0] sm:$0xff] %v4653_v17 }
 0x3c4   :  { %4544 = vst [vmem:[%s12397_s5 + $0x3a8] sm:$0xff] %v4430_v38  ;;  %v7874_v25 = vpop.f32.mrf.mxu0 }
 0x3c5   :  { %v7834_v52 = vpop.f32.mrf.mxu1  ;;  %4770 = vst [vmem:[%s12397_s5 + $0x608] sm:$0xff] %v7874_v25 }
 0x3c6   :  { %4547 = vst [vmem:[%s12397_s5 + $0x600] sm:$0xff] %v7834_v52  ;;  %v4656_v27 = vpop.f32.mrf.mxu0 }
 0x3c7   :  { %v4433_v59 = vpop.f32.mrf.mxu1  ;;  %4768 = vst [vmem:[%s12397_s5 + $0x478] sm:$0xff] %v4656_v27 }
 0x3c8   :  { %4545 = vst [vmem:[%s12397_s5 + $0x470] sm:$0xff] %v4433_v59  ;;  %v7877_v33 = vpop.f32.mrf.mxu0  ;;  %8116 = vmatmul.mubr.msk.bf16.gmra.mxu0 %vm92_vm0, %v8931_v46 }
 0x3c9   :  { %v7837_v63 = vpop.f32.mrf.mxu1  ;;  %4773 = vst [vmem:[%s12397_s5 + $0x860] sm:$0xff] %v7877_v33  ;;  %8076 = vmatmul.mubr.msk.bf16.gmra.mxu1 %vm92_vm0, %v8931_v46  ;;  %8119 = vmatprep.mubr.msk.bf16.mxu0 %vm92_vm0, %v8956_v45 }
 0x3ca   :  { %4550 = vst [vmem:[%s12397_s5 + $0x858] sm:$0xff] %v7837_v63  ;;  %v4669_v24 = vpop.f32.mrf.mxu0  ;;  %8079 = vmatprep.mubr.msk.bf16.mxu1 %vm92_vm0, %v8956_v45 }
 0x3cb   :  { %v4446_v32 = vpop.f32.mrf.mxu1  ;;  %4771 = vst [vmem:[%s12397_s5 + $0x6d0] sm:$0xff] %v4669_v24 }
 0x3cc   :  { %4548 = vst [vmem:[%s12397_s5 + $0x6c8] sm:$0xff] %v4446_v32  ;;  %v7878_v46 = vpop.f32.mrf.mxu0 }
 0x3cd   :  { %v7838_v16 = vpop.f32.mrf.mxu1  ;;  %4774 = vst [vmem:[%s12397_s5 + $0x928] sm:$0xff] %v7878_v46 }
 0x3ce   :  { %4551 = vst [vmem:[%s12397_s5 + $0x920] sm:$0xff] %v7838_v16  ;;  %v4672_v45 = vpop.f32.mrf.mxu0 }
 0x3cf   :  { %v4449_v41 = vpop.f32.mrf.mxu1  ;;  %4772 = vst [vmem:[%s12397_s5 + $0x798] sm:$0xff] %v4672_v45 }
 0x3d0   :  { %4549 = vst [vmem:[%s12397_s5 + $0x790] sm:$0xff] %v4449_v41  ;;  %v7881_v0 = vpop.f32.mrf.mxu0  ;;  %8120 = vmatmul.mubr.msk.bf16.gmra.mxu0 %vm92_vm0, %v8965_v34 }
 0x3d1   :  { %v7841_v14 = vpop.f32.mrf.mxu1  ;;  %4777 = vst [vmem:[%s12397_s5 + $0xb80] sm:$0xff] %v7881_v0  ;;  %8080 = vmatmul.mubr.msk.bf16.gmra.mxu1 %vm92_vm0, %v8965_v34  ;;  %8123 = vmatprep.mubr.msk.bf16.mxu0 %vm92_vm0, %v8788_v20 }
 0x3d2   :  { %4554 = vst [vmem:[%s12397_s5 + $0xb78] sm:$0xff] %v7841_v14  ;;  %v4685_v37 = vpop.f32.mrf.mxu0  ;;  %8083 = vmatprep.mubr.msk.bf16.mxu1 %vm92_vm0, %v8788_v20 }
 0x3d3   :  { %v4462_v23 = vpop.f32.mrf.mxu1  ;;  %4775 = vst [vmem:[%s12397_s5 + $0x9f0] sm:$0xff] %v4685_v37 }
 0x3d4   :  { %4552 = vst [vmem:[%s12397_s5 + $0x9e8] sm:$0xff] %v4462_v23  ;;  %v7882_v34 = vpop.f32.mrf.mxu0 }
 0x3d5   :  { %v7842_v43 = vpop.f32.mrf.mxu1  ;;  %4778 = vst [vmem:[%s12397_s5 + $0xc48] sm:$0xff] %v7882_v34 }
 0x3d6   :  { %4555 = vst [vmem:[%s12397_s5 + $0xc40] sm:$0xff] %v7842_v43  ;;  %v4688_v20 = vpop.f32.mrf.mxu0 }
 0x3d7   :  { %v4465_v55 = vpop.f32.mrf.mxu1  ;;  %4776 = vst [vmem:[%s12397_s5 + $0xab8] sm:$0xff] %v4688_v20 }
 0x3d8   :  { %4553 = vst [vmem:[%s12397_s5 + $0xab0] sm:$0xff] %v4465_v55  ;;  %v7885_v13 = vpop.f32.mrf.mxu0  ;;  %8124 = vmatmul.mubr.msk.bf16.gmra.mxu0 %vm92_vm0, %v8808_v8 }
 0x3d9   :  { %v7845_v57 = vpop.f32.mrf.mxu1  ;;  %4781 = vst [vmem:[%s12397_s5 + $0xea0] sm:$0xff] %v7885_v13  ;;  %8084 = vmatmul.mubr.msk.bf16.gmra.mxu1 %vm92_vm0, %v8808_v8  ;;  %8127 = vmatprep.mubr.msk.bf16.mxu0 %vm92_vm0, %v8850_v29 }
 0x3da   :  { %4558 = vst [vmem:[%s12397_s5 + $0xe98] sm:$0xff] %v7845_v57  ;;  %v4701_v44 = vpop.f32.mrf.mxu0  ;;  %8087 = vmatprep.mubr.msk.bf16.mxu1 %vm92_vm0, %v8850_v29 }
 0x3db   :  { %v4478_v56 = vpop.f32.mrf.mxu1  ;;  %4779 = vst [vmem:[%s12397_s5 + $0xd10] sm:$0xff] %v4701_v44 }
 0x3dc   :  { %4556 = vst [vmem:[%s12397_s5 + $0xd08] sm:$0xff] %v4478_v56  ;;  %v7886_v8 = vpop.f32.mrf.mxu0 }
 0x3dd   :  { %v7846_v22 = vpop.f32.mrf.mxu1  ;;  %4782 = vst [vmem:[%s12397_s5 + $0xf68] sm:$0xff] %v7886_v8 }
 0x3de   :  { %4559 = vst [vmem:[%s12397_s5 + $0xf60] sm:$0xff] %v7846_v22  ;;  %v4704_v29 = vpop.f32.mrf.mxu0 }
 0x3df   :  { %v4481_v11 = vpop.f32.mrf.mxu1  ;;  %4780 = vst [vmem:[%s12397_s5 + $0xdd8] sm:$0xff] %v4704_v29 }
 0x3e0   :  { %4557 = vst [vmem:[%s12397_s5 + $0xdd0] sm:$0xff] %v4481_v11  ;;  %v7889_v9 = vpop.f32.mrf.mxu0  ;;  %8128 = vmatmul.mubr.msk.bf16.gmra.mxu0 %vm92_vm0, %v8900_v12 }
 0x3e1   :  { %v7849_v48 = vpop.f32.mrf.mxu1  ;;  %4785 = vst [vmem:[%s12397_s5 + $0x11c0] sm:$0xff] %v7889_v9  ;;  %8088 = vmatmul.mubr.msk.bf16.gmra.mxu1 %vm92_vm0, %v8900_v12  ;;  %8131 = vmatprep.mubr.msk.bf16.mxu0 %vm92_vm0, %v8914_v21 }
 0x3e2   :  { %4562 = vst [vmem:[%s12397_s5 + $0x11b8] sm:$0xff] %v7849_v48  ;;  %v4717_v35 = vpop.f32.mrf.mxu0  ;;  %8091 = vmatprep.mubr.msk.bf16.mxu1 %vm92_vm0, %v8914_v21 }
 0x3e3   :  { %v4494_v4 = vpop.f32.mrf.mxu1  ;;  %4783 = vst [vmem:[%s12397_s5 + $0x1030] sm:$0xff] %v4717_v35 }
 0x3e4   :  { %4560 = vst [vmem:[%s12397_s5 + $0x1028] sm:$0xff] %v4494_v4  ;;  %v7890_v12 = vpop.f32.mrf.mxu0 }
 0x3e5   :  { %v7850_v49 = vpop.f32.mrf.mxu1  ;;  %4786 = vst [vmem:[%s12397_s5 + $0x1288] sm:$0xff] %v7890_v12 }
 0x3e6   :  { %4563 = vst [vmem:[%s12397_s5 + $0x1280] sm:$0xff] %v7850_v49  ;;  %v4720_v21 = vpop.f32.mrf.mxu0 }
 0x3e7   :  { %v4497_v36 = vpop.f32.mrf.mxu1  ;;  %4784 = vst [vmem:[%s12397_s5 + $0x10f8] sm:$0xff] %v4720_v21 }
 0x3e8   :  { %4561 = vst [vmem:[%s12397_s5 + $0x10f0] sm:$0xff] %v4497_v36  ;;  %v7893_v26 = vpop.f32.mrf.mxu0  ;;  %8132 = vmatmul.mubr.msk.bf16.gmra.mxu0 %vm92_vm0, %v8946_v19 }
 0x3e9   :  { %v7853_v15 = vpop.f32.mrf.mxu1  ;;  %4789 = vst [vmem:[%s12397_s5 + $0x14e0] sm:$0xff] %v7893_v26  ;;  %8092 = vmatmul.mubr.msk.bf16.gmra.mxu1 %vm92_vm0, %v8946_v19  ;;  %8135 = vmatprep.mubr.msk.bf16.mxu0 %vm92_vm0, %v8963_v62 }
 0x3ea   :  { %4566 = vst [vmem:[%s12397_s5 + $0x14d8] sm:$0xff] %v7853_v15  ;;  %v4733_v61 = vpop.f32.mrf.mxu0  ;;  %8095 = vmatprep.mubr.msk.bf16.mxu1 %vm92_vm0, %v8963_v62 }
 0x3eb   :  { %v4510_v58 = vpop.f32.mrf.mxu1  ;;  %4787 = vst [vmem:[%s12397_s5 + $0x1350] sm:$0xff] %v4733_v61 }
 0x3ec   :  { %4564 = vst [vmem:[%s12397_s5 + $0x1348] sm:$0xff] %v4510_v58  ;;  %v7894_v19 = vpop.f32.mrf.mxu0 }
 0x3ed   :  { %v7854_v53 = vpop.f32.mrf.mxu1  ;;  %4790 = vst [vmem:[%s12397_s5 + $0x15a8] sm:$0xff] %v7894_v19 }
 0x3ee   :  { %4567 = vst [vmem:[%s12397_s5 + $0x15a0] sm:$0xff] %v7854_v53  ;;  %v4736_v62 = vpop.f32.mrf.mxu0 }
 0x3ef   :  { %v4513_v54 = vpop.f32.mrf.mxu1  ;;  %4788 = vst [vmem:[%s12397_s5 + $0x1418] sm:$0xff] %v4736_v62 }
 0x3f0   :  { %4565 = vst [vmem:[%s12397_s5 + $0x1410] sm:$0xff] %v4513_v54  ;;  %v7897_v39 = vpop.f32.mrf.mxu0  ;;  %8136 = vmatmul.mubr.msk.bf16.gmra.mxu0 %vm92_vm0, %v8969_v18 }
 0x3f1   :  { %v7857_v30 = vpop.f32.mrf.mxu1  ;;  %4793 = vst [vmem:[%s12397_s5 + $0x1800] sm:$0x3] %v7897_v39  ;;  %8096 = vmatmul.mubr.msk.bf16.gmra.mxu1 %vm92_vm0, %v8969_v18 }
 0x3f2   :  { %4570 = vst [vmem:[%s12397_s5 + $0x17f8] sm:$0x3] %v7857_v30  ;;  %v4749_v31 = vpop.f32.mrf.mxu0 }
 0x3f3   :  { %v4526_v40 = vpop.f32.mrf.mxu1  ;;  %4791 = vst [vmem:[%s12397_s5 + $0x1670] sm:$0xff] %v4749_v31 }
 0x3f4   :  { %4568 = vst [vmem:[%s12397_s5 + $0x1668] sm:$0xff] %v4526_v40  ;;  %v7898_v60 = vpop.f32.mrf.mxu0 }
 0x3f5   :  { %v7858_v50 = vpop.f32.mrf.mxu1 }
 0x3f6   :  { %v4752_v51 = vpop.f32.mrf.mxu0 }
 0x3f7   :  { %v4529_v2 = vpop.f32.mrf.mxu1  ;;  %4792 = vst [vmem:[%s12397_s5 + $0x1738] sm:$0xff] %v4752_v51 }
 0x3f8   :  { %4569 = vst [vmem:[%s12397_s5 + $0x1730] sm:$0xff] %v4529_v2  ;;  %v7949_v18 = vpop.f32.mrf.mxu0 }
 0x3f9   :  { %v7909_v5 = vpop.f32.mrf.mxu1  ;;  %5211 = vst [vmem:[%s12397_s5 + $0x230] sm:$0xff] %v7949_v18 }
 0x3fa   :  { %4988 = vst [vmem:[%s12397_s5 + $0x228] sm:$0xff] %v7909_v5  ;;  %v5083_v6 = vpop.f32.mrf.mxu0 }
 0x3fb   :  { %v4860_v42 = vpop.f32.mrf.mxu1  ;;  %5209 = vst [vmem:[%s12397_s5 + $0xa0] sm:$0xff] %v5083_v6 }
 0x3fc   :  { %4986 = vst [vmem:[%s12397_s5 + $0x98] sm:$0xff] %v4860_v42  ;;  %v7950_v3 = vpop.f32.mrf.mxu0 }
 0x3fd   :  { %v7910_v47 = vpop.f32.mrf.mxu1  ;;  %5212 = vst [vmem:[%s12397_s5 + $0x2f8] sm:$0xff] %v7950_v3 }
 0x3fe   :  { %4989 = vst [vmem:[%s12397_s5 + $0x2f0] sm:$0xff] %v7910_v47  ;;  %v5086_v28 = vpop.f32.mrf.mxu0 }
 0x3ff   :  { %v4863_v1 = vpop.f32.mrf.mxu1  ;;  %5210 = vst [vmem:[%s12397_s5 + $0x168] sm:$0xff] %v5086_v28 }
 0x400   :  { %4987 = vst [vmem:[%s12397_s5 + $0x160] sm:$0xff] %v4863_v1  ;;  %v7953_v7 = vpop.f32.mrf.mxu0 }
 0x401   :  { %v7913_v10 = vpop.f32.mrf.mxu1  ;;  %5215 = vst [vmem:[%s12397_s5 + $0x550] sm:$0xff] %v7953_v7 }
 0x402   :  { %4992 = vst [vmem:[%s12397_s5 + $0x548] sm:$0xff] %v7913_v10  ;;  %v5099_v17 = vpop.f32.mrf.mxu0 }
 0x403   :  { %v4876_v38 = vpop.f32.mrf.mxu1  ;;  %5213 = vst [vmem:[%s12397_s5 + $0x3c0] sm:$0xff] %v5099_v17 }
 0x404   :  { %4990 = vst [vmem:[%s12397_s5 + $0x3b8] sm:$0xff] %v4876_v38  ;;  %v7954_v25 = vpop.f32.mrf.mxu0 }
 0x405   :  { %v7914_v52 = vpop.f32.mrf.mxu1  ;;  %5216 = vst [vmem:[%s12397_s5 + $0x618] sm:$0xff] %v7954_v25 }
 0x406   :  { %4993 = vst [vmem:[%s12397_s5 + $0x610] sm:$0xff] %v7914_v52  ;;  %v5102_v27 = vpop.f32.mrf.mxu0 }
 0x407   :  { %v4879_v59 = vpop.f32.mrf.mxu1  ;;  %5214 = vst [vmem:[%s12397_s5 + $0x488] sm:$0xff] %v5102_v27 }
 0x408   :  { %4991 = vst [vmem:[%s12397_s5 + $0x480] sm:$0xff] %v4879_v59  ;;  %v7957_v33 = vpop.f32.mrf.mxu0 }
 0x409   :  { %v7917_v63 = vpop.f32.mrf.mxu1  ;;  %5219 = vst [vmem:[%s12397_s5 + $0x870] sm:$0xff] %v7957_v33 }
 0x40a   :  { %4996 = vst [vmem:[%s12397_s5 + $0x868] sm:$0xff] %v7917_v63  ;;  %v5115_v24 = vpop.f32.mrf.mxu0 }
 0x40b   :  { %v4892_v32 = vpop.f32.mrf.mxu1  ;;  %5217 = vst [vmem:[%s12397_s5 + $0x6e0] sm:$0xff] %v5115_v24 }
 0x40c   :  { %4994 = vst [vmem:[%s12397_s5 + $0x6d8] sm:$0xff] %v4892_v32  ;;  %v7958_v46 = vpop.f32.mrf.mxu0 }
 0x40d   :  { %v7918_v16 = vpop.f32.mrf.mxu1  ;;  %5220 = vst [vmem:[%s12397_s5 + $0x938] sm:$0xff] %v7958_v46 }
 0x40e   :  { %4997 = vst [vmem:[%s12397_s5 + $0x930] sm:$0xff] %v7918_v16  ;;  %v5118_v45 = vpop.f32.mrf.mxu0 }
 0x40f   :  { %v4895_v41 = vpop.f32.mrf.mxu1  ;;  %5218 = vst [vmem:[%s12397_s5 + $0x7a8] sm:$0xff] %v5118_v45 }
 0x410   :  { %4995 = vst [vmem:[%s12397_s5 + $0x7a0] sm:$0xff] %v4895_v41  ;;  %v7961_v0 = vpop.f32.mrf.mxu0 }
 0x411   :  { %v7921_v14 = vpop.f32.mrf.mxu1  ;;  %5223 = vst [vmem:[%s12397_s5 + $0xb90] sm:$0xff] %v7961_v0 }
 0x412   :  { %5000 = vst [vmem:[%s12397_s5 + $0xb88] sm:$0xff] %v7921_v14  ;;  %v5131_v37 = vpop.f32.mrf.mxu0 }
 0x413   :  { %v4908_v23 = vpop.f32.mrf.mxu1  ;;  %5221 = vst [vmem:[%s12397_s5 + $0xa00] sm:$0xff] %v5131_v37 }
 0x414   :  { %4998 = vst [vmem:[%s12397_s5 + $0x9f8] sm:$0xff] %v4908_v23  ;;  %v7962_v34 = vpop.f32.mrf.mxu0 }
 0x415   :  { %v7922_v43 = vpop.f32.mrf.mxu1  ;;  %5224 = vst [vmem:[%s12397_s5 + $0xc58] sm:$0xff] %v7962_v34 }
 0x416   :  { %5001 = vst [vmem:[%s12397_s5 + $0xc50] sm:$0xff] %v7922_v43  ;;  %v5134_v20 = vpop.f32.mrf.mxu0 }
 0x417   :  { %v4911_v55 = vpop.f32.mrf.mxu1  ;;  %5222 = vst [vmem:[%s12397_s5 + $0xac8] sm:$0xff] %v5134_v20 }
 0x418   :  { %4999 = vst [vmem:[%s12397_s5 + $0xac0] sm:$0xff] %v4911_v55  ;;  %v7965_v13 = vpop.f32.mrf.mxu0 }
 0x419   :  { %v7925_v57 = vpop.f32.mrf.mxu1  ;;  %5227 = vst [vmem:[%s12397_s5 + $0xeb0] sm:$0xff] %v7965_v13 }
 0x41a   :  { %5004 = vst [vmem:[%s12397_s5 + $0xea8] sm:$0xff] %v7925_v57  ;;  %v5147_v44 = vpop.f32.mrf.mxu0 }
 0x41b   :  { %v4924_v56 = vpop.f32.mrf.mxu1  ;;  %5225 = vst [vmem:[%s12397_s5 + $0xd20] sm:$0xff] %v5147_v44 }
 0x41c   :  { %5002 = vst [vmem:[%s12397_s5 + $0xd18] sm:$0xff] %v4924_v56  ;;  %v7966_v8 = vpop.f32.mrf.mxu0 }
 0x41d   :  { %v7926_v22 = vpop.f32.mrf.mxu1  ;;  %5228 = vst [vmem:[%s12397_s5 + $0xf78] sm:$0xff] %v7966_v8 }
 0x41e   :  { %5005 = vst [vmem:[%s12397_s5 + $0xf70] sm:$0xff] %v7926_v22  ;;  %v5150_v29 = vpop.f32.mrf.mxu0 }
 0x41f   :  { %v4927_v11 = vpop.f32.mrf.mxu1  ;;  %5226 = vst [vmem:[%s12397_s5 + $0xde8] sm:$0xff] %v5150_v29 }
 0x420   :  { %5003 = vst [vmem:[%s12397_s5 + $0xde0] sm:$0xff] %v4927_v11  ;;  %v7969_v9 = vpop.f32.mrf.mxu0 }
 0x421   :  { %v7929_v48 = vpop.f32.mrf.mxu1  ;;  %5231 = vst [vmem:[%s12397_s5 + $0x11d0] sm:$0xff] %v7969_v9 }
 0x422   :  { %5008 = vst [vmem:[%s12397_s5 + $0x11c8] sm:$0xff] %v7929_v48  ;;  %v5163_v35 = vpop.f32.mrf.mxu0 }
 0x423   :  { %v4940_v4 = vpop.f32.mrf.mxu1  ;;  %5229 = vst [vmem:[%s12397_s5 + $0x1040] sm:$0xff] %v5163_v35 }
 0x424   :  { %5006 = vst [vmem:[%s12397_s5 + $0x1038] sm:$0xff] %v4940_v4  ;;  %v7970_v12 = vpop.f32.mrf.mxu0 }
 0x425   :  { %v7930_v49 = vpop.f32.mrf.mxu1  ;;  %5232 = vst [vmem:[%s12397_s5 + $0x1298] sm:$0xff] %v7970_v12 }
 0x426   :  { %5009 = vst [vmem:[%s12397_s5 + $0x1290] sm:$0xff] %v7930_v49  ;;  %v5166_v21 = vpop.f32.mrf.mxu0 }
 0x427   :  { %v4943_v36 = vpop.f32.mrf.mxu1  ;;  %5230 = vst [vmem:[%s12397_s5 + $0x1108] sm:$0xff] %v5166_v21 }
 0x428   :  { %5007 = vst [vmem:[%s12397_s5 + $0x1100] sm:$0xff] %v4943_v36  ;;  %v7973_v26 = vpop.f32.mrf.mxu0 }
 0x429   :  { %v7933_v15 = vpop.f32.mrf.mxu1  ;;  %5235 = vst [vmem:[%s12397_s5 + $0x14f0] sm:$0xff] %v7973_v26 }
 0x42a   :  { %5012 = vst [vmem:[%s12397_s5 + $0x14e8] sm:$0xff] %v7933_v15  ;;  %v5179_v61 = vpop.f32.mrf.mxu0 }
 0x42b   :  { %v4956_v58 = vpop.f32.mrf.mxu1  ;;  %5233 = vst [vmem:[%s12397_s5 + $0x1360] sm:$0xff] %v5179_v61 }
 0x42c   :  { %5010 = vst [vmem:[%s12397_s5 + $0x1358] sm:$0xff] %v4956_v58  ;;  %v7974_v19 = vpop.f32.mrf.mxu0 }
 0x42d   :  { %v7934_v53 = vpop.f32.mrf.mxu1  ;;  %5236 = vst [vmem:[%s12397_s5 + $0x15b8] sm:$0xff] %v7974_v19 }
 0x42e   :  { %5013 = vst [vmem:[%s12397_s5 + $0x15b0] sm:$0xff] %v7934_v53  ;;  %v5182_v62 = vpop.f32.mrf.mxu0 }
 0x42f   :  { %v4959_v54 = vpop.f32.mrf.mxu1  ;;  %5234 = vst [vmem:[%s12397_s5 + $0x1428] sm:$0xff] %v5182_v62 }
 0x430   :  { %5011 = vst [vmem:[%s12397_s5 + $0x1420] sm:$0xff] %v4959_v54  ;;  %v7977_v39 = vpop.f32.mrf.mxu0 }
 0x431   :  { %v7937_v30 = vpop.f32.mrf.mxu1  ;;  %5239 = vst [vmem:[%s12397_s5 + $0x1810] sm:$0x3] %v7977_v39 }
 0x432   :  { %5016 = vst [vmem:[%s12397_s5 + $0x1808] sm:$0x3] %v7937_v30  ;;  %v5195_v31 = vpop.f32.mrf.mxu0 }
 0x433   :  { %v4972_v40 = vpop.f32.mrf.mxu1  ;;  %5237 = vst [vmem:[%s12397_s5 + $0x1680] sm:$0xff] %v5195_v31 }
 0x434   :  { %5014 = vst [vmem:[%s12397_s5 + $0x1678] sm:$0xff] %v4972_v40  ;;  %v7978_v60 = vpop.f32.mrf.mxu0 }
 0x435   :  { %v7938_v50 = vpop.f32.mrf.mxu1 }
 0x436   :  { %v5198_v51 = vpop.f32.mrf.mxu0 }
 0x437   :  { %v4975_v2 = vpop.f32.mrf.mxu1  ;;  %5238 = vst [vmem:[%s12397_s5 + $0x1748] sm:$0xff] %v5198_v51 }
 0x438   :  { %5015 = vst [vmem:[%s12397_s5 + $0x1740] sm:$0xff] %v4975_v2  ;;  %v8029_v18 = vpop.f32.mrf.mxu0 }
 0x439   :  { %v7989_v5 = vpop.f32.mrf.mxu1  ;;  %5657 = vst [vmem:[%s12397_s5 + $0x240] sm:$0xff] %v8029_v18 }
 0x43a   :  { %5434 = vst [vmem:[%s12397_s5 + $0x238] sm:$0xff] %v7989_v5  ;;  %v5529_v6 = vpop.f32.mrf.mxu0 }
 0x43b   :  { %v5306_v42 = vpop.f32.mrf.mxu1  ;;  %5655 = vst [vmem:[%s12397_s5 + $0xb0] sm:$0xff] %v5529_v6 }
 0x43c   :  { %5432 = vst [vmem:[%s12397_s5 + $0xa8] sm:$0xff] %v5306_v42  ;;  %v8030_v3 = vpop.f32.mrf.mxu0 }
 0x43d   :  { %v7990_v47 = vpop.f32.mrf.mxu1  ;;  %5658 = vst [vmem:[%s12397_s5 + $0x308] sm:$0xff] %v8030_v3 }
 0x43e   :  { %5435 = vst [vmem:[%s12397_s5 + $0x300] sm:$0xff] %v7990_v47  ;;  %v5532_v28 = vpop.f32.mrf.mxu0 }
 0x43f   :  { %v5309_v1 = vpop.f32.mrf.mxu1  ;;  %5656 = vst [vmem:[%s12397_s5 + $0x178] sm:$0xff] %v5532_v28 }
 0x440   :  { %5433 = vst [vmem:[%s12397_s5 + $0x170] sm:$0xff] %v5309_v1  ;;  %v8033_v7 = vpop.f32.mrf.mxu0 }
 0x441   :  { %v7993_v10 = vpop.f32.mrf.mxu1  ;;  %5661 = vst [vmem:[%s12397_s5 + $0x560] sm:$0xff] %v8033_v7 }
 0x442   :  { %5438 = vst [vmem:[%s12397_s5 + $0x558] sm:$0xff] %v7993_v10  ;;  %v5545_v17 = vpop.f32.mrf.mxu0 }
 0x443   :  { %v5322_v38 = vpop.f32.mrf.mxu1  ;;  %5659 = vst [vmem:[%s12397_s5 + $0x3d0] sm:$0xff] %v5545_v17 }
 0x444   :  { %5436 = vst [vmem:[%s12397_s5 + $0x3c8] sm:$0xff] %v5322_v38  ;;  %v8034_v25 = vpop.f32.mrf.mxu0 }
 0x445   :  { %v7994_v52 = vpop.f32.mrf.mxu1  ;;  %5662 = vst [vmem:[%s12397_s5 + $0x628] sm:$0xff] %v8034_v25 }
 0x446   :  { %5439 = vst [vmem:[%s12397_s5 + $0x620] sm:$0xff] %v7994_v52  ;;  %v5548_v27 = vpop.f32.mrf.mxu0 }
 0x447   :  { %v5325_v59 = vpop.f32.mrf.mxu1  ;;  %5660 = vst [vmem:[%s12397_s5 + $0x498] sm:$0xff] %v5548_v27 }
 0x448   :  { %5437 = vst [vmem:[%s12397_s5 + $0x490] sm:$0xff] %v5325_v59  ;;  %v8037_v33 = vpop.f32.mrf.mxu0 }
 0x449   :  { %v7997_v63 = vpop.f32.mrf.mxu1  ;;  %5665 = vst [vmem:[%s12397_s5 + $0x880] sm:$0xff] %v8037_v33 }
 0x44a   :  { %5442 = vst [vmem:[%s12397_s5 + $0x878] sm:$0xff] %v7997_v63  ;;  %v5561_v24 = vpop.f32.mrf.mxu0 }
 0x44b   :  { %v5338_v32 = vpop.f32.mrf.mxu1  ;;  %5663 = vst [vmem:[%s12397_s5 + $0x6f0] sm:$0xff] %v5561_v24 }
 0x44c   :  { %5440 = vst [vmem:[%s12397_s5 + $0x6e8] sm:$0xff] %v5338_v32  ;;  %v8038_v46 = vpop.f32.mrf.mxu0 }
 0x44d   :  { %v7998_v16 = vpop.f32.mrf.mxu1  ;;  %5666 = vst [vmem:[%s12397_s5 + $0x948] sm:$0xff] %v8038_v46 }
 0x44e   :  { %5443 = vst [vmem:[%s12397_s5 + $0x940] sm:$0xff] %v7998_v16  ;;  %v5564_v45 = vpop.f32.mrf.mxu0 }
 0x44f   :  { %v5341_v41 = vpop.f32.mrf.mxu1  ;;  %5664 = vst [vmem:[%s12397_s5 + $0x7b8] sm:$0xff] %v5564_v45 }
 0x450   :  { %5441 = vst [vmem:[%s12397_s5 + $0x7b0] sm:$0xff] %v5341_v41  ;;  %v8041_v0 = vpop.f32.mrf.mxu0 }
 0x451   :  { %v8001_v14 = vpop.f32.mrf.mxu1  ;;  %5669 = vst [vmem:[%s12397_s5 + $0xba0] sm:$0xff] %v8041_v0 }
 0x452   :  { %5446 = vst [vmem:[%s12397_s5 + $0xb98] sm:$0xff] %v8001_v14  ;;  %v5577_v37 = vpop.f32.mrf.mxu0 }
 0x453   :  { %v5354_v23 = vpop.f32.mrf.mxu1  ;;  %5667 = vst [vmem:[%s12397_s5 + $0xa10] sm:$0xff] %v5577_v37 }
 0x454   :  { %5444 = vst [vmem:[%s12397_s5 + $0xa08] sm:$0xff] %v5354_v23  ;;  %v8042_v34 = vpop.f32.mrf.mxu0 }
 0x455   :  { %v8002_v43 = vpop.f32.mrf.mxu1  ;;  %5670 = vst [vmem:[%s12397_s5 + $0xc68] sm:$0xff] %v8042_v34 }
 0x456   :  { %5447 = vst [vmem:[%s12397_s5 + $0xc60] sm:$0xff] %v8002_v43  ;;  %v5580_v20 = vpop.f32.mrf.mxu0 }
 0x457   :  { %v5357_v55 = vpop.f32.mrf.mxu1  ;;  %5668 = vst [vmem:[%s12397_s5 + $0xad8] sm:$0xff] %v5580_v20 }
 0x458   :  { %5445 = vst [vmem:[%s12397_s5 + $0xad0] sm:$0xff] %v5357_v55  ;;  %v8045_v13 = vpop.f32.mrf.mxu0 }
 0x459   :  { %v8005_v57 = vpop.f32.mrf.mxu1  ;;  %5673 = vst [vmem:[%s12397_s5 + $0xec0] sm:$0xff] %v8045_v13 }
 0x45a   :  { %5450 = vst [vmem:[%s12397_s5 + $0xeb8] sm:$0xff] %v8005_v57  ;;  %v5593_v44 = vpop.f32.mrf.mxu0 }
 0x45b   :  { %v5370_v56 = vpop.f32.mrf.mxu1  ;;  %5671 = vst [vmem:[%s12397_s5 + $0xd30] sm:$0xff] %v5593_v44 }
 0x45c   :  { %5448 = vst [vmem:[%s12397_s5 + $0xd28] sm:$0xff] %v5370_v56  ;;  %v8046_v8 = vpop.f32.mrf.mxu0 }
 0x45d   :  { %v8006_v22 = vpop.f32.mrf.mxu1  ;;  %5674 = vst [vmem:[%s12397_s5 + $0xf88] sm:$0xff] %v8046_v8 }
 0x45e   :  { %5451 = vst [vmem:[%s12397_s5 + $0xf80] sm:$0xff] %v8006_v22  ;;  %v5596_v29 = vpop.f32.mrf.mxu0 }
 0x45f   :  { %v5373_v11 = vpop.f32.mrf.mxu1  ;;  %5672 = vst [vmem:[%s12397_s5 + $0xdf8] sm:$0xff] %v5596_v29 }
 0x460   :  { %5449 = vst [vmem:[%s12397_s5 + $0xdf0] sm:$0xff] %v5373_v11  ;;  %v8049_v9 = vpop.f32.mrf.mxu0 }
 0x461   :  { %v8009_v48 = vpop.f32.mrf.mxu1  ;;  %5677 = vst [vmem:[%s12397_s5 + $0x11e0] sm:$0xff] %v8049_v9 }
 0x462   :  { %5454 = vst [vmem:[%s12397_s5 + $0x11d8] sm:$0xff] %v8009_v48  ;;  %v5609_v35 = vpop.f32.mrf.mxu0 }
 0x463   :  { %v5386_v4 = vpop.f32.mrf.mxu1  ;;  %5675 = vst [vmem:[%s12397_s5 + $0x1050] sm:$0xff] %v5609_v35 }
 0x464   :  { %5452 = vst [vmem:[%s12397_s5 + $0x1048] sm:$0xff] %v5386_v4  ;;  %v8050_v12 = vpop.f32.mrf.mxu0 }
 0x465   :  { %v8010_v49 = vpop.f32.mrf.mxu1  ;;  %5678 = vst [vmem:[%s12397_s5 + $0x12a8] sm:$0xff] %v8050_v12 }
 0x466   :  { %5455 = vst [vmem:[%s12397_s5 + $0x12a0] sm:$0xff] %v8010_v49  ;;  %v5612_v21 = vpop.f32.mrf.mxu0 }
 0x467   :  { %v5389_v36 = vpop.f32.mrf.mxu1  ;;  %5676 = vst [vmem:[%s12397_s5 + $0x1118] sm:$0xff] %v5612_v21 }
 0x468   :  { %5453 = vst [vmem:[%s12397_s5 + $0x1110] sm:$0xff] %v5389_v36  ;;  %v8053_v26 = vpop.f32.mrf.mxu0 }
 0x469   :  { %v8013_v15 = vpop.f32.mrf.mxu1  ;;  %5681 = vst [vmem:[%s12397_s5 + $0x1500] sm:$0xff] %v8053_v26 }
 0x46a   :  { %5458 = vst [vmem:[%s12397_s5 + $0x14f8] sm:$0xff] %v8013_v15  ;;  %v5625_v61 = vpop.f32.mrf.mxu0 }
 0x46b   :  { %v5402_v58 = vpop.f32.mrf.mxu1  ;;  %5679 = vst [vmem:[%s12397_s5 + $0x1370] sm:$0xff] %v5625_v61 }
 0x46c   :  { %5456 = vst [vmem:[%s12397_s5 + $0x1368] sm:$0xff] %v5402_v58  ;;  %v8054_v19 = vpop.f32.mrf.mxu0 }
 0x46d   :  { %v8014_v53 = vpop.f32.mrf.mxu1  ;;  %5682 = vst [vmem:[%s12397_s5 + $0x15c8] sm:$0xff] %v8054_v19 }
 0x46e   :  { %5459 = vst [vmem:[%s12397_s5 + $0x15c0] sm:$0xff] %v8014_v53  ;;  %v5628_v62 = vpop.f32.mrf.mxu0 }
 0x46f   :  { %v5405_v54 = vpop.f32.mrf.mxu1  ;;  %5680 = vst [vmem:[%s12397_s5 + $0x1438] sm:$0xff] %v5628_v62 }
 0x470   :  { %5457 = vst [vmem:[%s12397_s5 + $0x1430] sm:$0xff] %v5405_v54  ;;  %v8057_v39 = vpop.f32.mrf.mxu0 }
 0x471   :  { %v8017_v30 = vpop.f32.mrf.mxu1  ;;  %5685 = vst [vmem:[%s12397_s5 + $0x1820] sm:$0x3] %v8057_v39 }
 0x472   :  { %5462 = vst [vmem:[%s12397_s5 + $0x1818] sm:$0x3] %v8017_v30  ;;  %v5641_v31 = vpop.f32.mrf.mxu0 }
 0x473   :  { %v5418_v40 = vpop.f32.mrf.mxu1  ;;  %5683 = vst [vmem:[%s12397_s5 + $0x1690] sm:$0xff] %v5641_v31 }
 0x474   :  { %5460 = vst [vmem:[%s12397_s5 + $0x1688] sm:$0xff] %v5418_v40  ;;  %v8058_v60 = vpop.f32.mrf.mxu0 }
 0x475   :  { %v8018_v50 = vpop.f32.mrf.mxu1 }
 0x476   :  { %v5644_v51 = vpop.f32.mrf.mxu0 }
 0x477   :  { %v5421_v2 = vpop.f32.mrf.mxu1  ;;  %5684 = vst [vmem:[%s12397_s5 + $0x1758] sm:$0xff] %v5644_v51 }
 0x478   :  { %5461 = vst [vmem:[%s12397_s5 + $0x1750] sm:$0xff] %v5421_v2  ;;  %v8109_v18 = vpop.f32.mrf.mxu0 }
 0x479   :  { %v8069_v5 = vpop.f32.mrf.mxu1  ;;  %6103 = vst [vmem:[%s12397_s5 + $0x250] sm:$0xff] %v8109_v18 }
 0x47a   :  { %5880 = vst [vmem:[%s12397_s5 + $0x248] sm:$0xff] %v8069_v5  ;;  %v5975_v6 = vpop.f32.mrf.mxu0 }
 0x47b   :  { %v5752_v42 = vpop.f32.mrf.mxu1  ;;  %6101 = vst [vmem:[%s12397_s5 + $0xc0] sm:$0xff] %v5975_v6 }
 0x47c   :  { %5878 = vst [vmem:[%s12397_s5 + $0xb8] sm:$0xff] %v5752_v42  ;;  %v8110_v3 = vpop.f32.mrf.mxu0 }
 0x47d   :  { %v8070_v47 = vpop.f32.mrf.mxu1  ;;  %6104 = vst [vmem:[%s12397_s5 + $0x318] sm:$0xff] %v8110_v3 }
 0x47e   :  { %5881 = vst [vmem:[%s12397_s5 + $0x310] sm:$0xff] %v8070_v47  ;;  %v5978_v28 = vpop.f32.mrf.mxu0 }
 0x47f   :  { %v5755_v1 = vpop.f32.mrf.mxu1  ;;  %6102 = vst [vmem:[%s12397_s5 + $0x188] sm:$0xff] %v5978_v28 }
 0x480   :  { %5879 = vst [vmem:[%s12397_s5 + $0x180] sm:$0xff] %v5755_v1  ;;  %v8113_v7 = vpop.f32.mrf.mxu0 }
 0x481   :  { %v8073_v10 = vpop.f32.mrf.mxu1  ;;  %6107 = vst [vmem:[%s12397_s5 + $0x570] sm:$0xff] %v8113_v7 }
 0x482   :  { %5884 = vst [vmem:[%s12397_s5 + $0x568] sm:$0xff] %v8073_v10  ;;  %v5991_v17 = vpop.f32.mrf.mxu0 }
 0x483   :  { %v5768_v38 = vpop.f32.mrf.mxu1  ;;  %6105 = vst [vmem:[%s12397_s5 + $0x3e0] sm:$0xff] %v5991_v17 }
 0x484   :  { %5882 = vst [vmem:[%s12397_s5 + $0x3d8] sm:$0xff] %v5768_v38  ;;  %v8114_v25 = vpop.f32.mrf.mxu0 }
 0x485   :  { %v8074_v52 = vpop.f32.mrf.mxu1  ;;  %6108 = vst [vmem:[%s12397_s5 + $0x638] sm:$0xff] %v8114_v25 }
 0x486   :  { %5885 = vst [vmem:[%s12397_s5 + $0x630] sm:$0xff] %v8074_v52  ;;  %v5994_v27 = vpop.f32.mrf.mxu0 }
 0x487   :  { %v5771_v59 = vpop.f32.mrf.mxu1  ;;  %6106 = vst [vmem:[%s12397_s5 + $0x4a8] sm:$0xff] %v5994_v27 }
 0x488   :  { %5883 = vst [vmem:[%s12397_s5 + $0x4a0] sm:$0xff] %v5771_v59  ;;  %v8117_v33 = vpop.f32.mrf.mxu0 }
 0x489   :  { %v8077_v63 = vpop.f32.mrf.mxu1  ;;  %6111 = vst [vmem:[%s12397_s5 + $0x890] sm:$0xff] %v8117_v33 }
 0x48a   :  { %5888 = vst [vmem:[%s12397_s5 + $0x888] sm:$0xff] %v8077_v63  ;;  %v6007_v24 = vpop.f32.mrf.mxu0 }
 0x48b   :  { %v5784_v32 = vpop.f32.mrf.mxu1  ;;  %6109 = vst [vmem:[%s12397_s5 + $0x700] sm:$0xff] %v6007_v24 }
 0x48c   :  { %5886 = vst [vmem:[%s12397_s5 + $0x6f8] sm:$0xff] %v5784_v32  ;;  %v8118_v46 = vpop.f32.mrf.mxu0 }
 0x48d   :  { %v8078_v16 = vpop.f32.mrf.mxu1  ;;  %6112 = vst [vmem:[%s12397_s5 + $0x958] sm:$0xff] %v8118_v46 }
 0x48e   :  { %5889 = vst [vmem:[%s12397_s5 + $0x950] sm:$0xff] %v8078_v16  ;;  %v6010_v45 = vpop.f32.mrf.mxu0 }
 0x48f   :  { %v5787_v41 = vpop.f32.mrf.mxu1  ;;  %6110 = vst [vmem:[%s12397_s5 + $0x7c8] sm:$0xff] %v6010_v45 }
 0x490   :  { %5887 = vst [vmem:[%s12397_s5 + $0x7c0] sm:$0xff] %v5787_v41  ;;  %v8121_v0 = vpop.f32.mrf.mxu0 }
 0x491   :  { %v8081_v14 = vpop.f32.mrf.mxu1  ;;  %6115 = vst [vmem:[%s12397_s5 + $0xbb0] sm:$0xff] %v8121_v0 }
 0x492   :  { %5892 = vst [vmem:[%s12397_s5 + $0xba8] sm:$0xff] %v8081_v14  ;;  %v6023_v37 = vpop.f32.mrf.mxu0 }
 0x493   :  { %v5800_v23 = vpop.f32.mrf.mxu1  ;;  %6113 = vst [vmem:[%s12397_s5 + $0xa20] sm:$0xff] %v6023_v37 }
 0x494   :  { %5890 = vst [vmem:[%s12397_s5 + $0xa18] sm:$0xff] %v5800_v23  ;;  %v8122_v34 = vpop.f32.mrf.mxu0 }
 0x495   :  { %v8082_v43 = vpop.f32.mrf.mxu1  ;;  %6116 = vst [vmem:[%s12397_s5 + $0xc78] sm:$0xff] %v8122_v34 }
 0x496   :  { %5893 = vst [vmem:[%s12397_s5 + $0xc70] sm:$0xff] %v8082_v43  ;;  %v6026_v20 = vpop.f32.mrf.mxu0 }
 0x497   :  { %v5803_v55 = vpop.f32.mrf.mxu1  ;;  %6114 = vst [vmem:[%s12397_s5 + $0xae8] sm:$0xff] %v6026_v20 }
 0x498   :  { %5891 = vst [vmem:[%s12397_s5 + $0xae0] sm:$0xff] %v5803_v55  ;;  %v8125_v13 = vpop.f32.mrf.mxu0 }
 0x499   :  { %v8085_v57 = vpop.f32.mrf.mxu1  ;;  %6119 = vst [vmem:[%s12397_s5 + $0xed0] sm:$0xff] %v8125_v13 }
 0x49a   :  { %5896 = vst [vmem:[%s12397_s5 + $0xec8] sm:$0xff] %v8085_v57  ;;  %v6039_v44 = vpop.f32.mrf.mxu0 }
 0x49b   :  { %v5816_v56 = vpop.f32.mrf.mxu1  ;;  %6117 = vst [vmem:[%s12397_s5 + $0xd40] sm:$0xff] %v6039_v44 }
 0x49c   :  { %5894 = vst [vmem:[%s12397_s5 + $0xd38] sm:$0xff] %v5816_v56  ;;  %v8126_v8 = vpop.f32.mrf.mxu0 }
 0x49d   :  { %v8086_v22 = vpop.f32.mrf.mxu1  ;;  %6120 = vst [vmem:[%s12397_s5 + $0xf98] sm:$0xff] %v8126_v8 }
 0x49e   :  { %5897 = vst [vmem:[%s12397_s5 + $0xf90] sm:$0xff] %v8086_v22  ;;  %v6042_v29 = vpop.f32.mrf.mxu0 }
 0x49f   :  { %v5819_v11 = vpop.f32.mrf.mxu1  ;;  %6118 = vst [vmem:[%s12397_s5 + $0xe08] sm:$0xff] %v6042_v29 }
 0x4a0   :  { %5895 = vst [vmem:[%s12397_s5 + $0xe00] sm:$0xff] %v5819_v11  ;;  %v8129_v9 = vpop.f32.mrf.mxu0 }
 0x4a1   :  { %v8089_v48 = vpop.f32.mrf.mxu1  ;;  %6123 = vst [vmem:[%s12397_s5 + $0x11f0] sm:$0xff] %v8129_v9 }
 0x4a2   :  { %5900 = vst [vmem:[%s12397_s5 + $0x11e8] sm:$0xff] %v8089_v48  ;;  %v6055_v35 = vpop.f32.mrf.mxu0 }
 0x4a3   :  { %v5832_v4 = vpop.f32.mrf.mxu1  ;;  %6121 = vst [vmem:[%s12397_s5 + $0x1060] sm:$0xff] %v6055_v35 }
 0x4a4   :  { %5898 = vst [vmem:[%s12397_s5 + $0x1058] sm:$0xff] %v5832_v4  ;;  %v8130_v12 = vpop.f32.mrf.mxu0 }
 0x4a5   :  { %v8090_v49 = vpop.f32.mrf.mxu1  ;;  %6124 = vst [vmem:[%s12397_s5 + $0x12b8] sm:$0xff] %v8130_v12 }
 0x4a6   :  { %5901 = vst [vmem:[%s12397_s5 + $0x12b0] sm:$0xff] %v8090_v49  ;;  %v6058_v21 = vpop.f32.mrf.mxu0 }
 0x4a7   :  { %v5835_v36 = vpop.f32.mrf.mxu1  ;;  %6122 = vst [vmem:[%s12397_s5 + $0x1128] sm:$0xff] %v6058_v21 }
 0x4a8   :  { %5899 = vst [vmem:[%s12397_s5 + $0x1120] sm:$0xff] %v5835_v36  ;;  %v8133_v26 = vpop.f32.mrf.mxu0 }
 0x4a9   :  { %v8093_v15 = vpop.f32.mrf.mxu1  ;;  %6127 = vst [vmem:[%s12397_s5 + $0x1510] sm:$0xff] %v8133_v26 }
 0x4aa   :  { %5904 = vst [vmem:[%s12397_s5 + $0x1508] sm:$0xff] %v8093_v15  ;;  %v6071_v61 = vpop.f32.mrf.mxu0 }
 0x4ab   :  { %v5848_v58 = vpop.f32.mrf.mxu1  ;;  %6125 = vst [vmem:[%s12397_s5 + $0x1380] sm:$0xff] %v6071_v61 }
 0x4ac   :  { %5902 = vst [vmem:[%s12397_s5 + $0x1378] sm:$0xff] %v5848_v58  ;;  %v8134_v19 = vpop.f32.mrf.mxu0 }
 0x4ad   :  { %v8094_v53 = vpop.f32.mrf.mxu1  ;;  %6128 = vst [vmem:[%s12397_s5 + $0x15d8] sm:$0xff] %v8134_v19 }
 0x4ae   :  { %5905 = vst [vmem:[%s12397_s5 + $0x15d0] sm:$0xff] %v8094_v53  ;;  %v6074_v62 = vpop.f32.mrf.mxu0 }
 0x4af   :  { %v5851_v54 = vpop.f32.mrf.mxu1  ;;  %6126 = vst [vmem:[%s12397_s5 + $0x1448] sm:$0xff] %v6074_v62 }
 0x4b0   :  { %5903 = vst [vmem:[%s12397_s5 + $0x1440] sm:$0xff] %v5851_v54  ;;  %v8137_v39 = vpop.f32.mrf.mxu0 }
 0x4b1   :  { %v8097_v30 = vpop.f32.mrf.mxu1  ;;  %6131 = vst [vmem:[%s12397_s5 + $0x1830] sm:$0x3] %v8137_v39 }
 0x4b2   :  { %5908 = vst [vmem:[%s12397_s5 + $0x1828] sm:$0x3] %v8097_v30  ;;  %v6087_v31 = vpop.f32.mrf.mxu0 }
 0x4b3   :  { %v5864_v40 = vpop.f32.mrf.mxu1  ;;  %6129 = vst [vmem:[%s12397_s5 + $0x16a0] sm:$0xff] %v6087_v31 }
 0x4b4   :  { %5906 = vst [vmem:[%s12397_s5 + $0x1698] sm:$0xff] %v5864_v40  ;;  %v8138_v60 = vpop.f32.mrf.mxu0 }
 0x4b5   :  { %v8098_v50 = vpop.f32.mrf.mxu1 }
 0x4b6   :  { %v6090_v51 = vpop.f32.mrf.mxu0 }
 0x4b7   :  { %v5867_v2 = vpop.f32.mrf.mxu1  ;;  %6130 = vst [vmem:[%s12397_s5 + $0x1768] sm:$0xff] %v6090_v51 }
 0x4b8   :  { %5907 = vst [vmem:[%s12397_s5 + $0x1760] sm:$0xff] %v5867_v2 }

// kernel: decoder_mnist_forward.7
= control target key start
LH: loop header
LB: loop body
LE: loop exit
PB: predicated region body
PF: predicated region fallthrough
CT: control target
= control target key end

     0   :  { %v7003_v0 = vmov 0.0   ;;  %vm3377_vm0 = vmmov 0   ;;  %vm499_vm1 = vcmask 1041408   ;;  %s6997_s4 = inlined_call_operand.vmem [shape: bf16[128,16], index: 4, kind: input, shape index: {}]   ;;  %s6998_s0 = inlined_call_operand.vmem [shape: f32[1250,128], index: 0, kind: input, shape index: {}]   ;;  %s6999_s1 = inlined_call_operand.vmem [shape: f32[1,128], index: 1, kind: input, shape index: {}]   ;;  %s7000_s2 = inlined_call_operand.vmem [shape: f32[1,128], index: 2, kind: input, shape index: {}]   ;;  %s7001_s3 = inlined_call_operand.vmem [shape: f32[1,128], index: 3, kind: input, shape index: {}]   ;;  %s7002_s5 = inlined_call_operand.vmem [shape: f32[1250,16], index: 5, kind: output, shape index: {}]  }
   0x1   :  { %3012 = vmatprep.subr.bf16.mxu0 %v7003_v0  ;;  %v3362_v1 = vld [vmem:[%s6997_s4 + $0x38] sm:$0xff]   ;;  %3344 = vmatprep.subr.bf16.mxu1 %v7003_v0  ;;  %v3363_v2 = vld [vmem:[%s6997_s4 + $0x30] sm:$0xff]   ;;  %v3364_v3 = vld [vmem:[%s6997_s4 + $0x28] sm:$0xff]  }
   0x2   :  { %3028 = vmatprep.mubr.msk.bf16.mxu0 %vm3377_vm0, %v7003_v0  ;;  %3188 = vmatprep.mubr.msk.bf16.mxu1 %vm3377_vm0, %v7003_v0  ;;  %v3365_v4 = vld [vmem:[%s6997_s4 + $0x20] sm:$0xff]   ;;  %v3366_v5 = vld [vmem:[%s6997_s4 + $0x18] sm:$0xff]   ;;  %v3367_v6 = vld [vmem:[%s6997_s4 + $0x10] sm:$0xff]  }
   0x3   :  { %3013 = vmatpush3.bf16.msra.mxu0 %v3362_v1  ;;  %3352 = vmatpush3.bf16.msra.mxu1 %v3362_v1  ;;  %v3368_v7 = vld [vmem:[%s6997_s4 + $0x8] sm:$0xff]   ;;  %v3369_v8 = vld [vmem:[%s6997_s4] sm:$0xff]   ;;  %v23_v11 = vld [vmem:[%s6998_s0 + $0x10] sm:$0xff] }
   0x4   :  { %3014 = vmatprep.subr.bf16.mxu0 %v7003_v0  ;;  %3345 = vmatprep.subr.bf16.mxu1 %v7003_v0  ;;  %v21_v9 = vld [vmem:[%s6998_s0] sm:$0xff]  ;;  %v22_v10 = vld [vmem:[%s6998_s0 + $0x8] sm:$0xff]  ;;  %v55_v13 = vld [vmem:[%s6998_s0 + $0x110] sm:$0xff] }
   0x5   :  { %v54_v12 = vld [vmem:[%s6998_s0 + $0x108] sm:$0xff]  ;;  %v56_v14 = vld [vmem:[%s6998_s0 + $0x118] sm:$0xff]  ;;  %v57_v15 = vld [vmem:[%s6998_s0 + $0x120] sm:$0xff] }
   0x6   :  { %v58_v16 = vld [vmem:[%s6998_s0 + $0x128] sm:$0xff]  ;;  %v59_v17 = vld [vmem:[%s6998_s0 + $0x130] sm:$0xff]  ;;  %v60_v18 = vld [vmem:[%s6998_s0 + $0x138] sm:$0xff] }
   0x7   :  { %3015 = vmatpush3.bf16.msra.mxu0 %v3363_v2  ;;  %3353 = vmatpush3.bf16.msra.mxu1 %v3363_v2  ;;  %v3485_v19 = vld [vmem:[%s6999_s1] ss:$0 sm:$0xff]  ;;  %v62_v21 = vld [vmem:[%s6998_s0 + $0x148] sm:$0xff]  ;;  %v63_v22 = vld [vmem:[%s6998_s0 + $0x150] sm:$0xff] }
   0x8   :  { %3016 = vmatprep.subr.bf16.mxu0 %v7003_v0  ;;  %3346 = vmatprep.subr.bf16.mxu1 %v7003_v0  ;;  %v61_v20 = vld [vmem:[%s6998_s0 + $0x140] sm:$0xff]  ;;  %v64_v23 = vld [vmem:[%s6998_s0 + $0x158] sm:$0xff]  ;;  %v66_v25 = vld [vmem:[%s6998_s0 + $0x168] sm:$0xff]  ;;  %v3524_v32 = vadd.f32 %v3485_v19, %v21_v9  ;;  %v3527_v33 = vadd.f32 %v3485_v19, %v22_v10  ;;  %v3542_v38 = vadd.f32 %v3485_v19, %v23_v11 }
   0x9   :  { %v65_v24 = vld [vmem:[%s6998_s0 + $0x160] sm:$0xff]  ;;  %v67_v26 = vld [vmem:[%s6998_s0 + $0x170] sm:$0xff]  ;;  %v68_v27 = vld [vmem:[%s6998_s0 + $0x178] sm:$0xff]  ;;  %v3545_v39 = vadd.f32 %v3485_v19, %v54_v12  ;;  %v3548_v40 = vadd.f32 %v3485_v19, %v55_v13  ;;  %v3551_v41 = vadd.f32 %v3485_v19, %v56_v14  ;;  %v3566_v46 = vadd.f32 %v3485_v19, %v57_v15 }
   0xa   :  { %v69_v28 = vld [vmem:[%s6998_s0 + $0x180] sm:$0xff]  ;;  %v70_v29 = vld [vmem:[%s6998_s0 + $0x188] sm:$0xff]  ;;  %v71_v30 = vld [vmem:[%s6998_s0 + $0x190] sm:$0xff]  ;;  %7250 = vst [vmem:[#allocation2_spill] sm:$0xff] %v3524_v32  ;;  %v3569_v47 = vadd.f32 %v3485_v19, %v58_v16  ;;  %v3572_v48 = vadd.f32 %v3485_v19, %v59_v17  ;;  %v3575_v49 = vadd.f32 %v3485_v19, %v60_v18  ;;  %v3590_v54 = vadd.f32 %v3485_v19, %v61_v20 }
   0xb   :  { %3017 = vmatpush3.bf16.msra.mxu0 %v3364_v3  ;;  %3354 = vmatpush3.bf16.msra.mxu1 %v3364_v3  ;;  %v72_v31 = vld [vmem:[%s6998_s0 + $0x198] sm:$0xff]  ;;  %7251 = vst [vmem:[#allocation3_spill] sm:$0xff] %v3527_v33  ;;  %v73_v34 = vld [vmem:[%s6998_s0 + $0x1a0] sm:$0xff]  ;;  %v74_v35 = vld [vmem:[%s6998_s0 + $0x1a8] sm:$0xff]  ;;  %v3593_v55 = vadd.f32 %v3485_v19, %v62_v21  ;;  %v3596_v56 = vadd.f32 %v3485_v19, %v63_v22 }
   0xc   :  { %3018 = vmatprep.subr.bf16.mxu0 %v7003_v0  ;;  %3347 = vmatprep.subr.bf16.mxu1 %v7003_v0  ;;  %v75_v36 = vld [vmem:[%s6998_s0 + $0x1b0] sm:$0xff]  ;;  %v76_v37 = vld [vmem:[%s6998_s0 + $0x1b8] sm:$0xff]  ;;  %7252 = vst [vmem:[#allocation4_spill] sm:$0xff] %v3542_v38  ;;  %v77_v42 = vld [vmem:[%s6998_s0 + $0x1c0] sm:$0xff]  ;;  %v3599_v57 = vadd.f32 %v3485_v19, %v64_v23  ;;  %v3614_v62 = vadd.f32 %v3485_v19, %v65_v24 }
   0xd   :  { %v78_v43 = vld [vmem:[%s6998_s0 + $0x1c8] sm:$0xff]  ;;  %v79_v44 = vld [vmem:[%s6998_s0 + $0x1d0] sm:$0xff]  ;;  %v80_v45 = vld [vmem:[%s6998_s0 + $0x1d8] sm:$0xff]  ;;  %v3617_v63 = vadd.f32 %v3485_v19, %v66_v25  ;;  %v3620_v1 = vadd.f32 %v3485_v19, %v67_v26  ;;  %v3623_v2 = vadd.f32 %v3485_v19, %v68_v27  ;;  %v3644_v9 = vadd.f32 %v3485_v19, %v71_v30 }
   0xe   :  { %v81_v50 = vld [vmem:[%s6998_s0 + $0x1e0] sm:$0xff]  ;;  %v82_v51 = vld [vmem:[%s6998_s0 + $0x1e8] sm:$0xff]  ;;  %v83_v52 = vld [vmem:[%s6998_s0 + $0x1f0] sm:$0xff]  ;;  %v3647_v10 = vadd.f32 %v3485_v19, %v72_v31  ;;  %v3662_v15 = vadd.f32 %v3485_v19, %v73_v34  ;;  %v3665_v16 = vadd.f32 %v3485_v19, %v74_v35  ;;  %v3668_v17 = vadd.f32 %v3485_v19, %v75_v36 }
   0xf   :  { %3019 = vmatpush3.bf16.msra.mxu0 %v3365_v4  ;;  %3355 = vmatpush3.bf16.msra.mxu1 %v3365_v4  ;;  %v84_v53 = vld [vmem:[%s6998_s0 + $0x1f8] sm:$0xff]  ;;  %v85_v58 = vld [vmem:[%s6998_s0 + $0x200] sm:$0xff]  ;;  %v86_v59 = vld [vmem:[%s6998_s0 + $0x208] sm:$0xff]  ;;  %v3671_v18 = vadd.f32 %v3485_v19, %v76_v37  ;;  %v3686_v24 = vadd.f32 %v3485_v19, %v77_v42  ;;  %v3689_v25 = vadd.f32 %v3485_v19, %v78_v43 }
  0x10   :  { %3020 = vmatprep.subr.bf16.mxu0 %v7003_v0  ;;  %3348 = vmatprep.subr.bf16.mxu1 %v7003_v0  ;;  %v87_v60 = vld [vmem:[%s6998_s0 + $0x210] sm:$0xff]  ;;  %v88_v61 = vld [vmem:[%s6998_s0 + $0x218] sm:$0xff]  ;;  %v89_v3 = vld [vmem:[%s6998_s0 + $0x220] sm:$0xff]  ;;  %7253 = vst [vmem:[#allocation5_spill] sm:$0xff] %v3665_v16  ;;  %v3692_v26 = vadd.f32 %v3485_v19, %v79_v44  ;;  %v3695_v27 = vadd.f32 %v3485_v19, %v80_v45 }
  0x11   :  { %v90_v4 = vld [vmem:[%s6998_s0 + $0x228] sm:$0xff]  ;;  %v93_v11 = vld [vmem:[%s6998_s0 + $0x240] sm:$0xff]  ;;  %v95_v13 = vld [vmem:[%s6998_s0 + $0x250] sm:$0xff]  ;;  %7254 = vst [vmem:[#allocation6_spill] sm:$0xff] %v3668_v17  ;;  %v3710_v34 = vadd.f32 %v3485_v19, %v81_v50  ;;  %v3713_v35 = vadd.f32 %v3485_v19, %v82_v51  ;;  %v3716_v36 = vadd.f32 %v3485_v19, %v83_v52  ;;  %v3719_v37 = vadd.f32 %v3485_v19, %v84_v53 }
  0x12   :  { %v94_v12 = vld [vmem:[%s6998_s0 + $0x248] sm:$0xff]  ;;  %v96_v14 = vld [vmem:[%s6998_s0 + $0x258] sm:$0xff]  ;;  %7255 = vst [vmem:[#allocation7_spill] sm:$0xff] %v3671_v18  ;;  %v97_v20 = vld [vmem:[%s6998_s0 + $0x260] sm:$0xff]  ;;  %v3734_v50 = vadd.f32 %v3485_v19, %v85_v58  ;;  %v3737_v51 = vadd.f32 %v3485_v19, %v86_v59  ;;  %v3740_v52 = vadd.f32 %v3485_v19, %v87_v60  ;;  %v3743_v53 = vadd.f32 %v3485_v19, %v88_v61 }
  0x13   :  { %3021 = vmatpush3.bf16.msra.mxu0 %v3366_v5  ;;  %3356 = vmatpush3.bf16.msra.mxu1 %v3366_v5  ;;  %v91_v5 = vld [vmem:[%s6998_s0 + $0x230] sm:$0xff]  ;;  %v98_v21 = vld [vmem:[%s6998_s0 + $0x268] sm:$0xff]  ;;  %v100_v23 = vld [vmem:[%s6998_s0 + $0x278] sm:$0xff]  ;;  %7256 = vst [vmem:[#allocation8_spill] sm:$0xff] %v3686_v24  ;;  %v3758_v60 = vadd.f32 %v3485_v19, %v89_v3  ;;  %v3761_v61 = vadd.f32 %v3485_v19, %v90_v4 }
  0x14   :  { %3022 = vmatprep.subr.bf16.mxu0 %v7003_v0  ;;  %3349 = vmatprep.subr.bf16.mxu1 %v7003_v0  ;;  %v99_v22 = vld [vmem:[%s6998_s0 + $0x270] sm:$0xff]  ;;  %7257 = vst [vmem:[#allocation9_spill] sm:$0xff] %v3689_v25  ;;  %7258 = vst [vmem:[#allocation10_spill] sm:$0xff] %v3692_v26  ;;  %v104_v31 = vld [vmem:[%s6998_s0 + $0x298] sm:$0xff] }
  0x15   :  { %7259 = vst [vmem:[#allocation11_spill] sm:$0xff] %v3695_v27  ;;  %v103_v30 = vld [vmem:[%s6998_s0 + $0x290] sm:$0xff]  ;;  %7260 = vst [vmem:[#allocation12_spill] sm:$0xff] %v3710_v34  ;;  %v105_v42 = vld [vmem:[%s6998_s0 + $0x2a0] sm:$0xff] }
  0x16   :  { %7261 = vst [vmem:[#allocation13_spill] sm:$0xff] %v3713_v35  ;;  %7262 = vst [vmem:[#allocation14_spill] sm:$0xff] %v3716_v36  ;;  %v106_v43 = vld [vmem:[%s6998_s0 + $0x2a8] sm:$0xff]  ;;  %v107_v44 = vld [vmem:[%s6998_s0 + $0x2b0] sm:$0xff] }
  0x17   :  { %3023 = vmatpush3.bf16.msra.mxu0 %v3367_v6  ;;  %3357 = vmatpush3.bf16.msra.mxu1 %v3367_v6  ;;  %v92_v6 = vld [vmem:[%s6998_s0 + $0x238] sm:$0xff]  ;;  %7263 = vst [vmem:[#allocation15_spill] sm:$0xff] %v3719_v37  ;;  %7264 = vst [vmem:[#allocation16_spill] sm:$0xff] %v3734_v50  ;;  %v110_v37 = vld [vmem:[%s6998_s0 + $0x2c8] sm:$0xff] }
  0x18   :  { %3024 = vmatprep.subr.bf16.mxu0 %v7003_v0  ;;  %3350 = vmatprep.subr.bf16.mxu1 %v7003_v0  ;;  %v108_v45 = vld [vmem:[%s6998_s0 + $0x2b8] sm:$0xff]  ;;  %7265 = vst [vmem:[#allocation17_spill] sm:$0xff] %v3737_v51  ;;  %7266 = vst [vmem:[#allocation18_spill] sm:$0xff] %v3740_v52  ;;  %v111_v58 = vld [vmem:[%s6998_s0 + $0x2d0] sm:$0xff]  ;;  %v3767_v52 = vadd.f32 %v3485_v19, %v92_v6  ;;  %v3785_v6 = vadd.f32 %v3485_v19, %v94_v12 }
  0x19   :  { %7267 = vst [vmem:[#allocation19_spill] sm:$0xff] %v3743_v53  ;;  %v112_v59 = vld [vmem:[%s6998_s0 + $0x2d8] sm:$0xff]  ;;  %7268 = vst [vmem:[#allocation20_spill] sm:$0xff] %v3758_v60  ;;  %v3764_v53 = vadd.f32 %v3485_v19, %v91_v5  ;;  %v113_v51 = vld [vmem:[%s6998_s0 + $0x2e0] sm:$0xff]  ;;  %v3782_v5 = vadd.f32 %v3485_v19, %v93_v11 }
  0x1a   :  { %7269 = vst [vmem:[#allocation21_spill] sm:$0xff] %v3761_v61  ;;  %7271 = vst [vmem:[#allocation23_spill] sm:$0xff] %v3767_v52  ;;  %v114_v50 = vld [vmem:[%s6998_s0 + $0x2e8] sm:$0xff]  ;;  %v115_v3 = vld [vmem:[%s6998_s0 + $0x2f0] sm:$0xff]  ;;  %v3788_v52 = vadd.f32 %v3485_v19, %v95_v13  ;;  %v3806_v13 = vadd.f32 %v3485_v19, %v97_v20 }
  0x1b   :  { %3025 = vmatpush3.bf16.msra.mxu0 %v3368_v7  ;;  %3358 = vmatpush3.bf16.msra.mxu1 %v3368_v7  ;;  %v3638_v7 = vadd.f32 %v3485_v19, %v69_v28  ;;  %v101_v28 = vld [vmem:[%s6998_s0 + $0x280] sm:$0xff]  ;;  %7270 = vst [vmem:[#allocation22_spill] sm:$0xff] %v3764_v53  ;;  %v116_v4 = vld [vmem:[%s6998_s0 + $0x2f8] sm:$0xff]  ;;  %7272 = vst [vmem:[#allocation24_spill] sm:$0xff] %v3782_v5  ;;  %v3791_v53 = vadd.f32 %v3485_v19, %v96_v14 }
  0x1c   :  { %3026 = vmatprep.subr.bf16.mxu0 %v7003_v0  ;;  %3351 = vmatprep.subr.bf16.mxu1 %v7003_v0  ;;  %v109_v0 = vld [vmem:[%s6998_s0 + $0x2c0] sm:$0xff]  ;;  %7273 = vst [vmem:[#allocation25_spill] sm:$0xff] %v3785_v6  ;;  %7274 = vst [vmem:[#allocation26_spill] sm:$0xff] %v3788_v52  ;;  %v118_v60 = vld [vmem:[%s6998_s0 + $0x308] sm:$0xff]  ;;  %v3809_v14 = vadd.f32 %v3485_v19, %v98_v21  ;;  %v3815_v52 = vadd.f32 %v3485_v19, %v100_v23 }
  0x1d   :  { %7275 = vst [vmem:[#allocation27_spill] sm:$0xff] %v3791_v53  ;;  %v117_v61 = vld [vmem:[%s6998_s0 + $0x300] sm:$0xff]  ;;  %v119_v11 = vld [vmem:[%s6998_s0 + $0x310] sm:$0xff]  ;;  %v120_v12 = vld [vmem:[%s6998_s0 + $0x318] sm:$0xff]  ;;  %v3812_v53 = vadd.f32 %v3485_v19, %v99_v22  ;;  %v3830_v22 = vadd.f32 %v3485_v19, %v101_v28 }
  0x1e   :  { %7276 = vst [vmem:[#allocation28_spill] sm:$0xff] %v3806_v13  ;;  %7277 = vst [vmem:[#allocation29_spill] sm:$0xff] %v3809_v14  ;;  %v121_v6 = vld [vmem:[%s6998_s0 + $0x320] sm:$0xff]  ;;  %v122_v5 = vld [vmem:[%s6998_s0 + $0x328] sm:$0xff] }
  0x1f   :  { %3027 = vmatpush3.bf16.msra.mxu0 %v3369_v8  ;;  %3359 = vmatpush3.bf16.msra.mxu1 %v3369_v8  ;;  %v3641_v8 = vadd.f32 %v3485_v19, %v70_v29  ;;  %v102_v29 = vld [vmem:[%s6998_s0 + $0x288] sm:$0xff]  ;;  %7278 = vst [vmem:[#allocation30_spill] sm:$0xff] %v3812_v53  ;;  %7279 = vst [vmem:[#allocation31_spill] sm:$0xff] %v3815_v52  ;;  %v123_v20 = vld [vmem:[%s6998_s0 + $0x330] sm:$0xff]  ;;  %v3836_v52 = vadd.f32 %v3485_v19, %v103_v30 }
  0x20   :  { %v124_v21 = vld [vmem:[%s6998_s0 + $0x338] sm:$0xff]  ;;  %7280 = vst [vmem:[#allocation32_spill] sm:$0xff] %v3830_v22  ;;  %v3833_v23 = vadd.f32 %v3485_v19, %v102_v29  ;;  %v3839_v53 = vadd.f32 %v3485_v19, %v104_v31  ;;  %v125_v14 = vld [vmem:[%s6998_s0 + $0x340] sm:$0xff]  ;;  %v126_v13 = vld [vmem:[%s6998_s0 + $0x348] sm:$0xff]  ;;  %v3854_v30 = vadd.f32 %v3485_v19, %v105_v42  ;;  %v3857_v31 = vadd.f32 %v3485_v19, %v106_v43 }
  0x21   :  { %7282 = vst [vmem:[#allocation34_spill] sm:$0xff] %v3836_v52  ;;  %v127_v28 = vld [vmem:[%s6998_s0 + $0x350] sm:$0xff]  ;;  %v128_v29 = vld [vmem:[%s6998_s0 + $0x358] sm:$0xff]  ;;  %v3863_v52 = vadd.f32 %v3485_v19, %v108_v45  ;;  %v130_v22 = vld [vmem:[%s6998_s0 + $0x368] sm:$0xff]  ;;  %v3881_v45 = vadd.f32 %v3485_v19, %v110_v37 }
  0x22   :  { %7281 = vst [vmem:[#allocation33_spill] sm:$0xff] %v3833_v23  ;;  %7283 = vst [vmem:[#allocation35_spill] sm:$0xff] %v3839_v53  ;;  %v3860_v53 = vadd.f32 %v3485_v19, %v107_v44  ;;  %v129_v23 = vld [vmem:[%s6998_s0 + $0x360] sm:$0xff]  ;;  %v131_v42 = vld [vmem:[%s6998_s0 + $0x370] sm:$0xff]  ;;  %v3878_v44 = vadd.f32 %v3485_v19, %v109_v0 }
  0x23   :  { %7284 = vst [vmem:[#allocation36_spill] sm:$0xff] %v3854_v30  ;;  %7285 = vst [vmem:[#allocation37_spill] sm:$0xff] %v3857_v31  ;;  %v132_v43 = vld [vmem:[%s6998_s0 + $0x378] sm:$0xff]  ;;  %v133_v31 = vld [vmem:[%s6998_s0 + $0x380] sm:$0xff] }
  0x24   :  { %7286 = vst [vmem:[#allocation38_spill] sm:$0xff] %v3860_v53  ;;  %7287 = vst [vmem:[#allocation39_spill] sm:$0xff] %v3863_v52  ;;  %v3884_v52 = vadd.f32 %v3485_v19, %v111_v58  ;;  %v3887_v53 = vadd.f32 %v3485_v19, %v112_v59  ;;  %v134_v30 = vld [vmem:[%s6998_s0 + $0x388] sm:$0xff]  ;;  %v135_v0 = vld [vmem:[%s6998_s0 + $0x390] sm:$0xff]  ;;  %v3902_v58 = vadd.f32 %v3485_v19, %v113_v51 }
  0x25   :  { %7288 = vst [vmem:[#allocation40_spill] sm:$0xff] %v3878_v44  ;;  %7289 = vst [vmem:[#allocation41_spill] sm:$0xff] %v3881_v45  ;;  %v136_v37 = vld [vmem:[%s6998_s0 + $0x398] sm:$0xff]  ;;  %v3905_v59 = vadd.f32 %v3485_v19, %v114_v50  ;;  %v137_v45 = vld [vmem:[%s6998_s0 + $0x3a0] sm:$0xff] }
  0x26   :  { %7290 = vst [vmem:[#allocation42_spill] sm:$0xff] %v3884_v52  ;;  %7291 = vst [vmem:[#allocation43_spill] sm:$0xff] %v3887_v53  ;;  %v3908_v53 = vadd.f32 %v3485_v19, %v115_v3  ;;  %v3911_v52 = vadd.f32 %v3485_v19, %v116_v4  ;;  %v138_v44 = vld [vmem:[%s6998_s0 + $0x3a8] sm:$0xff]  ;;  %v139_v51 = vld [vmem:[%s6998_s0 + $0x3b0] sm:$0xff]  ;;  %v3926_v3 = vadd.f32 %v3485_v19, %v117_v61 }
  0x27   :  { %7292 = vst [vmem:[#allocation44_spill] sm:$0xff] %v3902_v58  ;;  %7293 = vst [vmem:[#allocation45_spill] sm:$0xff] %v3905_v59  ;;  %v140_v50 = vld [vmem:[%s6998_s0 + $0x3b8] sm:$0xff]  ;;  %v3929_v4 = vadd.f32 %v3485_v19, %v118_v60  ;;  %v141_v59 = vld [vmem:[%s6998_s0 + $0x3c0] sm:$0xff] }
  0x28   :  { %7294 = vst [vmem:[#allocation46_spill] sm:$0xff] %v3908_v53  ;;  %7295 = vst [vmem:[#allocation47_spill] sm:$0xff] %v3911_v52  ;;  %v3932_v52 = vadd.f32 %v3485_v19, %v119_v11  ;;  %v3935_v53 = vadd.f32 %v3485_v19, %v120_v12  ;;  %v142_v58 = vld [vmem:[%s6998_s0 + $0x3c8] sm:$0xff]  ;;  %v143_v61 = vld [vmem:[%s6998_s0 + $0x3d0] sm:$0xff]  ;;  %v3950_v11 = vadd.f32 %v3485_v19, %v121_v6 }
  0x29   :  { %7296 = vst [vmem:[#allocation48_spill] sm:$0xff] %v3926_v3  ;;  %7297 = vst [vmem:[#allocation49_spill] sm:$0xff] %v3929_v4  ;;  %v144_v60 = vld [vmem:[%s6998_s0 + $0x3d8] sm:$0xff]  ;;  %v3953_v12 = vadd.f32 %v3485_v19, %v122_v5  ;;  %v145_v4 = vld [vmem:[%s6998_s0 + $0x3e0] sm:$0xff] }
  0x2a   :  { %7298 = vst [vmem:[#allocation50_spill] sm:$0xff] %v3932_v52  ;;  %7299 = vst [vmem:[#allocation51_spill] sm:$0xff] %v3935_v53  ;;  %v3956_v53 = vadd.f32 %v3485_v19, %v123_v20  ;;  %v3959_v52 = vadd.f32 %v3485_v19, %v124_v21  ;;  %v146_v3 = vld [vmem:[%s6998_s0 + $0x3e8] sm:$0xff]  ;;  %v147_v6 = vld [vmem:[%s6998_s0 + $0x3f0] sm:$0xff]  ;;  %v3974_v20 = vadd.f32 %v3485_v19, %v125_v14 }
  0x2b   :  { %7300 = vst [vmem:[#allocation52_spill] sm:$0xff] %v3950_v11  ;;  %7301 = vst [vmem:[#allocation53_spill] sm:$0xff] %v3953_v12  ;;  %v148_v5 = vld [vmem:[%s6998_s0 + $0x3f8] sm:$0xff]  ;;  %v3977_v21 = vadd.f32 %v3485_v19, %v126_v13  ;;  %v149_v12 = vld [vmem:[%s6998_s0 + $0x400] sm:$0xff] }
  0x2c   :  { %7302 = vst [vmem:[#allocation54_spill] sm:$0xff] %v3956_v53  ;;  %7303 = vst [vmem:[#allocation55_spill] sm:$0xff] %v3959_v52  ;;  %v3980_v52 = vadd.f32 %v3485_v19, %v127_v28  ;;  %v3983_v53 = vadd.f32 %v3485_v19, %v128_v29  ;;  %v150_v11 = vld [vmem:[%s6998_s0 + $0x408] sm:$0xff]  ;;  %v151_v14 = vld [vmem:[%s6998_s0 + $0x410] sm:$0xff]  ;;  %v3998_v28 = vadd.f32 %v3485_v19, %v129_v23 }
  0x2d   :  { %7304 = vst [vmem:[#allocation56_spill] sm:$0xff] %v3974_v20  ;;  %7305 = vst [vmem:[#allocation57_spill] sm:$0xff] %v3977_v21  ;;  %v152_v13 = vld [vmem:[%s6998_s0 + $0x418] sm:$0xff]  ;;  %v4001_v29 = vadd.f32 %v3485_v19, %v130_v22  ;;  %v153_v21 = vld [vmem:[%s6998_s0 + $0x420] sm:$0xff]  ;;  %v4019_v22 = vadd.f32 %v3485_v19, %v133_v31 }
  0x2e   :  { %7306 = vst [vmem:[#allocation58_spill] sm:$0xff] %v3980_v52  ;;  %7307 = vst [vmem:[#allocation59_spill] sm:$0xff] %v3983_v53  ;;  %v4004_v53 = vadd.f32 %v3485_v19, %v131_v42  ;;  %v4007_v52 = vadd.f32 %v3485_v19, %v132_v43  ;;  %v154_v20 = vld [vmem:[%s6998_s0 + $0x428] sm:$0xff]  ;;  %v155_v23 = vld [vmem:[%s6998_s0 + $0x430] sm:$0xff]  ;;  %v4022_v42 = vadd.f32 %v3485_v19, %v134_v30 }
  0x2f   :  { %7308 = vst [vmem:[#allocation60_spill] sm:$0xff] %v3998_v28  ;;  %7309 = vst [vmem:[#allocation61_spill] sm:$0xff] %v4001_v29  ;;  %v4025_v43 = vadd.f32 %v3485_v19, %v135_v0  ;;  %v157_v29 = vld [vmem:[%s6998_s0 + $0x440] sm:$0xff]  ;;  %v158_v31 = vld [vmem:[%s6998_s0 + $0x448] sm:$0xff]  ;;  %v4040_v30 = vadd.f32 %v3485_v19, %v137_v45  ;;  %v4043_v0 = vadd.f32 %v3485_v19, %v138_v44 }
  0x30   :  { %7310 = vst [vmem:[#allocation62_spill] sm:$0xff] %v4004_v53  ;;  %7311 = vst [vmem:[#allocation63_spill] sm:$0xff] %v4007_v52  ;;  %v4028_v52 = vadd.f32 %v3485_v19, %v136_v37  ;;  %v156_v53 = vld [vmem:[%s6998_s0 + $0x438] sm:$0xff]  ;;  %v4046_v37 = vadd.f32 %v3485_v19, %v139_v51  ;;  %v161_v45 = vld [vmem:[%s6998_s0 + $0x460] sm:$0xff]  ;;  %v4061_v44 = vadd.f32 %v3485_v19, %v141_v59 }
  0x31   :  { %7312 = vst [vmem:[#allocation64_spill] sm:$0xff] %v4019_v22  ;;  %7313 = vst [vmem:[#allocation65_spill] sm:$0xff] %v4022_v42  ;;  %v160_v42 = vld [vmem:[%s6998_s0 + $0x458] sm:$0xff]  ;;  %v4064_v51 = vadd.f32 %v3485_v19, %v142_v58  ;;  %v4082_v58 = vadd.f32 %v3485_v19, %v145_v4  ;;  %v167_v4 = vld [vmem:[%s6998_s0 + $0x490] sm:$0xff] }
  0x32   :  { %7314 = vst [vmem:[#allocation66_spill] sm:$0xff] %v4025_v43  ;;  %7315 = vst [vmem:[#allocation67_spill] sm:$0xff] %v4028_v52  ;;  %v4049_v52 = vadd.f32 %v3485_v19, %v140_v50  ;;  %v159_v43 = vld [vmem:[%s6998_s0 + $0x450] sm:$0xff]  ;;  %v4067_v50 = vadd.f32 %v3485_v19, %v143_v61  ;;  %v164_v59 = vld [vmem:[%s6998_s0 + $0x478] sm:$0xff]  ;;  %v4085_v61 = vadd.f32 %v3485_v19, %v146_v3 }
  0x33   :  { %7316 = vst [vmem:[#allocation68_spill] sm:$0xff] %v4040_v30  ;;  %7317 = vst [vmem:[#allocation69_spill] sm:$0xff] %v4043_v0  ;;  %v163_v0 = vld [vmem:[%s6998_s0 + $0x470] sm:$0xff]  ;;  %v4103_v3 = vadd.f32 %v3485_v19, %v149_v12  ;;  %v170_v12 = vld [vmem:[%s6998_s0 + $0x4a8] sm:$0xff] }
  0x34   :  { %7318 = vst [vmem:[#allocation70_spill] sm:$0xff] %v4046_v37  ;;  %7319 = vst [vmem:[#allocation71_spill] sm:$0xff] %v4049_v52  ;;  %v4070_v52 = vadd.f32 %v3485_v19, %v144_v60  ;;  %v162_v37 = vld [vmem:[%s6998_s0 + $0x468] sm:$0xff]  ;;  %v4088_v60 = vadd.f32 %v3485_v19, %v147_v6  ;;  %v4106_v6 = vadd.f32 %v3485_v19, %v150_v11 }
  0x35   :  { %7320 = vst [vmem:[#allocation72_spill] sm:$0xff] %v4061_v44  ;;  %7321 = vst [vmem:[#allocation73_spill] sm:$0xff] %v4064_v51  ;;  %v166_v51 = vld [vmem:[%s6998_s0 + $0x488] sm:$0xff]  ;;  %v4124_v11 = vadd.f32 %v3485_v19, %v153_v21  ;;  %v173_v21 = vld [vmem:[%s6998_s0 + $0x4c0] sm:$0xff] }
  0x36   :  { %7322 = vst [vmem:[#allocation74_spill] sm:$0xff] %v4067_v50  ;;  %7323 = vst [vmem:[#allocation75_spill] sm:$0xff] %v4070_v52  ;;  %v4091_v52 = vadd.f32 %v3485_v19, %v148_v5  ;;  %v165_v50 = vld [vmem:[%s6998_s0 + $0x480] sm:$0xff]  ;;  %v4109_v5 = vadd.f32 %v3485_v19, %v151_v14  ;;  %v4127_v14 = vadd.f32 %v3485_v19, %v154_v20 }
  0x37   :  { %7324 = vst [vmem:[#allocation76_spill] sm:$0xff] %v4082_v58  ;;  %7325 = vst [vmem:[#allocation77_spill] sm:$0xff] %v4085_v61  ;;  %v169_v61 = vld [vmem:[%s6998_s0 + $0x4a0] sm:$0xff]  ;;  %v4145_v20 = vadd.f32 %v3485_v19, %v157_v29  ;;  %v176_v29 = vld [vmem:[%s6998_s0 + $0x4d8] sm:$0xff] }
  0x38   :  { %7326 = vst [vmem:[#allocation78_spill] sm:$0xff] %v4088_v60  ;;  %7327 = vst [vmem:[#allocation79_spill] sm:$0xff] %v4091_v52  ;;  %v4112_v52 = vadd.f32 %v3485_v19, %v152_v13  ;;  %v168_v60 = vld [vmem:[%s6998_s0 + $0x498] sm:$0xff]  ;;  %v4130_v13 = vadd.f32 %v3485_v19, %v155_v23  ;;  %v4148_v23 = vadd.f32 %v3485_v19, %v158_v31 }
  0x39   :  { %7328 = vst [vmem:[#allocation80_spill] sm:$0xff] %v4103_v3  ;;  %7329 = vst [vmem:[#allocation81_spill] sm:$0xff] %v4106_v6  ;;  %v172_v6 = vld [vmem:[%s6998_s0 + $0x4b8] sm:$0xff]  ;;  %v4166_v31 = vadd.f32 %v3485_v19, %v161_v45  ;;  %v4184_v45 = vadd.f32 %v3485_v19, %v165_v50 }
  0x3a   :  { %7330 = vst [vmem:[#allocation82_spill] sm:$0xff] %v4109_v5  ;;  %7331 = vst [vmem:[#allocation83_spill] sm:$0xff] %v4112_v52  ;;  %v4133_v52 = vadd.f32 %v3485_v19, %v156_v53  ;;  %v171_v5 = vld [vmem:[%s6998_s0 + $0x4b0] sm:$0xff]  ;;  %v4151_v53 = vadd.f32 %v3485_v19, %v159_v43  ;;  %v4169_v43 = vadd.f32 %v3485_v19, %v162_v37 }
  0x3b   :  { %7332 = vst [vmem:[#allocation84_spill] sm:$0xff] %v4124_v11  ;;  %7333 = vst [vmem:[#allocation85_spill] sm:$0xff] %v4127_v14  ;;  %v175_v14 = vld [vmem:[%s6998_s0 + $0x4d0] sm:$0xff]  ;;  %v4187_v37 = vadd.f32 %v3485_v19, %v166_v51  ;;  %v4205_v50 = vadd.f32 %v3485_v19, %v172_v6  ;;  %v25_v51 = vld [vmem:[%s6998_s0 + $0x20] sm:$0xff] }
  0x3c   :  { %7334 = vst [vmem:[#allocation86_spill] sm:$0xff] %v4130_v13  ;;  %7335 = vst [vmem:[#allocation87_spill] sm:$0xff] %v4133_v52  ;;  %v4154_v52 = vadd.f32 %v3485_v19, %v160_v42  ;;  %v174_v13 = vld [vmem:[%s6998_s0 + $0x4c8] sm:$0xff]  ;;  %v4172_v42 = vadd.f32 %v3485_v19, %v163_v0  ;;  %v4190_v0 = vadd.f32 %v3485_v19, %v167_v4 }
  0x3d   :  { %7336 = vst [vmem:[#allocation88_spill] sm:$0xff] %v4148_v23  ;;  %7337 = vst [vmem:[#allocation89_spill] sm:$0xff] %v4151_v53  ;;  %v24_v53 = vld [vmem:[%s6998_s0 + $0x18] sm:$0xff]  ;;  %v177_v23 = vld [vmem:[%s6998_s0 + $0x4e0] sm:$0x3]  ;;  %v4211_v4 = vadd.f32 %v3485_v19, %v173_v21  ;;  %v4234_v21 = vadd.f32 %v3485_v19, %v25_v51 }
  0x3e   :  { %7338 = vst [vmem:[#allocation90_spill] sm:$0xff] %v4154_v52  ;;  %7339 = vst [vmem:[#allocation91_spill] sm:$0xff] %v4166_v31  ;;  %v4175_v52 = vadd.f32 %v3485_v19, %v164_v59  ;;  %v4193_v59 = vadd.f32 %v3485_v19, %v168_v60  ;;  %v4214_v60 = vadd.f32 %v3485_v19, %v174_v13  ;;  %v26_v13 = vld [vmem:[%s6998_s0 + $0x28] sm:$0xff] }
  0x3f   :  { %7340 = vst [vmem:[#allocation92_spill] sm:$0xff] %v4169_v43  ;;  %7341 = vst [vmem:[#allocation93_spill] sm:$0xff] %v4172_v42  ;;  %v4199_v42 = vadd.f32 %v3485_v19, %v170_v12  ;;  %v4202_v43 = vadd.f32 %v3485_v19, %v171_v5  ;;  %v4220_v12 = vadd.f32 %v3485_v19, %v176_v29 }
  0x40   :  { %7342 = vst [vmem:[#allocation94_spill] sm:$0xff] %v4175_v52  ;;  %7343 = vst [vmem:[#allocation95_spill] sm:$0xff] %v4184_v45  ;;  %v4196_v52 = vadd.f32 %v3485_v19, %v169_v61  ;;  %v4217_v61 = vadd.f32 %v3485_v19, %v175_v14  ;;  %v4223_v5 = vadd.f32 %v3485_v19, %v24_v53  ;;  %v27_v53 = vld [vmem:[%s6998_s0 + $0x30] sm:$0xff] }
  0x41   :  { %7344 = vst [vmem:[#allocation96_spill] sm:$0xff] %v4193_v59  ;;  %7346 = vst [vmem:[#allocation98_spill] sm:$0xff] %v4199_v42  ;;  %v4226_v6 = vadd.f32 %v3485_v19, %v177_v23  ;;  %v4241_v29 = vadd.f32 %v3485_v19, %v26_v13 }
  0x42   :  { %7345 = vst [vmem:[#allocation97_spill] sm:$0xff] %v4196_v52  ;;  %7347 = vst [vmem:[#allocation99_spill] sm:$0xff] %v4202_v43 }
  0x43   :  { %7348 = vst [vmem:[#allocation100_spill] sm:$0xff] %v4205_v50  ;;  %7349 = vst [vmem:[#allocation101_spill] sm:$0xff] %v4217_v61  ;;  %v344_v50 = vadd.f32 %v3527_v33, %v3524_v32  ;;  %v28_v33 = vld [vmem:[%s6998_s0 + $0x38] sm:$0xff]  ;;  %v4248_v32 = vadd.f32 %v3485_v19, %v27_v53 }
  0x44   :  { %7350 = vst [vmem:[#allocation102_spill] sm:$0xff] %v4220_v12  ;;  %7351 = vst [vmem:[#allocation103_spill] sm:$0xff] %v4223_v5 }
  0x45   :  { %7352 = vst [vmem:[#allocation104_spill] sm:$0xff] %v4226_v6  ;;  %7353 = vst [vmem:[#allocation105_spill] sm:$0xff] %v4234_v21  ;;  %v345_v14 = vadd.f32 %v344_v50, %v3542_v38  ;;  %v29_v50 = vld [vmem:[%s6998_s0 + $0x40] sm:$0xff]  ;;  %v4255_v38 = vadd.f32 %v3485_v19, %v28_v33 }
  0x46   :  { %7354 = vst [vmem:[#allocation106_spill] sm:$0xff] %v4241_v29  ;;  %7355 = vst [vmem:[#allocation107_spill] sm:$0xff] %v4248_v32 }
  0x47   :  { %v346_v23 = vadd.f32 %v345_v14, %v4223_v5  ;;  %7356 = vst [vmem:[#allocation108_spill] sm:$0xff] %v4255_v38  ;;  %v30_v14 = vld [vmem:[%s6998_s0 + $0x48] sm:$0xff]  ;;  %v4262_v5 = vadd.f32 %v3485_v19, %v29_v50 }
  0x49   :  { %v347_v51 = vadd.f32 %v346_v23, %v4234_v21  ;;  %7357 = vst [vmem:[#allocation109_spill] sm:$0xff] %v4262_v5  ;;  %v31_v23 = vld [vmem:[%s6998_s0 + $0x50] sm:$0xff]  ;;  %v4269_v21 = vadd.f32 %v3485_v19, %v30_v14 }
  0x4b   :  { %v348_v13 = vadd.f32 %v347_v51, %v4241_v29  ;;  %7358 = vst [vmem:[#allocation110_spill] sm:$0xff] %v4269_v21  ;;  %v32_v51 = vld [vmem:[%s6998_s0 + $0x58] sm:$0xff]  ;;  %v4276_v29 = vadd.f32 %v3485_v19, %v31_v23 }
  0x4d   :  { %v349_v53 = vadd.f32 %v348_v13, %v4248_v32  ;;  %7359 = vst [vmem:[#allocation111_spill] sm:$0xff] %v4276_v29  ;;  %v33_v13 = vld [vmem:[%s6998_s0 + $0x60] sm:$0xff]  ;;  %v4283_v32 = vadd.f32 %v3485_v19, %v32_v51 }
  0x4f   :  { %v350_v33 = vadd.f32 %v349_v53, %v4255_v38  ;;  %7360 = vst [vmem:[#allocation112_spill] sm:$0xff] %v4283_v32  ;;  %v34_v53 = vld [vmem:[%s6998_s0 + $0x68] sm:$0xff]  ;;  %v4290_v38 = vadd.f32 %v3485_v19, %v33_v13 }
  0x51   :  { %v351_v50 = vadd.f32 %v350_v33, %v4262_v5  ;;  %7361 = vst [vmem:[#allocation113_spill] sm:$0xff] %v4290_v38  ;;  %v35_v33 = vld [vmem:[%s6998_s0 + $0x70] sm:$0xff]  ;;  %v4297_v5 = vadd.f32 %v3485_v19, %v34_v53 }
  0x53   :  { %v352_v14 = vadd.f32 %v351_v50, %v4269_v21  ;;  %7362 = vst [vmem:[#allocation114_spill] sm:$0xff] %v4297_v5  ;;  %v36_v50 = vld [vmem:[%s6998_s0 + $0x78] sm:$0xff]  ;;  %v4304_v21 = vadd.f32 %v3485_v19, %v35_v33 }
  0x55   :  { %v353_v23 = vadd.f32 %v352_v14, %v4276_v29  ;;  %7363 = vst [vmem:[#allocation115_spill] sm:$0xff] %v4304_v21  ;;  %v37_v14 = vld [vmem:[%s6998_s0 + $0x80] sm:$0xff]  ;;  %v4311_v29 = vadd.f32 %v3485_v19, %v36_v50 }
  0x57   :  { %v354_v51 = vadd.f32 %v353_v23, %v4283_v32  ;;  %7364 = vst [vmem:[#allocation116_spill] sm:$0xff] %v4311_v29  ;;  %v38_v23 = vld [vmem:[%s6998_s0 + $0x88] sm:$0xff]  ;;  %v4318_v32 = vadd.f32 %v3485_v19, %v37_v14 }
  0x59   :  { %v355_v13 = vadd.f32 %v354_v51, %v4290_v38  ;;  %7365 = vst [vmem:[#allocation117_spill] sm:$0xff] %v4318_v32  ;;  %v39_v51 = vld [vmem:[%s6998_s0 + $0x90] sm:$0xff]  ;;  %v4325_v38 = vadd.f32 %v3485_v19, %v38_v23 }
  0x5b   :  { %v356_v53 = vadd.f32 %v355_v13, %v4297_v5  ;;  %7366 = vst [vmem:[#allocation118_spill] sm:$0xff] %v4325_v38  ;;  %v40_v13 = vld [vmem:[%s6998_s0 + $0x98] sm:$0xff]  ;;  %v4332_v5 = vadd.f32 %v3485_v19, %v39_v51 }
  0x5d   :  { %v357_v33 = vadd.f32 %v356_v53, %v4304_v21  ;;  %7367 = vst [vmem:[#allocation119_spill] sm:$0xff] %v4332_v5  ;;  %v41_v53 = vld [vmem:[%s6998_s0 + $0xa0] sm:$0xff]  ;;  %v4339_v21 = vadd.f32 %v3485_v19, %v40_v13 }
  0x5f   :  { %v358_v50 = vadd.f32 %v357_v33, %v4311_v29  ;;  %7368 = vst [vmem:[#allocation120_spill] sm:$0xff] %v4339_v21  ;;  %v42_v33 = vld [vmem:[%s6998_s0 + $0xa8] sm:$0xff]  ;;  %v4346_v29 = vadd.f32 %v3485_v19, %v41_v53 }
  0x61   :  { %v359_v14 = vadd.f32 %v358_v50, %v4318_v32  ;;  %7369 = vst [vmem:[#allocation121_spill] sm:$0xff] %v4346_v29  ;;  %v43_v50 = vld [vmem:[%s6998_s0 + $0xb0] sm:$0xff]  ;;  %v4353_v32 = vadd.f32 %v3485_v19, %v42_v33 }
  0x63   :  { %v360_v23 = vadd.f32 %v359_v14, %v4325_v38  ;;  %7370 = vst [vmem:[#allocation122_spill] sm:$0xff] %v4353_v32  ;;  %v44_v14 = vld [vmem:[%s6998_s0 + $0xb8] sm:$0xff]  ;;  %v4360_v38 = vadd.f32 %v3485_v19, %v43_v50 }
  0x65   :  { %v361_v51 = vadd.f32 %v360_v23, %v4332_v5  ;;  %7371 = vst [vmem:[#allocation123_spill] sm:$0xff] %v4360_v38  ;;  %v45_v23 = vld [vmem:[%s6998_s0 + $0xc0] sm:$0xff]  ;;  %v4367_v5 = vadd.f32 %v3485_v19, %v44_v14 }
  0x67   :  { %v362_v13 = vadd.f32 %v361_v51, %v4339_v21  ;;  %7372 = vst [vmem:[#allocation124_spill] sm:$0xff] %v4367_v5  ;;  %v46_v51 = vld [vmem:[%s6998_s0 + $0xc8] sm:$0xff]  ;;  %v4374_v21 = vadd.f32 %v3485_v19, %v45_v23 }
  0x69   :  { %v363_v53 = vadd.f32 %v362_v13, %v4346_v29  ;;  %7373 = vst [vmem:[#allocation125_spill] sm:$0xff] %v4374_v21  ;;  %v47_v13 = vld [vmem:[%s6998_s0 + $0xd0] sm:$0xff]  ;;  %v4381_v29 = vadd.f32 %v3485_v19, %v46_v51 }
  0x6b   :  { %v364_v33 = vadd.f32 %v363_v53, %v4353_v32  ;;  %7374 = vst [vmem:[#allocation126_spill] sm:$0xff] %v4381_v29  ;;  %v48_v53 = vld [vmem:[%s6998_s0 + $0xd8] sm:$0xff]  ;;  %v4388_v32 = vadd.f32 %v3485_v19, %v47_v13 }
  0x6d   :  { %v365_v50 = vadd.f32 %v364_v33, %v4360_v38  ;;  %7375 = vst [vmem:[#allocation127_spill] sm:$0xff] %v4388_v32  ;;  %v49_v33 = vld [vmem:[%s6998_s0 + $0xe0] sm:$0xff]  ;;  %v4395_v38 = vadd.f32 %v3485_v19, %v48_v53 }
  0x6f   :  { %v366_v14 = vadd.f32 %v365_v50, %v4367_v5  ;;  %7376 = vst [vmem:[#allocation128_spill] sm:$0xff] %v4395_v38  ;;  %v50_v50 = vld [vmem:[%s6998_s0 + $0xe8] sm:$0xff]  ;;  %v4402_v5 = vadd.f32 %v3485_v19, %v49_v33 }
  0x71   :  { %v367_v23 = vadd.f32 %v366_v14, %v4374_v21  ;;  %7377 = vst [vmem:[#allocation129_spill] sm:$0xff] %v4402_v5  ;;  %v51_v14 = vld [vmem:[%s6998_s0 + $0xf0] sm:$0xff]  ;;  %v4409_v21 = vadd.f32 %v3485_v19, %v50_v50 }
  0x73   :  { %v368_v51 = vadd.f32 %v367_v23, %v4381_v29  ;;  %v52_v23 = vld [vmem:[%s6998_s0 + $0xf8] sm:$0xff]  ;;  %v4416_v29 = vadd.f32 %v3485_v19, %v51_v14 }
  0x75   :  { %v369_v13 = vadd.f32 %v368_v51, %v4388_v32  ;;  %v53_v51 = vld [vmem:[%s6998_s0 + $0x100] sm:$0xff]  ;;  %v4423_v32 = vadd.f32 %v3485_v19, %v52_v23 }
  0x77   :  { %v370_v53 = vadd.f32 %v369_v13, %v4395_v38  ;;  %v4427_v13 = vadd.f32 %v3485_v19, %v53_v51 }
  0x79   :  { %v371_v33 = vadd.f32 %v370_v53, %v4402_v5 }
  0x7b   :  { %v372_v50 = vadd.f32 %v371_v33, %v4409_v21 }
  0x7d   :  { %v373_v38 = vadd.f32 %v372_v50, %v4416_v29 }
  0x7f   :  { %v374_v6 = vadd.f32 %v373_v38, %v4423_v32 }
  0x81   :  { %v375_v14 = vadd.f32 %v374_v6, %v4427_v13 }
  0x83   :  { %v376_v53 = vadd.f32 %v375_v14, %v3545_v39 }
  0x85   :  { %v377_v5 = vadd.f32 %v376_v53, %v3548_v40 }
  0x87   :  { %v378_v12 = vadd.f32 %v377_v5, %v3551_v41 }
  0x89   :  { %v379_v23 = vadd.f32 %v378_v12, %v3566_v46 }
  0x8b   :  { %v380_v61 = vadd.f32 %v379_v23, %v3569_v47 }
  0x8d   :  { %v381_v33 = vadd.f32 %v380_v61, %v3572_v48 }
  0x8f   :  { %v382_v19 = vadd.f32 %v381_v33, %v3575_v49 }
  0x91   :  { %v383_v51 = vadd.f32 %v382_v19, %v3590_v54 }
  0x93   :  { %v384_v38 = vadd.f32 %v383_v51, %v3593_v55 }
  0x95   :  { %v385_v6 = vadd.f32 %v384_v38, %v3596_v56 }
  0x97   :  { %v386_v50 = vadd.f32 %v385_v6, %v3599_v57 }
  0x99   :  { %v387_v14 = vadd.f32 %v386_v50, %v3614_v62 }
  0x9b   :  { %v388_v5 = vadd.f32 %v387_v14, %v3617_v63 }
  0x9d   :  { %v389_v12 = vadd.f32 %v388_v5, %v3620_v1 }
  0x9f   :  { %v390_v53 = vadd.f32 %v389_v12, %v3623_v2 }
  0xa1   :  { %v391_v61 = vadd.f32 %v390_v53, %v3638_v7 }
  0xa3   :  { %v392_v23 = vadd.f32 %v391_v61, %v3641_v8 }
  0xa5   :  { %v393_v33 = vadd.f32 %v392_v23, %v3644_v9 }
  0xa7   :  { %v394_v19 = vadd.f32 %v393_v33, %v3647_v10 }
  0xa9   :  { %v395_v51 = vadd.f32 %v394_v19, %v3662_v15  ;;  %v7378_v19 = vld [vmem:[#allocation15_spill] sm:$0xff] }
  0xab   :  { %v396_v38 = vadd.f32 %v395_v51, %v3665_v16  ;;  %v7379_v16 = vld [vmem:[#allocation16_spill] sm:$0xff] }
  0xad   :  { %v397_v6 = vadd.f32 %v396_v38, %v3668_v17  ;;  %v7380_v17 = vld [vmem:[#allocation17_spill] sm:$0xff] }
  0xaf   :  { %v398_v50 = vadd.f32 %v397_v6, %v3671_v18  ;;  %v7381_v18 = vld [vmem:[#allocation18_spill] sm:$0xff] }
  0xb1   :  { %v399_v14 = vadd.f32 %v398_v50, %v3686_v24  ;;  %v7382_v24 = vld [vmem:[#allocation19_spill] sm:$0xff] }
  0xb3   :  { %v400_v5 = vadd.f32 %v399_v14, %v3689_v25  ;;  %v7383_v25 = vld [vmem:[#allocation20_spill] sm:$0xff] }
  0xb5   :  { %v401_v12 = vadd.f32 %v400_v5, %v3692_v26  ;;  %v7384_v26 = vld [vmem:[#allocation21_spill] sm:$0xff] }
  0xb7   :  { %v402_v53 = vadd.f32 %v401_v12, %v3695_v27  ;;  %v7385_v27 = vld [vmem:[#allocation22_spill] sm:$0xff] }
  0xb9   :  { %v403_v61 = vadd.f32 %v402_v53, %v3710_v34  ;;  %v7386_v34 = vld [vmem:[#allocation23_spill] sm:$0xff] }
  0xbb   :  { %v404_v23 = vadd.f32 %v403_v61, %v3713_v35  ;;  %v7387_v35 = vld [vmem:[#allocation24_spill] sm:$0xff] }
  0xbd   :  { %v405_v33 = vadd.f32 %v404_v23, %v3716_v36  ;;  %v7388_v36 = vld [vmem:[#allocation25_spill] sm:$0xff] }
  0xbf   :  { %v406_v51 = vadd.f32 %v405_v33, %v7378_v19  ;;  %v7389_v19 = vld [vmem:[#allocation26_spill] sm:$0xff] }
  0xc1   :  { %v407_v38 = vadd.f32 %v406_v51, %v7379_v16  ;;  %v7390_v16 = vld [vmem:[#allocation27_spill] sm:$0xff] }
  0xc3   :  { %v408_v6 = vadd.f32 %v407_v38, %v7380_v17  ;;  %v7391_v17 = vld [vmem:[#allocation28_spill] sm:$0xff] }
  0xc5   :  { %v409_v50 = vadd.f32 %v408_v6, %v7381_v18  ;;  %v7392_v18 = vld [vmem:[#allocation29_spill] sm:$0xff] }
  0xc7   :  { %v410_v14 = vadd.f32 %v409_v50, %v7382_v24  ;;  %v7393_v24 = vld [vmem:[#allocation30_spill] sm:$0xff] }
  0xc9   :  { %v411_v5 = vadd.f32 %v410_v14, %v7383_v25  ;;  %v7394_v25 = vld [vmem:[#allocation31_spill] sm:$0xff] }
  0xcb   :  { %v412_v12 = vadd.f32 %v411_v5, %v7384_v26  ;;  %v7395_v26 = vld [vmem:[#allocation32_spill] sm:$0xff] }
  0xcd   :  { %v413_v53 = vadd.f32 %v412_v12, %v7385_v27  ;;  %v7396_v27 = vld [vmem:[#allocation33_spill] sm:$0xff] }
  0xcf   :  { %v414_v61 = vadd.f32 %v413_v53, %v7386_v34  ;;  %v7397_v34 = vld [vmem:[#allocation34_spill] sm:$0xff] }
  0xd1   :  { %v415_v23 = vadd.f32 %v414_v61, %v7387_v35  ;;  %v7398_v35 = vld [vmem:[#allocation35_spill] sm:$0xff] }
  0xd3   :  { %v416_v33 = vadd.f32 %v415_v23, %v7388_v36  ;;  %v7399_v36 = vld [vmem:[#allocation36_spill] sm:$0xff] }
  0xd5   :  { %v417_v51 = vadd.f32 %v416_v33, %v7389_v19  ;;  %v7400_v19 = vld [vmem:[#allocation37_spill] sm:$0xff] }
  0xd7   :  { %v418_v38 = vadd.f32 %v417_v51, %v7390_v16  ;;  %v7401_v16 = vld [vmem:[#allocation38_spill] sm:$0xff] }
  0xd9   :  { %v419_v6 = vadd.f32 %v418_v38, %v7391_v17  ;;  %v7402_v17 = vld [vmem:[#allocation39_spill] sm:$0xff] }
  0xdb   :  { %v420_v50 = vadd.f32 %v419_v6, %v7392_v18  ;;  %v7403_v18 = vld [vmem:[#allocation40_spill] sm:$0xff] }
  0xdd   :  { %v421_v14 = vadd.f32 %v420_v50, %v7393_v24  ;;  %v7404_v24 = vld [vmem:[#allocation41_spill] sm:$0xff] }
  0xdf   :  { %v422_v5 = vadd.f32 %v421_v14, %v7394_v25  ;;  %v7405_v25 = vld [vmem:[#allocation42_spill] sm:$0xff] }
  0xe1   :  { %v423_v12 = vadd.f32 %v422_v5, %v7395_v26  ;;  %v7406_v26 = vld [vmem:[#allocation43_spill] sm:$0xff] }
  0xe3   :  { %v424_v53 = vadd.f32 %v423_v12, %v7396_v27  ;;  %v7407_v27 = vld [vmem:[#allocation44_spill] sm:$0xff] }
  0xe5   :  { %v425_v61 = vadd.f32 %v424_v53, %v7397_v34  ;;  %v7408_v34 = vld [vmem:[#allocation45_spill] sm:$0xff] }
  0xe7   :  { %v426_v23 = vadd.f32 %v425_v61, %v7398_v35  ;;  %v7409_v35 = vld [vmem:[#allocation46_spill] sm:$0xff] }
  0xe9   :  { %v427_v33 = vadd.f32 %v426_v23, %v7399_v36  ;;  %v7410_v36 = vld [vmem:[#allocation47_spill] sm:$0xff] }
  0xeb   :  { %v428_v51 = vadd.f32 %v427_v33, %v7400_v19  ;;  %v7411_v19 = vld [vmem:[#allocation48_spill] sm:$0xff] }
  0xed   :  { %v429_v38 = vadd.f32 %v428_v51, %v7401_v16  ;;  %v7412_v16 = vld [vmem:[#allocation49_spill] sm:$0xff] }
  0xef   :  { %v430_v6 = vadd.f32 %v429_v38, %v7402_v17  ;;  %v7413_v17 = vld [vmem:[#allocation50_spill] sm:$0xff] }
  0xf1   :  { %v431_v50 = vadd.f32 %v430_v6, %v7403_v18  ;;  %v7414_v18 = vld [vmem:[#allocation51_spill] sm:$0xff] }
  0xf3   :  { %v432_v14 = vadd.f32 %v431_v50, %v7404_v24  ;;  %v7415_v24 = vld [vmem:[#allocation52_spill] sm:$0xff] }
  0xf5   :  { %v433_v5 = vadd.f32 %v432_v14, %v7405_v25  ;;  %v7416_v25 = vld [vmem:[#allocation53_spill] sm:$0xff] }
  0xf7   :  { %v434_v12 = vadd.f32 %v433_v5, %v7406_v26  ;;  %v7417_v26 = vld [vmem:[#allocation54_spill] sm:$0xff] }
  0xf9   :  { %v435_v53 = vadd.f32 %v434_v12, %v7407_v27  ;;  %v7418_v27 = vld [vmem:[#allocation55_spill] sm:$0xff] }
  0xfb   :  { %v436_v61 = vadd.f32 %v435_v53, %v7408_v34  ;;  %v7419_v34 = vld [vmem:[#allocation56_spill] sm:$0xff] }
  0xfd   :  { %v437_v23 = vadd.f32 %v436_v61, %v7409_v35  ;;  %v7420_v35 = vld [vmem:[#allocation57_spill] sm:$0xff] }
  0xff   :  { %v438_v33 = vadd.f32 %v437_v23, %v7410_v36  ;;  %v7421_v36 = vld [vmem:[#allocation58_spill] sm:$0xff] }
 0x101   :  { %v439_v51 = vadd.f32 %v438_v33, %v7411_v19  ;;  %v7422_v19 = vld [vmem:[#allocation59_spill] sm:$0xff] }
 0x103   :  { %v440_v38 = vadd.f32 %v439_v51, %v7412_v16 }
 0x105   :  { %v441_v6 = vadd.f32 %v440_v38, %v7413_v17  ;;  %v7423_v17 = vld [vmem:[#allocation61_spill] sm:$0xff] }
 0x107   :  { %v442_v50 = vadd.f32 %v441_v6, %v7414_v18  ;;  %v7424_v18 = vld [vmem:[#allocation62_spill] sm:$0xff] }
 0x109   :  { %v443_v14 = vadd.f32 %v442_v50, %v7415_v24  ;;  %v7425_v24 = vld [vmem:[#allocation63_spill] sm:$0xff] }
 0x10b   :  { %v444_v5 = vadd.f32 %v443_v14, %v7416_v25 }
 0x10d   :  { %v445_v12 = vadd.f32 %v444_v5, %v7417_v26  ;;  %v7426_v26 = vld [vmem:[#allocation65_spill] sm:$0xff] }
 0x10f   :  { %v446_v53 = vadd.f32 %v445_v12, %v7418_v27  ;;  %v7427_v27 = vld [vmem:[#allocation66_spill] sm:$0xff] }
 0x111   :  { %v447_v61 = vadd.f32 %v446_v53, %v7419_v34  ;;  %v7428_v34 = vld [vmem:[#allocation67_spill] sm:$0xff] }
 0x113   :  { %v448_v23 = vadd.f32 %v447_v61, %v7420_v35 }
 0x115   :  { %v449_v33 = vadd.f32 %v448_v23, %v7421_v36  ;;  %v7429_v36 = vld [vmem:[#allocation69_spill] sm:$0xff] }
 0x117   :  { %v450_v51 = vadd.f32 %v449_v33, %v7422_v19  ;;  %v7430_v19 = vld [vmem:[#allocation70_spill] sm:$0xff] }
 0x119   :  { %v451_v38 = vadd.f32 %v450_v51, %v3998_v28  ;;  %v7431_v28 = vld [vmem:[#allocation71_spill] sm:$0xff] }
 0x11b   :  { %v452_v6 = vadd.f32 %v451_v38, %v7423_v17 }
 0x11d   :  { %v453_v50 = vadd.f32 %v452_v6, %v7424_v18  ;;  %v7432_v18 = vld [vmem:[#allocation73_spill] sm:$0xff] }
 0x11f   :  { %v454_v14 = vadd.f32 %v453_v50, %v7425_v24  ;;  %v7433_v24 = vld [vmem:[#allocation74_spill] sm:$0xff] }
 0x121   :  { %v455_v5 = vadd.f32 %v454_v14, %v4019_v22  ;;  %v7434_v22 = vld [vmem:[#allocation75_spill] sm:$0xff] }
 0x123   :  { %v456_v12 = vadd.f32 %v455_v5, %v7426_v26 }
 0x125   :  { %v457_v53 = vadd.f32 %v456_v12, %v7427_v27  ;;  %v7435_v27 = vld [vmem:[#allocation77_spill] sm:$0xff] }
 0x127   :  { %v458_v61 = vadd.f32 %v457_v53, %v7428_v34  ;;  %v7436_v34 = vld [vmem:[#allocation78_spill] sm:$0xff] }
 0x129   :  { %v459_v23 = vadd.f32 %v458_v61, %v4040_v30  ;;  %v7437_v30 = vld [vmem:[#allocation79_spill] sm:$0xff] }
 0x12b   :  { %v460_v33 = vadd.f32 %v459_v23, %v7429_v36 }
 0x12d   :  { %v461_v51 = vadd.f32 %v460_v33, %v7430_v19  ;;  %v7438_v19 = vld [vmem:[#allocation81_spill] sm:$0xff] }
 0x12f   :  { %v462_v38 = vadd.f32 %v461_v51, %v7431_v28  ;;  %v7439_v28 = vld [vmem:[#allocation82_spill] sm:$0xff] }
 0x131   :  { %v463_v6 = vadd.f32 %v462_v38, %v4061_v44  ;;  %v7440_v44 = vld [vmem:[#allocation83_spill] sm:$0xff] }
 0x133   :  { %v464_v50 = vadd.f32 %v463_v6, %v7432_v18 }
 0x135   :  { %v465_v14 = vadd.f32 %v464_v50, %v7433_v24  ;;  %v7441_v24 = vld [vmem:[#allocation85_spill] sm:$0xff] }
 0x137   :  { %v466_v5 = vadd.f32 %v465_v14, %v7434_v22  ;;  %v7442_v22 = vld [vmem:[#allocation86_spill] sm:$0xff] }
 0x139   :  { %v467_v12 = vadd.f32 %v466_v5, %v4082_v58  ;;  %v7443_v58 = vld [vmem:[#allocation87_spill] sm:$0xff] }
 0x13b   :  { %v468_v53 = vadd.f32 %v467_v12, %v7435_v27 }
 0x13d   :  { %v469_v61 = vadd.f32 %v468_v53, %v7436_v34  ;;  %v7444_v34 = vld [vmem:[#allocation88_spill] sm:$0xff] }
 0x13f   :  { %v470_v23 = vadd.f32 %v469_v61, %v7437_v30  ;;  %v7445_v30 = vld [vmem:[#allocation89_spill] sm:$0xff] }
 0x141   :  { %v471_v33 = vadd.f32 %v470_v23, %v4103_v3  ;;  %v7446_v3 = vld [vmem:[#allocation90_spill] sm:$0xff] }
 0x143   :  { %v472_v51 = vadd.f32 %v471_v33, %v7438_v19 }
 0x145   :  { %v473_v38 = vadd.f32 %v472_v51, %v7439_v28  ;;  %v7447_v28 = vld [vmem:[#allocation92_spill] sm:$0xff] }
 0x147   :  { %v474_v6 = vadd.f32 %v473_v38, %v7440_v44  ;;  %v7448_v44 = vld [vmem:[#allocation93_spill] sm:$0xff] }
 0x149   :  { %v475_v50 = vadd.f32 %v474_v6, %v4124_v11  ;;  %v7449_v11 = vld [vmem:[#allocation94_spill] sm:$0xff] }
 0x14b   :  { %v476_v14 = vadd.f32 %v475_v50, %v7441_v24 }
 0x14d   :  { %v477_v5 = vadd.f32 %v476_v14, %v7442_v22 }
 0x14f   :  { %v478_v12 = vadd.f32 %v477_v5, %v7443_v58 }
 0x151   :  { %v479_v53 = vadd.f32 %v478_v12, %v4145_v20 }
 0x153   :  { %v480_v61 = vadd.f32 %v479_v53, %v7444_v34 }
 0x155   :  { %v481_v23 = vadd.f32 %v480_v61, %v7445_v30 }
 0x157   :  { %v482_v33 = vadd.f32 %v481_v23, %v7446_v3 }
 0x159   :  { %v483_v51 = vadd.f32 %v482_v33, %v4166_v31  ;;  %v7450_v31 = vld [vmem:[#allocation100_spill] sm:$0xff] }
 0x15b   :  { %v484_v38 = vadd.f32 %v483_v51, %v7447_v28 }
 0x15d   :  { %v485_v6 = vadd.f32 %v484_v38, %v7448_v44 }
 0x15f   :  { %v486_v50 = vadd.f32 %v485_v6, %v7449_v11  ;;  %v7451_v11 = vld [vmem:[#allocation101_spill] sm:$0xff] }
 0x161   :  { %v487_v14 = vadd.f32 %v486_v50, %v4184_v45  ;;  %v7452_v45 = vld [vmem:[#allocation102_spill] sm:$0xff] }
 0x163   :  { %v488_v5 = vadd.f32 %v487_v14, %v4187_v37 }
 0x165   :  { %v489_v12 = vadd.f32 %v488_v5, %v4190_v0  ;;  %v7453_v5 = vld [vmem:[#allocation104_spill] sm:$0xff] }
 0x167   :  { %v490_v53 = vadd.f32 %v489_v12, %v4193_v59  ;;  %v500_v12 = vsel %vm499_vm1, %v7453_v5, 0.0  ;;  %v7475_v5 = vld [vmem:[#allocation109_spill] sm:$0xff] }
 0x169   :  { %v491_v61 = vadd.f32 %v490_v53, %v4196_v52 }
 0x16b   :  { %v492_v23 = vadd.f32 %v491_v61, %v4199_v42 }
 0x16d   :  { %v493_v33 = vadd.f32 %v492_v23, %v4202_v43 }
 0x16f   :  { %v494_v51 = vadd.f32 %v493_v33, %v7450_v31 }
 0x171   :  { %v495_v38 = vadd.f32 %v494_v51, %v4211_v4 }
 0x173   :  { %v496_v6 = vadd.f32 %v495_v38, %v4214_v60 }
 0x175   :  { %v497_v50 = vadd.f32 %v496_v6, %v7451_v11 }
 0x177   :  { %v498_v14 = vadd.f32 %v497_v50, %v7452_v45  ;;  %v7463_v50 = vld [vmem:[#allocation4_spill] sm:$0xff] }
 0x179   :  { %v501_v59 = vadd.f32 %v500_v12, %v498_v14  ;;  %v7465_v14 = vld [vmem:[#allocation103_spill] sm:$0xff] }
 0x17b   :  { %v502_v53 = vrot.slane %v501_v59, 4 }
 0x17d   :  { %v503_v52 = vadd.f32 %v502_v53, %v501_v59  ;;  %v7467_v53 = vld [vmem:[#allocation105_spill] sm:$0xff] }
 0x17f   :  { %v504_v61 = vrot.slane %v503_v52, 2 }
 0x181   :  { %v505_v42 = vadd.f32 %v504_v61, %v503_v52 }
 0x183   :  { %v506_v23 = vrot.slane %v505_v42, 1 }
 0x185   :  { %v507_v43 = vadd.f32 %v506_v23, %v505_v42  ;;  %v7461_v42 = vld [vmem:[#allocation3_spill] sm:$0xff] }
 0x187   :  { %v4557_v33 = vmul.f32 0.0008, %v507_v43  ;;  %v7459_v43 = vld [vmem:[#allocation2_spill] sm:$0xff] }
 0x189   :  { %v4561_v51 = vsub.f32 %v7450_v31, %v4557_v33  ;;  %v4565_v38 = vsub.f32 %v4211_v4, %v4557_v33  ;;  %v4569_v6 = vsub.f32 %v4214_v60, %v4557_v33  ;;  %v4573_v59 = vsub.f32 %v7451_v11, %v4557_v33 }
 0x18a   :  { %v4577_v52 = vsub.f32 %v7452_v45, %v4557_v33  ;;  %v4581_v31 = vsub.f32 %v7459_v43, %v4557_v33  ;;  %v4585_v4 = vsub.f32 %v7461_v42, %v4557_v33  ;;  %v4589_v60 = vsub.f32 %v7463_v50, %v4557_v33  ;;  %v7469_v43 = vld [vmem:[#allocation106_spill] sm:$0xff] }
 0x18b   :  { %7454 = vst [vmem:[#allocation49_spill] sm:$0xff] %v4561_v51  ;;  %7455 = vst [vmem:[#allocation53_spill] sm:$0xff] %v4565_v38  ;;  %v4593_v11 = vsub.f32 %v7465_v14, %v4557_v33  ;;  %v4601_v61 = vsub.f32 %v7467_v53, %v4557_v33  ;;  %v4607_v42 = vsub.f32 %v7469_v43, %v4557_v33 }
 0x18c   :  { %7456 = vst [vmem:[#allocation57_spill] sm:$0xff] %v4569_v6  ;;  %7457 = vst [vmem:[#allocation61_spill] sm:$0xff] %v4573_v59  ;;  %v667_v45 = vmul.f32 %v4581_v31, %v4581_v31  ;;  %v668_v12 = vmul.f32 %v4585_v4, %v4585_v4  ;;  %v669_v23 = vmul.f32 %v4589_v60, %v4589_v60  ;;  %v7473_v59 = vld [vmem:[#allocation108_spill] sm:$0xff] }
 0x18d   :  { %7458 = vst [vmem:[#allocation65_spill] sm:$0xff] %v4577_v52  ;;  %7460 = vst [vmem:[#allocation69_spill] sm:$0xff] %v4581_v31  ;;  %v670_v50 = vmul.f32 %v4593_v11, %v4593_v11  ;;  %v7471_v31 = vld [vmem:[#allocation107_spill] sm:$0xff]  ;;  %v4619_v6 = vsub.f32 %v7473_v59, %v4557_v33  ;;  %v672_v43 = vmul.f32 %v4607_v42, %v4607_v42 }
 0x18e   :  { %7462 = vst [vmem:[#allocation73_spill] sm:$0xff] %v4585_v4  ;;  %7464 = vst [vmem:[#allocation77_spill] sm:$0xff] %v4589_v60  ;;  %v824_v14 = vadd.f32 %v668_v12, %v667_v45  ;;  %v4613_v52 = vsub.f32 %v7471_v31, %v4557_v33  ;;  %v671_v4 = vmul.f32 %v4601_v61, %v4601_v61  ;;  %v7477_v12 = vld [vmem:[#allocation110_spill] sm:$0xff] }
 0x18f   :  { %7466 = vst [vmem:[#allocation81_spill] sm:$0xff] %v4593_v11  ;;  %7468 = vst [vmem:[#allocation85_spill] sm:$0xff] %v4601_v61  ;;  %v4625_v11 = vsub.f32 %v7475_v5, %v4557_v33  ;;  %v4631_v61 = vsub.f32 %v7477_v12, %v4557_v33  ;;  %v674_v59 = vmul.f32 %v4619_v6, %v4619_v6  ;;  %v7483_v12 = vld [vmem:[#allocation113_spill] sm:$0xff] }
 0x190   :  { %7470 = vst [vmem:[#allocation86_spill] sm:$0xff] %v4607_v42  ;;  %7472 = vst [vmem:[#allocation87_spill] sm:$0xff] %v4613_v52  ;;  %v825_v53 = vadd.f32 %v824_v14, %v669_v23  ;;  %v673_v31 = vmul.f32 %v4613_v52, %v4613_v52  ;;  %v7479_v14 = vld [vmem:[#allocation111_spill] sm:$0xff] }
 0x191   :  { %7474 = vst [vmem:[#allocation88_spill] sm:$0xff] %v4619_v6  ;;  %7476 = vst [vmem:[#allocation89_spill] sm:$0xff] %v4625_v11  ;;  %v4637_v42 = vsub.f32 %v7479_v14, %v4557_v33  ;;  %v675_v5 = vmul.f32 %v4625_v11, %v4625_v11  ;;  %v4649_v6 = vsub.f32 %v7483_v12, %v4557_v33  ;;  %v7485_v14 = vld [vmem:[#allocation114_spill] sm:$0xff]  ;;  %v7489_v12 = vld [vmem:[#allocation116_spill] sm:$0xff] }
 0x192   :  { %v826_v60 = vadd.f32 %v825_v53, %v670_v50  ;;  %7478 = vst [vmem:[#allocation90_spill] sm:$0xff] %v4631_v61  ;;  %v7481_v53 = vld [vmem:[#allocation112_spill] sm:$0xff]  ;;  %v4655_v11 = vsub.f32 %v7485_v14, %v4557_v33  ;;  %v7491_v14 = vld [vmem:[#allocation117_spill] sm:$0xff] }
 0x193   :  { %7480 = vst [vmem:[#allocation92_spill] sm:$0xff] %v4637_v42  ;;  %v4643_v52 = vsub.f32 %v7481_v53, %v4557_v33  ;;  %7484 = vst [vmem:[#allocation100_spill] sm:$0xff] %v4649_v6  ;;  %v7487_v53 = vld [vmem:[#allocation115_spill] sm:$0xff] }
 0x194   :  { %v827_v45 = vadd.f32 %v826_v60, %v671_v4  ;;  %v676_v4 = vmul.f32 %v4631_v61, %v4631_v61  ;;  %7486 = vst [vmem:[#allocation101_spill] sm:$0xff] %v4655_v11  ;;  %v4661_v61 = vsub.f32 %v7487_v53, %v4557_v33  ;;  %v7493_v53 = vld [vmem:[#allocation118_spill] sm:$0xff] }
 0x195   :  { %7482 = vst [vmem:[#allocation93_spill] sm:$0xff] %v4643_v52 }
 0x196   :  { %v828_v23 = vadd.f32 %v827_v45, %v672_v43  ;;  %v677_v43 = vmul.f32 %v4637_v42, %v4637_v42  ;;  %7488 = vst [vmem:[#allocation102_spill] sm:$0xff] %v4661_v61  ;;  %v4667_v42 = vsub.f32 %v7489_v12, %v4557_v33  ;;  %v7495_v12 = vld [vmem:[#allocation119_spill] sm:$0xff] }
 0x198   :  { %v829_v50 = vadd.f32 %v828_v23, %v673_v31  ;;  %v678_v31 = vmul.f32 %v4643_v52, %v4643_v52  ;;  %7490 = vst [vmem:[#allocation2_spill] sm:$0xff] %v4667_v42  ;;  %v4673_v52 = vsub.f32 %v7491_v14, %v4557_v33  ;;  %v7497_v14 = vld [vmem:[#allocation120_spill] sm:$0xff] }
 0x19a   :  { %v830_v60 = vadd.f32 %v829_v50, %v674_v59  ;;  %v679_v59 = vmul.f32 %v4649_v6, %v4649_v6  ;;  %7492 = vst [vmem:[#allocation3_spill] sm:$0xff] %v4673_v52  ;;  %v4679_v6 = vsub.f32 %v7493_v53, %v4557_v33  ;;  %v7499_v53 = vld [vmem:[#allocation121_spill] sm:$0xff] }
 0x19c   :  { %v831_v45 = vadd.f32 %v830_v60, %v675_v5  ;;  %v680_v5 = vmul.f32 %v4655_v11, %v4655_v11  ;;  %7494 = vst [vmem:[#allocation4_spill] sm:$0xff] %v4679_v6  ;;  %v4685_v11 = vsub.f32 %v7495_v12, %v4557_v33  ;;  %v7501_v12 = vld [vmem:[#allocation122_spill] sm:$0xff] }
 0x19e   :  { %v832_v23 = vadd.f32 %v831_v45, %v676_v4  ;;  %v681_v4 = vmul.f32 %v4661_v61, %v4661_v61  ;;  %7496 = vst [vmem:[#allocation103_spill] sm:$0xff] %v4685_v11  ;;  %v4691_v61 = vsub.f32 %v7497_v14, %v4557_v33  ;;  %v7503_v14 = vld [vmem:[#allocation123_spill] sm:$0xff] }
 0x1a0   :  { %v833_v50 = vadd.f32 %v832_v23, %v677_v43  ;;  %v682_v43 = vmul.f32 %v4667_v42, %v4667_v42  ;;  %7498 = vst [vmem:[#allocation105_spill] sm:$0xff] %v4691_v61  ;;  %v4697_v42 = vsub.f32 %v7499_v53, %v4557_v33  ;;  %v7505_v53 = vld [vmem:[#allocation124_spill] sm:$0xff] }
 0x1a2   :  { %v834_v60 = vadd.f32 %v833_v50, %v678_v31  ;;  %v683_v31 = vmul.f32 %v4673_v52, %v4673_v52  ;;  %7500 = vst [vmem:[#allocation106_spill] sm:$0xff] %v4697_v42  ;;  %v4703_v52 = vsub.f32 %v7501_v12, %v4557_v33  ;;  %v7507_v12 = vld [vmem:[#allocation125_spill] sm:$0xff] }
 0x1a4   :  { %v835_v45 = vadd.f32 %v834_v60, %v679_v59  ;;  %v684_v59 = vmul.f32 %v4679_v6, %v4679_v6  ;;  %7502 = vst [vmem:[#allocation107_spill] sm:$0xff] %v4703_v52  ;;  %v4709_v6 = vsub.f32 %v7503_v14, %v4557_v33  ;;  %v7508_v14 = vld [vmem:[#allocation126_spill] sm:$0xff] }
 0x1a6   :  { %v836_v23 = vadd.f32 %v835_v45, %v680_v5  ;;  %v685_v5 = vmul.f32 %v4685_v11, %v4685_v11  ;;  %7504 = vst [vmem:[#allocation108_spill] sm:$0xff] %v4709_v6  ;;  %v4715_v11 = vsub.f32 %v7505_v53, %v4557_v33  ;;  %v7509_v53 = vld [vmem:[#allocation127_spill] sm:$0xff] }
 0x1a8   :  { %v837_v50 = vadd.f32 %v836_v23, %v681_v4  ;;  %v686_v4 = vmul.f32 %v4691_v61, %v4691_v61  ;;  %7506 = vst [vmem:[#allocation109_spill] sm:$0xff] %v4715_v11  ;;  %v4721_v61 = vsub.f32 %v7507_v12, %v4557_v33  ;;  %v7511_v12 = vld [vmem:[#allocation128_spill] sm:$0xff] }
 0x1aa   :  { %v838_v60 = vadd.f32 %v837_v50, %v682_v43  ;;  %v687_v43 = vmul.f32 %v4697_v42, %v4697_v42  ;;  %v4727_v42 = vsub.f32 %v7508_v14, %v4557_v33  ;;  %v7513_v14 = vld [vmem:[#allocation129_spill] sm:$0xff] }
 0x1ac   :  { %v839_v45 = vadd.f32 %v838_v60, %v683_v31  ;;  %v688_v31 = vmul.f32 %v4703_v52, %v4703_v52  ;;  %v4733_v52 = vsub.f32 %v7509_v53, %v4557_v33  ;;  %v4751_v53 = vsub.f32 %v4409_v21, %v4557_v33 }
 0x1ae   :  { %v840_v23 = vadd.f32 %v839_v45, %v684_v59  ;;  %v689_v59 = vmul.f32 %v4709_v6, %v4709_v6  ;;  %7510 = vst [vmem:[#allocation110_spill] sm:$0xff] %v4733_v52  ;;  %v4739_v6 = vsub.f32 %v7511_v12, %v4557_v33  ;;  %7515 = vst [vmem:[#allocation113_spill] sm:$0xff] %v4751_v53 }
 0x1af   :  { %v4757_v12 = vsub.f32 %v4416_v29, %v4557_v33  ;;  %v696_v21 = vmul.f32 %v4751_v53, %v4751_v53 }
 0x1b0   :  { %v841_v50 = vadd.f32 %v840_v23, %v685_v5  ;;  %v690_v5 = vmul.f32 %v4715_v11, %v4715_v11  ;;  %7512 = vst [vmem:[#allocation111_spill] sm:$0xff] %v4739_v6  ;;  %v4745_v11 = vsub.f32 %v7513_v14, %v4557_v33  ;;  %v4763_v14 = vsub.f32 %v4423_v32, %v4557_v33 }
 0x1b1   :  { %7516 = vst [vmem:[#allocation114_spill] sm:$0xff] %v4757_v12  ;;  %v697_v29 = vmul.f32 %v4757_v12, %v4757_v12 }
 0x1b2   :  { %v842_v60 = vadd.f32 %v841_v50, %v686_v4  ;;  %v691_v4 = vmul.f32 %v4721_v61, %v4721_v61  ;;  %7514 = vst [vmem:[#allocation112_spill] sm:$0xff] %v4745_v11  ;;  %7517 = vst [vmem:[#allocation115_spill] sm:$0xff] %v4763_v14  ;;  %v698_v32 = vmul.f32 %v4763_v14, %v4763_v14 }
 0x1b4   :  { %v843_v45 = vadd.f32 %v842_v60, %v687_v43  ;;  %v692_v43 = vmul.f32 %v4727_v42, %v4727_v42 }
 0x1b6   :  { %v844_v23 = vadd.f32 %v843_v45, %v688_v31  ;;  %v693_v31 = vmul.f32 %v4733_v52, %v4733_v52 }
 0x1b8   :  { %v845_v50 = vadd.f32 %v844_v23, %v689_v59  ;;  %v694_v59 = vmul.f32 %v4739_v6, %v4739_v6 }
 0x1ba   :  { %v846_v60 = vadd.f32 %v845_v50, %v690_v5  ;;  %v695_v5 = vmul.f32 %v4745_v11, %v4745_v11 }
 0x1bc   :  { %v847_v45 = vadd.f32 %v846_v60, %v691_v4  ;;  %v4769_v60 = vsub.f32 %v4427_v13, %v4557_v33 }
 0x1be   :  { %v848_v23 = vadd.f32 %v847_v45, %v692_v43  ;;  %7518 = vst [vmem:[#allocation116_spill] sm:$0xff] %v4769_v60  ;;  %v4775_v45 = vsub.f32 %v3545_v39, %v4557_v33  ;;  %v699_v13 = vmul.f32 %v4769_v60, %v4769_v60 }
 0x1c0   :  { %v849_v50 = vadd.f32 %v848_v23, %v693_v31  ;;  %7519 = vst [vmem:[#allocation117_spill] sm:$0xff] %v4775_v45  ;;  %v4781_v23 = vsub.f32 %v3548_v40, %v4557_v33  ;;  %v700_v39 = vmul.f32 %v4775_v45, %v4775_v45 }
 0x1c2   :  { %v850_v4 = vadd.f32 %v849_v50, %v694_v59  ;;  %7520 = vst [vmem:[#allocation118_spill] sm:$0xff] %v4781_v23  ;;  %v4787_v50 = vsub.f32 %v3551_v41, %v4557_v33  ;;  %v701_v40 = vmul.f32 %v4781_v23, %v4781_v23 }
 0x1c4   :  { %v851_v43 = vadd.f32 %v850_v4, %v695_v5  ;;  %7521 = vst [vmem:[#allocation119_spill] sm:$0xff] %v4787_v50  ;;  %v4793_v4 = vsub.f32 %v3566_v46, %v4557_v33  ;;  %v702_v41 = vmul.f32 %v4787_v50, %v4787_v50 }
 0x1c6   :  { %v852_v31 = vadd.f32 %v851_v43, %v696_v21  ;;  %7522 = vst [vmem:[#allocation120_spill] sm:$0xff] %v4793_v4  ;;  %v4799_v43 = vsub.f32 %v3569_v47, %v4557_v33  ;;  %v703_v46 = vmul.f32 %v4793_v4, %v4793_v4 }
 0x1c8   :  { %v853_v59 = vadd.f32 %v852_v31, %v697_v29  ;;  %7523 = vst [vmem:[#allocation121_spill] sm:$0xff] %v4799_v43  ;;  %v4805_v31 = vsub.f32 %v3572_v48, %v4557_v33  ;;  %v704_v47 = vmul.f32 %v4799_v43, %v4799_v43 }
 0x1ca   :  { %v854_v5 = vadd.f32 %v853_v59, %v698_v32  ;;  %7524 = vst [vmem:[#allocation122_spill] sm:$0xff] %v4805_v31  ;;  %v4811_v59 = vsub.f32 %v3575_v49, %v4557_v33  ;;  %v705_v48 = vmul.f32 %v4805_v31, %v4805_v31 }
 0x1cc   :  { %v855_v21 = vadd.f32 %v854_v5, %v699_v13  ;;  %7525 = vst [vmem:[#allocation123_spill] sm:$0xff] %v4811_v59  ;;  %v4817_v5 = vsub.f32 %v3590_v54, %v4557_v33  ;;  %v706_v49 = vmul.f32 %v4811_v59, %v4811_v59 }
 0x1ce   :  { %v856_v29 = vadd.f32 %v855_v21, %v700_v39  ;;  %7526 = vst [vmem:[#allocation124_spill] sm:$0xff] %v4817_v5  ;;  %v4823_v21 = vsub.f32 %v3593_v55, %v4557_v33  ;;  %v707_v54 = vmul.f32 %v4817_v5, %v4817_v5 }
 0x1d0   :  { %v857_v32 = vadd.f32 %v856_v29, %v701_v40  ;;  %7527 = vst [vmem:[#allocation125_spill] sm:$0xff] %v4823_v21  ;;  %v4829_v29 = vsub.f32 %v3596_v56, %v4557_v33  ;;  %v708_v55 = vmul.f32 %v4823_v21, %v4823_v21 }
 0x1d2   :  { %v858_v13 = vadd.f32 %v857_v32, %v702_v41  ;;  %7528 = vst [vmem:[#allocation126_spill] sm:$0xff] %v4829_v29  ;;  %v4835_v32 = vsub.f32 %v3599_v57, %v4557_v33  ;;  %v709_v56 = vmul.f32 %v4829_v29, %v4829_v29 }
 0x1d4   :  { %v859_v39 = vadd.f32 %v858_v13, %v703_v46  ;;  %7529 = vst [vmem:[#allocation127_spill] sm:$0xff] %v4835_v32  ;;  %v4841_v13 = vsub.f32 %v3614_v62, %v4557_v33  ;;  %v710_v57 = vmul.f32 %v4835_v32, %v4835_v32 }
 0x1d6   :  { %v860_v40 = vadd.f32 %v859_v39, %v704_v47  ;;  %7530 = vst [vmem:[#allocation128_spill] sm:$0xff] %v4841_v13  ;;  %v4847_v39 = vsub.f32 %v3617_v63, %v4557_v33  ;;  %v711_v62 = vmul.f32 %v4841_v13, %v4841_v13 }
 0x1d8   :  { %v861_v41 = vadd.f32 %v860_v40, %v705_v48  ;;  %7531 = vst [vmem:[#allocation129_spill] sm:$0xff] %v4847_v39  ;;  %v4853_v40 = vsub.f32 %v3620_v1, %v4557_v33  ;;  %v712_v63 = vmul.f32 %v4847_v39, %v4847_v39 }
 0x1da   :  { %v862_v46 = vadd.f32 %v861_v41, %v706_v49  ;;  %7532 = vst [vmem:[#allocation130_spill] sm:$0xff] %v4853_v40  ;;  %v4859_v41 = vsub.f32 %v3623_v2, %v4557_v33  ;;  %v713_v1 = vmul.f32 %v4853_v40, %v4853_v40 }
 0x1dc   :  { %v863_v47 = vadd.f32 %v862_v46, %v707_v54  ;;  %7533 = vst [vmem:[#allocation131_spill] sm:$0xff] %v4859_v41  ;;  %v4865_v46 = vsub.f32 %v3638_v7, %v4557_v33  ;;  %v714_v2 = vmul.f32 %v4859_v41, %v4859_v41 }
 0x1de   :  { %v864_v48 = vadd.f32 %v863_v47, %v708_v55  ;;  %7534 = vst [vmem:[#allocation132_spill] sm:$0xff] %v4865_v46  ;;  %v4871_v47 = vsub.f32 %v3641_v8, %v4557_v33  ;;  %v715_v7 = vmul.f32 %v4865_v46, %v4865_v46 }
 0x1e0   :  { %v865_v49 = vadd.f32 %v864_v48, %v709_v56  ;;  %7535 = vst [vmem:[#allocation133_spill] sm:$0xff] %v4871_v47  ;;  %v4877_v48 = vsub.f32 %v3644_v9, %v4557_v33  ;;  %v716_v8 = vmul.f32 %v4871_v47, %v4871_v47 }
 0x1e2   :  { %v866_v54 = vadd.f32 %v865_v49, %v710_v57  ;;  %7536 = vst [vmem:[#allocation134_spill] sm:$0xff] %v4877_v48  ;;  %v4883_v49 = vsub.f32 %v3647_v10, %v4557_v33  ;;  %v717_v9 = vmul.f32 %v4877_v48, %v4877_v48 }
 0x1e4   :  { %v867_v55 = vadd.f32 %v866_v54, %v711_v62  ;;  %7537 = vst [vmem:[#allocation135_spill] sm:$0xff] %v4883_v49  ;;  %v4889_v54 = vsub.f32 %v3662_v15, %v4557_v33  ;;  %v718_v10 = vmul.f32 %v4883_v49, %v4883_v49 }
 0x1e6   :  { %v868_v56 = vadd.f32 %v867_v55, %v712_v63  ;;  %7538 = vst [vmem:[#allocation136_spill] sm:$0xff] %v4889_v54  ;;  %v7539_v55 = vld [vmem:[#allocation5_spill] sm:$0xff]  ;;  %v719_v15 = vmul.f32 %v4889_v54, %v4889_v54 }
 0x1e7   :  { %v4895_v46 = vsub.f32 %v7539_v55, %v4557_v33  ;;  %v7545_v55 = vld [vmem:[#allocation8_spill] sm:$0xff] }
 0x1e8   :  { %v869_v57 = vadd.f32 %v868_v56, %v713_v1  ;;  %v7541_v56 = vld [vmem:[#allocation6_spill] sm:$0xff]  ;;  %v4913_v49 = vsub.f32 %v7545_v55, %v4557_v33  ;;  %v7551_v55 = vld [vmem:[#allocation11_spill] sm:$0xff] }
 0x1e9   :  { %7540 = vst [vmem:[#allocation5_spill] sm:$0xff] %v4895_v46  ;;  %v4901_v47 = vsub.f32 %v7541_v56, %v4557_v33  ;;  %v7547_v56 = vld [vmem:[#allocation9_spill] sm:$0xff] }
 0x1ea   :  { %v870_v62 = vadd.f32 %v869_v57, %v714_v2  ;;  %v7543_v57 = vld [vmem:[#allocation7_spill] sm:$0xff]  ;;  %7546 = vst [vmem:[#allocation8_spill] sm:$0xff] %v4913_v49  ;;  %v4919_v54 = vsub.f32 %v7547_v56, %v4557_v33  ;;  %v7553_v56 = vld [vmem:[#allocation12_spill] sm:$0xff] }
 0x1eb   :  { %7542 = vst [vmem:[#allocation6_spill] sm:$0xff] %v4901_v47  ;;  %v4907_v48 = vsub.f32 %v7543_v57, %v4557_v33  ;;  %v7549_v57 = vld [vmem:[#allocation10_spill] sm:$0xff] }
 0x1ec   :  { %v871_v63 = vadd.f32 %v870_v62, %v715_v7  ;;  %v720_v7 = vmul.f32 %v4895_v46, %v4895_v46  ;;  %7548 = vst [vmem:[#allocation9_spill] sm:$0xff] %v4919_v54  ;;  %v4925_v46 = vsub.f32 %v7549_v57, %v4557_v33  ;;  %v7555_v57 = vld [vmem:[#allocation13_spill] sm:$0xff] }
 0x1ed   :  { %7544 = vst [vmem:[#allocation7_spill] sm:$0xff] %v4907_v48 }
 0x1ee   :  { %v872_v1 = vadd.f32 %v871_v63, %v716_v8  ;;  %v721_v8 = vmul.f32 %v4901_v47, %v4901_v47  ;;  %7550 = vst [vmem:[#allocation10_spill] sm:$0xff] %v4925_v46  ;;  %v4931_v47 = vsub.f32 %v7551_v55, %v4557_v33  ;;  %v7557_v55 = vld [vmem:[#allocation14_spill] sm:$0xff] }
 0x1f0   :  { %v873_v2 = vadd.f32 %v872_v1, %v717_v9  ;;  %v722_v9 = vmul.f32 %v4907_v48, %v4907_v48  ;;  %7552 = vst [vmem:[#allocation11_spill] sm:$0xff] %v4931_v47  ;;  %v4937_v48 = vsub.f32 %v7553_v56, %v4557_v33  ;;  %v7559_v56 = vld [vmem:[#allocation15_spill] sm:$0xff] }
 0x1f2   :  { %v874_v62 = vadd.f32 %v873_v2, %v718_v10  ;;  %v723_v10 = vmul.f32 %v4913_v49, %v4913_v49  ;;  %7554 = vst [vmem:[#allocation12_spill] sm:$0xff] %v4937_v48  ;;  %v4943_v49 = vsub.f32 %v7555_v57, %v4557_v33  ;;  %v7561_v57 = vld [vmem:[#allocation16_spill] sm:$0xff] }
 0x1f4   :  { %v875_v63 = vadd.f32 %v874_v62, %v719_v15  ;;  %v724_v15 = vmul.f32 %v4919_v54, %v4919_v54  ;;  %7556 = vst [vmem:[#allocation13_spill] sm:$0xff] %v4943_v49  ;;  %v4949_v54 = vsub.f32 %v7557_v55, %v4557_v33  ;;  %v7563_v55 = vld [vmem:[#allocation17_spill] sm:$0xff] }
 0x1f6   :  { %v876_v1 = vadd.f32 %v875_v63, %v720_v7  ;;  %v725_v7 = vmul.f32 %v4925_v46, %v4925_v46  ;;  %7558 = vst [vmem:[#allocation14_spill] sm:$0xff] %v4949_v54  ;;  %v4955_v46 = vsub.f32 %v7559_v56, %v4557_v33  ;;  %v7565_v56 = vld [vmem:[#allocation18_spill] sm:$0xff] }
 0x1f8   :  { %v877_v2 = vadd.f32 %v876_v1, %v721_v8  ;;  %v726_v8 = vmul.f32 %v4931_v47, %v4931_v47  ;;  %7560 = vst [vmem:[#allocation15_spill] sm:$0xff] %v4955_v46  ;;  %v4961_v47 = vsub.f32 %v7561_v57, %v4557_v33  ;;  %v7567_v57 = vld [vmem:[#allocation19_spill] sm:$0xff] }
 0x1fa   :  { %v878_v62 = vadd.f32 %v877_v2, %v722_v9  ;;  %v727_v9 = vmul.f32 %v4937_v48, %v4937_v48  ;;  %7562 = vst [vmem:[#allocation16_spill] sm:$0xff] %v4961_v47  ;;  %v4967_v48 = vsub.f32 %v7563_v55, %v4557_v33  ;;  %v7569_v55 = vld [vmem:[#allocation20_spill] sm:$0xff] }
 0x1fc   :  { %v879_v63 = vadd.f32 %v878_v62, %v723_v10  ;;  %v728_v10 = vmul.f32 %v4943_v49, %v4943_v49  ;;  %7564 = vst [vmem:[#allocation17_spill] sm:$0xff] %v4967_v48  ;;  %v4973_v49 = vsub.f32 %v7565_v56, %v4557_v33  ;;  %v7571_v56 = vld [vmem:[#allocation21_spill] sm:$0xff] }
 0x1fe   :  { %v880_v1 = vadd.f32 %v879_v63, %v724_v15  ;;  %v729_v15 = vmul.f32 %v4949_v54, %v4949_v54  ;;  %7566 = vst [vmem:[#allocation18_spill] sm:$0xff] %v4973_v49  ;;  %v4979_v54 = vsub.f32 %v7567_v57, %v4557_v33  ;;  %v7573_v57 = vld [vmem:[#allocation22_spill] sm:$0xff] }
 0x200   :  { %v881_v2 = vadd.f32 %v880_v1, %v725_v7  ;;  %v730_v7 = vmul.f32 %v4955_v46, %v4955_v46  ;;  %7568 = vst [vmem:[#allocation19_spill] sm:$0xff] %v4979_v54  ;;  %v4985_v46 = vsub.f32 %v7569_v55, %v4557_v33  ;;  %v7575_v55 = vld [vmem:[#allocation23_spill] sm:$0xff] }
 0x202   :  { %v882_v62 = vadd.f32 %v881_v2, %v726_v8  ;;  %v731_v8 = vmul.f32 %v4961_v47, %v4961_v47  ;;  %7570 = vst [vmem:[#allocation20_spill] sm:$0xff] %v4985_v46  ;;  %v4991_v47 = vsub.f32 %v7571_v56, %v4557_v33  ;;  %v7577_v56 = vld [vmem:[#allocation24_spill] sm:$0xff] }
 0x204   :  { %v883_v63 = vadd.f32 %v882_v62, %v727_v9  ;;  %v732_v9 = vmul.f32 %v4967_v48, %v4967_v48  ;;  %7572 = vst [vmem:[#allocation21_spill] sm:$0xff] %v4991_v47  ;;  %v4997_v48 = vsub.f32 %v7573_v57, %v4557_v33  ;;  %v7579_v57 = vld [vmem:[#allocation25_spill] sm:$0xff] }
 0x206   :  { %v884_v1 = vadd.f32 %v883_v63, %v728_v10  ;;  %v733_v10 = vmul.f32 %v4973_v49, %v4973_v49  ;;  %7574 = vst [vmem:[#allocation22_spill] sm:$0xff] %v4997_v48  ;;  %v5003_v49 = vsub.f32 %v7575_v55, %v4557_v33  ;;  %v7581_v55 = vld [vmem:[#allocation26_spill] sm:$0xff] }
 0x208   :  { %v885_v2 = vadd.f32 %v884_v1, %v729_v15  ;;  %v734_v15 = vmul.f32 %v4979_v54, %v4979_v54  ;;  %7576 = vst [vmem:[#allocation23_spill] sm:$0xff] %v5003_v49  ;;  %v5009_v54 = vsub.f32 %v7577_v56, %v4557_v33  ;;  %v7583_v56 = vld [vmem:[#allocation27_spill] sm:$0xff] }
 0x20a   :  { %v886_v62 = vadd.f32 %v885_v2, %v730_v7  ;;  %v735_v7 = vmul.f32 %v4985_v46, %v4985_v46  ;;  %7578 = vst [vmem:[#allocation24_spill] sm:$0xff] %v5009_v54  ;;  %v5015_v46 = vsub.f32 %v7579_v57, %v4557_v33  ;;  %v7585_v57 = vld [vmem:[#allocation28_spill] sm:$0xff] }
 0x20c   :  { %v887_v63 = vadd.f32 %v886_v62, %v731_v8  ;;  %v736_v8 = vmul.f32 %v4991_v47, %v4991_v47  ;;  %7580 = vst [vmem:[#allocation25_spill] sm:$0xff] %v5015_v46  ;;  %v5021_v47 = vsub.f32 %v7581_v55, %v4557_v33  ;;  %v7587_v55 = vld [vmem:[#allocation29_spill] sm:$0xff] }
 0x20e   :  { %v888_v1 = vadd.f32 %v887_v63, %v732_v9  ;;  %v737_v9 = vmul.f32 %v4997_v48, %v4997_v48  ;;  %7582 = vst [vmem:[#allocation26_spill] sm:$0xff] %v5021_v47  ;;  %v5027_v48 = vsub.f32 %v7583_v56, %v4557_v33  ;;  %v7589_v56 = vld [vmem:[#allocation30_spill] sm:$0xff] }
 0x210   :  { %v889_v2 = vadd.f32 %v888_v1, %v733_v10  ;;  %v738_v10 = vmul.f32 %v5003_v49, %v5003_v49  ;;  %7584 = vst [vmem:[#allocation27_spill] sm:$0xff] %v5027_v48  ;;  %v5033_v49 = vsub.f32 %v7585_v57, %v4557_v33  ;;  %v7591_v57 = vld [vmem:[#allocation31_spill] sm:$0xff] }
 0x212   :  { %v890_v62 = vadd.f32 %v889_v2, %v734_v15  ;;  %v739_v15 = vmul.f32 %v5009_v54, %v5009_v54  ;;  %7586 = vst [vmem:[#allocation28_spill] sm:$0xff] %v5033_v49  ;;  %v5039_v54 = vsub.f32 %v7587_v55, %v4557_v33  ;;  %v7593_v55 = vld [vmem:[#allocation32_spill] sm:$0xff] }
 0x214   :  { %v891_v63 = vadd.f32 %v890_v62, %v735_v7  ;;  %v740_v7 = vmul.f32 %v5015_v46, %v5015_v46  ;;  %7588 = vst [vmem:[#allocation29_spill] sm:$0xff] %v5039_v54  ;;  %v5045_v46 = vsub.f32 %v7589_v56, %v4557_v33  ;;  %v7594_v56 = vld [vmem:[#allocation33_spill] sm:$0xff] }
 0x216   :  { %v892_v1 = vadd.f32 %v891_v63, %v736_v8  ;;  %v741_v8 = vmul.f32 %v5021_v47, %v5021_v47  ;;  %7590 = vst [vmem:[#allocation30_spill] sm:$0xff] %v5045_v46  ;;  %v5051_v47 = vsub.f32 %v7591_v57, %v4557_v33  ;;  %v7595_v57 = vld [vmem:[#allocation34_spill] sm:$0xff] }
 0x218   :  { %v893_v2 = vadd.f32 %v892_v1, %v737_v9  ;;  %v742_v9 = vmul.f32 %v5027_v48, %v5027_v48  ;;  %7592 = vst [vmem:[#allocation31_spill] sm:$0xff] %v5051_v47  ;;  %v5057_v48 = vsub.f32 %v7593_v55, %v4557_v33  ;;  %v7596_v55 = vld [vmem:[#allocation35_spill] sm:$0xff] }
 0x21a   :  { %v894_v62 = vadd.f32 %v893_v2, %v738_v10  ;;  %v743_v10 = vmul.f32 %v5033_v49, %v5033_v49  ;;  %v5063_v49 = vsub.f32 %v7594_v56, %v4557_v33  ;;  %v7597_v56 = vld [vmem:[#allocation36_spill] sm:$0xff] }
 0x21c   :  { %v895_v63 = vadd.f32 %v894_v62, %v739_v15  ;;  %v744_v15 = vmul.f32 %v5039_v54, %v5039_v54  ;;  %v5069_v54 = vsub.f32 %v7595_v57, %v4557_v33  ;;  %v7598_v57 = vld [vmem:[#allocation37_spill] sm:$0xff] }
 0x21d   :  { %v5087_v41 = vsub.f32 %v7598_v57, %v4557_v33  ;;  %v7601_v57 = vld [vmem:[#allocation40_spill] sm:$0xff] }
 0x21e   :  { %v896_v1 = vadd.f32 %v895_v63, %v740_v7  ;;  %v745_v7 = vmul.f32 %v5045_v46, %v5045_v46  ;;  %v5075_v46 = vsub.f32 %v7596_v55, %v4557_v33  ;;  %v7599_v55 = vld [vmem:[#allocation38_spill] sm:$0xff]  ;;  %v5105_v13 = vsub.f32 %v7601_v57, %v4557_v33  ;;  %v7604_v57 = vld [vmem:[#allocation43_spill] sm:$0xff] }
 0x21f   :  { %v5093_v40 = vsub.f32 %v7599_v55, %v4557_v33  ;;  %v7602_v55 = vld [vmem:[#allocation41_spill] sm:$0xff]  ;;  %v5123_v21 = vsub.f32 %v7604_v57, %v4557_v33  ;;  %v7607_v57 = vld [vmem:[#allocation46_spill] sm:$0xff] }
 0x220   :  { %v897_v2 = vadd.f32 %v896_v1, %v741_v8  ;;  %v746_v8 = vmul.f32 %v5051_v47, %v5051_v47  ;;  %v5081_v47 = vsub.f32 %v7597_v56, %v4557_v33  ;;  %v7600_v56 = vld [vmem:[#allocation39_spill] sm:$0xff]  ;;  %v5111_v32 = vsub.f32 %v7602_v55, %v4557_v33  ;;  %v7605_v55 = vld [vmem:[#allocation44_spill] sm:$0xff] }
 0x221   :  { %v5099_v39 = vsub.f32 %v7600_v56, %v4557_v33  ;;  %v7603_v56 = vld [vmem:[#allocation42_spill] sm:$0xff]  ;;  %v5129_v5 = vsub.f32 %v7605_v55, %v4557_v33  ;;  %v5141_v31 = vsub.f32 %v7607_v57, %v4557_v33  ;;  %v7608_v55 = vld [vmem:[#allocation47_spill] sm:$0xff]  ;;  %v5159_v57 = vsub.f32 %v7412_v16, %v4557_v33 }
 0x222   :  { %v898_v62 = vadd.f32 %v897_v2, %v742_v9  ;;  %v747_v9 = vmul.f32 %v5057_v48, %v5057_v48  ;;  %v5117_v29 = vsub.f32 %v7603_v56, %v4557_v33  ;;  %v7606_v56 = vld [vmem:[#allocation45_spill] sm:$0xff]  ;;  %v5147_v43 = vsub.f32 %v7608_v55, %v4557_v33  ;;  %v7610_v55 = vld [vmem:[#allocation50_spill] sm:$0xff] }
 0x223   :  { %v5135_v59 = vsub.f32 %v7606_v56, %v4557_v33  ;;  %v7609_v56 = vld [vmem:[#allocation48_spill] sm:$0xff]  ;;  %v5165_v50 = vsub.f32 %v7610_v55, %v4557_v33  ;;  %v764_v16 = vmul.f32 %v5159_v57, %v5159_v57  ;;  %v5183_v55 = vsub.f32 %v7416_v25, %v4557_v33 }
 0x224   :  { %v899_v63 = vadd.f32 %v898_v62, %v743_v10  ;;  %v748_v10 = vmul.f32 %v5063_v49, %v5063_v49  ;;  %v5153_v4 = vsub.f32 %v7609_v56, %v4557_v33  ;;  %v7611_v56 = vld [vmem:[#allocation51_spill] sm:$0xff] }
 0x225   :  { %v5171_v23 = vsub.f32 %v7611_v56, %v4557_v33  ;;  %v7613_v56 = vld [vmem:[#allocation54_spill] sm:$0xff]  ;;  %v768_v25 = vmul.f32 %v5183_v55, %v5183_v55 }
 0x226   :  { %v900_v1 = vadd.f32 %v899_v63, %v744_v15  ;;  %v749_v15 = vmul.f32 %v5069_v54, %v5069_v54  ;;  %v5189_v60 = vsub.f32 %v7613_v56, %v4557_v33  ;;  %v5207_v56 = vsub.f32 %v7420_v35, %v4557_v33 }
 0x228   :  { %v901_v2 = vadd.f32 %v900_v1, %v745_v7  ;;  %v750_v7 = vmul.f32 %v5075_v46, %v5075_v46  ;;  %v772_v35 = vmul.f32 %v5207_v56, %v5207_v56 }
 0x22a   :  { %v902_v62 = vadd.f32 %v901_v2, %v746_v8  ;;  %v751_v8 = vmul.f32 %v5081_v47, %v5081_v47 }
 0x22c   :  { %v903_v63 = vadd.f32 %v902_v62, %v747_v9  ;;  %v752_v9 = vmul.f32 %v5087_v41, %v5087_v41 }
 0x22e   :  { %v904_v1 = vadd.f32 %v903_v63, %v748_v10  ;;  %v753_v10 = vmul.f32 %v5093_v40, %v5093_v40 }
 0x230   :  { %v905_v2 = vadd.f32 %v904_v1, %v749_v15  ;;  %v754_v15 = vmul.f32 %v5099_v39, %v5099_v39 }
 0x232   :  { %v906_v62 = vadd.f32 %v905_v2, %v750_v7  ;;  %v755_v7 = vmul.f32 %v5105_v13, %v5105_v13 }
 0x234   :  { %v907_v63 = vadd.f32 %v906_v62, %v751_v8  ;;  %v756_v8 = vmul.f32 %v5111_v32, %v5111_v32 }
 0x236   :  { %v908_v1 = vadd.f32 %v907_v63, %v752_v9  ;;  %v757_v9 = vmul.f32 %v5117_v29, %v5117_v29 }
 0x238   :  { %v909_v2 = vadd.f32 %v908_v1, %v753_v10  ;;  %v758_v10 = vmul.f32 %v5123_v21, %v5123_v21 }
 0x23a   :  { %v910_v62 = vadd.f32 %v909_v2, %v754_v15  ;;  %v759_v15 = vmul.f32 %v5129_v5, %v5129_v5 }
 0x23c   :  { %v911_v63 = vadd.f32 %v910_v62, %v755_v7  ;;  %v760_v7 = vmul.f32 %v5135_v59, %v5135_v59 }
 0x23e   :  { %v912_v1 = vadd.f32 %v911_v63, %v756_v8  ;;  %v761_v8 = vmul.f32 %v5141_v31, %v5141_v31 }
 0x240   :  { %v913_v2 = vadd.f32 %v912_v1, %v757_v9  ;;  %v762_v9 = vmul.f32 %v5147_v43, %v5147_v43 }
 0x242   :  { %v914_v62 = vadd.f32 %v913_v2, %v758_v10  ;;  %v763_v10 = vmul.f32 %v5153_v4, %v5153_v4 }
 0x244   :  { %v915_v63 = vadd.f32 %v914_v62, %v759_v15  ;;  %v7612_v62 = vld [vmem:[#allocation52_spill] sm:$0xff] }
 0x245   :  { %v5177_v45 = vsub.f32 %v7612_v62, %v4557_v33  ;;  %v7614_v62 = vld [vmem:[#allocation55_spill] sm:$0xff] }
 0x246   :  { %v916_v1 = vadd.f32 %v915_v63, %v760_v7  ;;  %v765_v7 = vmul.f32 %v5165_v50, %v5165_v50  ;;  %v5195_v14 = vsub.f32 %v7614_v62, %v4557_v33  ;;  %v7616_v62 = vld [vmem:[#allocation58_spill] sm:$0xff] }
 0x247   :  { %v5213_v53 = vsub.f32 %v7616_v62, %v4557_v33  ;;  %v5231_v62 = vsub.f32 %v7423_v17, %v4557_v33 }
 0x248   :  { %v917_v2 = vadd.f32 %v916_v1, %v761_v8  ;;  %v766_v8 = vmul.f32 %v5171_v23, %v5171_v23 }
 0x249   :  { %7617 = vst [vmem:[#allocation32_spill] sm:$0xff] %v5213_v53  ;;  %7621 = vst [vmem:[#allocation34_spill] sm:$0xff] %v5231_v62  ;;  %v776_v17 = vmul.f32 %v5231_v62, %v5231_v62 }
 0x24a   :  { %v918_v15 = vadd.f32 %v917_v2, %v762_v9  ;;  %v767_v9 = vmul.f32 %v5177_v45, %v5177_v45 }
 0x24c   :  { %v919_v63 = vadd.f32 %v918_v15, %v763_v10  ;;  %v7615_v15 = vld [vmem:[#allocation56_spill] sm:$0xff] }
 0x24d   :  { %v5201_v12 = vsub.f32 %v7615_v15, %v4557_v33  ;;  %v7618_v15 = vld [vmem:[#allocation59_spill] sm:$0xff] }
 0x24e   :  { %v920_v1 = vadd.f32 %v919_v63, %v764_v16  ;;  %v769_v16 = vmul.f32 %v5189_v60, %v5189_v60  ;;  %v5219_v11 = vsub.f32 %v7618_v15, %v4557_v33  ;;  %v7622_v15 = vld [vmem:[#allocation62_spill] sm:$0xff] }
 0x24f   :  { %v5237_v52 = vsub.f32 %v7622_v15, %v4557_v33  ;;  %v5255_v15 = vsub.f32 %v7426_v26, %v4557_v33 }
 0x250   :  { %v921_v2 = vadd.f32 %v920_v1, %v765_v7  ;;  %v770_v7 = vmul.f32 %v5195_v14, %v5195_v14  ;;  %7619 = vst [vmem:[#allocation33_spill] sm:$0xff] %v5219_v11 }
 0x251   :  { %7623 = vst [vmem:[#allocation35_spill] sm:$0xff] %v5237_v52  ;;  %7627 = vst [vmem:[#allocation37_spill] sm:$0xff] %v5255_v15  ;;  %v780_v26 = vmul.f32 %v5255_v15, %v5255_v15 }
 0x252   :  { %v922_v10 = vadd.f32 %v921_v2, %v766_v8  ;;  %v771_v8 = vmul.f32 %v5201_v12, %v5201_v12 }
 0x254   :  { %v923_v63 = vadd.f32 %v922_v10, %v767_v9  ;;  %v7620_v10 = vld [vmem:[#allocation60_spill] sm:$0xff] }
 0x255   :  { %v5225_v6 = vsub.f32 %v7620_v10, %v4557_v33  ;;  %v7624_v10 = vld [vmem:[#allocation63_spill] sm:$0xff] }
 0x256   :  { %v924_v1 = vadd.f32 %v923_v63, %v768_v25  ;;  %v773_v25 = vmul.f32 %v5213_v53, %v5213_v53  ;;  %v5243_v53 = vsub.f32 %v7624_v10, %v4557_v33  ;;  %v7628_v10 = vld [vmem:[#allocation66_spill] sm:$0xff] }
 0x257   :  { %v5261_v62 = vsub.f32 %v7628_v10, %v4557_v33  ;;  %v5279_v10 = vsub.f32 %v7429_v36, %v4557_v33 }
 0x258   :  { %v925_v2 = vadd.f32 %v924_v1, %v769_v16  ;;  %v774_v16 = vmul.f32 %v5219_v11, %v5219_v11  ;;  %7625 = vst [vmem:[#allocation36_spill] sm:$0xff] %v5243_v53 }
 0x259   :  { %7629 = vst [vmem:[#allocation38_spill] sm:$0xff] %v5261_v62  ;;  %7633 = vst [vmem:[#allocation40_spill] sm:$0xff] %v5279_v10  ;;  %v784_v36 = vmul.f32 %v5279_v10, %v5279_v10 }
 0x25a   :  { %v926_v9 = vadd.f32 %v925_v2, %v770_v7  ;;  %v775_v7 = vmul.f32 %v5225_v6, %v5225_v6 }
 0x25c   :  { %v927_v63 = vadd.f32 %v926_v9, %v771_v8  ;;  %v7626_v9 = vld [vmem:[#allocation64_spill] sm:$0xff] }
 0x25d   :  { %v5249_v11 = vsub.f32 %v7626_v9, %v4557_v33  ;;  %v7630_v9 = vld [vmem:[#allocation67_spill] sm:$0xff] }
 0x25e   :  { %v928_v1 = vadd.f32 %v927_v63, %v772_v35  ;;  %v777_v35 = vmul.f32 %v5237_v52, %v5237_v52  ;;  %v5267_v52 = vsub.f32 %v7630_v9, %v4557_v33  ;;  %v7634_v9 = vld [vmem:[#allocation70_spill] sm:$0xff] }
 0x25f   :  { %v5285_v15 = vsub.f32 %v7634_v9, %v4557_v33  ;;  %v5303_v9 = vsub.f32 %v7432_v18, %v4557_v33 }
 0x260   :  { %v929_v2 = vadd.f32 %v928_v1, %v773_v25  ;;  %v778_v25 = vmul.f32 %v5243_v53, %v5243_v53  ;;  %7631 = vst [vmem:[#allocation39_spill] sm:$0xff] %v5267_v52 }
 0x261   :  { %7635 = vst [vmem:[#allocation41_spill] sm:$0xff] %v5285_v15  ;;  %7639 = vst [vmem:[#allocation43_spill] sm:$0xff] %v5303_v9  ;;  %v788_v18 = vmul.f32 %v5303_v9, %v5303_v9 }
 0x262   :  { %v930_v8 = vadd.f32 %v929_v2, %v774_v16  ;;  %v779_v16 = vmul.f32 %v5249_v11, %v5249_v11 }
 0x264   :  { %v931_v63 = vadd.f32 %v930_v8, %v775_v7  ;;  %v7632_v8 = vld [vmem:[#allocation68_spill] sm:$0xff] }
 0x265   :  { %v5273_v53 = vsub.f32 %v7632_v8, %v4557_v33  ;;  %v7636_v8 = vld [vmem:[#allocation71_spill] sm:$0xff] }
 0x266   :  { %v932_v1 = vadd.f32 %v931_v63, %v776_v17  ;;  %v781_v17 = vmul.f32 %v5261_v62, %v5261_v62  ;;  %v5291_v62 = vsub.f32 %v7636_v8, %v4557_v33  ;;  %v7640_v8 = vld [vmem:[#allocation74_spill] sm:$0xff] }
 0x267   :  { %v5309_v10 = vsub.f32 %v7640_v8, %v4557_v33  ;;  %v5327_v8 = vsub.f32 %v7435_v27, %v4557_v33 }
 0x268   :  { %v933_v2 = vadd.f32 %v932_v1, %v777_v35  ;;  %v782_v35 = vmul.f32 %v5267_v52, %v5267_v52  ;;  %7637 = vst [vmem:[#allocation42_spill] sm:$0xff] %v5291_v62 }
 0x269   :  { %7641 = vst [vmem:[#allocation44_spill] sm:$0xff] %v5309_v10  ;;  %7645 = vst [vmem:[#allocation46_spill] sm:$0xff] %v5327_v8  ;;  %v792_v27 = vmul.f32 %v5327_v8, %v5327_v8 }
 0x26a   :  { %v934_v7 = vadd.f32 %v933_v2, %v778_v25  ;;  %v783_v25 = vmul.f32 %v5273_v53, %v5273_v53 }
 0x26c   :  { %v935_v63 = vadd.f32 %v934_v7, %v779_v16  ;;  %v7638_v7 = vld [vmem:[#allocation72_spill] sm:$0xff] }
 0x26d   :  { %v5297_v52 = vsub.f32 %v7638_v7, %v4557_v33  ;;  %v7642_v7 = vld [vmem:[#allocation75_spill] sm:$0xff] }
 0x26e   :  { %v936_v1 = vadd.f32 %v935_v63, %v780_v26  ;;  %v785_v26 = vmul.f32 %v5285_v15, %v5285_v15  ;;  %v5315_v15 = vsub.f32 %v7642_v7, %v4557_v33  ;;  %v7646_v7 = vld [vmem:[#allocation78_spill] sm:$0xff] }
 0x26f   :  { %v5333_v9 = vsub.f32 %v7646_v7, %v4557_v33  ;;  %v5351_v7 = vsub.f32 %v7438_v19, %v4557_v33 }
 0x270   :  { %v937_v2 = vadd.f32 %v936_v1, %v781_v17  ;;  %v786_v17 = vmul.f32 %v5291_v62, %v5291_v62  ;;  %7643 = vst [vmem:[#allocation45_spill] sm:$0xff] %v5315_v15 }
 0x271   :  { %7647 = vst [vmem:[#allocation47_spill] sm:$0xff] %v5333_v9  ;;  %v796_v19 = vmul.f32 %v5351_v7, %v5351_v7 }
 0x272   :  { %v938_v16 = vadd.f32 %v937_v2, %v782_v35  ;;  %v787_v35 = vmul.f32 %v5297_v52, %v5297_v52 }
 0x274   :  { %v939_v63 = vadd.f32 %v938_v16, %v783_v25  ;;  %v7644_v16 = vld [vmem:[#allocation76_spill] sm:$0xff] }
 0x275   :  { %v5321_v62 = vsub.f32 %v7644_v16, %v4557_v33  ;;  %v7648_v16 = vld [vmem:[#allocation79_spill] sm:$0xff] }
 0x276   :  { %v940_v1 = vadd.f32 %v939_v63, %v784_v36  ;;  %v789_v36 = vmul.f32 %v5309_v10, %v5309_v10  ;;  %v5339_v10 = vsub.f32 %v7648_v16, %v4557_v33  ;;  %v7651_v16 = vld [vmem:[#allocation82_spill] sm:$0xff] }
 0x277   :  { %v5357_v8 = vsub.f32 %v7651_v16, %v4557_v33  ;;  %v5375_v16 = vsub.f32 %v7441_v24, %v4557_v33 }
 0x278   :  { %v941_v2 = vadd.f32 %v940_v1, %v785_v26  ;;  %v790_v26 = vmul.f32 %v5315_v15, %v5315_v15  ;;  %7649 = vst [vmem:[#allocation48_spill] sm:$0xff] %v5339_v10 }
 0x279   :  { %v800_v24 = vmul.f32 %v5375_v16, %v5375_v16 }
 0x27a   :  { %v942_v25 = vadd.f32 %v941_v2, %v786_v17  ;;  %v791_v17 = vmul.f32 %v5321_v62, %v5321_v62 }
 0x27c   :  { %v943_v63 = vadd.f32 %v942_v25, %v787_v35  ;;  %v7650_v25 = vld [vmem:[#allocation80_spill] sm:$0xff] }
 0x27d   :  { %v5345_v15 = vsub.f32 %v7650_v25, %v4557_v33  ;;  %v7652_v25 = vld [vmem:[#allocation83_spill] sm:$0xff] }
 0x27e   :  { %v944_v1 = vadd.f32 %v943_v63, %v788_v18  ;;  %v793_v18 = vmul.f32 %v5333_v9, %v5333_v9  ;;  %v5363_v9 = vsub.f32 %v7652_v25, %v4557_v33  ;;  %v5381_v25 = vsub.f32 %v7442_v22, %v4557_v33 }
 0x280   :  { %v945_v2 = vadd.f32 %v944_v1, %v789_v36  ;;  %v794_v36 = vmul.f32 %v5339_v10, %v5339_v10  ;;  %v801_v22 = vmul.f32 %v5381_v25, %v5381_v25 }
 0x282   :  { %v946_v35 = vadd.f32 %v945_v2, %v790_v26  ;;  %v795_v26 = vmul.f32 %v5345_v15, %v5345_v15 }
 0x284   :  { %v947_v63 = vadd.f32 %v946_v35, %v791_v17  ;;  %v7653_v35 = vld [vmem:[#allocation84_spill] sm:$0xff] }
 0x285   :  { %v5369_v10 = vsub.f32 %v7653_v35, %v4557_v33  ;;  %v5387_v35 = vsub.f32 %v7443_v58, %v4557_v33 }
 0x286   :  { %v948_v1 = vadd.f32 %v947_v63, %v792_v27  ;;  %v797_v27 = vmul.f32 %v5357_v8, %v5357_v8 }
 0x287   :  { %7654 = vst [vmem:[#allocation50_spill] sm:$0xff] %v5387_v35  ;;  %v802_v58 = vmul.f32 %v5387_v35, %v5387_v35 }
 0x288   :  { %v949_v2 = vadd.f32 %v948_v1, %v793_v18  ;;  %v798_v18 = vmul.f32 %v5363_v9, %v5363_v9 }
 0x28a   :  { %v950_v17 = vadd.f32 %v949_v2, %v794_v36  ;;  %v799_v36 = vmul.f32 %v5369_v10, %v5369_v10 }
 0x28c   :  { %v951_v63 = vadd.f32 %v950_v17, %v795_v26  ;;  %v5393_v17 = vsub.f32 %v4145_v20, %v4557_v33 }
 0x28e   :  { %v952_v1 = vadd.f32 %v951_v63, %v796_v19  ;;  %7655 = vst [vmem:[#allocation51_spill] sm:$0xff] %v5393_v17  ;;  %v5399_v63 = vsub.f32 %v7444_v34, %v4557_v33  ;;  %v803_v20 = vmul.f32 %v5393_v17, %v5393_v17 }
 0x290   :  { %v953_v2 = vadd.f32 %v952_v1, %v797_v27  ;;  %7656 = vst [vmem:[#allocation52_spill] sm:$0xff] %v5399_v63  ;;  %v5405_v1 = vsub.f32 %v7445_v30, %v4557_v33  ;;  %v804_v34 = vmul.f32 %v5399_v63, %v5399_v63  ;;  %v7686_v63 = vld [vmem:[#allocation85_spill] sm:$0xff] }
 0x292   :  { %v954_v26 = vadd.f32 %v953_v2, %v798_v18  ;;  %7657 = vst [vmem:[#allocation54_spill] sm:$0xff] %v5405_v1  ;;  %v5411_v2 = vsub.f32 %v7446_v3, %v4557_v33  ;;  %v805_v30 = vmul.f32 %v5405_v1, %v5405_v1 }
 0x294   :  { %v955_v19 = vadd.f32 %v954_v26, %v799_v36  ;;  %7658 = vst [vmem:[#allocation55_spill] sm:$0xff] %v5411_v2  ;;  %v7659_v26 = vld [vmem:[#allocation91_spill] sm:$0xff]  ;;  %v806_v3 = vmul.f32 %v5411_v2, %v5411_v2 }
 0x295   :  { %v5417_v35 = vsub.f32 %v7659_v26, %v4557_v33  ;;  %v7663_v26 = vld [vmem:[#allocation94_spill] sm:$0xff] }
 0x296   :  { %v956_v27 = vadd.f32 %v955_v19, %v800_v24  ;;  %v5423_v19 = vsub.f32 %v7447_v28, %v4557_v33  ;;  %v5435_v1 = vsub.f32 %v7663_v26, %v4557_v33  ;;  %v5453_v26 = vsub.f32 %v4190_v0, %v4557_v33 }
 0x297   :  { %7660 = vst [vmem:[#allocation56_spill] sm:$0xff] %v5417_v35 }
 0x298   :  { %v957_v18 = vadd.f32 %v956_v27, %v801_v22  ;;  %7661 = vst [vmem:[#allocation58_spill] sm:$0xff] %v5423_v19  ;;  %v5429_v27 = vsub.f32 %v7448_v44, %v4557_v33  ;;  %7664 = vst [vmem:[#allocation60_spill] sm:$0xff] %v5435_v1  ;;  %v808_v28 = vmul.f32 %v5423_v19, %v5423_v19 }
 0x299   :  { %7668 = vst [vmem:[#allocation64_spill] sm:$0xff] %v5453_v26  ;;  %v813_v0 = vmul.f32 %v5453_v26, %v5453_v26  ;;  %v7677_v26 = vld [vmem:[#allocation104_spill] sm:$0xff] }
 0x29a   :  { %v958_v36 = vadd.f32 %v957_v18, %v802_v58  ;;  %7662 = vst [vmem:[#allocation59_spill] sm:$0xff] %v5429_v27  ;;  %v807_v58 = vmul.f32 %v5417_v35, %v5417_v35  ;;  %v809_v44 = vmul.f32 %v5429_v27, %v5429_v27 }
 0x29c   :  { %v959_v24 = vadd.f32 %v958_v36, %v803_v20  ;;  %v7665_v36 = vld [vmem:[#allocation95_spill] sm:$0xff] }
 0x29d   :  { %v5441_v2 = vsub.f32 %v7665_v36, %v4557_v33  ;;  %v7669_v36 = vld [vmem:[#allocation96_spill] sm:$0xff] }
 0x29e   :  { %v960_v22 = vadd.f32 %v959_v24, %v804_v34  ;;  %v5447_v24 = vsub.f32 %v4187_v37, %v4557_v33  ;;  %v5459_v27 = vsub.f32 %v7669_v36, %v4557_v33  ;;  %v7675_v36 = vld [vmem:[#allocation99_spill] sm:$0xff] }
 0x29f   :  { %7666 = vst [vmem:[#allocation62_spill] sm:$0xff] %v5441_v2 }
 0x2a0   :  { %v961_v18 = vadd.f32 %v960_v22, %v805_v30  ;;  %7667 = vst [vmem:[#allocation63_spill] sm:$0xff] %v5447_v24  ;;  %v810_v30 = vmul.f32 %v5435_v1, %v5435_v1  ;;  %7670 = vst [vmem:[#allocation66_spill] sm:$0xff] %v5459_v27  ;;  %v812_v37 = vmul.f32 %v5447_v24, %v5447_v24 }
 0x2a1   :  { %v5477_v24 = vsub.f32 %v7675_v36, %v4557_v33 }
 0x2a2   :  { %v962_v20 = vadd.f32 %v961_v18, %v806_v3  ;;  %v811_v3 = vmul.f32 %v5441_v2, %v5441_v2 }
 0x2a3   :  { %7676 = vst [vmem:[#allocation70_spill] sm:$0xff] %v5477_v24 }
 0x2a4   :  { %v963_v34 = vadd.f32 %v962_v20, %v807_v58  ;;  %v7671_v20 = vld [vmem:[#allocation97_spill] sm:$0xff] }
 0x2a5   :  { %v5465_v1 = vsub.f32 %v7671_v20, %v4557_v33 }
 0x2a6   :  { %v964_v22 = vadd.f32 %v963_v34, %v808_v28  ;;  %v7673_v34 = vld [vmem:[#allocation98_spill] sm:$0xff] }
 0x2a7   :  { %7672 = vst [vmem:[#allocation67_spill] sm:$0xff] %v5465_v1  ;;  %v5471_v2 = vsub.f32 %v7673_v34, %v4557_v33 }
 0x2a8   :  { %v965_v18 = vadd.f32 %v964_v22, %v809_v44  ;;  %v814_v44 = vmul.f32 %v5459_v27, %v5459_v27  ;;  %v818_v27 = vmul.f32 %v4561_v51, %v4561_v51 }
 0x2a9   :  { %7674 = vst [vmem:[#allocation68_spill] sm:$0xff] %v5471_v2  ;;  %v816_v20 = vmul.f32 %v5471_v2, %v5471_v2 }
 0x2aa   :  { %v966_v58 = vadd.f32 %v965_v18, %v810_v30  ;;  %v815_v30 = vmul.f32 %v5465_v1, %v5465_v1  ;;  %v5491_v1 = vsub.f32 %v7677_v26, %v4557_v33 }
 0x2ac   :  { %v967_v28 = vadd.f32 %v966_v58, %v811_v3  ;;  %v817_v58 = vmul.f32 %v5477_v24, %v5477_v24  ;;  %7678 = vst [vmem:[#allocation71_spill] sm:$0xff] %v5491_v1 }
 0x2ae   :  { %v968_v22 = vadd.f32 %v967_v28, %v812_v37  ;;  %v819_v28 = vmul.f32 %v4565_v38, %v4565_v38 }
 0x2b0   :  { %v969_v18 = vadd.f32 %v968_v22, %v813_v0  ;;  %v7679_v0 = vld [vmem:[#allocation57_spill] sm:$0xff] }
 0x2b1   :  { %v820_v22 = vmul.f32 %v7679_v0, %v7679_v0 }
 0x2b2   :  { %v970_v3 = vadd.f32 %v969_v18, %v814_v44  ;;  %v7680_v18 = vld [vmem:[#allocation61_spill] sm:$0xff] }
 0x2b3   :  { %v821_v24 = vmul.f32 %v7680_v18, %v7680_v18 }
 0x2b4   :  { %v971_v34 = vadd.f32 %v970_v3, %v815_v30  ;;  %v823_v3 = vmul.f32 %v5491_v1, %v5491_v1 }
 0x2b6   :  { %v972_v37 = vadd.f32 %v971_v34, %v816_v20  ;;  %v7681_v20 = vld [vmem:[#allocation65_spill] sm:$0xff] }
 0x2b7   :  { %v822_v34 = vmul.f32 %v7681_v20, %v7681_v20 }
 0x2b8   :  { %v973_v36 = vadd.f32 %v972_v37, %v817_v58  ;;  %v979_v37 = vsel %vm499_vm1, %v823_v3, 0.0 }
 0x2ba   :  { %v974_v44 = vadd.f32 %v973_v36, %v818_v27 }
 0x2bc   :  { %v975_v30 = vadd.f32 %v974_v44, %v819_v28 }
 0x2be   :  { %v976_v38 = vadd.f32 %v975_v30, %v820_v22  ;;  %v5507_v22 = vld [vmem:[%s7000_s2] ss:$0 sm:$0xff]  ;;  %v7683_v30 = vld [vmem:[#allocation73_spill] sm:$0xff] }
 0x2c0   :  { %v977_v58 = vadd.f32 %v976_v38, %v821_v24  ;;  %v7682_v38 = vld [vmem:[#allocation69_spill] sm:$0xff] }
 0x2c2   :  { %v978_v33 = vadd.f32 %v977_v58, %v822_v34  ;;  %v7685_v34 = vld [vmem:[#allocation81_spill] sm:$0xff] }
 0x2c4   :  { %v980_v26 = vadd.f32 %v979_v37, %v978_v33 }
 0x2c6   :  { %v981_v51 = vrot.slane %v980_v26, 4 }
 0x2c8   :  { %v982_v2 = vadd.f32 %v981_v51, %v980_v26 }
 0x2ca   :  { %v983_v0 = vrot.slane %v982_v2, 2 }
 0x2cc   :  { %v984_v27 = vadd.f32 %v983_v0, %v982_v2  ;;  %v5520_v0 = vld [vmem:[%s7001_s3] ss:$0 sm:$0xff] }
 0x2ce   :  { %v985_v36 = vrot.slane %v984_v27, 1 }
 0x2d0   :  { %v986_v19 = vadd.f32 %v985_v36, %v984_v27 }
 0x2d2   :  { %v987_v18 = vmul.f32 0.0008, %v986_v19 }
 0x2d4   :  { %v988_v28 = vadd.f32 1e-05, %v987_v18  ;;  %v7684_v18 = vld [vmem:[#allocation77_spill] sm:$0xff] }
 0x2d6   :  { %3370 = vrsqrt.f32 %v988_v28 }
 0x2e3   :  { %v5502_v44 = vpop.eup %3370 }
 0x2e4   :  { %v990_v24 = vmul.f32 %v5502_v44, %v7682_v38  ;;  %v991_v51 = vmul.f32 %v5502_v44, %v7683_v30  ;;  %v1070_v2 = vmul.f32 %v5502_v44, %v5057_v48  ;;  %v1071_v19 = vmul.f32 %v5502_v44, %v5063_v49 }
 0x2e5   :  { %v992_v3 = vmul.f32 %v5502_v44, %v7684_v18  ;;  %v993_v58 = vmul.f32 %v5502_v44, %v7685_v34  ;;  %v1072_v37 = vmul.f32 %v5502_v44, %v5069_v54  ;;  %v1073_v48 = vmul.f32 %v5502_v44, %v5075_v46 }
 0x2e6   :  { %v1153_v33 = vmul.f32 %v5507_v22, %v990_v24  ;;  %v1154_v49 = vmul.f32 %v5507_v22, %v991_v51  ;;  %v1233_v26 = vmul.f32 %v5507_v22, %v1070_v2  ;;  %v1234_v27 = vmul.f32 %v5507_v22, %v1071_v19 }
 0x2e7   :  { %v1155_v36 = vmul.f32 %v5507_v22, %v992_v3  ;;  %v1156_v28 = vmul.f32 %v5507_v22, %v993_v58  ;;  %v1235_v38 = vmul.f32 %v5507_v22, %v1072_v37  ;;  %v1236_v30 = vmul.f32 %v5507_v22, %v1073_v48 }
 0x2e8   :  { %v1316_v54 = vadd.f32 %v5520_v0, %v1153_v33  ;;  %v1317_v46 = vadd.f32 %v5520_v0, %v1154_v49  ;;  %v1396_v24 = vadd.f32 %v5520_v0, %v1233_v26  ;;  %v1397_v51 = vadd.f32 %v5520_v0, %v1234_v27 }
 0x2e9   :  { %v1318_v2 = vadd.f32 %v5520_v0, %v1155_v36  ;;  %v1319_v19 = vadd.f32 %v5520_v0, %v1156_v28  ;;  %v1398_v18 = vadd.f32 %v5520_v0, %v1235_v38  ;;  %v1399_v3 = vadd.f32 %v5520_v0, %v1236_v30 }
 0x2ea   :  { %vm1473_vm2 = vcmp.ge.f32.partialorder %v1316_v54, 0.0  ;;  %vm1474_vm3 = vcmp.ge.f32.partialorder %v1317_v46, 0.0  ;;  %v1630_v34 = vmul.f32 0.01, %v1316_v54  ;;  %v1631_v58 = vmul.f32 0.01, %v1317_v46 }
 0x2eb   :  { %vm1553_vm4 = vcmp.ge.f32.partialorder %v1396_v24, 0.0  ;;  %vm1554_vm5 = vcmp.ge.f32.partialorder %v1397_v51, 0.0  ;;  %v1710_v37 = vmul.f32 0.01, %v1396_v24  ;;  %v1711_v48 = vmul.f32 0.01, %v1397_v51 }
 0x2ec   :  { %v1787_v33 = vsel %vm1473_vm2, %v1316_v54, %v1630_v34  ;;  %v1788_v49 = vsel %vm1474_vm3, %v1317_v46, %v1631_v58  ;;  %vm1475_vm6 = vcmp.ge.f32.partialorder %v1318_v2, 0.0  ;;  %vm1476_vm7 = vcmp.ge.f32.partialorder %v1319_v19, 0.0 }
 0x2ed   :  { %v1944_v26 = vpack.c.bf16 %v1788_v49, %v1787_v33  ;;  %v1867_v27 = vsel %vm1553_vm4, %v1396_v24, %v1710_v37  ;;  %v1868_v36 = vsel %vm1554_vm5, %v1397_v51, %v1711_v48  ;;  %v1632_v28 = vmul.f32 0.01, %v1318_v2  ;;  %v7688_v24 = vld [vmem:[#allocation86_spill] sm:$0xff] }
 0x2ee   :  { %v1984_v1 = vpack.c.bf16 %v1868_v36, %v1867_v27  ;;  %v1633_v38 = vmul.f32 0.01, %v1319_v19  ;;  %vm1555_vm8 = vcmp.ge.f32.partialorder %v1398_v18, 0.0  ;;  %vm1556_vm9 = vcmp.ge.f32.partialorder %v1399_v3, 0.0  ;;  %v7690_v27 = vld [vmem:[#allocation88_spill] sm:$0xff] }
 0x2ef   :  { %3029 = vmatmul.mubr.bf16.vlgmr.msra.gmra.mxu0 %v1944_v26  ;;  %v1789_v30 = vsel %vm1475_vm6, %v1318_v2, %v1632_v28  ;;  %v1712_v20 = vmul.f32 0.01, %v1398_v18  ;;  %v1713_v35 = vmul.f32 0.01, %v1399_v3  ;;  %v994_v17 = vmul.f32 %v5502_v44, %v7686_v63  ;;  %v7689_v26 = vld [vmem:[#allocation87_spill] sm:$0xff] }
 0x2f0   :  { %3189 = vmatmul.mubr.bf16.vlgmr.msra.gmra.mxu1 %v1984_v1  ;;  %v7687_v54 = vmov 0.0   ;;  %v1790_v46 = vsel %vm1476_vm7, %v1319_v19, %v1633_v38  ;;  %v995_v51 = vmul.f32 %v5502_v44, %v7688_v24  ;;  %v1074_v34 = vmul.f32 %v5502_v44, %v5081_v47 }
 0x2f1   :  { %3032 = vmatprep.mubr.msk.bf16.mxu0 %vm3377_vm0, %v7687_v54  ;;  %v1945_v58 = vpack.c.bf16 %v1790_v46, %v1789_v30  ;;  %3192 = vmatprep.mubr.msk.bf16.mxu1 %vm3377_vm0, %v7687_v54  ;;  %v1869_v2 = vsel %vm1555_vm8, %v1398_v18, %v1712_v20  ;;  %v1870_v37 = vsel %vm1556_vm9, %v1399_v3, %v1713_v35 }
 0x2f2   :  { %v1157_v63 = vmul.f32 %v5507_v22, %v994_v17  ;;  %v1985_v1 = vpack.c.bf16 %v1870_v37, %v1869_v2  ;;  %v1158_v48 = vmul.f32 %v5507_v22, %v995_v51  ;;  %v1075_v19 = vmul.f32 %v5502_v44, %v5087_v41 }
 0x2f3   :  { %v1237_v33 = vmul.f32 %v5507_v22, %v1074_v34  ;;  %v996_v47 = vmul.f32 %v5502_v44, %v7689_v26  ;;  %v997_v36 = vmul.f32 %v5502_v44, %v7690_v27  ;;  %v1076_v35 = vmul.f32 %v5502_v44, %v5093_v40 }
 0x2f4   :  { %v1320_v49 = vadd.f32 %v5520_v0, %v1157_v63  ;;  %v1321_v17 = vadd.f32 %v5520_v0, %v1158_v48  ;;  %v1238_v20 = vmul.f32 %v5507_v22, %v1075_v19  ;;  %v1077_v41 = vmul.f32 %v5502_v44, %v5099_v39 }
 0x2f5   :  { %v1400_v18 = vadd.f32 %v5520_v0, %v1237_v33  ;;  %v1159_v28 = vmul.f32 %v5507_v22, %v996_v47  ;;  %v1160_v38 = vmul.f32 %v5507_v22, %v997_v36  ;;  %v1239_v37 = vmul.f32 %v5507_v22, %v1076_v35  ;;  %v7692_v47 = vld [vmem:[#allocation90_spill] sm:$0xff] }
 0x2f6   :  { %vm1477_vm10 = vcmp.ge.f32.partialorder %v1320_v49, 0.0  ;;  %v1634_v3 = vmul.f32 0.01, %v1320_v49  ;;  %vm1478_vm11 = vcmp.ge.f32.partialorder %v1321_v17, 0.0  ;;  %v1635_v30 = vmul.f32 0.01, %v1321_v17 }
 0x2f7   :  { %v1401_v46 = vadd.f32 %v5520_v0, %v1238_v20  ;;  %vm1557_vm12 = vcmp.ge.f32.partialorder %v1400_v18, 0.0  ;;  %3033 = vmatmul.mubr.bf16.gmra.mxu0 %v1945_v58  ;;  %v1714_v24 = vmul.f32 0.01, %v1400_v18  ;;  %v1322_v51 = vadd.f32 %v5520_v0, %v1159_v28 }
 0x2f8   :  { %v1791_v40 = vsel %vm1477_vm10, %v1320_v49, %v1634_v3  ;;  %v1323_v34 = vadd.f32 %v5520_v0, %v1160_v38  ;;  %3193 = vmatmul.mubr.bf16.gmra.mxu1 %v1985_v1  ;;  %3036 = vmatprep.mubr.msk.bf16.mxu0 %vm3377_vm0, %v7687_v54  ;;  %v1792_v39 = vsel %vm1478_vm11, %v1321_v17, %v1635_v30  ;;  %v7691_v49 = vld [vmem:[#allocation89_spill] sm:$0xff] }
 0x2f9   :  { %vm1558_vm13 = vcmp.ge.f32.partialorder %v1401_v46, 0.0  ;;  %v1715_v2 = vmul.f32 0.01, %v1401_v46  ;;  %3196 = vmatprep.mubr.msk.bf16.mxu1 %vm3377_vm0, %v7687_v54  ;;  %v1871_v63 = vsel %vm1557_vm12, %v1400_v18, %v1714_v24  ;;  %v1946_v58 = vpack.c.bf16 %v1792_v39, %v1791_v40 }
 0x2fa   :  { %vm1479_vm14 = vcmp.ge.f32.partialorder %v1322_v51, 0.0  ;;  %v1240_v19 = vmul.f32 %v5507_v22, %v1077_v41  ;;  %v1636_v33 = vmul.f32 0.01, %v1322_v51  ;;  %v1402_v1 = vadd.f32 %v5520_v0, %v1239_v37 }
 0x2fb   :  { %v1872_v48 = vsel %vm1558_vm13, %v1401_v46, %v1715_v2  ;;  %v998_v26 = vmul.f32 %v5502_v44, %v7691_v49  ;;  %v999_v27 = vmul.f32 %v5502_v44, %v7692_v47  ;;  %v1637_v35 = vmul.f32 0.01, %v1323_v34 }
 0x2fc   :  { %v1986_v36 = vpack.c.bf16 %v1872_v48, %v1871_v63  ;;  %v1403_v17 = vadd.f32 %v5520_v0, %v1240_v19  ;;  %v1078_v20 = vmul.f32 %v5502_v44, %v5105_v13  ;;  %vm1480_vm15 = vcmp.ge.f32.partialorder %v1323_v34, 0.0  ;;  %v7693_v13 = vld [vmem:[#allocation92_spill] sm:$0xff] }
 0x2fd   :  { %vm1559_vm1 = vcmp.ge.f32.partialorder %v1402_v1, 0.0  ;;  %v1716_v18 = vmul.f32 0.01, %v1402_v1  ;;  %v1161_v41 = vmul.f32 %v5507_v22, %v998_v26  ;;  %v1162_v28 = vmul.f32 %v5507_v22, %v999_v27 }
 0x2fe   :  { %vm1560_vm2 = vcmp.ge.f32.partialorder %v1403_v17, 0.0  ;;  %v1717_v3 = vmul.f32 0.01, %v1403_v17  ;;  %v1079_v38 = vmul.f32 %v5502_v44, %v5111_v32  ;;  %v1793_v30 = vsel %vm1479_vm14, %v1322_v51, %v1636_v33  ;;  %v7694_v33 = vld [vmem:[#allocation93_spill] sm:$0xff] }
 0x2ff   :  { %3037 = vmatmul.mubr.bf16.gmra.mxu0 %v1946_v58  ;;  %v1324_v46 = vadd.f32 %v5520_v0, %v1161_v41  ;;  %v1241_v40 = vmul.f32 %v5507_v22, %v1078_v20  ;;  %v1000_v24 = vmul.f32 %v5502_v44, %v7693_v13  ;;  %v1794_v39 = vsel %vm1480_vm15, %v1323_v34, %v1637_v35  ;;  %v7696_v13 = vld [vmem:[#allocation101_spill] sm:$0xff] }
 0x300   :  { %3197 = vmatmul.mubr.bf16.gmra.mxu1 %v1986_v36  ;;  %3040 = vmatprep.mubr.msk.bf16.mxu0 %vm3377_vm0, %v7687_v54  ;;  %v1325_v2 = vadd.f32 %v5520_v0, %v1162_v28  ;;  %v1242_v37 = vmul.f32 %v5507_v22, %v1079_v38  ;;  %v1873_v32 = vsel %vm1559_vm1, %v1402_v1, %v1716_v18 }
 0x301   :  { %3200 = vmatprep.mubr.msk.bf16.mxu1 %vm3377_vm0, %v7687_v54  ;;  %v1874_v51 = vsel %vm1560_vm2, %v1403_v17, %v1717_v3  ;;  %v1638_v63 = vmul.f32 0.01, %v1324_v46  ;;  %v1404_v58 = vadd.f32 %v5520_v0, %v1241_v40  ;;  %vm1481_vm3 = vcmp.ge.f32.partialorder %v1324_v46, 0.0  ;;  %v7695_v3 = vld [vmem:[#allocation100_spill] sm:$0xff] }
 0x302   :  { %v1639_v48 = vmul.f32 0.01, %v1325_v2  ;;  %v1405_v19 = vadd.f32 %v5520_v0, %v1242_v37  ;;  %v1001_v34 = vmul.f32 %v5502_v44, %v7694_v33  ;;  %v1947_v49 = vpack.c.bf16 %v1794_v39, %v1793_v30 }
 0x303   :  { %vm1482_vm4 = vcmp.ge.f32.partialorder %v1325_v2, 0.0  ;;  %v1718_v26 = vmul.f32 0.01, %v1404_v58  ;;  %v1163_v47 = vmul.f32 %v5507_v22, %v1000_v24  ;;  %v1987_v27 = vpack.c.bf16 %v1874_v51, %v1873_v32 }
 0x304   :  { %vm1561_vm5 = vcmp.ge.f32.partialorder %v1404_v58, 0.0  ;;  %v1719_v1 = vmul.f32 0.01, %v1405_v19  ;;  %v1164_v36 = vmul.f32 %v5507_v22, %v1001_v34  ;;  %v1795_v35 = vsel %vm1481_vm3, %v1324_v46, %v1638_v63 }
 0x305   :  { %vm1562_vm6 = vcmp.ge.f32.partialorder %v1405_v19, 0.0  ;;  %v1080_v17 = vmul.f32 %v5502_v44, %v5117_v29  ;;  %v1796_v20 = vsel %vm1482_vm4, %v1325_v2, %v1639_v48  ;;  %v1326_v18 = vadd.f32 %v5520_v0, %v1163_v47 }
 0x306   :  { %v1081_v41 = vmul.f32 %v5502_v44, %v5123_v21  ;;  %v1002_v28 = vmul.f32 %v5502_v44, %v7695_v3  ;;  %v1875_v38 = vsel %vm1561_vm5, %v1404_v58, %v1718_v26  ;;  %v1327_v30 = vadd.f32 %v5520_v0, %v1164_v36  ;;  %v7697_v36 = vld [vmem:[#allocation102_spill] sm:$0xff] }
 0x307   :  { %3041 = vmatmul.mubr.bf16.gmra.mxu0 %v1947_v49  ;;  %v1243_v40 = vmul.f32 %v5507_v22, %v1080_v17  ;;  %v1876_v29 = vsel %vm1562_vm6, %v1405_v19, %v1719_v1  ;;  %v1003_v24 = vmul.f32 %v5502_v44, %v7696_v13  ;;  %v1948_v21 = vpack.c.bf16 %v1796_v20, %v1795_v35 }
 0x308   :  { %3201 = vmatmul.mubr.bf16.gmra.mxu1 %v1987_v27  ;;  %3044 = vmatprep.mubr.msk.bf16.mxu0 %vm3377_vm0, %v7687_v54  ;;  %v1244_v46 = vmul.f32 %v5507_v22, %v1081_v41  ;;  %v1165_v2 = vmul.f32 %v5507_v22, %v1002_v28  ;;  %v1082_v37 = vmul.f32 %v5502_v44, %v5129_v5  ;;  %vm1483_vm7 = vcmp.ge.f32.partialorder %v1326_v18, 0.0  ;;  %v7698_v41 = vld [vmem:[#allocation2_spill] sm:$0xff] }
 0x309   :  { %3204 = vmatprep.mubr.msk.bf16.mxu1 %vm3377_vm0, %v7687_v54  ;;  %v1406_v39 = vadd.f32 %v5520_v0, %v1243_v40  ;;  %v1166_v51 = vmul.f32 %v5507_v22, %v1003_v24  ;;  %v1083_v63 = vmul.f32 %v5502_v44, %v5135_v59  ;;  %v1988_v58 = vpack.c.bf16 %v1876_v29, %v1875_v38 }
 0x30a   :  { %v1407_v32 = vadd.f32 %v5520_v0, %v1244_v46  ;;  %v1640_v48 = vmul.f32 0.01, %v1326_v18  ;;  %v1641_v19 = vmul.f32 0.01, %v1327_v30  ;;  %vm1484_vm8 = vcmp.ge.f32.partialorder %v1327_v30, 0.0 }
 0x30b   :  { %v1720_v33 = vmul.f32 0.01, %v1406_v39  ;;  %vm1563_vm9 = vcmp.ge.f32.partialorder %v1406_v39, 0.0  ;;  %v1328_v34 = vadd.f32 %v5520_v0, %v1165_v2  ;;  %v1329_v49 = vadd.f32 %v5520_v0, %v1166_v51 }
 0x30c   :  { %v1721_v26 = vmul.f32 0.01, %v1407_v32  ;;  %v1245_v5 = vmul.f32 %v5507_v22, %v1082_v37  ;;  %v1246_v47 = vmul.f32 %v5507_v22, %v1083_v63  ;;  %vm1564_vm10 = vcmp.ge.f32.partialorder %v1407_v32, 0.0 }
 0x30d   :  { %v1797_v27 = vsel %vm1483_vm7, %v1326_v18, %v1640_v48  ;;  %v1798_v59 = vsel %vm1484_vm8, %v1327_v30, %v1641_v19  ;;  %v1877_v1 = vsel %vm1563_vm9, %v1406_v39, %v1720_v33  ;;  %v1004_v35 = vmul.f32 %v5502_v44, %v7697_v36  ;;  %v7700_v48 = vld [vmem:[#allocation4_spill] sm:$0xff] }
 0x30e   :  { %vm1485_vm11 = vcmp.ge.f32.partialorder %v1328_v34, 0.0  ;;  %v1642_v17 = vmul.f32 0.01, %v1328_v34  ;;  %v1643_v20 = vmul.f32 0.01, %v1329_v49  ;;  %v1005_v3 = vmul.f32 %v5502_v44, %v7698_v41 }
 0x30f   :  { %3045 = vmatmul.mubr.bf16.gmra.mxu0 %v1948_v21  ;;  %v1878_v28 = vsel %vm1564_vm10, %v1407_v32, %v1721_v26  ;;  %vm1486_vm12 = vcmp.ge.f32.partialorder %v1329_v49, 0.0  ;;  %v1408_v18 = vadd.f32 %v5520_v0, %v1245_v5  ;;  %v1409_v38 = vadd.f32 %v5520_v0, %v1246_v47 }
 0x310   :  { %3205 = vmatmul.mubr.bf16.gmra.mxu1 %v1988_v58  ;;  %3048 = vmatprep.mubr.msk.bf16.mxu0 %vm3377_vm0, %v7687_v54  ;;  %v1167_v30 = vmul.f32 %v5507_v22, %v1004_v35  ;;  %v1084_v40 = vmul.f32 %v5502_v44, %v5141_v31  ;;  %v1085_v29 = vmul.f32 %v5502_v44, %v5147_v43  ;;  %v7699_v31 = vld [vmem:[#allocation3_spill] sm:$0xff] }
 0x311   :  { %3208 = vmatprep.mubr.msk.bf16.mxu1 %vm3377_vm0, %v7687_v54  ;;  %v1949_v46 = vpack.c.bf16 %v1798_v59, %v1797_v27  ;;  %v1168_v13 = vmul.f32 %v5507_v22, %v1005_v3  ;;  %v1989_v24 = vpack.c.bf16 %v1878_v28, %v1877_v1  ;;  %v1799_v21 = vsel %vm1485_vm11, %v1328_v34, %v1642_v17  ;;  %v7701_v17 = vld [vmem:[#allocation103_spill] sm:$0xff]  ;;  %v7702_v3 = vld [vmem:[#allocation105_spill] sm:$0xff] }
 0x312   :  { %v1800_v39 = vsel %vm1486_vm12, %v1329_v49, %v1643_v20  ;;  %v1722_v2 = vmul.f32 0.01, %v1408_v18  ;;  %v1723_v37 = vmul.f32 0.01, %v1409_v38  ;;  %v1247_v32 = vmul.f32 %v5507_v22, %v1084_v40 }
 0x313   :  { %v1248_v51 = vmul.f32 %v5507_v22, %v1085_v29  ;;  %vm1565_vm13 = vcmp.ge.f32.partialorder %v1408_v18, 0.0  ;;  %vm1566_vm14 = vcmp.ge.f32.partialorder %v1409_v38, 0.0  ;;  %v1330_v63 = vadd.f32 %v5520_v0, %v1167_v30 }
 0x314   :  { %v1006_v58 = vmul.f32 %v5502_v44, %v7699_v31  ;;  %v1331_v43 = vadd.f32 %v5520_v0, %v1168_v13  ;;  %v1007_v19 = vmul.f32 %v5502_v44, %v7700_v48  ;;  %v1086_v33 = vmul.f32 %v5502_v44, %v5153_v4 }
 0x315   :  { %v1950_v34 = vpack.c.bf16 %v1800_v39, %v1799_v21  ;;  %v1879_v49 = vsel %vm1565_vm13, %v1408_v18, %v1722_v2  ;;  %v1880_v26 = vsel %vm1566_vm14, %v1409_v38, %v1723_v37  ;;  %v1410_v5 = vadd.f32 %v5520_v0, %v1247_v32 }
 0x316   :  { %v1411_v47 = vadd.f32 %v5520_v0, %v1248_v51  ;;  %vm1487_vm15 = vcmp.ge.f32.partialorder %v1330_v63, 0.0  ;;  %v1644_v27 = vmul.f32 0.01, %v1330_v63  ;;  %v1169_v59 = vmul.f32 %v5507_v22, %v1006_v58 }
 0x317   :  { %3049 = vmatmul.mubr.bf16.gmra.mxu0 %v1949_v46  ;;  %v1087_v4 = vmul.f32 %v5502_v44, %v5159_v57  ;;  %v1645_v1 = vmul.f32 0.01, %v1331_v43  ;;  %v1170_v36 = vmul.f32 %v5507_v22, %v1007_v19  ;;  %v1249_v35 = vmul.f32 %v5507_v22, %v1086_v33 }
 0x318   :  { %3209 = vmatmul.mubr.bf16.gmra.mxu1 %v1989_v24  ;;  %3052 = vmatprep.mubr.msk.bf16.mxu0 %vm3377_vm0, %v7687_v54  ;;  %v1008_v20 = vmul.f32 %v5502_v44, %v7701_v17  ;;  %v1990_v41 = vpack.c.bf16 %v1880_v26, %v1879_v49  ;;  %vm1488_vm1 = vcmp.ge.f32.partialorder %v1331_v43, 0.0  ;;  %v1009_v28 = vmul.f32 %v5502_v44, %v7702_v3  ;;  %v7703_v26 = vld [vmem:[#allocation106_spill] sm:$0xff] }
 0x319   :  { %3212 = vmatprep.mubr.msk.bf16.mxu1 %vm3377_vm0, %v7687_v54  ;;  %v1724_v18 = vmul.f32 0.01, %v1410_v5  ;;  %v1725_v38 = vmul.f32 0.01, %v1411_v47  ;;  %v1250_v30 = vmul.f32 %v5507_v22, %v1087_v4  ;;  %v1801_v40 = vsel %vm1487_vm15, %v1330_v63, %v1644_v27 }
 0x31a   :  { %vm1567_vm2 = vcmp.ge.f32.partialorder %v1410_v5, 0.0  ;;  %vm1568_vm3 = vcmp.ge.f32.partialorder %v1411_v47, 0.0  ;;  %v1332_v57 = vadd.f32 %v5520_v0, %v1169_v59  ;;  %v1802_v29 = vsel %vm1488_vm1, %v1331_v43, %v1645_v1 }
 0x31b   :  { %v1333_v46 = vadd.f32 %v5520_v0, %v1170_v36  ;;  %v1412_v13 = vadd.f32 %v5520_v0, %v1249_v35  ;;  %v1171_v24 = vmul.f32 %v5507_v22, %v1008_v20  ;;  %v1172_v21 = vmul.f32 %v5507_v22, %v1009_v28 }
 0x31c   :  { %v1088_v39 = vmul.f32 %v5502_v44, %v5165_v50  ;;  %v1881_v2 = vsel %vm1567_vm2, %v1410_v5, %v1724_v18  ;;  %v1882_v37 = vsel %vm1568_vm3, %v1411_v47, %v1725_v38  ;;  %v1413_v32 = vadd.f32 %v5520_v0, %v1250_v30  ;;  %v7704_v5 = vld [vmem:[#allocation107_spill] sm:$0xff] }
 0x31d   :  { %v1089_v51 = vmul.f32 %v5502_v44, %v5171_v23  ;;  %v1951_v63 = vpack.c.bf16 %v1802_v29, %v1801_v40  ;;  %vm1489_vm4 = vcmp.ge.f32.partialorder %v1332_v57, 0.0  ;;  %v1646_v31 = vmul.f32 0.01, %v1332_v57 }
 0x31e   :  { %vm1490_vm5 = vcmp.ge.f32.partialorder %v1333_v46, 0.0  ;;  %v1647_v58 = vmul.f32 0.01, %v1333_v46  ;;  %v1726_v43 = vmul.f32 0.01, %v1412_v13  ;;  %v1334_v48 = vadd.f32 %v5520_v0, %v1171_v24 }
 0x31f   :  { %3053 = vmatmul.mubr.bf16.gmra.mxu0 %v1950_v34  ;;  %v1991_v19 = vpack.c.bf16 %v1882_v37, %v1881_v2  ;;  %vm1569_vm6 = vcmp.ge.f32.partialorder %v1412_v13, 0.0  ;;  %v1335_v50 = vadd.f32 %v5520_v0, %v1172_v21  ;;  %v1251_v33 = vmul.f32 %v5507_v22, %v1088_v39  ;;  %v7705_v39 = vld [vmem:[#allocation108_spill] sm:$0xff]  ;;  %v7706_v37 = vld [vmem:[#allocation109_spill] sm:$0xff] }
 0x320   :  { %3213 = vmatmul.mubr.bf16.gmra.mxu1 %v1990_v41  ;;  %3056 = vmatprep.mubr.msk.bf16.mxu0 %vm3377_vm0, %v7687_v54  ;;  %v1727_v34 = vmul.f32 0.01, %v1413_v32  ;;  %v1252_v49 = vmul.f32 %v5507_v22, %v1089_v51  ;;  %v1010_v23 = vmul.f32 %v5502_v44, %v7703_v26  ;;  %v1011_v47 = vmul.f32 %v5502_v44, %v7704_v5 }
 0x321   :  { %3216 = vmatprep.mubr.msk.bf16.mxu1 %vm3377_vm0, %v7687_v54  ;;  %v1803_v27 = vsel %vm1489_vm4, %v1332_v57, %v1646_v31  ;;  %vm1570_vm7 = vcmp.ge.f32.partialorder %v1413_v32, 0.0  ;;  %v1090_v59 = vmul.f32 %v5502_v44, %v5177_v45  ;;  %v1804_v4 = vsel %vm1490_vm5, %v1333_v46, %v1647_v58 }
 0x322   :  { %v1883_v1 = vsel %vm1569_vm6, %v1412_v13, %v1726_v43  ;;  %vm1491_vm8 = vcmp.ge.f32.partialorder %v1334_v48, 0.0  ;;  %v1091_v36 = vmul.f32 %v5502_v44, %v5183_v55  ;;  %vm1492_vm9 = vcmp.ge.f32.partialorder %v1335_v50, 0.0 }
 0x323   :  { %v1648_v35 = vmul.f32 0.01, %v1334_v48  ;;  %v1649_v17 = vmul.f32 0.01, %v1335_v50  ;;  %v1414_v20 = vadd.f32 %v5520_v0, %v1251_v33  ;;  %v1884_v45 = vsel %vm1570_vm7, %v1413_v32, %v1727_v34 }
 0x324   :  { %v1415_v41 = vadd.f32 %v5520_v0, %v1252_v49  ;;  %v1173_v3 = vmul.f32 %v5507_v22, %v1010_v23  ;;  %v1174_v28 = vmul.f32 %v5507_v22, %v1011_v47  ;;  %v1253_v55 = vmul.f32 %v5507_v22, %v1090_v59 }
 0x325   :  { %v1952_v18 = vpack.c.bf16 %v1804_v4, %v1803_v27  ;;  %v1254_v38 = vmul.f32 %v5507_v22, %v1091_v36  ;;  %v1992_v30 = vpack.c.bf16 %v1884_v45, %v1883_v1  ;;  %v1805_v40 = vsel %vm1491_vm8, %v1334_v48, %v1648_v35 }
 0x326   :  { %v1806_v57 = vsel %vm1492_vm9, %v1335_v50, %v1649_v17  ;;  %v1728_v29 = vmul.f32 0.01, %v1414_v20  ;;  %vm1571_vm10 = vcmp.ge.f32.partialorder %v1414_v20, 0.0  ;;  %v1729_v46 = vmul.f32 0.01, %v1415_v41 }
 0x327   :  { %3057 = vmatmul.mubr.bf16.gmra.mxu0 %v1951_v63  ;;  %v1336_v13 = vadd.f32 %v5520_v0, %v1173_v3  ;;  %v1337_v24 = vadd.f32 %v5520_v0, %v1174_v28  ;;  %vm1572_vm11 = vcmp.ge.f32.partialorder %v1415_v41, 0.0  ;;  %v1416_v21 = vadd.f32 %v5520_v0, %v1253_v55 }
 0x328   :  { %3217 = vmatmul.mubr.bf16.gmra.mxu1 %v1991_v19  ;;  %3060 = vmatprep.mubr.msk.bf16.mxu0 %vm3377_vm0, %v7687_v54  ;;  %v1012_v2 = vmul.f32 %v5502_v44, %v7705_v39  ;;  %v1013_v32 = vmul.f32 %v5502_v44, %v7706_v37  ;;  %v1417_v51 = vadd.f32 %v5520_v0, %v1254_v38 }
 0x329   :  { %3220 = vmatprep.mubr.msk.bf16.mxu1 %vm3377_vm0, %v7687_v54  ;;  %v1092_v63 = vmul.f32 %v5502_v44, %v5189_v60  ;;  %v1093_v31 = vmul.f32 %v5502_v44, %v5195_v14  ;;  %v1953_v58 = vpack.c.bf16 %v1806_v57, %v1805_v40  ;;  %v1885_v43 = vsel %vm1571_vm10, %v1414_v20, %v1728_v29  ;;  %v7707_v40 = vld [vmem:[#allocation110_spill] sm:$0xff] }
 0x32a   :  { %v1886_v48 = vsel %vm1572_vm11, %v1415_v41, %v1729_v46  ;;  %vm1493_vm12 = vcmp.ge.f32.partialorder %v1336_v13, 0.0  ;;  %vm1494_vm13 = vcmp.ge.f32.partialorder %v1337_v24, 0.0  ;;  %v1650_v19 = vmul.f32 0.01, %v1336_v13  ;;  %v7708_v46 = vld [vmem:[#allocation111_spill] sm:$0xff] }
 0x32b   :  { %v1651_v50 = vmul.f32 0.01, %v1337_v24  ;;  %v1730_v33 = vmul.f32 0.01, %v1416_v21  ;;  %v1175_v60 = vmul.f32 %v5507_v22, %v1012_v2  ;;  %v1176_v34 = vmul.f32 %v5507_v22, %v1013_v32 }
 0x32c   :  { %vm1573_vm14 = vcmp.ge.f32.partialorder %v1416_v21, 0.0  ;;  %v1731_v14 = vmul.f32 0.01, %v1417_v51  ;;  %v1255_v49 = vmul.f32 %v5507_v22, %v1092_v63  ;;  %v1256_v26 = vmul.f32 %v5507_v22, %v1093_v31  ;;  %v7709_v63 = vld [vmem:[#allocation32_spill] sm:$0xff] }
 0x32d   :  { %v1993_v23 = vpack.c.bf16 %v1886_v48, %v1885_v43  ;;  %vm1574_vm15 = vcmp.ge.f32.partialorder %v1417_v51, 0.0  ;;  %v1807_v5 = vsel %vm1493_vm12, %v1336_v13, %v1650_v19  ;;  %v1014_v47 = vmul.f32 %v5502_v44, %v4721_v61  ;;  %v7710_v48 = vld [vmem:[#allocation33_spill] sm:$0xff] }
 0x32e   :  { %v1808_v27 = vsel %vm1494_vm13, %v1337_v24, %v1651_v50  ;;  %v1887_v59 = vsel %vm1573_vm14, %v1416_v21, %v1730_v33  ;;  %v1338_v4 = vadd.f32 %v5520_v0, %v1175_v60  ;;  %v1339_v1 = vadd.f32 %v5520_v0, %v1176_v34 }
 0x32f   :  { %3061 = vmatmul.mubr.bf16.gmra.mxu0 %v1952_v18  ;;  %v1888_v36 = vsel %vm1574_vm15, %v1417_v51, %v1731_v14  ;;  %v1418_v35 = vadd.f32 %v5520_v0, %v1255_v49  ;;  %v1419_v17 = vadd.f32 %v5520_v0, %v1256_v26  ;;  %v1015_v20 = vmul.f32 %v5502_v44, %v4727_v42 }
 0x330   :  { %3221 = vmatmul.mubr.bf16.gmra.mxu1 %v1992_v30  ;;  %3064 = vmatprep.mubr.msk.bf16.mxu0 %vm3377_vm0, %v7687_v54  ;;  %v1094_v61 = vmul.f32 %v5502_v44, %v5201_v12  ;;  %v1954_v45 = vpack.c.bf16 %v1808_v27, %v1807_v5  ;;  %v1177_v41 = vmul.f32 %v5507_v22, %v1014_v47  ;;  %vm1495_vm1 = vcmp.ge.f32.partialorder %v1338_v4, 0.0  ;;  %v7711_v27 = vld [vmem:[#allocation112_spill] sm:$0xff] }
 0x331   :  { %3224 = vmatprep.mubr.msk.bf16.mxu1 %vm3377_vm0, %v7687_v54  ;;  %v1095_v3 = vmul.f32 %v5502_v44, %v5207_v56  ;;  %v1994_v28 = vpack.c.bf16 %v1888_v36, %v1887_v59  ;;  %vm1496_vm2 = vcmp.ge.f32.partialorder %v1339_v1, 0.0  ;;  %v1652_v42 = vmul.f32 0.01, %v1338_v4 }
 0x332   :  { %v1653_v55 = vmul.f32 0.01, %v1339_v1  ;;  %v1732_v18 = vmul.f32 0.01, %v1418_v35  ;;  %v1733_v38 = vmul.f32 0.01, %v1419_v17  ;;  %v1178_v30 = vmul.f32 %v5507_v22, %v1015_v20 }
 0x333   :  { %vm1575_vm3 = vcmp.ge.f32.partialorder %v1418_v35, 0.0  ;;  %vm1576_vm4 = vcmp.ge.f32.partialorder %v1419_v17, 0.0  ;;  %v1257_v12 = vmul.f32 %v5507_v22, %v1094_v61  ;;  %v1016_v57 = vmul.f32 %v5502_v44, %v7707_v40  ;;  %v7713_v20 = vld [vmem:[#allocation34_spill] sm:$0xff] }
 0x334   :  { %v1258_v29 = vmul.f32 %v5507_v22, %v1095_v3  ;;  %v1017_v56 = vmul.f32 %v5502_v44, %v7708_v46  ;;  %v1809_v13 = vsel %vm1495_vm1, %v1338_v4, %v1652_v42  ;;  %v1340_v24 = vadd.f32 %v5520_v0, %v1177_v41  ;;  %v7712_v4 = vld [vmem:[#allocation113_spill] sm:$0xff] }
 0x335   :  { %v1810_v21 = vsel %vm1496_vm2, %v1339_v1, %v1653_v55  ;;  %v1889_v39 = vsel %vm1575_vm3, %v1418_v35, %v1732_v18  ;;  %v1890_v2 = vsel %vm1576_vm4, %v1419_v17, %v1733_v38  ;;  %v1341_v37 = vadd.f32 %v5520_v0, %v1178_v30 }
 0x336   :  { %v1420_v32 = vadd.f32 %v5520_v0, %v1257_v12  ;;  %v1179_v51 = vmul.f32 %v5507_v22, %v1016_v57  ;;  %v1096_v31 = vmul.f32 %v5502_v44, %v7709_v63  ;;  %v1180_v43 = vmul.f32 %v5507_v22, %v1017_v56  ;;  %v7716_v63 = vld [vmem:[#allocation35_spill] sm:$0xff] }
 0x337   :  { %3065 = vmatmul.mubr.bf16.gmra.mxu0 %v1953_v58  ;;  %v1421_v58 = vadd.f32 %v5520_v0, %v1258_v29  ;;  %v1097_v19 = vmul.f32 %v5502_v44, %v7710_v48  ;;  %v1955_v50 = vpack.c.bf16 %v1810_v21, %v1809_v13  ;;  %vm1497_vm5 = vcmp.ge.f32.partialorder %v1340_v24, 0.0  ;;  %v7714_v21 = vld [vmem:[#allocation114_spill] sm:$0xff] }
 0x338   :  { %3225 = vmatmul.mubr.bf16.gmra.mxu1 %v1993_v23  ;;  %3068 = vmatprep.mubr.msk.bf16.mxu0 %vm3377_vm0, %v7687_v54  ;;  %v1995_v33 = vpack.c.bf16 %v1890_v2, %v1889_v39  ;;  %vm1498_vm6 = vcmp.ge.f32.partialorder %v1341_v37, 0.0  ;;  %v1654_v60 = vmul.f32 0.01, %v1340_v24  ;;  %v1655_v34 = vmul.f32 0.01, %v1341_v37  ;;  %v7715_v2 = vld [vmem:[#allocation115_spill] sm:$0xff] }
 0x339   :  { %3228 = vmatprep.mubr.msk.bf16.mxu1 %vm3377_vm0, %v7687_v54  ;;  %vm1577_vm7 = vcmp.ge.f32.partialorder %v1420_v32, 0.0  ;;  %v1734_v14 = vmul.f32 0.01, %v1420_v32  ;;  %v1342_v49 = vadd.f32 %v5520_v0, %v1179_v51  ;;  %v1259_v26 = vmul.f32 %v5507_v22, %v1096_v31 }
 0x33a   :  { %v1735_v23 = vmul.f32 0.01, %v1421_v58  ;;  %v1343_v5 = vadd.f32 %v5520_v0, %v1180_v43  ;;  %v1260_v47 = vmul.f32 %v5507_v22, %v1097_v19  ;;  %v1018_v59 = vmul.f32 %v5502_v44, %v7711_v27 }
 0x33b   :  { %vm1578_vm8 = vcmp.ge.f32.partialorder %v1421_v58, 0.0  ;;  %v1019_v1 = vmul.f32 %v5502_v44, %v7712_v4  ;;  %v1811_v36 = vsel %vm1497_vm5, %v1340_v24, %v1654_v60  ;;  %v1812_v35 = vsel %vm1498_vm6, %v1341_v37, %v1655_v34 }
 0x33c   :  { %v1098_v17 = vmul.f32 %v5502_v44, %v5225_v6  ;;  %v1099_v61 = vmul.f32 %v5502_v44, %v7713_v20  ;;  %vm1499_vm9 = vcmp.ge.f32.partialorder %v1342_v49, 0.0  ;;  %v1656_v41 = vmul.f32 0.01, %v1342_v49 }
 0x33d   :  { %v1422_v3 = vadd.f32 %v5520_v0, %v1259_v26  ;;  %v1657_v42 = vmul.f32 0.01, %v1343_v5  ;;  %v1423_v6 = vadd.f32 %v5520_v0, %v1260_v47  ;;  %v1181_v55 = vmul.f32 %v5507_v22, %v1018_v59 }
 0x33e   :  { %vm1500_vm10 = vcmp.ge.f32.partialorder %v1343_v5, 0.0  ;;  %v1182_v18 = vmul.f32 %v5507_v22, %v1019_v1  ;;  %v1956_v38 = vpack.c.bf16 %v1812_v35, %v1811_v36  ;;  %v1261_v30 = vmul.f32 %v5507_v22, %v1098_v17  ;;  %v7718_v36 = vld [vmem:[#allocation116_spill] sm:$0xff] }
 0x33f   :  { %3069 = vmatmul.mubr.bf16.gmra.mxu0 %v1954_v45  ;;  %v1891_v45 = vsel %vm1577_vm7, %v1420_v32, %v1734_v14  ;;  %v1262_v12 = vmul.f32 %v5507_v22, %v1099_v61  ;;  %v1813_v57 = vsel %vm1499_vm9, %v1342_v49, %v1656_v41  ;;  %vm1579_vm11 = vcmp.ge.f32.partialorder %v1422_v3, 0.0 }
 0x340   :  { %3229 = vmatmul.mubr.bf16.gmra.mxu1 %v1994_v28  ;;  %3072 = vmatprep.mubr.msk.bf16.mxu0 %vm3377_vm0, %v7687_v54  ;;  %v1892_v28 = vsel %vm1578_vm8, %v1421_v58, %v1735_v23  ;;  %v1814_v29 = vsel %vm1500_vm10, %v1343_v5, %v1657_v42  ;;  %v1736_v46 = vmul.f32 0.01, %v1422_v3  ;;  %v1737_v56 = vmul.f32 0.01, %v1423_v6  ;;  %v7717_v58 = vld [vmem:[#allocation36_spill] sm:$0xff] }
 0x341   :  { %3232 = vmatprep.mubr.msk.bf16.mxu1 %vm3377_vm0, %v7687_v54  ;;  %v1996_v40 = vpack.c.bf16 %v1892_v28, %v1891_v45  ;;  %v1344_v13 = vadd.f32 %v5520_v0, %v1181_v55  ;;  %vm1580_vm12 = vcmp.ge.f32.partialorder %v1423_v6, 0.0  ;;  %v1345_v24 = vadd.f32 %v5520_v0, %v1182_v18  ;;  %v7719_v45 = vld [vmem:[#allocation117_spill] sm:$0xff] }
 0x342   :  { %v1020_v39 = vmul.f32 %v5502_v44, %v7714_v21  ;;  %v1021_v37 = vmul.f32 %v5502_v44, %v7715_v2  ;;  %v1424_v32 = vadd.f32 %v5520_v0, %v1261_v30  ;;  %v1425_v51 = vadd.f32 %v5520_v0, %v1262_v12 }
 0x343   :  { %v1100_v31 = vmul.f32 %v5502_v44, %v7716_v63  ;;  %v1101_v43 = vmul.f32 %v5502_v44, %v7717_v58  ;;  %v1957_v48 = vpack.c.bf16 %v1814_v29, %v1813_v57  ;;  %v1893_v19 = vsel %vm1579_vm11, %v1422_v3, %v1736_v46  ;;  %v7721_v46 = vld [vmem:[#allocation118_spill] sm:$0xff] }
 0x344   :  { %vm1501_vm13 = vcmp.ge.f32.partialorder %v1344_v13, 0.0  ;;  %v1659_v60 = vmul.f32 0.01, %v1345_v24  ;;  %v1183_v34 = vmul.f32 %v5507_v22, %v1020_v39  ;;  %v1184_v14 = vmul.f32 %v5507_v22, %v1021_v37  ;;  %v7723_v39 = vld [vmem:[#allocation38_spill] sm:$0xff] }
 0x345   :  { %vm1502_vm14 = vcmp.ge.f32.partialorder %v1345_v24, 0.0  ;;  %v1738_v49 = vmul.f32 0.01, %v1424_v32  ;;  %v1739_v26 = vmul.f32 0.01, %v1425_v51  ;;  %v1263_v23 = vmul.f32 %v5507_v22, %v1100_v31 }
 0x346   :  { %vm1581_vm15 = vcmp.ge.f32.partialorder %v1424_v32, 0.0  ;;  %vm1582_vm1 = vcmp.ge.f32.partialorder %v1425_v51, 0.0  ;;  %v1264_v47 = vmul.f32 %v5507_v22, %v1101_v43  ;;  %v1816_v59 = vsel %vm1502_vm14, %v1345_v24, %v1659_v60  ;;  %v7722_v24 = vld [vmem:[#allocation119_spill] sm:$0xff] }
 0x347   :  { %3073 = vmatmul.mubr.bf16.gmra.mxu0 %v1955_v50  ;;  %v1894_v50 = vsel %vm1580_vm12, %v1423_v6, %v1737_v56  ;;  %v1346_v4 = vadd.f32 %v5520_v0, %v1183_v34  ;;  %v1347_v1 = vadd.f32 %v5520_v0, %v1184_v14  ;;  %v1022_v35 = vmul.f32 %v5502_v44, %v7718_v36  ;;  %v7720_v6 = vld [vmem:[#allocation37_spill] sm:$0xff]  ;;  %v7725_v36 = vld [vmem:[#allocation120_spill] sm:$0xff] }
 0x348   :  { %3233 = vmatmul.mubr.bf16.gmra.mxu1 %v1995_v33  ;;  %3076 = vmatprep.mubr.msk.bf16.mxu0 %vm3377_vm0, %v7687_v54  ;;  %v1658_v33 = vmul.f32 0.01, %v1344_v13  ;;  %v1997_v5 = vpack.c.bf16 %v1894_v50, %v1893_v19  ;;  %v1895_v17 = vsel %vm1581_vm15, %v1424_v32, %v1738_v49  ;;  %v1896_v20 = vsel %vm1582_vm1, %v1425_v51, %v1739_v26  ;;  %v7724_v32 = vld [vmem:[#allocation39_spill] sm:$0xff] }
 0x349   :  { %3236 = vmatprep.mubr.msk.bf16.mxu1 %vm3377_vm0, %v7687_v54  ;;  %v1426_v61 = vadd.f32 %v5520_v0, %v1263_v23  ;;  %v1023_v41 = vmul.f32 %v5502_v44, %v7719_v45  ;;  %v1427_v3 = vadd.f32 %v5520_v0, %v1264_v47  ;;  %v1102_v28 = vmul.f32 %v5502_v44, %v5249_v11 }
 0x34a   :  { %v1815_v27 = vsel %vm1501_vm13, %v1344_v13, %v1658_v33  ;;  %v1103_v55 = vmul.f32 %v5502_v44, %v7720_v6  ;;  %v1998_v18 = vpack.c.bf16 %v1896_v20, %v1895_v17  ;;  %vm1503_vm2 = vcmp.ge.f32.partialorder %v1346_v4, 0.0  ;;  %v7726_v17 = vld [vmem:[#allocation121_spill] sm:$0xff] }
 0x34b   :  { %v1958_v42 = vpack.c.bf16 %v1816_v59, %v1815_v27  ;;  %vm1504_vm3 = vcmp.ge.f32.partialorder %v1347_v1, 0.0  ;;  %v1661_v30 = vmul.f32 0.01, %v1347_v1  ;;  %v1740_v12 = vmul.f32 0.01, %v1426_v61 }
 0x34c   :  { %v1186_v57 = vmul.f32 %v5507_v22, %v1023_v41  ;;  %vm1583_vm4 = vcmp.ge.f32.partialorder %v1426_v61, 0.0  ;;  %v1741_v29 = vmul.f32 0.01, %v1427_v3  ;;  %v1265_v11 = vmul.f32 %v5507_v22, %v1102_v28  ;;  %v7727_v41 = vld [vmem:[#allocation40_spill] sm:$0xff] }
 0x34d   :  { %v1024_v56 = vmul.f32 %v5502_v44, %v7721_v46  ;;  %vm1584_vm5 = vcmp.ge.f32.partialorder %v1427_v3, 0.0  ;;  %v1266_v13 = vmul.f32 %v5507_v22, %v1103_v55  ;;  %v1025_v21 = vmul.f32 %v5502_v44, %v7722_v24  ;;  %v5900_v24 = vld [vmem:[%s7001_s3] ss:$0 sm:$0xff] }
 0x34e   :  { %v1104_v2 = vmul.f32 %v5502_v44, %v7723_v39  ;;  %v1105_v51 = vmul.f32 %v5502_v44, %v7724_v32  ;;  %v1818_v63 = vsel %vm1504_vm3, %v1347_v1, %v1661_v30  ;;  %v1897_v31 = vsel %vm1583_vm4, %v1426_v61, %v1740_v12 }
 0x34f   :  { %3077 = vmatmul.mubr.bf16.gmra.mxu0 %v1956_v38  ;;  %v1660_v38 = vmul.f32 0.01, %v1346_v4  ;;  %v1349_v43 = vadd.f32 %v5520_v0, %v1186_v57  ;;  %v1428_v19 = vadd.f32 %v5520_v0, %v1265_v11  ;;  %v1187_v50 = vmul.f32 %v5507_v22, %v1024_v56 }
 0x350   :  { %3237 = vmatmul.mubr.bf16.gmra.mxu1 %v1996_v40  ;;  %3080 = vmatprep.mubr.msk.bf16.mxu0 %vm3377_vm0, %v7687_v54  ;;  %v1185_v40 = vmul.f32 %v5507_v22, %v1022_v35  ;;  %v1429_v33 = vadd.f32 %v5520_v0, %v1266_v13  ;;  %v1188_v60 = vmul.f32 %v5507_v22, %v1025_v21 }
 0x351   :  { %3240 = vmatprep.mubr.msk.bf16.mxu1 %vm3377_vm0, %v7687_v54  ;;  %v1817_v37 = vsel %vm1503_vm2, %v1346_v4, %v1660_v38  ;;  %v1267_v34 = vmul.f32 %v5507_v22, %v1104_v2  ;;  %v1268_v49 = vmul.f32 %v5507_v22, %v1105_v51  ;;  %vm1506_vm7 = vcmp.ge.f32.partialorder %v1349_v43, 0.0  ;;  %v7729_v51 = vld [vmem:[#allocation123_spill] sm:$0xff] }
 0x352   :  { %v1348_v58 = vadd.f32 %v5520_v0, %v1185_v40  ;;  %v1959_v14 = vpack.c.bf16 %v1818_v63, %v1817_v37  ;;  %vm1585_vm8 = vcmp.ge.f32.partialorder %v1428_v19, 0.0  ;;  %v1742_v47 = vmul.f32 0.01, %v1428_v19  ;;  %v7728_v37 = vld [vmem:[#allocation122_spill] sm:$0xff] }
 0x353   :  { %v1350_v27 = vadd.f32 %v5520_v0, %v1187_v50  ;;  %v1743_v59 = vmul.f32 0.01, %v1429_v33  ;;  %v1351_v4 = vadd.f32 %v5520_v0, %v1188_v60  ;;  %v1430_v1 = vadd.f32 %v5520_v0, %v1267_v34 }
 0x354   :  { %vm1505_vm6 = vcmp.ge.f32.partialorder %v1348_v58, 0.0  ;;  %v1662_v23 = vmul.f32 0.01, %v1348_v58  ;;  %v1026_v35 = vmul.f32 %v5502_v44, %v7725_v36  ;;  %vm1586_vm9 = vcmp.ge.f32.partialorder %v1429_v33, 0.0 }
 0x355   :  { %v1431_v22 = vadd.f32 %v5520_v0, %v1268_v49  ;;  %v1027_v20 = vmul.f32 %v5502_v44, %v7726_v17  ;;  %v1106_v45 = vmul.f32 %v5502_v44, %v5273_v53  ;;  %vm1507_vm10 = vcmp.ge.f32.partialorder %v1350_v27, 0.0  ;;  %v5890_v53 = vld [vmem:[%s7000_s2] ss:$0 sm:$0xff] }
 0x356   :  { %v1819_v61 = vsel %vm1505_vm6, %v1348_v58, %v1662_v23  ;;  %v1664_v0 = vmul.f32 0.01, %v1350_v27  ;;  %v1900_v6 = vsel %vm1586_vm9, %v1429_v33, %v1743_v59  ;;  %v1665_v55 = vmul.f32 0.01, %v1351_v4  ;;  %v7732_v59 = vld [vmem:[#allocation124_spill] sm:$0xff] }
 0x357   :  { %3081 = vmatmul.mubr.bf16.gmra.mxu0 %v1957_v48  ;;  %v1898_v48 = vsel %vm1584_vm5, %v1427_v3, %v1741_v29  ;;  %v1107_v3 = vmul.f32 %v5502_v44, %v7727_v41  ;;  %v1189_v38 = vmul.f32 %v5890_v53, %v1026_v35  ;;  %vm1508_vm11 = vcmp.ge.f32.partialorder %v1351_v4, 0.0 }
 0x358   :  { %3241 = vmatmul.mubr.bf16.gmra.mxu1 %v1997_v5  ;;  %3084 = vmatprep.mubr.msk.bf16.mxu0 %vm3377_vm0, %v7687_v54  ;;  %v1999_v26 = vpack.c.bf16 %v1898_v48, %v1897_v31  ;;  %v1663_v5 = vmul.f32 0.01, %v1349_v43  ;;  %vm1587_vm12 = vcmp.ge.f32.partialorder %v1430_v1, 0.0  ;;  %v1745_v30 = vmul.f32 0.01, %v1431_v22 }
 0x359   :  { %3244 = vmatprep.mubr.msk.bf16.mxu1 %vm3377_vm0, %v7687_v54  ;;  %v1190_v12 = vmul.f32 %v5890_v53, %v1027_v20  ;;  %vm1588_vm13 = vcmp.ge.f32.partialorder %v1431_v22, 0.0  ;;  %v1269_v57 = vmul.f32 %v5890_v53, %v1106_v45  ;;  %v1270_v29 = vmul.f32 %v5890_v53, %v1107_v3 }
 0x35a   :  { %v1820_v28 = vsel %vm1506_vm7, %v1349_v43, %v1663_v5  ;;  %v1821_v46 = vsel %vm1507_vm10, %v1350_v27, %v1664_v0  ;;  %v1822_v56 = vsel %vm1508_vm11, %v1351_v4, %v1665_v55  ;;  %v1352_v21 = vadd.f32 %v5900_v24, %v1189_v38  ;;  %v7730_v43 = vld [vmem:[#allocation41_spill] sm:$0xff] }
 0x35b   :  { %v1960_v40 = vpack.c.bf16 %v1820_v28, %v1819_v61  ;;  %v1902_v39 = vsel %vm1588_vm13, %v1431_v22, %v1745_v30  ;;  %v1353_v2 = vadd.f32 %v5900_v24, %v1190_v12  ;;  %v1028_v32 = vmul.f32 %v5502_v44, %v7728_v37 }
 0x35c   :  { %v1029_v63 = vmul.f32 %v5502_v44, %v7729_v51  ;;  %v1432_v31 = vadd.f32 %v5900_v24, %v1269_v57  ;;  %v1433_v58 = vadd.f32 %v5900_v24, %v1270_v29  ;;  %v1108_v48 = vmul.f32 %v5502_v44, %v7730_v43 }
 0x35d   :  { %v1961_v33 = vpack.c.bf16 %v1822_v56, %v1821_v46  ;;  %vm1509_vm14 = vcmp.ge.f32.partialorder %v1352_v21, 0.0  ;;  %vm1510_vm15 = vcmp.ge.f32.partialorder %v1353_v2, 0.0  ;;  %v1666_v34 = vmul.f32 0.01, %v1352_v21  ;;  %v7735_v56 = vld [vmem:[#allocation126_spill] sm:$0xff] }
 0x35e   :  { %v1192_v49 = vmul.f32 %v5890_v53, %v1029_v63  ;;  %v1746_v23 = vmul.f32 0.01, %v1432_v31  ;;  %v1747_v5 = vmul.f32 0.01, %v1433_v58  ;;  %vm1589_vm1 = vcmp.ge.f32.partialorder %v1432_v31, 0.0  ;;  %v7738_v63 = vld [vmem:[#allocation45_spill] sm:$0xff] }
 0x35f   :  { %3085 = vmatmul.mubr.bf16.gmra.mxu0 %v1958_v42  ;;  %v1899_v42 = vsel %vm1585_vm8, %v1428_v19, %v1742_v47  ;;  %v7731_v19 = vld [vmem:[#allocation42_spill] sm:$0xff]  ;;  %v1271_v47 = vmul.f32 %v5890_v53, %v1108_v48  ;;  %vm1590_vm2 = vcmp.ge.f32.partialorder %v1433_v58, 0.0  ;;  %v1030_v4 = vmul.f32 %v5502_v44, %v7732_v59 }
 0x360   :  { %3245 = vmatmul.mubr.bf16.gmra.mxu1 %v1998_v18  ;;  %3088 = vmatprep.mubr.msk.bf16.mxu0 %vm3377_vm0, %v7687_v54  ;;  %v1744_v18 = vmul.f32 0.01, %v1430_v1  ;;  %v2000_v11 = vpack.c.bf16 %v1900_v6, %v1899_v42  ;;  %v1109_v50 = vmul.f32 %v5502_v44, %v7731_v19  ;;  %v1823_v35 = vsel %vm1509_vm14, %v1352_v21, %v1666_v34  ;;  %v7734_v6 = vld [vmem:[#allocation43_spill] sm:$0xff] }
 0x361   :  { %3248 = vmatprep.mubr.msk.bf16.mxu1 %vm3377_vm0, %v7687_v54  ;;  %v1355_v17 = vadd.f32 %v5900_v24, %v1192_v49  ;;  %v1903_v61 = vsel %vm1589_vm1, %v1432_v31, %v1746_v23  ;;  %v1904_v45 = vsel %vm1590_vm2, %v1433_v58, %v1747_v5  ;;  %v1434_v41 = vadd.f32 %v5900_v24, %v1271_v47  ;;  %v7736_v21 = vld [vmem:[#allocation127_spill] sm:$0xff] }
 0x362   :  { %v1901_v13 = vsel %vm1587_vm12, %v1430_v1, %v1744_v18  ;;  %v1272_v27 = vmul.f32 %v5890_v53, %v1109_v50  ;;  %v7733_v1 = vld [vmem:[#allocation125_spill] sm:$0xff]  ;;  %v1193_v28 = vmul.f32 %v5890_v53, %v1030_v4  ;;  %v1110_v42 = vmul.f32 %v5502_v44, %v5297_v52 }
 0x363   :  { %v2001_v60 = vpack.c.bf16 %v1902_v39, %v1901_v13  ;;  %v1031_v36 = vmul.f32 %v5502_v44, %v7733_v1  ;;  %v1111_v55 = vmul.f32 %v5502_v44, %v7734_v6  ;;  %vm1512_vm4 = vcmp.ge.f32.partialorder %v1355_v17, 0.0 }
 0x364   :  { %v1435_v3 = vadd.f32 %v5900_v24, %v1272_v27  ;;  %v2002_v38 = vpack.c.bf16 %v1904_v45, %v1903_v61  ;;  %v1669_v12 = vmul.f32 0.01, %v1355_v17  ;;  %vm1591_vm5 = vcmp.ge.f32.partialorder %v1434_v41, 0.0 }
 0x365   :  { %v1194_v0 = vmul.f32 %v5890_v53, %v1031_v36  ;;  %v1356_v29 = vadd.f32 %v5900_v24, %v1193_v28  ;;  %v1273_v52 = vmul.f32 %v5890_v53, %v1110_v42  ;;  %v1274_v46 = vmul.f32 %v5890_v53, %v1111_v55  ;;  %v7739_v36 = vld [vmem:[#allocation128_spill] sm:$0xff] }
 0x366   :  { %v1749_v57 = vmul.f32 0.01, %v1435_v3  ;;  %vm1592_vm6 = vcmp.ge.f32.partialorder %v1435_v3, 0.0  ;;  %v1032_v13 = vmul.f32 %v5502_v44, %v7735_v56  ;;  %v1033_v39 = vmul.f32 %v5502_v44, %v7736_v21  ;;  %v7742_v56 = vld [vmem:[#allocation130_spill] sm:$0xff] }
 0x367   :  { %3089 = vmatmul.mubr.bf16.gmra.mxu0 %v1959_v14  ;;  %v1191_v14 = vmul.f32 %v5890_v53, %v1028_v32  ;;  %v1826_v37 = vsel %vm1512_vm4, %v1355_v17, %v1669_v12  ;;  %v7737_v32 = vld [vmem:[#allocation44_spill] sm:$0xff]  ;;  %v1113_v31 = vmul.f32 %v5502_v44, %v7738_v63  ;;  %v1670_v48 = vmul.f32 0.01, %v1356_v29  ;;  %v7744_v63 = vld [vmem:[#allocation47_spill] sm:$0xff] }
 0x368   :  { %3249 = vmatmul.mubr.bf16.gmra.mxu1 %v1999_v26  ;;  %3092 = vmatprep.mubr.msk.bf16.mxu0 %vm3377_vm0, %v7687_v54  ;;  %v1667_v26 = vmul.f32 0.01, %v1353_v2  ;;  %v1112_v51 = vmul.f32 %v5502_v44, %v7737_v32  ;;  %v1906_v43 = vsel %vm1592_vm6, %v1435_v3, %v1749_v57  ;;  %v1436_v19 = vadd.f32 %v5900_v24, %v1273_v52 }
 0x369   :  { %3252 = vmatprep.mubr.msk.bf16.mxu1 %vm3377_vm0, %v7687_v54  ;;  %v1354_v22 = vadd.f32 %v5900_v24, %v1191_v14  ;;  %vm1513_vm7 = vcmp.ge.f32.partialorder %v1356_v29, 0.0  ;;  %v1196_v34 = vmul.f32 %v5890_v53, %v1033_v39  ;;  %v1114_v45 = vmul.f32 %v5502_v44, %v5321_v62 }
 0x36a   :  { %v1824_v20 = vsel %vm1510_vm15, %v1353_v2, %v1667_v26  ;;  %v1275_v49 = vmul.f32 %v5890_v53, %v1112_v51  ;;  %v1276_v26 = vmul.f32 %v5890_v53, %v1113_v31  ;;  %v1827_v5 = vsel %vm1513_vm7, %v1356_v29, %v1670_v48 }
 0x36b   :  { %v1962_v18 = vpack.c.bf16 %v1824_v20, %v1823_v35  ;;  %vm1511_vm3 = vcmp.ge.f32.partialorder %v1354_v22, 0.0  ;;  %v1668_v30 = vmul.f32 0.01, %v1354_v22  ;;  %vm1593_vm9 = vcmp.ge.f32.partialorder %v1436_v19, 0.0 }
 0x36c   :  { %v1750_v27 = vmul.f32 0.01, %v1436_v19  ;;  %v1359_v1 = vadd.f32 %v5900_v24, %v1196_v34  ;;  %v1034_v35 = vmul.f32 %v5502_v44, %v7739_v36  ;;  %v1438_v20 = vadd.f32 %v5900_v24, %v1275_v49 }
 0x36d   :  { %v1825_v2 = vsel %vm1511_vm3, %v1354_v22, %v1668_v30  ;;  %v7740_v22 = vld [vmem:[#allocation129_spill] sm:$0xff]  ;;  %v1439_v61 = vadd.f32 %v5900_v24, %v1276_v26  ;;  %v1277_v12 = vmul.f32 %v5890_v53, %v1114_v45  ;;  %v1116_v31 = vmul.f32 %v5502_v44, %v7744_v63 }
 0x36e   :  { %v1963_v14 = vpack.c.bf16 %v1826_v37, %v1825_v2  ;;  %v1035_v17 = vmul.f32 %v5502_v44, %v7740_v22  ;;  %v1907_v42 = vsel %vm1593_vm9, %v1436_v19, %v1750_v27  ;;  %v1673_v55 = vmul.f32 0.01, %v1359_v1  ;;  %v7743_v37 = vld [vmem:[#allocation131_spill] sm:$0xff]  ;;  %v7747_v27 = vld [vmem:[#allocation133_spill] sm:$0xff] }
 0x36f   :  { %3093 = vmatmul.mubr.bf16.gmra.mxu0 %v1960_v40  ;;  %v1748_v40 = vmul.f32 0.01, %v1434_v41  ;;  %vm1516_vm12 = vcmp.ge.f32.partialorder %v1359_v1, 0.0  ;;  %v1753_v30 = vmul.f32 0.01, %v1439_v61  ;;  %vm1595_vm13 = vcmp.ge.f32.partialorder %v1438_v20, 0.0 }
 0x370   :  { %3253 = vmatmul.mubr.bf16.gmra.mxu1 %v2000_v11  ;;  %3096 = vmatprep.mubr.msk.bf16.mxu0 %vm3377_vm0, %v7687_v54  ;;  %v1357_v11 = vadd.f32 %v5900_v24, %v1194_v0  ;;  %v1198_v62 = vmul.f32 %v5890_v53, %v1035_v17  ;;  %vm1596_vm14 = vcmp.ge.f32.partialorder %v1439_v61, 0.0  ;;  %v1830_v52 = vsel %vm1516_vm12, %v1359_v1, %v1673_v55 }
 0x371   :  { %3256 = vmatprep.mubr.msk.bf16.mxu1 %vm3377_vm0, %v7687_v54  ;;  %v1905_v58 = vsel %vm1591_vm5, %v1434_v41, %v1748_v40  ;;  %v7741_v41 = vld [vmem:[#allocation46_spill] sm:$0xff]  ;;  %v1910_v39 = vsel %vm1596_vm14, %v1439_v61, %v1753_v30  ;;  %v1440_v2 = vadd.f32 %v5900_v24, %v1277_v12  ;;  %v1037_v32 = vmul.f32 %v5502_v44, %v7743_v37 }
 0x372   :  { %v1671_v50 = vmul.f32 0.01, %v1357_v11  ;;  %vm1514_vm8 = vcmp.ge.f32.partialorder %v1357_v11, 0.0  ;;  %v2003_v23 = vpack.c.bf16 %v1906_v43, %v1905_v58  ;;  %v1115_v3 = vmul.f32 %v5502_v44, %v7741_v41  ;;  %v7745_v58 = vld [vmem:[#allocation48_spill] sm:$0xff] }
 0x373   :  { %v1117_v43 = vmul.f32 %v5502_v44, %v7745_v58  ;;  %v1754_v34 = vmul.f32 0.01, %v1440_v2  ;;  %vm1597_vm2 = vcmp.ge.f32.partialorder %v1440_v2, 0.0  ;;  %v1279_v26 = vmul.f32 %v5890_v53, %v1116_v31 }
 0x374   :  { %v1828_v47 = vsel %vm1514_vm8, %v1357_v11, %v1671_v50  ;;  %v1278_v57 = vmul.f32 %v5890_v53, %v1115_v3  ;;  %v1118_v1 = vmul.f32 %v5502_v44, %v5345_v15  ;;  %v1119_v36 = vmul.f32 %v5502_v44, %v5351_v7 }
 0x375   :  { %v1964_v28 = vpack.c.bf16 %v1828_v47, %v1827_v5  ;;  %v7746_v5 = vld [vmem:[#allocation132_spill] sm:$0xff]  ;;  %v1911_v17 = vsel %vm1597_vm2, %v1440_v2, %v1754_v34  ;;  %v1442_v45 = vadd.f32 %v5900_v24, %v1279_v26 }
 0x376   :  { %v1441_v51 = vadd.f32 %v5900_v24, %v1278_v57  ;;  %v1038_v47 = vmul.f32 %v5502_v44, %v7746_v5  ;;  %v7749_v57 = vld [vmem:[#allocation135_spill] sm:$0xff] }
 0x377   :  { %3097 = vmatmul.mubr.bf16.gmra.mxu0 %v1961_v33  ;;  %v1437_v33 = vadd.f32 %v5900_v24, %v1274_v46  ;;  %v1361_v46 = vadd.f32 %v5900_v24, %v1198_v62  ;;  %vm1599_vm6 = vcmp.ge.f32.partialorder %v1442_v45, 0.0 }
 0x378   :  { %3257 = vmatmul.mubr.bf16.gmra.mxu1 %v2001_v60  ;;  %3100 = vmatprep.mubr.msk.bf16.mxu0 %vm3377_vm0, %v7687_v54  ;;  %v1195_v60 = vmul.f32 %v5890_v53, %v1032_v13  ;;  %v1036_v13 = vmul.f32 %v5502_v44, %v7742_v56  ;;  %v1755_v49 = vmul.f32 0.01, %v1441_v51  ;;  %vm1598_vm3 = vcmp.ge.f32.partialorder %v1441_v51, 0.0 }
 0x379   :  { %3260 = vmatprep.mubr.msk.bf16.mxu1 %vm3377_vm0, %v7687_v54  ;;  %v1751_v59 = vmul.f32 0.01, %v1437_v33  ;;  %vm1594_vm10 = vcmp.ge.f32.partialorder %v1437_v33, 0.0  ;;  %vm1518_vm1 = vcmp.ge.f32.partialorder %v1361_v46, 0.0  ;;  %v1201_v7 = vmul.f32 %v5890_v53, %v1038_v47  ;;  %v7751_v47 = vld [vmem:[#allocation5_spill] sm:$0xff] }
 0x37a   :  { %v1358_v4 = vadd.f32 %v5900_v24, %v1195_v60  ;;  %v1199_v50 = vmul.f32 %v5890_v53, %v1036_v13  ;;  %v1675_v60 = vmul.f32 0.01, %v1361_v46  ;;  %v1912_v61 = vsel %vm1598_vm3, %v1441_v51, %v1755_v49 }
 0x37b   :  { %v1908_v0 = vsel %vm1594_vm10, %v1437_v33, %v1751_v59  ;;  %v1039_v59 = vmul.f32 %v5502_v44, %v7747_v27  ;;  %v1364_v12 = vadd.f32 %v5900_v24, %v1201_v7  ;;  %v1120_v13 = vmul.f32 %v5502_v44, %v5357_v8 }
 0x37c   :  { %v1672_v6 = vmul.f32 0.01, %v1358_v4  ;;  %vm1515_vm11 = vcmp.ge.f32.partialorder %v1358_v4, 0.0  ;;  %v2004_v40 = vpack.c.bf16 %v1908_v0, %v1907_v42  ;;  %v1832_v22 = vsel %vm1518_vm1, %v1361_v46, %v1675_v60 }
 0x37d   :  { %v1202_v41 = vmul.f32 %v5890_v53, %v1039_v59  ;;  %v1282_v42 = vmul.f32 %v5890_v53, %v1119_v36  ;;  %v2006_v0 = vpack.c.bf16 %v1912_v61, %v1911_v17  ;;  %vm1521_vm8 = vcmp.ge.f32.partialorder %v1364_v12, 0.0 }
 0x37e   :  { %v1829_v29 = vsel %vm1515_vm11, %v1358_v4, %v1672_v6  ;;  %v1362_v4 = vadd.f32 %v5900_v24, %v1199_v50  ;;  %v1283_v58 = vmul.f32 %v5890_v53, %v1120_v13  ;;  %v1043_v27 = vmul.f32 %v5502_v44, %v7751_v47 }
 0x37f   :  { %3101 = vmatmul.mubr.bf16.gmra.mxu0 %v1962_v18  ;;  %v1197_v18 = vmul.f32 %v5890_v53, %v1034_v35  ;;  %v1965_v48 = vpack.c.bf16 %v1830_v52, %v1829_v29  ;;  %v1041_v29 = vmul.f32 %v5502_v44, %v7749_v57  ;;  %v1122_v59 = vmul.f32 %v5502_v44, %v5369_v10 }
 0x380   :  { %3261 = vmatmul.mubr.bf16.gmra.mxu1 %v2002_v38  ;;  %3104 = vmatprep.mubr.msk.bf16.mxu0 %vm3377_vm0, %v7687_v54  ;;  %v1752_v38 = vmul.f32 0.01, %v1438_v20  ;;  %vm1519_vm4 = vcmp.ge.f32.partialorder %v1362_v4, 0.0  ;;  %v1676_v6 = vmul.f32 0.01, %v1362_v4  ;;  %v1446_v49 = vadd.f32 %v5900_v24, %v1283_v58  ;;  %v7755_v58 = vld [vmem:[#allocation8_spill] sm:$0xff] }
 0x381   :  { %3264 = vmatprep.mubr.msk.bf16.mxu1 %vm3377_vm0, %v7687_v54  ;;  %v1360_v11 = vadd.f32 %v5900_v24, %v1197_v18  ;;  %v1756_v18 = vmul.f32 0.01, %v1442_v45  ;;  %v1204_v8 = vmul.f32 %v5890_v53, %v1041_v29  ;;  %v1285_v10 = vmul.f32 %v5890_v53, %v1122_v59 }
 0x382   :  { %v1909_v21 = vsel %vm1595_vm13, %v1438_v20, %v1752_v38  ;;  %v7748_v38 = vld [vmem:[#allocation134_spill] sm:$0xff]  ;;  %v1833_v46 = vsel %vm1519_vm4, %v1362_v4, %v1676_v6  ;;  %v1760_v17 = vmul.f32 0.01, %v1446_v49  ;;  %vm1603_vm14 = vcmp.ge.f32.partialorder %v1446_v49, 0.0 }
 0x383   :  { %v2005_v19 = vpack.c.bf16 %v1910_v39, %v1909_v21  ;;  %vm1517_vm15 = vcmp.ge.f32.partialorder %v1360_v11, 0.0  ;;  %v1674_v33 = vmul.f32 0.01, %v1360_v11  ;;  %v1040_v30 = vmul.f32 %v5502_v44, %v7748_v38 }
 0x384   :  { %v1121_v21 = vmul.f32 %v5502_v44, %v5363_v9  ;;  %v1913_v39 = vsel %vm1599_vm6, %v1442_v45, %v1756_v18  ;;  %v1367_v50 = vadd.f32 %v5900_v24, %v1204_v8  ;;  %v1206_v45 = vmul.f32 %v5890_v53, %v1043_v27 }
 0x385   :  { %v1831_v35 = vsel %vm1517_vm15, %v1360_v11, %v1674_v33  ;;  %v1445_v11 = vadd.f32 %v5900_v24, %v1282_v42  ;;  %v1203_v37 = vmul.f32 %v5890_v53, %v1040_v30  ;;  %vm2751_vm1 = vcmask 130048  }
 0x386   :  { %v1966_v3 = vpack.c.bf16 %v1832_v22, %v1831_v35  ;;  %vm1524_vm13 = vcmp.ge.f32.partialorder %v1367_v50, 0.0  ;;  %v1681_v22 = vmul.f32 0.01, %v1367_v50  ;;  %v1917_v6 = vsel %vm1603_vm14, %v1446_v49, %v1760_v17 }
 0x387   :  { %3105 = vmatmul.mubr.bf16.gmra.mxu0 %v1963_v14  ;;  %v1200_v14 = vmul.f32 %v5890_v53, %v1037_v32  ;;  %v1678_v32 = vmul.f32 0.01, %v1364_v12  ;;  %v1759_v31 = vmul.f32 0.01, %v1445_v11  ;;  %vm1602_vm11 = vcmp.ge.f32.partialorder %v1445_v11, 0.0 }
 0x388   :  { %3265 = vmatmul.mubr.bf16.gmra.mxu1 %v2003_v23  ;;  %3108 = vmatprep.mubr.msk.bf16.mxu0 %vm3377_vm0, %v7687_v54  ;;  %v1280_v23 = vmul.f32 %v5890_v53, %v1117_v43  ;;  %v1284_v43 = vmul.f32 %v5890_v53, %v1121_v21  ;;  %v1448_v30 = vadd.f32 %v5900_v24, %v1285_v10 }
 0x389   :  { %3268 = vmatprep.mubr.msk.bf16.mxu1 %vm3377_vm0, %v7687_v54  ;;  %v1363_v20 = vadd.f32 %v5900_v24, %v1200_v14  ;;  %v1835_v33 = vsel %vm1521_vm8, %v1364_v12, %v1678_v32  ;;  %v1916_v14 = vsel %vm1602_vm11, %v1445_v11, %v1759_v31 }
 0x38a   :  { %v1443_v15 = vadd.f32 %v5900_v24, %v1280_v23  ;;  %v1447_v26 = vadd.f32 %v5900_v24, %v1284_v43  ;;  %v7750_v23 = vld [vmem:[#allocation136_spill] sm:$0xff]  ;;  %v1762_v32 = vmul.f32 0.01, %v1448_v30  ;;  %vm1605_vm4 = vcmp.ge.f32.partialorder %v1448_v30, 0.0 }
 0x38b   :  { %vm1520_vm5 = vcmp.ge.f32.partialorder %v1363_v20, 0.0  ;;  %v1677_v55 = vmul.f32 0.01, %v1363_v20  ;;  %v1042_v5 = vmul.f32 %v5502_v44, %v7750_v23  ;;  %v1046_v43 = vmul.f32 %v5502_v44, %v7755_v58 }
 0x38c   :  { %v1757_v62 = vmul.f32 0.01, %v1443_v15  ;;  %vm1600_vm7 = vcmp.ge.f32.partialorder %v1443_v15, 0.0  ;;  %vm1604_vm15 = vcmp.ge.f32.partialorder %v1447_v26, 0.0  ;;  %v1919_v27 = vsel %vm1605_vm4, %v1448_v30, %v1762_v32 }
 0x38d   :  { %v1834_v56 = vsel %vm1520_vm5, %v1363_v20, %v1677_v55  ;;  %v1761_v20 = vmul.f32 0.01, %v1447_v26  ;;  %v1205_v61 = vmul.f32 %v5890_v53, %v1042_v5 }
 0x38e   :  { %v1914_v2 = vsel %vm1600_vm7, %v1443_v15, %v1757_v62  ;;  %v1967_v51 = vpack.c.bf16 %v1834_v56, %v1833_v46  ;;  %v7752_v15 = vld [vmem:[#allocation6_spill] sm:$0xff]  ;;  %v1369_v62 = vadd.f32 %v5900_v24, %v1206_v45 }
 0x38f   :  { %3109 = vmatmul.mubr.bf16.gmra.mxu0 %v1964_v28  ;;  %v1281_v28 = vmul.f32 %v5890_v53, %v1118_v1  ;;  %v1123_v1 = vmul.f32 %v5502_v44, %v5375_v16  ;;  %v1044_v7 = vmul.f32 %v5502_v44, %v7752_v15  ;;  %v1918_v55 = vsel %vm1604_vm15, %v1447_v26, %v1761_v20  ;;  %v7758_v26 = vld [vmem:[#allocation52_spill] sm:$0xff] }
 0x390   :  { %3269 = vmatmul.mubr.bf16.gmra.mxu1 %v2004_v40  ;;  %3112 = vmatprep.mubr.msk.bf16.mxu0 %vm3377_vm0, %v7687_v54  ;;  %v1365_v40 = vadd.f32 %v5900_v24, %v1202_v41  ;;  %v1368_v18 = vadd.f32 %v5900_v24, %v1205_v61  ;;  %vm1526_vm3 = vcmp.ge.f32.partialorder %v1369_v62, 0.0  ;;  %v1127_v23 = vmul.f32 %v5502_v44, %v7758_v26 }
 0x391   :  { %3272 = vmatprep.mubr.msk.bf16.mxu1 %vm3377_vm0, %v7687_v54  ;;  %v1444_v52 = vadd.f32 %v5900_v24, %v1281_v28  ;;  %v1286_v16 = vmul.f32 %v5890_v53, %v1123_v1  ;;  %v7753_v28 = vld [vmem:[#allocation7_spill] sm:$0xff]  ;;  %v1207_v12 = vmul.f32 %v5890_v53, %v1044_v7 }
 0x392   :  { %vm1522_vm9 = vcmp.ge.f32.partialorder %v1365_v40, 0.0  ;;  %v1679_v63 = vmul.f32 0.01, %v1365_v40  ;;  %v1045_v42 = vmul.f32 %v5502_v44, %v7753_v28  ;;  %vm1525_vm2 = vcmp.ge.f32.partialorder %v1368_v18, 0.0 }
 0x393   :  { %v1758_v9 = vmul.f32 0.01, %v1444_v52  ;;  %vm1601_vm10 = vcmp.ge.f32.partialorder %v1444_v52, 0.0  ;;  %v1449_v29 = vadd.f32 %v5900_v24, %v1286_v16  ;;  %v1370_v8 = vadd.f32 %v5900_v24, %v1207_v12  ;;  %v7760_v12 = vld [vmem:[#allocation11_spill] sm:$0xff] }
 0x394   :  { %v1836_v60 = vsel %vm1522_vm9, %v1365_v40, %v1679_v63  ;;  %v1124_v40 = vmul.f32 %v5502_v44, %v5381_v25  ;;  %v1208_v13 = vmul.f32 %v5890_v53, %v1045_v42  ;;  %v2009_v25 = vpack.c.bf16 %v1918_v55, %v1917_v6 }
 0x395   :  { %v1915_v34 = vsel %vm1601_vm10, %v1444_v52, %v1758_v9  ;;  %v1968_v4 = vpack.c.bf16 %v1836_v60, %v1835_v33  ;;  %v7754_v52 = vld [vmem:[#allocation50_spill] sm:$0xff]  ;;  %v1763_v9 = vmul.f32 0.01, %v1449_v29  ;;  %vm1606_vm5 = vcmp.ge.f32.partialorder %v1449_v29, 0.0 }
 0x396   :  { %v2008_v36 = vpack.c.bf16 %v1916_v14, %v1915_v34  ;;  %v1125_v11 = vmul.f32 %v5502_v44, %v7754_v52  ;;  %v7757_v14 = vld [vmem:[#allocation51_spill] sm:$0xff]  ;;  %v1684_v59 = vmul.f32 0.01, %v1370_v8  ;;  %vm1527_vm6 = vcmp.ge.f32.partialorder %v1370_v8, 0.0 }
 0x397   :  { %3113 = vmatmul.mubr.bf16.gmra.mxu0 %v1965_v48  ;;  %v2007_v48 = vpack.c.bf16 %v1914_v2, %v1913_v39  ;;  %v1682_v39 = vmul.f32 0.01, %v1368_v18  ;;  %v1126_v49 = vmul.f32 %v5502_v44, %v7757_v14  ;;  %v1290_v7 = vmul.f32 %v5890_v53, %v1127_v23 }
 0x398   :  { %3273 = vmatmul.mubr.bf16.gmra.mxu1 %v2005_v19  ;;  %3116 = vmatprep.mubr.msk.bf16.mxu0 %vm3377_vm0, %v7687_v54  ;;  %v1366_v19 = vadd.f32 %v5900_v24, %v1203_v37  ;;  %v1683_v37 = vmul.f32 0.01, %v1369_v62  ;;  %v1288_v31 = vmul.f32 %v5890_v53, %v1125_v11  ;;  %v7761_v11 = vld [vmem:[#allocation54_spill] sm:$0xff] }
 0x399   :  { %3276 = vmatprep.mubr.msk.bf16.mxu1 %vm3377_vm0, %v7687_v54  ;;  %v1839_v34 = vsel %vm1525_vm2, %v1368_v18, %v1682_v39  ;;  %v1289_v15 = vmul.f32 %v5890_v53, %v1126_v49  ;;  %v1453_v52 = vadd.f32 %v5900_v24, %v1290_v7 }
 0x39a   :  { %vm1523_vm12 = vcmp.ge.f32.partialorder %v1366_v19, 0.0  ;;  %v1680_v35 = vmul.f32 0.01, %v1366_v19  ;;  %v1840_v47 = vsel %vm1526_vm3, %v1369_v62, %v1683_v37 }
 0x39b   :  { %v1970_v10 = vpack.c.bf16 %v1840_v47, %v1839_v34 }
 0x39c   :  { %v1837_v41 = vsel %vm1523_vm12, %v1366_v19, %v1680_v35  ;;  %v1371_v19 = vadd.f32 %v5900_v24, %v1208_v13  ;;  %v1451_v35 = vadd.f32 %v5900_v24, %v1288_v31  ;;  %v7762_v13 = vld [vmem:[#allocation55_spill] sm:$0xff] }
 0x39e   :  { %v1685_v20 = vmul.f32 0.01, %v1371_v19  ;;  %vm1528_vm7 = vcmp.ge.f32.partialorder %v1371_v19, 0.0  ;;  %vm1608_vm9 = vcmp.ge.f32.partialorder %v1451_v35, 0.0 }
 0x39f   :  { %3117 = vmatmul.mubr.bf16.gmra.mxu0 %v1966_v3  ;;  %v1838_v3 = vsel %vm1524_vm13, %v1367_v50, %v1681_v22  ;;  %v7756_v50 = vld [vmem:[#allocation9_spill] sm:$0xff]  ;;  %v1209_v22 = vmul.f32 %v5890_v53, %v1046_v43  ;;  %v1767_v43 = vmul.f32 0.01, %v1453_v52  ;;  %vm1610_vm13 = vcmp.ge.f32.partialorder %v1453_v52, 0.0 }
 0x3a0   :  { %3277 = vmatmul.mubr.bf16.gmra.mxu1 %v2006_v0  ;;  %3120 = vmatprep.mubr.msk.bf16.mxu0 %vm3377_vm0, %v7687_v54  ;;  %v1969_v56 = vpack.c.bf16 %v1838_v3, %v1837_v41  ;;  %v1047_v33 = vmul.f32 %v5502_v44, %v7756_v50  ;;  %v1841_v3 = vsel %vm1527_vm6, %v1370_v8, %v1684_v59 }
 0x3a1   :  { %3280 = vmatprep.mubr.msk.bf16.mxu1 %vm3377_vm0, %v7687_v54  ;;  %v1372_v6 = vadd.f32 %v5900_v24, %v1209_v22  ;;  %v1842_v18 = vsel %vm1528_vm7, %v1371_v19, %v1685_v20  ;;  %v7764_v22 = vld [vmem:[#allocation13_spill] sm:$0xff]  ;;  %v7765_v20 = vld [vmem:[#allocation56_spill] sm:$0xff] }
 0x3a2   :  { %v1210_v61 = vmul.f32 %v5890_v53, %v1047_v33  ;;  %v1971_v39 = vpack.c.bf16 %v1842_v18, %v1841_v3 }
 0x3a3   :  { %vm1529_vm10 = vcmp.ge.f32.partialorder %v1372_v6, 0.0  ;;  %v1686_v8 = vmul.f32 0.01, %v1372_v6 }
 0x3a4   :  { %v1373_v62 = vadd.f32 %v5900_v24, %v1210_v61  ;;  %v1130_v61 = vmul.f32 %v5502_v44, %v7765_v20  ;;  %v7772_v20 = vld [vmem:[#allocation17_spill] sm:$0xff] }
 0x3a5   :  { %v1843_v14 = vsel %vm1529_vm10, %v1372_v6, %v1686_v8 }
 0x3a6   :  { %vm1530_vm11 = vcmp.ge.f32.partialorder %v1373_v62, 0.0 }
 0x3a7   :  { %3121 = vmatmul.mubr.bf16.gmra.mxu0 %v1967_v51  ;;  %v1287_v51 = vmul.f32 %v5890_v53, %v1124_v40  ;;  %v1049_v40 = vmul.f32 %v5502_v44, %v7760_v12 }
 0x3a8   :  { %3281 = vmatmul.mubr.bf16.gmra.mxu1 %v2007_v48  ;;  %3124 = vmatprep.mubr.msk.bf16.mxu0 %vm3377_vm0, %v7687_v54 }
 0x3a9   :  { %3284 = vmatprep.mubr.msk.bf16.mxu1 %vm3377_vm0, %v7687_v54 }
 0x3af   :  { %v2121_v0 = vpop.f32.mrf.mxu0  ;;  %3125 = vmatmul.mubr.bf16.gmra.mxu0 %v1968_v4  ;;  %v1450_v4 = vadd.f32 %v5900_v24, %v1287_v51  ;;  %v1687_v51 = vmul.f32 0.01, %v1373_v62 }
 0x3b0   :  { %2752 = vst.msk [vmem:[%s7002_s5] sm:$0xff] %vm2751_vm1, %v2121_v0  ;;  %v2441_v38 = vpop.f32.mrf.mxu1  ;;  %3285 = vmatmul.mubr.bf16.gmra.mxu1 %v2008_v36  ;;  %3128 = vmatprep.mubr.msk.bf16.mxu0 %vm3377_vm0, %v7687_v54  ;;  %v1920_v36 = vsel %vm1606_vm5, %v1449_v29, %v1763_v9  ;;  %v1765_v0 = vmul.f32 0.01, %v1451_v35  ;;  %v1452_v29 = vadd.f32 %v5900_v24, %v1289_v15 }
 0x3b1   :  { %v3030_v57 = vpop.f32.mrf.mxu0  ;;  %2832 = vst.msk [vmem:[%s7002_s5 + $0x280] sm:$0xff] %vm2751_vm1, %v2441_v38  ;;  %3288 = vmatprep.mubr.msk.bf16.mxu1 %vm3377_vm0, %v7687_v54  ;;  %v2010_v41 = vpack.c.bf16 %v1920_v36, %v1919_v27  ;;  %vm1607_vm8 = vcmp.ge.f32.partialorder %v1450_v4, 0.0  ;;  %v1764_v42 = vmul.f32 0.01, %v1450_v4  ;;  %v7759_v38 = vld [vmem:[#allocation10_spill] sm:$0xff]  ;;  %v1212_v9 = vmul.f32 %v5890_v53, %v1049_v40 }
 0x3b2   :  { %v3190_v46 = vpop.f32.mrf.mxu1  ;;  %v1048_v30 = vmul.f32 %v5502_v44, %v7759_v38  ;;  %v1922_v37 = vsel %vm1608_vm9, %v1451_v35, %v1765_v0  ;;  %v1766_v58 = vmul.f32 0.01, %v1452_v29  ;;  %vm1609_vm12 = vcmp.ge.f32.partialorder %v1452_v29, 0.0 }
 0x3b3   :  { %v2124_v21 = vpop.f32.mrf.mxu0  ;;  %v1128_v46 = vmul.f32 %v5502_v44, %v7761_v11  ;;  %v1844_v49 = vsel %vm1530_vm11, %v1373_v62, %v1687_v51  ;;  %v1375_v23 = vadd.f32 %v5900_v24, %v1212_v9  ;;  %v1924_v27 = vsel %vm1610_vm13, %v1453_v52, %v1767_v43 }
 0x3b4   :  { %2753 = vst.msk [vmem:[%s7002_s5 + $0x8] sm:$0xff] %vm2751_vm1, %v2124_v21  ;;  %v2444_v2 = vpop.f32.mrf.mxu1  ;;  %v1129_v21 = vmul.f32 %v5502_v44, %v7762_v13  ;;  %v1923_v47 = vsel %vm1609_vm12, %v1452_v29, %v1766_v58  ;;  %v1293_v38 = vmul.f32 %v5890_v53, %v1130_v61  ;;  %v1055_v61 = vmul.f32 %v5502_v44, %v7772_v20 }
 0x3b5   :  { %v3031_v63 = vpop.f32.mrf.mxu0  ;;  %2833 = vst.msk [vmem:[%s7002_s5 + $0x288] sm:$0xff] %vm2751_vm1, %v2444_v2  ;;  %v1921_v2 = vsel %vm1607_vm8, %v1450_v4, %v1764_v42  ;;  %v7763_v4 = vld [vmem:[#allocation12_spill] sm:$0xff]  ;;  %v1689_v3 = vmul.f32 0.01, %v1375_v23  ;;  %v2012_v42 = vpack.c.bf16 %v1924_v27, %v1923_v47  ;;  %vm1532_vm15 = vcmp.ge.f32.partialorder %v1375_v23, 0.0 }
 0x3b6   :  { %v3191_v48 = vpop.f32.mrf.mxu1  ;;  %v1211_v63 = vmul.f32 %v5890_v53, %v1048_v30  ;;  %v2011_v50 = vpack.c.bf16 %v1922_v37, %v1921_v2  ;;  %v1292_v33 = vmul.f32 %v5890_v53, %v1129_v21  ;;  %v7768_v21 = vld [vmem:[#allocation15_spill] sm:$0xff] }
 0x3b7   :  { %v2129_v60 = vpop.f32.mrf.mxu0  ;;  %3129 = vmatmul.mubr.bf16.gmra.mxu0 %v1969_v56  ;;  %v1291_v48 = vmul.f32 %v5890_v53, %v1128_v46  ;;  %v1846_v29 = vsel %vm1532_vm15, %v1375_v23, %v1689_v3 }
 0x3b8   :  { %2754 = vst.msk [vmem:[%s7002_s5 + $0x10] sm:$0xff] %vm2751_vm1, %v2129_v60  ;;  %v2449_v5 = vpop.f32.mrf.mxu1  ;;  %3289 = vmatmul.mubr.bf16.gmra.mxu1 %v2009_v25  ;;  %3132 = vmatprep.mubr.msk.bf16.mxu0 %vm3377_vm0, %v7687_v54  ;;  %v1374_v26 = vadd.f32 %v5900_v24, %v1211_v63  ;;  %v1455_v35 = vadd.f32 %v5900_v24, %v1292_v33  ;;  %v7769_v63 = vld [vmem:[#allocation59_spill] sm:$0xff] }
 0x3b9   :  { %v3034_v1 = vpop.f32.mrf.mxu0  ;;  %2834 = vst.msk [vmem:[%s7002_s5 + $0x290] sm:$0xff] %vm2751_vm1, %v2449_v5  ;;  %3292 = vmatprep.mubr.msk.bf16.mxu1 %vm3377_vm0, %v7687_v54  ;;  %v1454_v59 = vadd.f32 %v5900_v24, %v1291_v48  ;;  %v1132_v9 = vmul.f32 %v5502_v44, %v7769_v63 }
 0x3ba   :  { %v3194_v17 = vpop.f32.mrf.mxu1  ;;  %v1050_v1 = vmul.f32 %v5502_v44, %v7763_v4  ;;  %vm1531_vm14 = vcmp.ge.f32.partialorder %v1374_v26, 0.0  ;;  %v1769_v18 = vmul.f32 0.01, %v1455_v35  ;;  %vm1612_vm3 = vcmp.ge.f32.partialorder %v1455_v35, 0.0  ;;  %v7771_v4 = vld [vmem:[#allocation16_spill] sm:$0xff] }
 0x3bb   :  { %v2132_v45 = vpop.f32.mrf.mxu0  ;;  %v1051_v17 = vmul.f32 %v5502_v44, %v7764_v22  ;;  %v1768_v0 = vmul.f32 0.01, %v1454_v59  ;;  %vm1611_vm2 = vcmp.ge.f32.partialorder %v1454_v59, 0.0  ;;  %v1295_v47 = vmul.f32 %v5890_v53, %v1132_v9  ;;  %v7776_v9 = vld [vmem:[#allocation19_spill] sm:$0xff] }
 0x3bc   :  { %2755 = vst.msk [vmem:[%s7002_s5 + $0x18] sm:$0xff] %vm2751_vm1, %v2132_v45  ;;  %v2452_v16 = vpop.f32.mrf.mxu1  ;;  %v1213_v6 = vmul.f32 %v5890_v53, %v1050_v1  ;;  %v1926_v2 = vsel %vm1612_vm3, %v1455_v35, %v1769_v18  ;;  %v1054_v1 = vmul.f32 %v5502_v44, %v7771_v4 }
 0x3bd   :  { %v3035_v28 = vpop.f32.mrf.mxu0  ;;  %2835 = vst.msk [vmem:[%s7002_s5 + $0x298] sm:$0xff] %vm2751_vm1, %v2452_v16  ;;  %v1972_v16 = vpack.c.bf16 %v1844_v49, %v1843_v14  ;;  %v1214_v62 = vmul.f32 %v5890_v53, %v1051_v17  ;;  %v1925_v11 = vsel %vm1611_vm2, %v1454_v59, %v1768_v0  ;;  %v7774_v0 = vld [vmem:[#allocation63_spill] sm:$0xff] }
 0x3be   :  { %v3195_v55 = vpop.f32.mrf.mxu1  ;;  %v1376_v46 = vadd.f32 %v5900_v24, %v1213_v6  ;;  %v1135_v6 = vmul.f32 %v5502_v44, %v7774_v0  ;;  %v1217_v18 = vmul.f32 %v5890_v53, %v1054_v1 }
 0x3bf   :  { %v2137_v57 = vpop.f32.mrf.mxu0  ;;  %3133 = vmatmul.mubr.bf16.gmra.mxu0 %v1970_v10  ;;  %v7766_v10 = vld [vmem:[#allocation58_spill] sm:$0xff]  ;;  %v1377_v37 = vadd.f32 %v5900_v24, %v1214_v62 }
 0x3c0   :  { %2756 = vst.msk [vmem:[%s7002_s5 + $0x20] sm:$0xff] %vm2751_vm1, %v2137_v57  ;;  %v2457_v56 = vpop.f32.mrf.mxu1  ;;  %3293 = vmatmul.mubr.bf16.gmra.mxu1 %v2010_v41  ;;  %3136 = vmatprep.mubr.msk.bf16.mxu0 %vm3377_vm0, %v7687_v54  ;;  %v1131_v15 = vmul.f32 %v5502_v44, %v7766_v10  ;;  %v1688_v41 = vmul.f32 0.01, %v1374_v26  ;;  %v1690_v33 = vmul.f32 0.01, %v1376_v46  ;;  %vm1533_vm4 = vcmp.ge.f32.partialorder %v1376_v46, 0.0 }
 0x3c1   :  { %v3038_v25 = vpop.f32.mrf.mxu0  ;;  %2836 = vst.msk [vmem:[%s7002_s5 + $0x2a0] sm:$0xff] %vm2751_vm1, %v2457_v56  ;;  %3296 = vmatprep.mubr.msk.bf16.mxu1 %vm3377_vm0, %v7687_v54  ;;  %v7767_v56 = vld [vmem:[#allocation14_spill] sm:$0xff]  ;;  %vm1534_vm5 = vcmp.ge.f32.partialorder %v1377_v37, 0.0  ;;  %v1691_v49 = vmul.f32 0.01, %v1377_v37 }
 0x3c2   :  { %v3198_v32 = vpop.f32.mrf.mxu1  ;;  %v1294_v12 = vmul.f32 %v5890_v53, %v1131_v15  ;;  %v1845_v57 = vsel %vm1531_vm14, %v1374_v26, %v1688_v41  ;;  %v1052_v13 = vmul.f32 %v5502_v44, %v7767_v56  ;;  %v1053_v25 = vmul.f32 %v5502_v44, %v7768_v21 }
 0x3c3   :  { %v2140_v31 = vpop.f32.mrf.mxu0  ;;  %v1456_v32 = vadd.f32 %v5900_v24, %v1293_v38  ;;  %v1973_v48 = vpack.c.bf16 %v1846_v29, %v1845_v57  ;;  %v1847_v35 = vsel %vm1533_vm4, %v1376_v46, %v1690_v33  ;;  %v1848_v10 = vsel %vm1534_vm5, %v1377_v37, %v1691_v49 }
 0x3c4   :  { %2757 = vst.msk [vmem:[%s7002_s5 + $0x28] sm:$0xff] %vm2751_vm1, %v2140_v31  ;;  %v2460_v19 = vpop.f32.mrf.mxu1  ;;  %v1457_v51 = vadd.f32 %v5900_v24, %v1294_v12  ;;  %v7770_v31 = vld [vmem:[#allocation60_spill] sm:$0xff]  ;;  %v1974_v38 = vpack.c.bf16 %v1848_v10, %v1847_v35 }
 0x3c5   :  { %v3039_v60 = vpop.f32.mrf.mxu0  ;;  %2837 = vst.msk [vmem:[%s7002_s5 + $0x2a8] sm:$0xff] %vm2751_vm1, %v2460_v19  ;;  %v1133_v58 = vmul.f32 %v5502_v44, %v7770_v31  ;;  %v1770_v26 = vmul.f32 0.01, %v1456_v32  ;;  %vm1613_vm6 = vcmp.ge.f32.partialorder %v1456_v32, 0.0  ;;  %v1057_v31 = vmul.f32 %v5502_v44, %v7776_v9 }
 0x3c6   :  { %v3199_v34 = vpop.f32.mrf.mxu1  ;;  %v1215_v60 = vmul.f32 %v5890_v53, %v1052_v13  ;;  %vm1614_vm7 = vcmp.ge.f32.partialorder %v1457_v51, 0.0  ;;  %v1298_v13 = vmul.f32 %v5890_v53, %v1135_v6 }
 0x3c7   :  { %v2145_v5 = vpop.f32.mrf.mxu0  ;;  %3137 = vmatmul.mubr.bf16.gmra.mxu0 %v1971_v39  ;;  %v1216_v34 = vmul.f32 %v5890_v53, %v1053_v25  ;;  %v1296_v27 = vmul.f32 %v5890_v53, %v1133_v58  ;;  %v1927_v15 = vsel %vm1613_vm6, %v1456_v32, %v1770_v26  ;;  %v1380_v25 = vadd.f32 %v5900_v24, %v1217_v18  ;;  %v7777_v58 = vld [vmem:[#allocation64_spill] sm:$0xff] }
 0x3c8   :  { %2758 = vst.msk [vmem:[%s7002_s5 + $0x30] sm:$0xff] %vm2751_vm1, %v2145_v5  ;;  %v2465_v36 = vpop.f32.mrf.mxu1  ;;  %3297 = vmatmul.mubr.bf16.gmra.mxu1 %v2011_v50  ;;  %3140 = vmatprep.mubr.msk.bf16.mxu0 %vm3377_vm0, %v7687_v54  ;;  %v2013_v50 = vpack.c.bf16 %v1926_v2, %v1925_v11  ;;  %v1771_v5 = vmul.f32 0.01, %v1457_v51  ;;  %v1378_v22 = vadd.f32 %v5900_v24, %v1215_v60  ;;  %v7778_v60 = vld [vmem:[#allocation66_spill] sm:$0xff] }
 0x3c9   :  { %v3042_v45 = vpop.f32.mrf.mxu0  ;;  %2838 = vst.msk [vmem:[%s7002_s5 + $0x2b0] sm:$0xff] %vm2751_vm1, %v2465_v36  ;;  %3300 = vmatprep.mubr.msk.bf16.mxu1 %vm3377_vm0, %v7687_v54  ;;  %v1379_v17 = vadd.f32 %v5900_v24, %v1216_v34  ;;  %v1461_v33 = vadd.f32 %v5900_v24, %v1298_v13  ;;  %v1137_v34 = vmul.f32 %v5502_v44, %v7778_v60  ;;  %v1694_v26 = vmul.f32 0.01, %v1380_v25 }
 0x3ca   :  { %v3202_v7 = vpop.f32.mrf.mxu1  ;;  %v1928_v3 = vsel %vm1614_vm7, %v1457_v51, %v1771_v5  ;;  %vm1535_vm8 = vcmp.ge.f32.partialorder %v1378_v22, 0.0  ;;  %vm1537_vm12 = vcmp.ge.f32.partialorder %v1380_v25, 0.0 }
 0x3cb   :  { %v2148_v28 = vpop.f32.mrf.mxu0  ;;  %v7773_v7 = vld [vmem:[#allocation62_spill] sm:$0xff]  ;;  %v1693_v12 = vmul.f32 0.01, %v1379_v17  ;;  %v2014_v29 = vpack.c.bf16 %v1928_v3, %v1927_v15  ;;  %vm1536_vm9 = vcmp.ge.f32.partialorder %v1379_v17, 0.0  ;;  %vm1618_vm15 = vcmp.ge.f32.partialorder %v1461_v33, 0.0  ;;  %v7780_v3 = vld [vmem:[#allocation21_spill] sm:$0xff] }
 0x3cc   :  { %2759 = vst.msk [vmem:[%s7002_s5 + $0x38] sm:$0xff] %vm2751_vm1, %v2148_v28  ;;  %v2468_v55 = vpop.f32.mrf.mxu1  ;;  %v1458_v28 = vadd.f32 %v5900_v24, %v1295_v47  ;;  %v6328_v47 = vld [vmem:[%s7000_s2] ss:$0 sm:$0xff] }
 0x3cd   :  { %v3043_v30 = vpop.f32.mrf.mxu0  ;;  %2839 = vst.msk [vmem:[%s7002_s5 + $0x2b8] sm:$0xff] %vm2751_vm1, %v2468_v55  ;;  %v1850_v37 = vsel %vm1536_vm9, %v1379_v17, %v1693_v12  ;;  %v1220_v1 = vmul.f32 %v6328_v47, %v1057_v31  ;;  %v1300_v17 = vmul.f32 %v6328_v47, %v1137_v34  ;;  %v6347_v15 = vld [vmem:[%s7001_s3] ss:$0 sm:$0xff]  ;;  %v7784_v31 = vld [vmem:[#allocation23_spill] sm:$0xff] }
 0x3ce   :  { %v3203_v40 = vpop.f32.mrf.mxu1  ;;  %v1692_v30 = vmul.f32 0.01, %v1378_v22  ;;  %v1772_v46 = vmul.f32 0.01, %v1458_v28  ;;  %vm1615_vm10 = vcmp.ge.f32.partialorder %v1458_v28, 0.0 }
 0x3cf   :  { %v2153_v52 = vpop.f32.mrf.mxu0  ;;  %3141 = vmatmul.mubr.bf16.gmra.mxu0 %v1972_v16  ;;  %v1134_v16 = vmul.f32 %v5502_v44, %v7773_v7  ;;  %v1218_v40 = vmul.f32 %v5890_v53, %v1055_v61  ;;  %v1851_v61 = vsel %vm1537_vm12, %v1380_v25, %v1694_v26  ;;  %v1383_v6 = vadd.f32 %v6347_v15, %v1220_v1 }
 0x3d0   :  { %2760 = vst.msk [vmem:[%s7002_s5 + $0x40] sm:$0xff] %vm2751_vm1, %v2153_v52  ;;  %v2473_v39 = vpop.f32.mrf.mxu1  ;;  %3301 = vmatmul.mubr.bf16.gmra.mxu1 %v2012_v42  ;;  %3144 = vmatprep.mubr.msk.bf16.mxu0 %vm3377_vm0, %v7687_v54  ;;  %v1459_v42 = vadd.f32 %v5900_v24, %v1296_v27  ;;  %v1849_v2 = vsel %vm1535_vm8, %v1378_v22, %v1692_v30  ;;  %v1775_v22 = vmul.f32 0.01, %v1461_v33  ;;  %v7781_v30 = vld [vmem:[#allocation67_spill] sm:$0xff] }
 0x3d1   :  { %v3046_v8 = vpop.f32.mrf.mxu0  ;;  %2840 = vst.msk [vmem:[%s7002_s5 + $0x2c0] sm:$0xff] %vm2751_vm1, %v2473_v39  ;;  %3304 = vmatprep.mubr.msk.bf16.mxu1 %vm3377_vm0, %v7687_v54  ;;  %v1297_v52 = vmul.f32 %v5890_v53, %v1134_v16  ;;  %v1381_v32 = vadd.f32 %v5900_v24, %v1218_v40  ;;  %v1975_v49 = vpack.c.bf16 %v1850_v37, %v1849_v2  ;;  %v7779_v16 = vld [vmem:[#allocation20_spill] sm:$0xff]  ;;  %vm1540_vm3 = vcmp.ge.f32.partialorder %v1383_v6, 0.0 }
 0x3d2   :  { %v3206_v43 = vpop.f32.mrf.mxu1  ;;  %v1773_v56 = vmul.f32 0.01, %v1459_v42  ;;  %vm1616_vm11 = vcmp.ge.f32.partialorder %v1459_v42, 0.0  ;;  %v7775_v8 = vld [vmem:[#allocation18_spill] sm:$0xff]  ;;  %v1138_v12 = vmul.f32 %v5502_v44, %v7781_v30  ;;  %v7782_v40 = vld [vmem:[#allocation68_spill] sm:$0xff]  ;;  %v7788_v30 = vld [vmem:[#allocation25_spill] sm:$0xff] }
 0x3d3   :  { %v2156_v19 = vpop.f32.mrf.mxu0  ;;  %v1056_v51 = vmul.f32 %v5502_v44, %v7775_v8  ;;  %v1460_v63 = vadd.f32 %v5900_v24, %v1297_v52  ;;  %v1136_v43 = vmul.f32 %v5502_v44, %v7777_v58  ;;  %vm1538_vm13 = vcmp.ge.f32.partialorder %v1381_v32, 0.0 }
 0x3d4   :  { %2761 = vst.msk [vmem:[%s7002_s5 + $0x48] sm:$0xff] %vm2751_vm1, %v2156_v19  ;;  %v2476_v14 = vpop.f32.mrf.mxu1  ;;  %v1929_v19 = vsel %vm1615_vm10, %v1458_v28, %v1772_v46  ;;  %v1695_v5 = vmul.f32 0.01, %v1381_v32  ;;  %v1059_v28 = vmul.f32 %v5502_v44, %v7780_v3  ;;  %v1301_v8 = vmul.f32 %v6328_v47, %v1138_v12 }
 0x3d5   :  { %v3047_v23 = vpop.f32.mrf.mxu0  ;;  %2841 = vst.msk [vmem:[%s7002_s5 + $0x2c8] sm:$0xff] %vm2751_vm1, %v2476_v14  ;;  %v1219_v27 = vmul.f32 %v6328_v47, %v1056_v51  ;;  %v1774_v4 = vmul.f32 0.01, %v1460_v63  ;;  %vm1617_vm14 = vcmp.ge.f32.partialorder %v1460_v63, 0.0  ;;  %v1061_v58 = vmul.f32 %v5502_v44, %v7784_v31 }
 0x3d6   :  { %v3207_v59 = vpop.f32.mrf.mxu1  ;;  %v1852_v10 = vsel %vm1538_vm13, %v1381_v32, %v1695_v5  ;;  %v1222_v13 = vmul.f32 %v6328_v47, %v1059_v28  ;;  %v1464_v5 = vadd.f32 %v6347_v15, %v1301_v8  ;;  %v1063_v12 = vmul.f32 %v5502_v44, %v7788_v30 }
 0x3d7   :  { %v2161_v36 = vpop.f32.mrf.mxu0  ;;  %3145 = vmatmul.mubr.bf16.gmra.mxu0 %v1973_v48  ;;  %v1382_v7 = vadd.f32 %v6347_v15, %v1219_v27  ;;  %v1931_v0 = vsel %vm1617_vm14, %v1460_v63, %v1774_v4  ;;  %v1976_v52 = vpack.c.bf16 %v1852_v10, %v1851_v61  ;;  %v7783_v63 = vld [vmem:[#allocation22_spill] sm:$0xff] }
 0x3d8   :  { %2762 = vst.msk [vmem:[%s7002_s5 + $0x50] sm:$0xff] %vm2751_vm1, %v2161_v36  ;;  %v2481_v45 = vpop.f32.mrf.mxu1  ;;  %3305 = vmatmul.mubr.bf16.gmra.mxu1 %v2013_v50  ;;  %3148 = vmatprep.mubr.msk.bf16.mxu0 %vm3377_vm0, %v7687_v54  ;;  %v1930_v50 = vsel %vm1616_vm11, %v1459_v42, %v1773_v56  ;;  %v1299_v36 = vmul.f32 %v6328_v47, %v1136_v43  ;;  %vm1621_vm8 = vcmp.ge.f32.partialorder %v1464_v5, 0.0 }
 0x3d9   :  { %v3050_v41 = vpop.f32.mrf.mxu0  ;;  %2842 = vst.msk [vmem:[%s7002_s5 + $0x2d0] sm:$0xff] %vm2751_vm1, %v2481_v45  ;;  %3308 = vmatprep.mubr.msk.bf16.mxu1 %vm3377_vm0, %v7687_v54  ;;  %v2015_v59 = vpack.c.bf16 %v1930_v50, %v1929_v19  ;;  %vm1539_vm2 = vcmp.ge.f32.partialorder %v1382_v7, 0.0  ;;  %v1696_v46 = vmul.f32 0.01, %v1382_v7  ;;  %v1060_v9 = vmul.f32 %v5502_v44, %v7783_v63 }
 0x3da   :  { %v3210_v55 = vpop.f32.mrf.mxu1  ;;  %v1058_v41 = vmul.f32 %v5502_v44, %v7779_v16  ;;  %v1385_v50 = vadd.f32 %v6347_v15, %v1222_v13  ;;  %v1778_v16 = vmul.f32 0.01, %v1464_v5 }
 0x3db   :  { %v2164_v62 = vpop.f32.mrf.mxu0  ;;  %v1462_v55 = vadd.f32 %v6347_v15, %v1299_v36  ;;  %v1223_v1 = vmul.f32 %v6328_v47, %v1060_v9  ;;  %v1224_v36 = vmul.f32 %v6328_v47, %v1061_v58 }
 0x3dc   :  { %2763 = vst.msk [vmem:[%s7002_s5 + $0x58] sm:$0xff] %vm2751_vm1, %v2164_v62  ;;  %v2484_v57 = vpop.f32.mrf.mxu1  ;;  %v1932_v62 = vsel %vm1618_vm15, %v1461_v33, %v1775_v22  ;;  %v1221_v56 = vmul.f32 %v6328_v47, %v1058_v41  ;;  %vm1542_vm7 = vcmp.ge.f32.partialorder %v1385_v50, 0.0 }
 0x3dd   :  { %v3051_v11 = vpop.f32.mrf.mxu0  ;;  %2843 = vst.msk [vmem:[%s7002_s5 + $0x2d8] sm:$0xff] %vm2751_vm1, %v2484_v57  ;;  %v1139_v57 = vmul.f32 %v5502_v44, %v7782_v40  ;;  %v2016_v25 = vpack.c.bf16 %v1932_v62, %v1931_v0  ;;  %v1776_v2 = vmul.f32 0.01, %v1462_v55  ;;  %vm1619_vm4 = vcmp.ge.f32.partialorder %v1462_v55, 0.0  ;;  %v7787_v62 = vld [vmem:[#allocation24_spill] sm:$0xff] }
 0x3de   :  { %v3211_v21 = vpop.f32.mrf.mxu1  ;;  %v1384_v19 = vadd.f32 %v6347_v15, %v1221_v56  ;;  %v1387_v0 = vadd.f32 %v6347_v15, %v1224_v36 }
 0x3df   :  { %v2169_v39 = vpop.f32.mrf.mxu0  ;;  %3149 = vmatmul.mubr.bf16.gmra.mxu0 %v1974_v38  ;;  %v1463_v38 = vadd.f32 %v6347_v15, %v1300_v17  ;;  %v1302_v51 = vmul.f32 %v6328_v47, %v1139_v57  ;;  %v1933_v34 = vsel %vm1619_vm4, %v1462_v55, %v1776_v2 }
 0x3e0   :  { %2764 = vst.msk [vmem:[%s7002_s5 + $0x60] sm:$0xff] %vm2751_vm1, %v2169_v39  ;;  %v2489_v53 = vpop.f32.mrf.mxu1  ;;  %3309 = vmatmul.mubr.bf16.gmra.mxu1 %v2014_v29  ;;  %3152 = vmatprep.mubr.msk.bf16.mxu0 %vm3377_vm0, %v7687_v54  ;;  %v1697_v39 = vmul.f32 0.01, %v1383_v6  ;;  %v1698_v17 = vmul.f32 0.01, %v1384_v19  ;;  %vm1541_vm6 = vcmp.ge.f32.partialorder %v1384_v19, 0.0 }
 0x3e1   :  { %v3054_v48 = vpop.f32.mrf.mxu0  ;;  %2844 = vst.msk [vmem:[%s7002_s5 + $0x2e0] sm:$0xff] %vm2751_vm1, %v2489_v53  ;;  %3312 = vmatprep.mubr.msk.bf16.mxu1 %vm3377_vm0, %v7687_v54  ;;  %v1777_v32 = vmul.f32 0.01, %v1463_v38  ;;  %vm1620_vm5 = vcmp.ge.f32.partialorder %v1463_v38, 0.0  ;;  %v1465_v27 = vadd.f32 %v6347_v15, %v1302_v51  ;;  %vm1544_vm11 = vcmp.ge.f32.partialorder %v1387_v0, 0.0 }
 0x3e2   :  { %v3214_v14 = vpop.f32.mrf.mxu1  ;;  %v1853_v48 = vsel %vm1539_vm2, %v1382_v7, %v1696_v46  ;;  %v1854_v60 = vsel %vm1540_vm3, %v1383_v6, %v1697_v39  ;;  %v1855_v55 = vsel %vm1541_vm6, %v1384_v19, %v1698_v17  ;;  %v1935_v46 = vsel %vm1621_vm8, %v1464_v5, %v1778_v16  ;;  %v7792_v5 = vld [vmem:[#allocation27_spill] sm:$0xff] }
 0x3e3   :  { %v2172_v23 = vpop.f32.mrf.mxu0  ;;  %v7785_v14 = vld [vmem:[#allocation70_spill] sm:$0xff]  ;;  %v1977_v22 = vpack.c.bf16 %v1854_v60, %v1853_v48  ;;  %v1779_v41 = vmul.f32 0.01, %v1465_v27  ;;  %vm1622_vm9 = vcmp.ge.f32.partialorder %v1465_v27, 0.0 }
 0x3e4   :  { %2765 = vst.msk [vmem:[%s7002_s5 + $0x68] sm:$0xff] %vm2751_vm1, %v2172_v23  ;;  %v2492_v24 = vpop.f32.mrf.mxu1  ;;  %v1934_v23 = vsel %vm1620_vm5, %v1463_v38, %v1777_v32  ;;  %v1062_v38 = vmul.f32 %v5502_v44, %v7787_v62  ;;  %v1701_v32 = vmul.f32 0.01, %v1387_v0 }
 0x3e5   :  { %v3055_v35 = vpop.f32.mrf.mxu0  ;;  %2845 = vst.msk [vmem:[%s7002_s5 + $0x2e8] sm:$0xff] %vm2751_vm1, %v2492_v24  ;;  %v7786_v24 = vld [vmem:[#allocation49_spill] sm:$0xff]  ;;  %v1936_v56 = vsel %vm1622_vm9, %v1465_v27, %v1779_v41  ;;  %v1065_v27 = vmul.f32 %v5502_v44, %v7792_v5 }
 0x3e6   :  { %v3215_v20 = vpop.f32.mrf.mxu1  ;;  %v1225_v51 = vmul.f32 %v6328_v47, %v1062_v38  ;;  %v2018_v9 = vpack.c.bf16 %v1936_v56, %v1935_v46  ;;  %v1858_v60 = vsel %vm1544_vm11, %v1387_v0, %v1701_v32  ;;  %v7795_v56 = vld [vmem:[#allocation28_spill] sm:$0xff] }
 0x3e7   :  { %v2177_v45 = vpop.f32.mrf.mxu0  ;;  %3153 = vmatmul.mubr.bf16.gmra.mxu0 %v1975_v49  ;;  %v1140_v49 = vmul.f32 %v5502_v44, %v7785_v14  ;;  %v1699_v20 = vmul.f32 0.01, %v1385_v50 }
 0x3e8   :  { %2766 = vst.msk [vmem:[%s7002_s5 + $0x70] sm:$0xff] %vm2751_vm1, %v2177_v45  ;;  %v2497_v42 = vpop.f32.mrf.mxu1  ;;  %3313 = vmatmul.mubr.bf16.gmra.mxu1 %v2015_v59  ;;  %3156 = vmatprep.mubr.msk.bf16.mxu0 %vm3377_vm0, %v7687_v54  ;;  %v1141_v59 = vmul.f32 %v5502_v44, %v7786_v24  ;;  %v2017_v45 = vpack.c.bf16 %v1934_v23, %v1933_v34 }
 0x3e9   :  { %v3058_v18 = vpop.f32.mrf.mxu0  ;;  %2846 = vst.msk [vmem:[%s7002_s5 + $0x2f0] sm:$0xff] %vm2751_vm1, %v2497_v42  ;;  %3316 = vmatprep.mubr.msk.bf16.mxu1 %vm3377_vm0, %v7687_v54  ;;  %v1303_v10 = vmul.f32 %v6328_v47, %v1140_v49  ;;  %v1386_v42 = vadd.f32 %v6347_v15, %v1223_v1  ;;  %v1388_v14 = vadd.f32 %v6347_v15, %v1225_v51 }
 0x3ea   :  { %v3218_v29 = vpop.f32.mrf.mxu1  ;;  %v1304_v3 = vmul.f32 %v6328_v47, %v1141_v59  ;;  %v1856_v18 = vsel %vm1542_vm7, %v1385_v50, %v1699_v20  ;;  %v7794_v20 = vld [vmem:[#allocation65_spill] sm:$0xff] }
 0x3eb   :  { %v2180_v11 = vpop.f32.mrf.mxu0  ;;  %v1466_v57 = vadd.f32 %v6347_v15, %v1303_v10  ;;  %v7789_v29 = vld [vmem:[#allocation53_spill] sm:$0xff]  ;;  %v1978_v2 = vpack.c.bf16 %v1856_v18, %v1855_v55  ;;  %vm1543_vm10 = vcmp.ge.f32.partialorder %v1386_v42, 0.0  ;;  %v1702_v16 = vmul.f32 0.01, %v1388_v14 }
 0x3ec   :  { %2767 = vst.msk [vmem:[%s7002_s5 + $0x78] sm:$0xff] %vm2751_vm1, %v2180_v11  ;;  %v2500_v21 = vpop.f32.mrf.mxu1  ;;  %v1467_v13 = vadd.f32 %v6347_v15, %v1304_v3  ;;  %vm1545_vm14 = vcmp.ge.f32.partialorder %v1388_v14, 0.0 }
 0x3ed   :  { %v3059_v37 = vpop.f32.mrf.mxu0  ;;  %2847 = vst.msk [vmem:[%s7002_s5 + $0x2f8] sm:$0xff] %vm2751_vm1, %v2500_v21  ;;  %v7790_v21 = vld [vmem:[#allocation57_spill] sm:$0xff]  ;;  %v1780_v31 = vmul.f32 0.01, %v1466_v57  ;;  %vm1623_vm12 = vcmp.ge.f32.partialorder %v1466_v57, 0.0 }
 0x3ee   :  { %v3219_v53 = vpop.f32.mrf.mxu1  ;;  %v1700_v37 = vmul.f32 0.01, %v1386_v42  ;;  %v1781_v48 = vmul.f32 0.01, %v1467_v13  ;;  %vm1624_vm13 = vcmp.ge.f32.partialorder %v1467_v13, 0.0 }
 0x3ef   :  { %v2185_v43 = vpop.f32.mrf.mxu0  ;;  %3157 = vmatmul.mubr.bf16.gmra.mxu0 %v1976_v52  ;;  %v1142_v52 = vmul.f32 %v5502_v44, %v7789_v29  ;;  %v1226_v53 = vmul.f32 %v6328_v47, %v1063_v12  ;;  %v1937_v59 = vsel %vm1623_vm12, %v1466_v57, %v1780_v31 }
 0x3f0   :  { %2768 = vst.msk [vmem:[%s7002_s5 + $0x80] sm:$0xff] %vm2751_vm1, %v2185_v43  ;;  %v2505_v33 = vpop.f32.mrf.mxu1  ;;  %3317 = vmatmul.mubr.bf16.gmra.mxu1 %v2016_v25  ;;  %3160 = vmatprep.mubr.msk.bf16.mxu0 %vm3377_vm0, %v7687_v54  ;;  %v1143_v25 = vmul.f32 %v5502_v44, %v7790_v21  ;;  %v1938_v36 = vsel %vm1624_vm13, %v1467_v13, %v1781_v48  ;;  %v7796_v21 = vld [vmem:[#allocation29_spill] sm:$0xff] }
 0x3f1   :  { %v3062_v26 = vpop.f32.mrf.mxu0  ;;  %2848 = vst.msk [vmem:[%s7002_s5 + $0x300] sm:$0xff] %vm2751_vm1, %v2505_v33  ;;  %3320 = vmatprep.mubr.msk.bf16.mxu1 %vm3377_vm0, %v7687_v54  ;;  %v1305_v58 = vmul.f32 %v6328_v47, %v1142_v52  ;;  %v1857_v33 = vsel %vm1543_vm10, %v1386_v42, %v1700_v37  ;;  %v1389_v49 = vadd.f32 %v6347_v15, %v1226_v53 }
 0x3f2   :  { %v3222_v4 = vpop.f32.mrf.mxu1  ;;  %v1306_v19 = vmul.f32 %v6328_v47, %v1143_v25  ;;  %v7791_v26 = vld [vmem:[#allocation26_spill] sm:$0xff]  ;;  %v1979_v10 = vpack.c.bf16 %v1858_v60, %v1857_v33  ;;  %v2019_v0 = vpack.c.bf16 %v1938_v36, %v1937_v59  ;;  %v1066_v13 = vmul.f32 %v5502_v44, %v7795_v56  ;;  %v7799_v36 = vld [vmem:[#allocation31_spill] sm:$0xff] }
 0x3f3   :  { %v2188_v35 = vpop.f32.mrf.mxu0  ;;  %v1064_v23 = vmul.f32 %v5502_v44, %v7791_v26  ;;  %v1468_v4 = vadd.f32 %v6347_v15, %v1305_v58  ;;  %v1703_v41 = vmul.f32 0.01, %v1389_v49  ;;  %vm1546_vm15 = vcmp.ge.f32.partialorder %v1389_v49, 0.0 }
 0x3f4   :  { %2769 = vst.msk [vmem:[%s7002_s5 + $0x88] sm:$0xff] %vm2751_vm1, %v2188_v35  ;;  %v2508_v61 = vpop.f32.mrf.mxu1  ;;  %v1469_v35 = vadd.f32 %v6347_v15, %v1306_v19  ;;  %v1067_v25 = vmul.f32 %v5502_v44, %v7796_v21  ;;  %v1229_v19 = vmul.f32 %v6328_v47, %v1066_v13 }
 0x3f5   :  { %v3063_v7 = vpop.f32.mrf.mxu0  ;;  %2849 = vst.msk [vmem:[%s7002_s5 + $0x308] sm:$0xff] %vm2751_vm1, %v2508_v61  ;;  %v1145_v61 = vmul.f32 %v5502_v44, %v7794_v20  ;;  %v1227_v3 = vmul.f32 %v6328_v47, %v1064_v23  ;;  %vm1625_vm2 = vcmp.ge.f32.partialorder %v1468_v4, 0.0  ;;  %v1860_v57 = vsel %vm1546_vm15, %v1389_v49, %v1703_v41 }
 0x3f6   :  { %v3223_v28 = vpop.f32.mrf.mxu1  ;;  %v1783_v18 = vmul.f32 0.01, %v1469_v35  ;;  %vm1626_vm3 = vcmp.ge.f32.partialorder %v1469_v35, 0.0 }
 0x3f7   :  { %v2193_v6 = vpop.f32.mrf.mxu0  ;;  %3161 = vmatmul.mubr.bf16.gmra.mxu0 %v1977_v22  ;;  %v7793_v22 = vld [vmem:[#allocation61_spill] sm:$0xff]  ;;  %v1228_v28 = vmul.f32 %v6328_v47, %v1065_v27  ;;  %v1308_v38 = vmul.f32 %v6328_v47, %v1145_v61  ;;  %v1390_v29 = vadd.f32 %v6347_v15, %v1227_v3  ;;  %v7798_v27 = vld [vmem:[#allocation30_spill] sm:$0xff] }
 0x3f8   :  { %2770 = vst.msk [vmem:[%s7002_s5 + $0x90] sm:$0xff] %vm2751_vm1, %v2193_v6  ;;  %v2513_v40 = vpop.f32.mrf.mxu1  ;;  %3321 = vmatmul.mubr.bf16.gmra.mxu1 %v2017_v45  ;;  %3164 = vmatprep.mubr.msk.bf16.mxu0 %vm3377_vm0, %v7687_v54  ;;  %v1144_v17 = vmul.f32 %v5502_v44, %v7793_v22  ;;  %v1782_v6 = vmul.f32 0.01, %v1468_v4 }
 0x3f9   :  { %v3066_v11 = vpop.f32.mrf.mxu0  ;;  %2850 = vst.msk [vmem:[%s7002_s5 + $0x310] sm:$0xff] %vm2751_vm1, %v2513_v40  ;;  %3324 = vmatprep.mubr.msk.bf16.mxu1 %vm3377_vm0, %v7687_v54  ;;  %v1859_v40 = vsel %vm1545_vm14, %v1388_v14, %v1702_v16  ;;  %v1391_v52 = vadd.f32 %v6347_v15, %v1228_v28  ;;  %v1471_v32 = vadd.f32 %v6347_v15, %v1308_v38  ;;  %vm1547_vm4 = vcmp.ge.f32.partialorder %v1390_v29, 0.0 }
 0x3fa   :  { %v3226_v39 = vpop.f32.mrf.mxu1  ;;  %v1307_v62 = vmul.f32 %v6328_v47, %v1144_v17  ;;  %v1939_v46 = vsel %vm1625_vm2, %v1468_v4, %v1782_v6  ;;  %v1704_v31 = vmul.f32 0.01, %v1390_v29  ;;  %v1392_v4 = vadd.f32 %v6347_v15, %v1229_v19 }
 0x3fb   :  { %v2196_v8 = vpop.f32.mrf.mxu0  ;;  %v1705_v58 = vmul.f32 0.01, %v1391_v52  ;;  %vm1548_vm5 = vcmp.ge.f32.partialorder %v1391_v52, 0.0  ;;  %vm1628_vm7 = vcmp.ge.f32.partialorder %v1471_v32, 0.0 }
 0x3fc   :  { %2771 = vst.msk [vmem:[%s7002_s5 + $0x98] sm:$0xff] %vm2751_vm1, %v2196_v8  ;;  %v2516_v63 = vpop.f32.mrf.mxu1  ;;  %v1470_v37 = vadd.f32 %v6347_v15, %v1307_v62  ;;  %v7797_v8 = vld [vmem:[#allocation71_spill] sm:$0xff]  ;;  %v1861_v23 = vsel %vm1547_vm4, %v1390_v29, %v1704_v31  ;;  %v1706_v3 = vmul.f32 0.01, %v1392_v4  ;;  %vm1549_vm8 = vcmp.ge.f32.partialorder %v1392_v4, 0.0 }
 0x3fd   :  { %v3067_v43 = vpop.f32.mrf.mxu0  ;;  %2851 = vst.msk [vmem:[%s7002_s5 + $0x318] sm:$0xff] %vm2751_vm1, %v2516_v63  ;;  %v1146_v51 = vmul.f32 %v5502_v44, %v7797_v8  ;;  %v1862_v5 = vsel %vm1548_vm5, %v1391_v52, %v1705_v58 }
 0x3fe   :  { %v3227_v50 = vpop.f32.mrf.mxu1  ;;  %v1784_v60 = vmul.f32 0.01, %v1470_v37  ;;  %vm1627_vm6 = vcmp.ge.f32.partialorder %v1470_v37, 0.0  ;;  %v1863_v38 = vsel %vm1549_vm8, %v1392_v4, %v1706_v3 }
 0x3ff   :  { %v2201_v34 = vpop.f32.mrf.mxu0  ;;  %3165 = vmatmul.mubr.bf16.gmra.mxu0 %v1978_v2  ;;  %v1940_v2 = vsel %vm1626_vm3, %v1469_v35, %v1783_v18  ;;  %v1230_v50 = vmul.f32 %v6328_v47, %v1067_v25  ;;  %v1309_v14 = vmul.f32 %v6328_v47, %v1146_v51  ;;  %v1069_v35 = vmul.f32 %v5502_v44, %v7799_v36 }
 0x400   :  { %2772 = vst.msk [vmem:[%s7002_s5 + $0xa0] sm:$0xff] %vm2751_vm1, %v2201_v34  ;;  %v2521_v24 = vpop.f32.mrf.mxu1  ;;  %3325 = vmatmul.mubr.bf16.gmra.mxu1 %v2018_v9  ;;  %3168 = vmatprep.mubr.msk.bf16.mxu0 %vm3377_vm0, %v7687_v54  ;;  %v1980_v9 = vpack.c.bf16 %v1860_v57, %v1859_v40  ;;  %v2020_v48 = vpack.c.bf16 %v1940_v2, %v1939_v46  ;;  %v1785_v34 = vmul.f32 0.01, %v1471_v32 }
 0x401   :  { %v3070_v1 = vpop.f32.mrf.mxu0  ;;  %2852 = vst.msk [vmem:[%s7002_s5 + $0x320] sm:$0xff] %vm2751_vm1, %v2521_v24  ;;  %3328 = vmatprep.mubr.msk.bf16.mxu1 %vm3377_vm0, %v7687_v54  ;;  %v1068_v24 = vmul.f32 %v5502_v44, %v7798_v27  ;;  %v1941_v17 = vsel %vm1627_vm6, %v1470_v37, %v1784_v60  ;;  %v1472_v61 = vadd.f32 %v6347_v15, %v1309_v14 }
 0x402   :  { %v3230_v45 = vpop.f32.mrf.mxu1  ;;  %v1393_v1 = vadd.f32 %v6347_v15, %v1230_v50  ;;  %v1942_v20 = vsel %vm1628_vm7, %v1471_v32, %v1785_v34 }
 0x403   :  { %v2204_v7 = vpop.f32.mrf.mxu0  ;;  %v1231_v44 = vmul.f32 %v6328_v47, %v1068_v24  ;;  %v2021_v41 = vpack.c.bf16 %v1942_v20, %v1941_v17  ;;  %v1786_v6 = vmul.f32 0.01, %v1472_v61  ;;  %vm1629_vm10 = vcmp.ge.f32.partialorder %v1472_v61, 0.0 }
 0x404   :  { %2773 = vst.msk [vmem:[%s7002_s5 + $0xa8] sm:$0xff] %vm2751_vm1, %v2204_v7  ;;  %v2524_v42 = vpop.f32.mrf.mxu1  ;;  %v1981_v7 = vpack.c.bf16 %v1862_v5, %v1861_v23  ;;  %v1707_v28 = vmul.f32 0.01, %v1393_v1  ;;  %vm1550_vm9 = vcmp.ge.f32.partialorder %v1393_v1, 0.0 }
 0x405   :  { %v3071_v55 = vpop.f32.mrf.mxu0  ;;  %2853 = vst.msk [vmem:[%s7002_s5 + $0x328] sm:$0xff] %vm2751_vm1, %v2524_v42  ;;  %v1232_v42 = vmul.f32 %v6328_v47, %v1069_v35  ;;  %v1394_v62 = vadd.f32 %v6347_v15, %v1231_v44  ;;  %v1943_v57 = vsel %vm1629_vm10, %v1472_v61, %v1786_v6 }
 0x406   :  { %v3231_v30 = vpop.f32.mrf.mxu1 }
 0x407   :  { %v2209_v12 = vpop.f32.mrf.mxu0  ;;  %3169 = vmatmul.mubr.bf16.gmra.mxu0 %v1979_v10  ;;  %v1864_v30 = vsel %vm1550_vm9, %v1393_v1, %v1707_v28  ;;  %v1708_v56 = vmul.f32 0.01, %v1394_v62  ;;  %vm1551_vm11 = vcmp.ge.f32.partialorder %v1394_v62, 0.0 }
 0x408   :  { %2774 = vst.msk [vmem:[%s7002_s5 + $0xb0] sm:$0xff] %vm2751_vm1, %v2209_v12  ;;  %v2529_v11 = vpop.f32.mrf.mxu1  ;;  %3329 = vmatmul.mubr.bf16.gmra.mxu1 %v2019_v0  ;;  %3172 = vmatprep.mubr.msk.bf16.mxu0 %vm3377_vm0, %v7687_v54  ;;  %v1395_v12 = vadd.f32 %v6347_v15, %v1232_v42  ;;  %v2022_v15 = vpack.c.bf16 %v1943_v57, %v1943_v57 }
 0x409   :  { %v3074_v39 = vpop.f32.mrf.mxu0  ;;  %2854 = vst.msk [vmem:[%s7002_s5 + $0x330] sm:$0xff] %vm2751_vm1, %v2529_v11  ;;  %3332 = vmatprep.mubr.msk.bf16.mxu1 %vm3377_vm0, %v7687_v54  ;;  %v1982_v11 = vpack.c.bf16 %v1864_v30, %v1863_v38  ;;  %v1865_v37 = vsel %vm1551_vm11, %v1394_v62, %v1708_v56 }
 0x40a   :  { %v3234_v53 = vpop.f32.mrf.mxu1  ;;  %v1709_v13 = vmul.f32 0.01, %v1395_v12  ;;  %vm1552_vm12 = vcmp.ge.f32.partialorder %v1395_v12, 0.0 }
 0x40b   :  { %v2212_v63 = vpop.f32.mrf.mxu0 }
 0x40c   :  { %2775 = vst.msk [vmem:[%s7002_s5 + $0xb8] sm:$0xff] %vm2751_vm1, %v2212_v63  ;;  %v2532_v43 = vpop.f32.mrf.mxu1  ;;  %v1866_v32 = vsel %vm1552_vm12, %v1395_v12, %v1709_v13 }
 0x40d   :  { %v3075_v33 = vpop.f32.mrf.mxu0  ;;  %2855 = vst.msk [vmem:[%s7002_s5 + $0x338] sm:$0xff] %vm2751_vm1, %v2532_v43  ;;  %v1983_v63 = vpack.c.bf16 %v1866_v32, %v1865_v37 }
 0x40e   :  { %v3235_v49 = vpop.f32.mrf.mxu1 }
 0x40f   :  { %v2217_v26 = vpop.f32.mrf.mxu0  ;;  %3173 = vmatmul.mubr.bf16.gmra.mxu0 %v1980_v9 }
 0x410   :  { %2776 = vst.msk [vmem:[%s7002_s5 + $0xc0] sm:$0xff] %vm2751_vm1, %v2217_v26  ;;  %v2537_v59 = vpop.f32.mrf.mxu1  ;;  %3333 = vmatmul.mubr.bf16.gmra.mxu1 %v2020_v48  ;;  %3176 = vmatprep.mubr.msk.bf16.mxu0 %vm3377_vm0, %v7687_v54 }
 0x411   :  { %v3078_v22 = vpop.f32.mrf.mxu0  ;;  %2856 = vst.msk [vmem:[%s7002_s5 + $0x340] sm:$0xff] %vm2751_vm1, %v2537_v59  ;;  %3336 = vmatprep.mubr.msk.bf16.mxu1 %vm3377_vm0, %v7687_v54 }
 0x412   :  { %v3238_v45 = vpop.f32.mrf.mxu1 }
 0x413   :  { %v2220_v10 = vpop.f32.mrf.mxu0 }
 0x414   :  { %2777 = vst.msk [vmem:[%s7002_s5 + $0xc8] sm:$0xff] %vm2751_vm1, %v2220_v10  ;;  %v2540_v16 = vpop.f32.mrf.mxu1 }
 0x415   :  { %v3079_v0 = vpop.f32.mrf.mxu0  ;;  %2857 = vst.msk [vmem:[%s7002_s5 + $0x348] sm:$0xff] %vm2751_vm1, %v2540_v16 }
 0x416   :  { %v3239_v55 = vpop.f32.mrf.mxu1 }
 0x417   :  { %v2225_v18 = vpop.f32.mrf.mxu0  ;;  %3177 = vmatmul.mubr.bf16.gmra.mxu0 %v1981_v7 }
 0x418   :  { %2778 = vst.msk [vmem:[%s7002_s5 + $0xd0] sm:$0xff] %vm2751_vm1, %v2225_v18  ;;  %v2545_v47 = vpop.f32.mrf.mxu1  ;;  %3337 = vmatmul.mubr.bf16.gmra.mxu1 %v2021_v41  ;;  %3180 = vmatprep.mubr.msk.bf16.mxu0 %vm3377_vm0, %v7687_v54 }
 0x419   :  { %v3082_v40 = vpop.f32.mrf.mxu0  ;;  %2858 = vst.msk [vmem:[%s7002_s5 + $0x350] sm:$0xff] %vm2751_vm1, %v2545_v47  ;;  %3340 = vmatprep.mubr.msk.bf16.mxu1 %vm3377_vm0, %v7687_v54 }
 0x41a   :  { %v3242_v29 = vpop.f32.mrf.mxu1 }
 0x41b   :  { %v2228_v52 = vpop.f32.mrf.mxu0 }
 0x41c   :  { %2779 = vst.msk [vmem:[%s7002_s5 + $0xd8] sm:$0xff] %vm2751_vm1, %v2228_v52  ;;  %v2548_v46 = vpop.f32.mrf.mxu1 }
 0x41d   :  { %v3083_v21 = vpop.f32.mrf.mxu0  ;;  %2859 = vst.msk [vmem:[%s7002_s5 + $0x358] sm:$0xff] %vm2751_vm1, %v2548_v46 }
 0x41e   :  { %v3243_v25 = vpop.f32.mrf.mxu1 }
 0x41f   :  { %v2233_v39 = vpop.f32.mrf.mxu0  ;;  %3181 = vmatmul.mubr.bf16.gmra.mxu0 %v1982_v11 }
 0x420   :  { %2780 = vst.msk [vmem:[%s7002_s5 + $0xe0] sm:$0xff] %vm2751_vm1, %v2233_v39  ;;  %v2553_v2 = vpop.f32.mrf.mxu1  ;;  %3341 = vmatmul.mubr.bf16.gmra.mxu1 %v2022_v15  ;;  %3184 = vmatprep.mubr.msk.bf16.mxu0 %vm3377_vm0, %v7687_v54  ;;  %vm2908_vm0 = vcmask 123904  }
 0x421   :  { %v3086_v8 = vpop.f32.mrf.mxu0  ;;  %2860 = vst.msk [vmem:[%s7002_s5 + $0x360] sm:$0xff] %vm2751_vm1, %v2553_v2 }
 0x422   :  { %v3246_v51 = vpop.f32.mrf.mxu1 }
 0x423   :  { %v2236_v53 = vpop.f32.mrf.mxu0 }
 0x424   :  { %2781 = vst.msk [vmem:[%s7002_s5 + $0xe8] sm:$0xff] %vm2751_vm1, %v2236_v53  ;;  %v2556_v9 = vpop.f32.mrf.mxu1 }
 0x425   :  { %v3087_v31 = vpop.f32.mrf.mxu0  ;;  %2861 = vst.msk [vmem:[%s7002_s5 + $0x368] sm:$0xff] %vm2751_vm1, %v2556_v9 }
 0x426   :  { %v3247_v54 = vpop.f32.mrf.mxu1 }
 0x427   :  { %v2241_v58 = vpop.f32.mrf.mxu0  ;;  %3185 = vmatmul.mubr.bf16.gmra.mxu0 %v1983_v63 }
 0x428   :  { %2782 = vst.msk [vmem:[%s7002_s5 + $0xf0] sm:$0xff] %vm2751_vm1, %v2241_v58  ;;  %v2561_v43 = vpop.f32.mrf.mxu1 }
 0x429   :  { %v3090_v48 = vpop.f32.mrf.mxu0  ;;  %2862 = vst.msk [vmem:[%s7002_s5 + $0x370] sm:$0xff] %vm2751_vm1, %v2561_v43 }
 0x42a   :  { %v3250_v19 = vpop.f32.mrf.mxu1 }
 0x42b   :  { %v2244_v50 = vpop.f32.mrf.mxu0 }
 0x42c   :  { %2783 = vst.msk [vmem:[%s7002_s5 + $0xf8] sm:$0xff] %vm2751_vm1, %v2244_v50  ;;  %v2564_v33 = vpop.f32.mrf.mxu1 }
 0x42d   :  { %v3091_v60 = vpop.f32.mrf.mxu0  ;;  %2863 = vst.msk [vmem:[%s7002_s5 + $0x378] sm:$0xff] %vm2751_vm1, %v2564_v33 }
 0x42e   :  { %v3251_v34 = vpop.f32.mrf.mxu1 }
 0x42f   :  { %v2249_v14 = vpop.f32.mrf.mxu0 }
 0x430   :  { %2784 = vst.msk [vmem:[%s7002_s5 + $0x100] sm:$0xff] %vm2751_vm1, %v2249_v14  ;;  %v2569_v49 = vpop.f32.mrf.mxu1 }
 0x431   :  { %v3094_v26 = vpop.f32.mrf.mxu0  ;;  %2864 = vst.msk [vmem:[%s7002_s5 + $0x380] sm:$0xff] %vm2751_vm1, %v2569_v49 }
 0x432   :  { %v3254_v23 = vpop.f32.mrf.mxu1 }
 0x433   :  { %v2252_v5 = vpop.f32.mrf.mxu0 }
 0x434   :  { %2785 = vst.msk [vmem:[%s7002_s5 + $0x108] sm:$0xff] %vm2751_vm1, %v2252_v5  ;;  %v2572_v27 = vpop.f32.mrf.mxu1 }
 0x435   :  { %v3095_v24 = vpop.f32.mrf.mxu0  ;;  %2865 = vst.msk [vmem:[%s7002_s5 + $0x388] sm:$0xff] %vm2751_vm1, %v2572_v27 }
 0x436   :  { %v3255_v59 = vpop.f32.mrf.mxu1 }
 0x437   :  { %v2257_v4 = vpop.f32.mrf.mxu0 }
 0x438   :  { %2786 = vst.msk [vmem:[%s7002_s5 + $0x110] sm:$0xff] %vm2751_vm1, %v2257_v4  ;;  %v2577_v1 = vpop.f32.mrf.mxu1 }
 0x439   :  { %v3098_v36 = vpop.f32.mrf.mxu0  ;;  %2866 = vst.msk [vmem:[%s7002_s5 + $0x390] sm:$0xff] %vm2751_vm1, %v2577_v1 }
 0x43a   :  { %v3258_v35 = vpop.f32.mrf.mxu1 }
 0x43b   :  { %v2260_v22 = vpop.f32.mrf.mxu0 }
 0x43c   :  { %2787 = vst.msk [vmem:[%s7002_s5 + $0x118] sm:$0xff] %vm2751_vm1, %v2260_v22  ;;  %v2580_v17 = vpop.f32.mrf.mxu1 }
 0x43d   :  { %v3099_v20 = vpop.f32.mrf.mxu0  ;;  %2867 = vst.msk [vmem:[%s7002_s5 + $0x398] sm:$0xff] %vm2751_vm1, %v2580_v17 }
 0x43e   :  { %v3259_v61 = vpop.f32.mrf.mxu1 }
 0x43f   :  { %v2265_v45 = vpop.f32.mrf.mxu0 }
 0x440   :  { %2788 = vst.msk [vmem:[%s7002_s5 + $0x120] sm:$0xff] %vm2751_vm1, %v2265_v45  ;;  %v2585_v10 = vpop.f32.mrf.mxu1 }
 0x441   :  { %v3102_v7 = vpop.f32.mrf.mxu0  ;;  %2868 = vst.msk [vmem:[%s7002_s5 + $0x3a0] sm:$0xff] %vm2751_vm1, %v2585_v10 }
 0x442   :  { %v3262_v44 = vpop.f32.mrf.mxu1 }
 0x443   :  { %v2268_v16 = vpop.f32.mrf.mxu0 }
 0x444   :  { %2789 = vst.msk [vmem:[%s7002_s5 + $0x128] sm:$0xff] %vm2751_vm1, %v2268_v16  ;;  %v2588_v41 = vpop.f32.mrf.mxu1 }
 0x445   :  { %v3103_v3 = vpop.f32.mrf.mxu0  ;;  %2869 = vst.msk [vmem:[%s7002_s5 + $0x3a8] sm:$0xff] %vm2751_vm1, %v2588_v41 }
 0x446   :  { %v3263_v28 = vpop.f32.mrf.mxu1 }
 0x447   :  { %v2273_v42 = vpop.f32.mrf.mxu0 }
 0x448   :  { %2790 = vst.msk [vmem:[%s7002_s5 + $0x130] sm:$0xff] %vm2751_vm1, %v2273_v42  ;;  %v2593_v0 = vpop.f32.mrf.mxu1 }
 0x449   :  { %v3106_v6 = vpop.f32.mrf.mxu0  ;;  %2870 = vst.msk [vmem:[%s7002_s5 + $0x3b0] sm:$0xff] %vm2751_vm1, %v2593_v0 }
 0x44a   :  { %v3266_v55 = vpop.f32.mrf.mxu1 }
 0x44b   :  { %v2276_v18 = vpop.f32.mrf.mxu0 }
 0x44c   :  { %2791 = vst.msk [vmem:[%s7002_s5 + $0x138] sm:$0xff] %vm2751_vm1, %v2276_v18  ;;  %v2596_v62 = vpop.f32.mrf.mxu1 }
 0x44d   :  { %v3107_v47 = vpop.f32.mrf.mxu0  ;;  %2871 = vst.msk [vmem:[%s7002_s5 + $0x3b8] sm:$0xff] %vm2751_vm1, %v2596_v62 }
 0x44e   :  { %v3267_v38 = vpop.f32.mrf.mxu1 }
 0x44f   :  { %v2281_v30 = vpop.f32.mrf.mxu0 }
 0x450   :  { %2792 = vst.msk [vmem:[%s7002_s5 + $0x140] sm:$0xff] %vm2751_vm1, %v2281_v30  ;;  %v2601_v12 = vpop.f32.mrf.mxu1 }
 0x451   :  { %v3110_v40 = vpop.f32.mrf.mxu0  ;;  %2872 = vst.msk [vmem:[%s7002_s5 + $0x3c0] sm:$0xff] %vm2751_vm1, %v2601_v12 }
 0x452   :  { %v3270_v57 = vpop.f32.mrf.mxu1 }
 0x453   :  { %v2284_v29 = vpop.f32.mrf.mxu0 }
 0x454   :  { %2793 = vst.msk [vmem:[%s7002_s5 + $0x148] sm:$0xff] %vm2751_vm1, %v2284_v29  ;;  %v2604_v52 = vpop.f32.mrf.mxu1 }
 0x455   :  { %v3111_v11 = vpop.f32.mrf.mxu0  ;;  %2873 = vst.msk [vmem:[%s7002_s5 + $0x3c8] sm:$0xff] %vm2751_vm1, %v2604_v52 }
 0x456   :  { %v3271_v46 = vpop.f32.mrf.mxu1 }
 0x457   :  { %v2289_v15 = vpop.f32.mrf.mxu0 }
 0x458   :  { %2794 = vst.msk [vmem:[%s7002_s5 + $0x150] sm:$0xff] %vm2751_vm1, %v2289_v15  ;;  %v2609_v56 = vpop.f32.mrf.mxu1 }
 0x459   :  { %v3114_v13 = vpop.f32.mrf.mxu0  ;;  %2874 = vst.msk [vmem:[%s7002_s5 + $0x3d0] sm:$0xff] %vm2751_vm1, %v2609_v56 }
 0x45a   :  { %v3274_v21 = vpop.f32.mrf.mxu1 }
 0x45b   :  { %v2292_v25 = vpop.f32.mrf.mxu0 }
 0x45c   :  { %2795 = vst.msk [vmem:[%s7002_s5 + $0x158] sm:$0xff] %vm2751_vm1, %v2292_v25  ;;  %v2612_v39 = vpop.f32.mrf.mxu1 }
 0x45d   :  { %v3115_v2 = vpop.f32.mrf.mxu0  ;;  %2875 = vst.msk [vmem:[%s7002_s5 + $0x3d8] sm:$0xff] %vm2751_vm1, %v2612_v39 }
 0x45e   :  { %v3275_v37 = vpop.f32.mrf.mxu1 }
 0x45f   :  { %v2297_v32 = vpop.f32.mrf.mxu0 }
 0x460   :  { %2796 = vst.msk [vmem:[%s7002_s5 + $0x160] sm:$0xff] %vm2751_vm1, %v2297_v32  ;;  %v2617_v8 = vpop.f32.mrf.mxu1 }
 0x461   :  { %v3118_v51 = vpop.f32.mrf.mxu0  ;;  %2876 = vst.msk [vmem:[%s7002_s5 + $0x3e0] sm:$0xff] %vm2751_vm1, %v2617_v8 }
 0x462   :  { %v3278_v53 = vpop.f32.mrf.mxu1 }
 0x463   :  { %v2300_v63 = vpop.f32.mrf.mxu0 }
 0x464   :  { %2797 = vst.msk [vmem:[%s7002_s5 + $0x168] sm:$0xff] %vm2751_vm1, %v2300_v63  ;;  %v2620_v9 = vpop.f32.mrf.mxu1 }
 0x465   :  { %v3119_v31 = vpop.f32.mrf.mxu0  ;;  %2877 = vst.msk [vmem:[%s7002_s5 + $0x3e8] sm:$0xff] %vm2751_vm1, %v2620_v9 }
 0x466   :  { %v3279_v54 = vpop.f32.mrf.mxu1 }
 0x467   :  { %v2305_v58 = vpop.f32.mrf.mxu0 }
 0x468   :  { %2798 = vst.msk [vmem:[%s7002_s5 + $0x170] sm:$0xff] %vm2751_vm1, %v2305_v58  ;;  %v2625_v43 = vpop.f32.mrf.mxu1 }
 0x469   :  { %v3122_v48 = vpop.f32.mrf.mxu0  ;;  %2878 = vst.msk [vmem:[%s7002_s5 + $0x3f0] sm:$0xff] %vm2751_vm1, %v2625_v43 }
 0x46a   :  { %v3282_v19 = vpop.f32.mrf.mxu1 }
 0x46b   :  { %v2308_v50 = vpop.f32.mrf.mxu0 }
 0x46c   :  { %2799 = vst.msk [vmem:[%s7002_s5 + $0x178] sm:$0xff] %vm2751_vm1, %v2308_v50  ;;  %v2628_v33 = vpop.f32.mrf.mxu1 }
 0x46d   :  { %v3123_v60 = vpop.f32.mrf.mxu0  ;;  %2879 = vst.msk [vmem:[%s7002_s5 + $0x3f8] sm:$0xff] %vm2751_vm1, %v2628_v33 }
 0x46e   :  { %v3283_v34 = vpop.f32.mrf.mxu1 }
 0x46f   :  { %v2313_v14 = vpop.f32.mrf.mxu0 }
 0x470   :  { %2800 = vst.msk [vmem:[%s7002_s5 + $0x180] sm:$0xff] %vm2751_vm1, %v2313_v14  ;;  %v2633_v49 = vpop.f32.mrf.mxu1 }
 0x471   :  { %v3126_v26 = vpop.f32.mrf.mxu0  ;;  %2880 = vst.msk [vmem:[%s7002_s5 + $0x400] sm:$0xff] %vm2751_vm1, %v2633_v49 }
 0x472   :  { %v3286_v23 = vpop.f32.mrf.mxu1 }
 0x473   :  { %v2316_v5 = vpop.f32.mrf.mxu0 }
 0x474   :  { %2801 = vst.msk [vmem:[%s7002_s5 + $0x188] sm:$0xff] %vm2751_vm1, %v2316_v5  ;;  %v2636_v27 = vpop.f32.mrf.mxu1 }
 0x475   :  { %v3127_v24 = vpop.f32.mrf.mxu0  ;;  %2881 = vst.msk [vmem:[%s7002_s5 + $0x408] sm:$0xff] %vm2751_vm1, %v2636_v27 }
 0x476   :  { %v3287_v59 = vpop.f32.mrf.mxu1 }
 0x477   :  { %v2321_v4 = vpop.f32.mrf.mxu0 }
 0x478   :  { %2802 = vst.msk [vmem:[%s7002_s5 + $0x190] sm:$0xff] %vm2751_vm1, %v2321_v4  ;;  %v2641_v1 = vpop.f32.mrf.mxu1 }
 0x479   :  { %v3130_v36 = vpop.f32.mrf.mxu0  ;;  %2882 = vst.msk [vmem:[%s7002_s5 + $0x410] sm:$0xff] %vm2751_vm1, %v2641_v1 }
 0x47a   :  { %v3290_v35 = vpop.f32.mrf.mxu1 }
 0x47b   :  { %v2324_v22 = vpop.f32.mrf.mxu0 }
 0x47c   :  { %2803 = vst.msk [vmem:[%s7002_s5 + $0x198] sm:$0xff] %vm2751_vm1, %v2324_v22  ;;  %v2644_v17 = vpop.f32.mrf.mxu1 }
 0x47d   :  { %v3131_v20 = vpop.f32.mrf.mxu0  ;;  %2883 = vst.msk [vmem:[%s7002_s5 + $0x418] sm:$0xff] %vm2751_vm1, %v2644_v17 }
 0x47e   :  { %v3291_v61 = vpop.f32.mrf.mxu1 }
 0x47f   :  { %v2329_v45 = vpop.f32.mrf.mxu0 }
 0x480   :  { %2804 = vst.msk [vmem:[%s7002_s5 + $0x1a0] sm:$0xff] %vm2751_vm1, %v2329_v45  ;;  %v2649_v10 = vpop.f32.mrf.mxu1 }
 0x481   :  { %v3134_v7 = vpop.f32.mrf.mxu0  ;;  %2884 = vst.msk [vmem:[%s7002_s5 + $0x420] sm:$0xff] %vm2751_vm1, %v2649_v10 }
 0x482   :  { %v3294_v44 = vpop.f32.mrf.mxu1 }
 0x483   :  { %v2332_v16 = vpop.f32.mrf.mxu0 }
 0x484   :  { %2805 = vst.msk [vmem:[%s7002_s5 + $0x1a8] sm:$0xff] %vm2751_vm1, %v2332_v16  ;;  %v2652_v41 = vpop.f32.mrf.mxu1 }
 0x485   :  { %v3135_v3 = vpop.f32.mrf.mxu0  ;;  %2885 = vst.msk [vmem:[%s7002_s5 + $0x428] sm:$0xff] %vm2751_vm1, %v2652_v41 }
 0x486   :  { %v3295_v28 = vpop.f32.mrf.mxu1 }
 0x487   :  { %v2337_v42 = vpop.f32.mrf.mxu0 }
 0x488   :  { %2806 = vst.msk [vmem:[%s7002_s5 + $0x1b0] sm:$0xff] %vm2751_vm1, %v2337_v42  ;;  %v2657_v0 = vpop.f32.mrf.mxu1 }
 0x489   :  { %v3138_v6 = vpop.f32.mrf.mxu0  ;;  %2886 = vst.msk [vmem:[%s7002_s5 + $0x430] sm:$0xff] %vm2751_vm1, %v2657_v0 }
 0x48a   :  { %v3298_v55 = vpop.f32.mrf.mxu1 }
 0x48b   :  { %v2340_v18 = vpop.f32.mrf.mxu0 }
 0x48c   :  { %2807 = vst.msk [vmem:[%s7002_s5 + $0x1b8] sm:$0xff] %vm2751_vm1, %v2340_v18  ;;  %v2660_v62 = vpop.f32.mrf.mxu1 }
 0x48d   :  { %v3139_v47 = vpop.f32.mrf.mxu0  ;;  %2887 = vst.msk [vmem:[%s7002_s5 + $0x438] sm:$0xff] %vm2751_vm1, %v2660_v62 }
 0x48e   :  { %v3299_v38 = vpop.f32.mrf.mxu1 }
 0x48f   :  { %v2345_v30 = vpop.f32.mrf.mxu0 }
 0x490   :  { %2808 = vst.msk [vmem:[%s7002_s5 + $0x1c0] sm:$0xff] %vm2751_vm1, %v2345_v30  ;;  %v2665_v12 = vpop.f32.mrf.mxu1 }
 0x491   :  { %v3142_v40 = vpop.f32.mrf.mxu0  ;;  %2888 = vst.msk [vmem:[%s7002_s5 + $0x440] sm:$0xff] %vm2751_vm1, %v2665_v12 }
 0x492   :  { %v3302_v57 = vpop.f32.mrf.mxu1 }
 0x493   :  { %v2348_v29 = vpop.f32.mrf.mxu0 }
 0x494   :  { %2809 = vst.msk [vmem:[%s7002_s5 + $0x1c8] sm:$0xff] %vm2751_vm1, %v2348_v29  ;;  %v2668_v52 = vpop.f32.mrf.mxu1 }
 0x495   :  { %v3143_v11 = vpop.f32.mrf.mxu0  ;;  %2889 = vst.msk [vmem:[%s7002_s5 + $0x448] sm:$0xff] %vm2751_vm1, %v2668_v52 }
 0x496   :  { %v3303_v46 = vpop.f32.mrf.mxu1 }
 0x497   :  { %v2353_v15 = vpop.f32.mrf.mxu0 }
 0x498   :  { %2810 = vst.msk [vmem:[%s7002_s5 + $0x1d0] sm:$0xff] %vm2751_vm1, %v2353_v15  ;;  %v2673_v56 = vpop.f32.mrf.mxu1 }
 0x499   :  { %v3146_v13 = vpop.f32.mrf.mxu0  ;;  %2890 = vst.msk [vmem:[%s7002_s5 + $0x450] sm:$0xff] %vm2751_vm1, %v2673_v56 }
 0x49a   :  { %v3306_v21 = vpop.f32.mrf.mxu1 }
 0x49b   :  { %v2356_v25 = vpop.f32.mrf.mxu0 }
 0x49c   :  { %2811 = vst.msk [vmem:[%s7002_s5 + $0x1d8] sm:$0xff] %vm2751_vm1, %v2356_v25  ;;  %v2676_v39 = vpop.f32.mrf.mxu1 }
 0x49d   :  { %v3147_v2 = vpop.f32.mrf.mxu0  ;;  %2891 = vst.msk [vmem:[%s7002_s5 + $0x458] sm:$0xff] %vm2751_vm1, %v2676_v39 }
 0x49e   :  { %v3307_v37 = vpop.f32.mrf.mxu1 }
 0x49f   :  { %v2361_v32 = vpop.f32.mrf.mxu0 }
 0x4a0   :  { %2812 = vst.msk [vmem:[%s7002_s5 + $0x1e0] sm:$0xff] %vm2751_vm1, %v2361_v32  ;;  %v2681_v8 = vpop.f32.mrf.mxu1 }
 0x4a1   :  { %v3150_v51 = vpop.f32.mrf.mxu0  ;;  %2892 = vst.msk [vmem:[%s7002_s5 + $0x460] sm:$0xff] %vm2751_vm1, %v2681_v8 }
 0x4a2   :  { %v3310_v53 = vpop.f32.mrf.mxu1 }
 0x4a3   :  { %v2364_v63 = vpop.f32.mrf.mxu0 }
 0x4a4   :  { %2813 = vst.msk [vmem:[%s7002_s5 + $0x1e8] sm:$0xff] %vm2751_vm1, %v2364_v63  ;;  %v2684_v9 = vpop.f32.mrf.mxu1 }
 0x4a5   :  { %v3151_v31 = vpop.f32.mrf.mxu0  ;;  %2893 = vst.msk [vmem:[%s7002_s5 + $0x468] sm:$0xff] %vm2751_vm1, %v2684_v9 }
 0x4a6   :  { %v3311_v54 = vpop.f32.mrf.mxu1 }
 0x4a7   :  { %v2369_v58 = vpop.f32.mrf.mxu0 }
 0x4a8   :  { %2814 = vst.msk [vmem:[%s7002_s5 + $0x1f0] sm:$0xff] %vm2751_vm1, %v2369_v58  ;;  %v2689_v43 = vpop.f32.mrf.mxu1 }
 0x4a9   :  { %v3154_v48 = vpop.f32.mrf.mxu0  ;;  %2894 = vst.msk [vmem:[%s7002_s5 + $0x470] sm:$0xff] %vm2751_vm1, %v2689_v43 }
 0x4aa   :  { %v3314_v19 = vpop.f32.mrf.mxu1 }
 0x4ab   :  { %v2372_v50 = vpop.f32.mrf.mxu0 }
 0x4ac   :  { %2815 = vst.msk [vmem:[%s7002_s5 + $0x1f8] sm:$0xff] %vm2751_vm1, %v2372_v50  ;;  %v2692_v33 = vpop.f32.mrf.mxu1 }
 0x4ad   :  { %v3155_v60 = vpop.f32.mrf.mxu0  ;;  %2895 = vst.msk [vmem:[%s7002_s5 + $0x478] sm:$0xff] %vm2751_vm1, %v2692_v33 }
 0x4ae   :  { %v3315_v34 = vpop.f32.mrf.mxu1 }
 0x4af   :  { %v2377_v14 = vpop.f32.mrf.mxu0 }
 0x4b0   :  { %2816 = vst.msk [vmem:[%s7002_s5 + $0x200] sm:$0xff] %vm2751_vm1, %v2377_v14  ;;  %v2697_v49 = vpop.f32.mrf.mxu1 }
 0x4b1   :  { %v3158_v26 = vpop.f32.mrf.mxu0  ;;  %2896 = vst.msk [vmem:[%s7002_s5 + $0x480] sm:$0xff] %vm2751_vm1, %v2697_v49 }
 0x4b2   :  { %v3318_v23 = vpop.f32.mrf.mxu1 }
 0x4b3   :  { %v2380_v5 = vpop.f32.mrf.mxu0 }
 0x4b4   :  { %2817 = vst.msk [vmem:[%s7002_s5 + $0x208] sm:$0xff] %vm2751_vm1, %v2380_v5  ;;  %v2700_v27 = vpop.f32.mrf.mxu1 }
 0x4b5   :  { %v3159_v24 = vpop.f32.mrf.mxu0  ;;  %2897 = vst.msk [vmem:[%s7002_s5 + $0x488] sm:$0xff] %vm2751_vm1, %v2700_v27 }
 0x4b6   :  { %v3319_v59 = vpop.f32.mrf.mxu1 }
 0x4b7   :  { %v2385_v4 = vpop.f32.mrf.mxu0 }
 0x4b8   :  { %2818 = vst.msk [vmem:[%s7002_s5 + $0x210] sm:$0xff] %vm2751_vm1, %v2385_v4  ;;  %v2705_v1 = vpop.f32.mrf.mxu1 }
 0x4b9   :  { %v3162_v36 = vpop.f32.mrf.mxu0  ;;  %2898 = vst.msk [vmem:[%s7002_s5 + $0x490] sm:$0xff] %vm2751_vm1, %v2705_v1 }
 0x4ba   :  { %v3322_v35 = vpop.f32.mrf.mxu1 }
 0x4bb   :  { %v2388_v22 = vpop.f32.mrf.mxu0 }
 0x4bc   :  { %2819 = vst.msk [vmem:[%s7002_s5 + $0x218] sm:$0xff] %vm2751_vm1, %v2388_v22  ;;  %v2708_v17 = vpop.f32.mrf.mxu1 }
 0x4bd   :  { %v3163_v20 = vpop.f32.mrf.mxu0  ;;  %2899 = vst.msk [vmem:[%s7002_s5 + $0x498] sm:$0xff] %vm2751_vm1, %v2708_v17 }
 0x4be   :  { %v3323_v61 = vpop.f32.mrf.mxu1 }
 0x4bf   :  { %v2393_v45 = vpop.f32.mrf.mxu0 }
 0x4c0   :  { %2820 = vst.msk [vmem:[%s7002_s5 + $0x220] sm:$0xff] %vm2751_vm1, %v2393_v45  ;;  %v2713_v10 = vpop.f32.mrf.mxu1 }
 0x4c1   :  { %v3166_v7 = vpop.f32.mrf.mxu0  ;;  %2900 = vst.msk [vmem:[%s7002_s5 + $0x4a0] sm:$0xff] %vm2751_vm1, %v2713_v10 }
 0x4c2   :  { %v3326_v44 = vpop.f32.mrf.mxu1 }
 0x4c3   :  { %v2396_v16 = vpop.f32.mrf.mxu0 }
 0x4c4   :  { %2821 = vst.msk [vmem:[%s7002_s5 + $0x228] sm:$0xff] %vm2751_vm1, %v2396_v16  ;;  %v2716_v41 = vpop.f32.mrf.mxu1 }
 0x4c5   :  { %v3167_v3 = vpop.f32.mrf.mxu0  ;;  %2901 = vst.msk [vmem:[%s7002_s5 + $0x4a8] sm:$0xff] %vm2751_vm1, %v2716_v41 }
 0x4c6   :  { %v3327_v28 = vpop.f32.mrf.mxu1 }
 0x4c7   :  { %v2401_v42 = vpop.f32.mrf.mxu0 }
 0x4c8   :  { %2822 = vst.msk [vmem:[%s7002_s5 + $0x230] sm:$0xff] %vm2751_vm1, %v2401_v42  ;;  %v2721_v0 = vpop.f32.mrf.mxu1 }
 0x4c9   :  { %v3170_v6 = vpop.f32.mrf.mxu0  ;;  %2902 = vst.msk [vmem:[%s7002_s5 + $0x4b0] sm:$0xff] %vm2751_vm1, %v2721_v0 }
 0x4ca   :  { %v3330_v55 = vpop.f32.mrf.mxu1 }
 0x4cb   :  { %v2404_v18 = vpop.f32.mrf.mxu0 }
 0x4cc   :  { %2823 = vst.msk [vmem:[%s7002_s5 + $0x238] sm:$0xff] %vm2751_vm1, %v2404_v18  ;;  %v2724_v62 = vpop.f32.mrf.mxu1 }
 0x4cd   :  { %v3171_v47 = vpop.f32.mrf.mxu0  ;;  %2903 = vst.msk [vmem:[%s7002_s5 + $0x4b8] sm:$0xff] %vm2751_vm1, %v2724_v62 }
 0x4ce   :  { %v3331_v38 = vpop.f32.mrf.mxu1 }
 0x4cf   :  { %v2409_v30 = vpop.f32.mrf.mxu0 }
 0x4d0   :  { %2824 = vst.msk [vmem:[%s7002_s5 + $0x240] sm:$0xff] %vm2751_vm1, %v2409_v30  ;;  %v2729_v12 = vpop.f32.mrf.mxu1 }
 0x4d1   :  { %v3174_v40 = vpop.f32.mrf.mxu0  ;;  %2904 = vst.msk [vmem:[%s7002_s5 + $0x4c0] sm:$0xff] %vm2751_vm1, %v2729_v12 }
 0x4d2   :  { %v3334_v57 = vpop.f32.mrf.mxu1 }
 0x4d3   :  { %v2412_v29 = vpop.f32.mrf.mxu0 }
 0x4d4   :  { %2825 = vst.msk [vmem:[%s7002_s5 + $0x248] sm:$0xff] %vm2751_vm1, %v2412_v29  ;;  %v2732_v52 = vpop.f32.mrf.mxu1 }
 0x4d5   :  { %v3175_v11 = vpop.f32.mrf.mxu0  ;;  %2905 = vst.msk [vmem:[%s7002_s5 + $0x4c8] sm:$0xff] %vm2751_vm1, %v2732_v52 }
 0x4d6   :  { %v3335_v46 = vpop.f32.mrf.mxu1 }
 0x4d7   :  { %v2417_v15 = vpop.f32.mrf.mxu0 }
 0x4d8   :  { %2826 = vst.msk [vmem:[%s7002_s5 + $0x250] sm:$0xff] %vm2751_vm1, %v2417_v15  ;;  %v2737_v56 = vpop.f32.mrf.mxu1 }
 0x4d9   :  { %v3178_v13 = vpop.f32.mrf.mxu0  ;;  %2906 = vst.msk [vmem:[%s7002_s5 + $0x4d0] sm:$0xff] %vm2751_vm1, %v2737_v56 }
 0x4da   :  { %v3338_v21 = vpop.f32.mrf.mxu1 }
 0x4db   :  { %v2420_v25 = vpop.f32.mrf.mxu0 }
 0x4dc   :  { %2827 = vst.msk [vmem:[%s7002_s5 + $0x258] sm:$0xff] %vm2751_vm1, %v2420_v25  ;;  %v2740_v39 = vpop.f32.mrf.mxu1 }
 0x4dd   :  { %v3179_v2 = vpop.f32.mrf.mxu0  ;;  %2907 = vst.msk [vmem:[%s7002_s5 + $0x4d8] sm:$0xff] %vm2751_vm1, %v2740_v39 }
 0x4de   :  { %v3339_v37 = vpop.f32.mrf.mxu1 }
 0x4df   :  { %v2425_v32 = vpop.f32.mrf.mxu0 }
 0x4e0   :  { %2828 = vst.msk [vmem:[%s7002_s5 + $0x260] sm:$0xff] %vm2751_vm1, %v2425_v32  ;;  %v2745_v8 = vpop.f32.mrf.mxu1 }
 0x4e1   :  { %v3182_v51 = vpop.f32.mrf.mxu0  ;;  %2909 = vst.msk [vmem:[%s7002_s5 + $0x4e0] sm:$0x3] %vm2908_vm0, %v2745_v8 }
 0x4e2   :  { %v3342_v53 = vpop.f32.mrf.mxu1 }
 0x4e3   :  { %v2428_v63 = vpop.f32.mrf.mxu0 }
 0x4e4   :  { %2829 = vst.msk [vmem:[%s7002_s5 + $0x268] sm:$0xff] %vm2751_vm1, %v2428_v63  ;;  %v2748_v9 = vpop.f32.mrf.mxu1 }
 0x4e5   :  { %v3183_v31 = vpop.f32.mrf.mxu0 }
 0x4e6   :  { %v3343_v54 = vpop.f32.mrf.mxu1 }
 0x4e7   :  { %v2433_v58 = vpop.f32.mrf.mxu0 }
 0x4e8   :  { %2830 = vst.msk [vmem:[%s7002_s5 + $0x270] sm:$0xff] %vm2751_vm1, %v2433_v58 }
 0x4e9   :  { %v3186_v43 = vpop.f32.mrf.mxu0 }
 0x4eb   :  { %v2436_v48 = vpop.f32.mrf.mxu0 }
 0x4ec   :  { %2831 = vst.msk [vmem:[%s7002_s5 + $0x278] sm:$0xff] %vm2751_vm1, %v2436_v48 }
 0x4ed   :  { %v3187_v19 = vpop.f32.mrf.mxu0 }

</bundles_post_ra>
